<compile_context>
chip_gen: v6e
topology: v6e:2x2x1
jax: 0.10.0
libtpu: 0.0.40
codegen_flags: <defaults>
</compile_context>

<pallas_src>
import math

import jax
import jax.numpy as jnp
from jax import lax
from jax.experimental import pallas as pl
from jax.experimental.pallas import tpu as pltpu

LEAKY_SLOPE = 0.01   # torch.nn.LeakyReLU default
BN_EPS = 1e-5        # torch.nn.BatchNorm2d default

# ---- static geometry of the instantiated network ----------------------------
C0 = 4                      # network input channels
H1 = W1 = 16                # input spatial size (layers 1 & 2)
WP1 = W1 + 2                # 18  padded width
HPWP1 = (H1 + 2) * WP1      # 324 flattened padded rows
SMAX1 = 2 * WP1 + 2         # 38  largest 3x3 tap shift
NPAD1 = HPWP1 + SMAX1       # 362 rows incl. tail pad so every tap window is in-bounds

H3 = W3 = 8                 # layer-3 input spatial size (after MaxPool)
WP3 = W3 + 2                # 10
HPWP3 = (H3 + 2) * WP3      # 100
SMAX3 = 2 * WP3 + 2         # 22

C1, C2, C3 = 4, 8, 16       # per-layer conv output channels
S3 = (H3 // 2) * (W3 // 2)  # 16 layer-3 output spatial positions (4x4)
NFC0, NCLS = 23, 2          # true FC widths
NPADFC = 128                # lane-padded FC width


def _leaky(x):
    return jnp.where(x > 0, x, LEAKY_SLOPE * x)


# --------------------------- fused Pallas kernel -----------------------------
def fused_forward_kernel(x_ref,
                         w1_ref, s1_ref, t1_ref,
                         w2_ref, s2_ref, t2_ref,
                         w3_ref, s3_ref, t3_ref,
                         wfc0_ref, bfc0_ref, wfc1_ref, bfc1_ref,
                         o_ref,
                         pm2_ref, pm3_ref, dpool_ref, dstr_ref):
    """Whole forward pass for one image (grid axis = batch).

    Activations are kept as (flattened padded spatial rows, channels) f32 tiles.
    Each conv = one im2col matmul: 9 shifted windows of the zero-padded flat map
    concatenated along K, times a (9*Cin, Cout) weight, then the folded
    (bias + BatchNorm-eval) affine and LeakyReLU.  MaxPool(2,2) and stride-2
    decimation use VPU slices/maxes plus a stride-2 read from VMEM scratch.
    """
    shifts1 = [kh * WP1 + kw for kh in range(3) for kw in range(3)]
    shifts3 = [kh * WP3 + kw for kh in range(3) for kw in range(3)]

    def conv(taps, w_ref, scale_ref, shift_ref):
        opnd = jnp.concatenate(taps, axis=1)                        # (rows, 9*Cin)
        y = jnp.dot(opnd, w_ref[...], preferred_element_type=jnp.float32)
        return _leaky(y * scale_ref[...] + shift_ref[...])          # bias+BN folded

    # padded-map scratch: borders and tap-window tails must be zero each step
    pm2_ref[...] = jnp.zeros_like(pm2_ref)
    pm3_ref[...] = jnp.zeros_like(pm3_ref)

    # ---- layer 1: Conv(4,4,3,s=1,p=1) + BN + LeakyReLU -----------------------
    y1 = conv([x_ref[0, s:s + HPWP1, :] for s in shifts1], w1_ref, s1_ref, t1_ref)
    for i in range(H1):           # scatter valid rows into layer-2 padded map interior
        r = (i + 1) * WP1 + 1
        pm2_ref[r:r + W1, :] = y1[i * WP1:i * WP1 + W1, :]

    # ---- layer 2: Conv(4,8,3,s=1,p=1) + BN + LeakyReLU + MaxPool(2,2) --------
    y2 = conv([pm2_ref[s:s + HPWP1, :] for s in shifts1], w2_ref, s2_ref, t2_ref)
    evens = jnp.concatenate([y2[(2 * a) * WP1:(2 * a) * WP1 + W1, :]
                             for a in range(H1 // 2)], axis=0)      # (128, 8)
    odds = jnp.concatenate([y2[(2 * a + 1) * WP1:(2 * a + 1) * WP1 + W1, :]
                            for a in range(H1 // 2)], axis=0)       # (128, 8)
    vm = jnp.maximum(evens, odds)                                   # vertical max
    vs = jnp.concatenate([vm[1:, :], vm[:1, :]], axis=0)            # vm shifted by 1 row
    dpool_ref[...] = jnp.maximum(vm, vs)                            # horizontal pair max
    pooled = dpool_ref[pl.ds(0, (H1 // 2) * (W1 // 2), stride=2), :]  # (64, 8) = 8x8xC2
    for i in range(H3):           # scatter into layer-3 padded map interior
        r = (i + 1) * WP3 + 1
        pm3_ref[r:r + W3, :] = pooled[i * W3:(i + 1) * W3, :]

    # ---- layer 3: Conv(8,16,3,s=2,p=1) + BN + LeakyReLU ----------------------
    y3 = conv([pm3_ref[s:s + HPWP3, :] for s in shifts3], w3_ref, s3_ref, t3_ref)
    dstr_ref[...] = jnp.concatenate([y3[(2 * a) * WP3:(2 * a) * WP3 + W3, :]
                                     for a in range(H3 // 2)], axis=0)   # (32, 16)
    act3 = dstr_ref[pl.ds(0, S3, stride=2), :]                      # stride-2 -> (16, 16)

    # ---- classifier: Flatten(NCHW) + Dropout(eval=id) + FC0+LReLU + FC1 ------
    # FC0 weights are pre-permuted to (spatial, channel, out) so we contract the
    # (spatial, channel) activation directly, without materializing the flatten.
    h = bfc0_ref[...]                                               # (1, 128)
    for s in range(S3):
        h = h + jnp.dot(act3[s:s + 1, :], wfc0_ref[s],
                        preferred_element_type=jnp.float32)
    h = _leaky(h)
    logits = jnp.dot(h, wfc1_ref[...], preferred_element_type=jnp.float32) + bfc1_ref[...]
    o_ref[0] = logits.astype(o_ref.dtype)


# --------------------------- wrapper ------------------------------------------
def random_architecture_forward(x_nchw, params_conv, fc_packed):
    modes = [p["mode"] for p in params_conv]
    assert modes == ["none", "pool", "stride"], modes
    assert params_conv[0]["w9"].shape == (9 * C0, C1)
    assert params_conv[1]["w9"].shape == (9 * C1, C2)
    assert params_conv[2]["w9"].shape == (9 * C2, C3)
    assert HPWP3 + SMAX3 <= 128
    B = x_nchw.shape[0]
    assert x_nchw.shape == (B, C0, H1, W1)

    # NCHW -> NHWC, zero-pad spatially, flatten row-major, tail-pad for tap windows
    x = jnp.transpose(x_nchw, (0, 2, 3, 1)).astype(jnp.float32)
    x = jnp.pad(x, ((0, 0), (1, 1), (1, 1), (0, 0))).reshape(B, HPWP1, C0)
    x = jnp.pad(x, ((0, 0), (0, SMAX1), (0, 0)))                    # (B, 362, 4)

    (w1, s1, t1), (w2, s2, t2), (w3, s3, t3) = [
        (p["w9"], p["scale"], p["shift"]) for p in params_conv]

    const2 = lambda b: (0, 0)
    const3 = lambda b: (0, 0, 0)

    out = pl.pallas_call(
        fused_forward_kernel,
        out_shape=jax.ShapeDtypeStruct((B, 1, NPADFC), jnp.float32),
        grid=(B,),
        in_specs=[
            pl.BlockSpec((1, NPAD1, C0), lambda b: (b, 0, 0)),      # x (per image)
            pl.BlockSpec((9 * C0, C1), const2),                     # conv1 weights
            pl.BlockSpec((1, C1), const2),                          # conv1 scale
            pl.BlockSpec((1, C1), const2),                          # conv1 shift
            pl.BlockSpec((9 * C1, C2), const2),                     # conv2 weights
            pl.BlockSpec((1, C2), const2),
            pl.BlockSpec((1, C2), const2),
            pl.BlockSpec((9 * C2, C3), const2),                     # conv3 weights
            pl.BlockSpec((1, C3), const2),
            pl.BlockSpec((1, C3), const2),
            pl.BlockSpec((S3, C3, NPADFC), const3),                 # FC0 w (s, c, n)
            pl.BlockSpec((1, NPADFC), const2),                      # FC0 b
            pl.BlockSpec((NPADFC, NPADFC), const2),                 # FC1 w (padded)
            pl.BlockSpec((1, NPADFC), const2),                      # FC1 b
        ],
        out_specs=pl.BlockSpec((1, 1, NPADFC), lambda b: (b, 0, 0)),
        scratch_shapes=[
            pltpu.VMEM((368, C1), jnp.float32),                     # layer-2 padded map
            pltpu.VMEM((128, C2), jnp.float32),                     # layer-3 padded map
            pltpu.VMEM((128, C2), jnp.float32),                     # maxpool workspace
            pltpu.VMEM((32, C3), jnp.float32),                      # stride-2 workspace
        ],
        compiler_params=pltpu.CompilerParams(dimension_semantics=("parallel",)),
    )(x, w1, s1, t1, w2, s2, t2, w3, s3, t3,
      fc_packed["w0p"], fc_packed["b0p"], fc_packed["w1p"], fc_packed["b1p"])
    return out[:, 0, :NCLS]


# --------------------------- parameters ---------------------------------------
def build_params(convolutions, n_fcblocks, initial_shape, n_classes, key):
    first_in_channels, H0, W0 = initial_shape[0], initial_shape[1], initial_shape[2]

    # unroll the convolutional blocks exactly like define_convolutional_block
    conv_layers, H, W = [], H0, W0
    for i in range(len(convolutions)):
        item = convolutions["conv%i" % i]
        in_ch = item["in_channels"] if item["in_channels"] is not None else first_in_channels
        out_ch = item["out_channels"]
        for _ in range(item["n_conv"] - 1):
            conv_layers.append(dict(cin=in_ch, cout=in_ch, mode="none", H=H, W=W))
        red = "pool" if item["d_reduction"] == "MaxPooling" else "stride"
        conv_layers.append(dict(cin=in_ch, cout=out_ch, mode=red, H=H, W=W))
        H, W = H // 2, W // 2

    params_conv = []
    for lyr in conv_layers:
        key, k1, k2, k3, k4, k5, k6 = jax.random.split(key, 7)
        Cin, Cout = lyr["cin"], lyr["cout"]
        w = 0.1 * jax.random.normal(k1, (3, 3, Cin, Cout), jnp.float32)   # HWIO
        b = 0.05 * jax.random.normal(k2, (Cout,), jnp.float32)
        gamma = 1.0 + 0.1 * jax.random.normal(k3, (Cout,), jnp.float32)
        beta = 0.05 * jax.random.normal(k4, (Cout,), jnp.float32)
        mean = 0.05 * jax.random.normal(k5, (Cout,), jnp.float32)
        var = 1.0 + 0.1 * jnp.abs(jax.random.normal(k6, (Cout,), jnp.float32))
        scale = gamma / jnp.sqrt(var + BN_EPS)
        shift = beta + (b - mean) * scale
        params_conv.append(dict(
            w9=w.reshape(9 * Cin, Cout),               # im2col weights, (kh,kw,cin)-major
            scale=scale.reshape(1, Cout), shift=shift.reshape(1, Cout),
            mode=lyr["mode"],
            raw=dict(w=w, b=b, gamma=gamma, beta=beta, mean=mean, var=var)))

    # mirrors RandomArchitecture.fc_dict_design
    n_conv = len(convolutions)
    last_out = convolutions["conv%i" % (n_conv - 1)]["out_channels"]
    in_features = float(last_out * math.ceil(H0 / 2 ** n_conv) * math.ceil(W0 / 2 ** n_conv))
    ratio = (in_features / n_classes) ** (1.0 / n_fcblocks)
    fc_dims = []
    for _ in range(n_fcblocks):
        out_features = in_features / ratio
        fc_dims.append((int(round(in_features)), int(round(out_features))))
        in_features = out_features

    params_fc = []
    for fi, fo in fc_dims:
        key, k1, k2 = jax.random.split(key, 3)
        w = 0.1 * jax.random.normal(k1, (fi, fo), jnp.float32)
        b = 0.05 * jax.random.normal(k2, (fo,), jnp.float32)
        params_fc.append(dict(w=w, b=b.reshape(1, fo)))

    # pack the classifier for the fused kernel: lane-pad to 128, and pre-permute
    # FC0 rows from NCHW-flatten order (c * S3 + s) to (s, c, n).
    f0, f1 = params_fc
    assert f0["w"].shape == (C3 * S3, NFC0) and f1["w"].shape == (NFC0, NCLS)
    w0p = jnp.zeros((C3 * S3, NPADFC), jnp.float32).at[:, :NFC0].set(f0["w"])
    w0p = w0p.reshape(C3, S3, NPADFC).transpose(1, 0, 2)            # (s, c, 128)
    b0p = jnp.zeros((1, NPADFC), jnp.float32).at[:, :NFC0].set(f0["b"])
    w1p = jnp.zeros((NPADFC, NPADFC), jnp.float32).at[:NFC0, :NCLS].set(f1["w"])
    b1p = jnp.zeros((1, NPADFC), jnp.float32).at[:, :NCLS].set(f1["b"])
    fc_packed = dict(w0p=w0p, b0p=b0p, w1p=w1p, b1p=b1p)
    return params_conv, params_fc, fc_packed


# --------------------------- pure-JAX reference --------------------------------
def reference_forward(x_nchw, params_conv, params_fc):
    x = jnp.transpose(x_nchw, (0, 2, 3, 1))
    for lyr in params_conv:
        raw, mode = lyr["raw"], lyr["mode"]
        stride = (2, 2) if mode == "stride" else (1, 1)
        y = lax.conv_general_dilated(
            x, raw["w"], window_strides=stride, padding=((1, 1), (1, 1)),
            dimension_numbers=("NHWC", "HWIO", "NHWC"),
            precision=lax.Precision.HIGHEST) + raw["b"]
        y = (y - raw["mean"]) / jnp.sqrt(raw["var"] + BN_EPS) * raw["gamma"] + raw["beta"]
        y = jnp.where(y > 0, y, LEAKY_SLOPE * y)
        if mode == "pool":
            y = lax.reduce_window(y, -jnp.inf, lax.max, (1, 2, 2, 1), (1, 2, 2, 1), "VALID")
        x = y
    feat = jnp.transpose(x, (0, 3, 1, 2)).reshape(x.shape[0], -1)
    h = jnp.dot(feat, params_fc[0]["w"], precision=lax.Precision.HIGHEST) + params_fc[0]["b"]
    h = jnp.where(h > 0, h, LEAKY_SLOPE * h)
    return jnp.dot(h, params_fc[1]["w"], precision=lax.Precision.HIGHEST) + params_fc[1]["b"]


# --------------------------- main ----------------------------------------------
if __name__ == "__main__":
    convolutions = {
        "conv0": {"n_conv": 2, "in_channels": None, "out_channels": 8,
                  "d_reduction": "MaxPooling"},
        "conv1": {"n_conv": 1, "in_channels": 8, "out_channels": 16,
                  "d_reduction": "stride"},
    }
    initial_shape = [4, 16, 16]          # (C, H, W), 2-D network
    key = jax.random.PRNGKey(0)
    key, kx = jax.random.split(key)
    x = jax.random.normal(kx, (2, initial_shape[0], initial_shape[1], initial_shape[2]),
                          jnp.float32)   # NCHW, like the PyTorch module

    params_conv, params_fc, fc_packed = build_params(
        convolutions, n_fcblocks=2, initial_shape=initial_shape, n_classes=2, key=key)

    fwd = jax.jit(lambda inp: random_architecture_forward(inp, params_conv, fc_packed))
    out = jax.block_until_ready(fwd(x))
    ref = jax.block_until_ready(reference_forward(x, params_conv, params_fc))

    assert out.shape == (2, 2) and out.dtype == jnp.float32
    max_err = float(jnp.max(jnp.abs(out - ref)))
    assert max_err < 2e-3, f"mismatch vs reference: {max_err}"
    print("KERNEL_OK")
</pallas_src>

<mosaic_0001>
module attributes {stable_mosaic.version = 11 : i64} {
  func.func @fused_forward_kernel(%arg0: i32, %arg1: memref<1x362x4xf32, #tpu.memory_space<vmem>>, %arg2: memref<36x4xf32, #tpu.memory_space<vmem>>, %arg3: memref<1x4xf32, #tpu.memory_space<vmem>>, %arg4: memref<1x4xf32, #tpu.memory_space<vmem>>, %arg5: memref<36x8xf32, #tpu.memory_space<vmem>>, %arg6: memref<1x8xf32, #tpu.memory_space<vmem>>, %arg7: memref<1x8xf32, #tpu.memory_space<vmem>>, %arg8: memref<72x16xf32, #tpu.memory_space<vmem>>, %arg9: memref<1x16xf32, #tpu.memory_space<vmem>>, %arg10: memref<1x16xf32, #tpu.memory_space<vmem>>, %arg11: memref<16x16x128xf32, #tpu.memory_space<vmem>>, %arg12: memref<1x128xf32, #tpu.memory_space<vmem>>, %arg13: memref<128x128xf32, #tpu.memory_space<vmem>>, %arg14: memref<1x128xf32, #tpu.memory_space<vmem>>, %arg15: memref<1x1x128xf32, #tpu.memory_space<vmem>>, %arg16: memref<368x4xf32, #tpu.memory_space<vmem>>, %arg17: memref<128x8xf32, #tpu.memory_space<vmem>>, %arg18: memref<128x8xf32, #tpu.memory_space<vmem>>, %arg19: memref<32x16xf32, #tpu.memory_space<vmem>>) attributes {dimension_semantics = [#tpu.dimension_semantics<parallel>], iteration_bounds = array<i64: 2>, scalar_prefetch = 0 : i64, scratch_operands = 4 : i64, tpu.core_type = #tpu.core_type<tc>, window_params = [{transform_indices = @transform_0, window_bounds = array<i64: 1, 362, 4>}, {pipeline_mode = #tpu.pipeline_mode<synchronous>, transform_indices = @transform_1, window_bounds = array<i64: 36, 4>}, {pipeline_mode = #tpu.pipeline_mode<synchronous>, transform_indices = @transform_2, window_bounds = array<i64: 1, 4>}, {pipeline_mode = #tpu.pipeline_mode<synchronous>, transform_indices = @transform_3, window_bounds = array<i64: 1, 4>}, {pipeline_mode = #tpu.pipeline_mode<synchronous>, transform_indices = @transform_4, window_bounds = array<i64: 36, 8>}, {pipeline_mode = #tpu.pipeline_mode<synchronous>, transform_indices = @transform_5, window_bounds = array<i64: 1, 8>}, {pipeline_mode = #tpu.pipeline_mode<synchronous>, transform_indices = @transform_6, window_bounds = array<i64: 1, 8>}, {pipeline_mode = #tpu.pipeline_mode<synchronous>, transform_indices = @transform_7, window_bounds = array<i64: 72, 16>}, {pipeline_mode = #tpu.pipeline_mode<synchronous>, transform_indices = @transform_8, window_bounds = array<i64: 1, 16>}, {pipeline_mode = #tpu.pipeline_mode<synchronous>, transform_indices = @transform_9, window_bounds = array<i64: 1, 16>}, {pipeline_mode = #tpu.pipeline_mode<synchronous>, transform_indices = @transform_10, window_bounds = array<i64: 16, 16, 128>}, {pipeline_mode = #tpu.pipeline_mode<synchronous>, transform_indices = @transform_11, window_bounds = array<i64: 1, 128>}, {pipeline_mode = #tpu.pipeline_mode<synchronous>, transform_indices = @transform_12, window_bounds = array<i64: 128, 128>}, {pipeline_mode = #tpu.pipeline_mode<synchronous>, transform_indices = @transform_13, window_bounds = array<i64: 1, 128>}, {transform_indices = @transform_14, window_bounds = array<i64: 1, 1, 128>}]} {
    %cst = arith.constant 0.000000e+00 : f32
    %0 = vector.broadcast %cst : f32 to vector<368x4xf32>
    %c0 = arith.constant 0 : index
    %c0_0 = arith.constant 0 : index
    %1 = vector.load %arg16[%c0, %c0_0] : memref<368x4xf32, #tpu.memory_space<vmem>>, vector<368x4xf32>
    tpu.vector_store %arg16[%c0, %c0_0], %0 {strides = array<i32>} : memref<368x4xf32, #tpu.memory_space<vmem>>, vector<368x4xf32>,
    %cst_1 = arith.constant 0.000000e+00 : f32
    %2 = vector.broadcast %cst_1 : f32 to vector<128x8xf32>
    %c0_2 = arith.constant 0 : index
    %c0_3 = arith.constant 0 : index
    %3 = vector.load %arg17[%c0_2, %c0_3] : memref<128x8xf32, #tpu.memory_space<vmem>>, vector<128x8xf32>
    tpu.vector_store %arg17[%c0_2, %c0_3], %2 {strides = array<i32>} : memref<128x8xf32, #tpu.memory_space<vmem>>, vector<128x8xf32>,
    %c0_4 = arith.constant 0 : index
    %c0_5 = arith.constant 0 : index
    %c0_6 = arith.constant 0 : index
    %4 = vector.load %arg1[%c0_4, %c0_5, %c0_6] : memref<1x362x4xf32, #tpu.memory_space<vmem>>, vector<1x324x4xf32>
    %5 = vector.shape_cast %4 : vector<1x324x4xf32> to vector<324x4xf32>
    %c0_7 = arith.constant 0 : index
    %c1 = arith.constant 1 : index
    %c0_8 = arith.constant 0 : index
    %6 = vector.load %arg1[%c0_7, %c1, %c0_8] : memref<1x362x4xf32, #tpu.memory_space<vmem>>, vector<1x324x4xf32>
    %7 = vector.shape_cast %6 : vector<1x324x4xf32> to vector<324x4xf32>
    %c0_9 = arith.constant 0 : index
    %c2 = arith.constant 2 : index
    %c0_10 = arith.constant 0 : index
    %8 = vector.load %arg1[%c0_9, %c2, %c0_10] : memref<1x362x4xf32, #tpu.memory_space<vmem>>, vector<1x324x4xf32>
    %9 = vector.shape_cast %8 : vector<1x324x4xf32> to vector<324x4xf32>
    %c0_11 = arith.constant 0 : index
    %c18 = arith.constant 18 : index
    %c0_12 = arith.constant 0 : index
    %10 = vector.load %arg1[%c0_11, %c18, %c0_12] : memref<1x362x4xf32, #tpu.memory_space<vmem>>, vector<1x324x4xf32>
    %11 = vector.shape_cast %10 : vector<1x324x4xf32> to vector<324x4xf32>
    %c0_13 = arith.constant 0 : index
    %c19 = arith.constant 19 : index
    %c0_14 = arith.constant 0 : index
    %12 = vector.load %arg1[%c0_13, %c19, %c0_14] : memref<1x362x4xf32, #tpu.memory_space<vmem>>, vector<1x324x4xf32>
    %13 = vector.shape_cast %12 : vector<1x324x4xf32> to vector<324x4xf32>
    %c0_15 = arith.constant 0 : index
    %c20 = arith.constant 20 : index
    %c0_16 = arith.constant 0 : index
    %14 = vector.load %arg1[%c0_15, %c20, %c0_16] : memref<1x362x4xf32, #tpu.memory_space<vmem>>, vector<1x324x4xf32>
    %15 = vector.shape_cast %14 : vector<1x324x4xf32> to vector<324x4xf32>
    %c0_17 = arith.constant 0 : index
    %c36 = arith.constant 36 : index
    %c0_18 = arith.constant 0 : index
    %16 = vector.load %arg1[%c0_17, %c36, %c0_18] : memref<1x362x4xf32, #tpu.memory_space<vmem>>, vector<1x324x4xf32>
    %17 = vector.shape_cast %16 : vector<1x324x4xf32> to vector<324x4xf32>
    %c0_19 = arith.constant 0 : index
    %c37 = arith.constant 37 : index
    %c0_20 = arith.constant 0 : index
    %18 = vector.load %arg1[%c0_19, %c37, %c0_20] : memref<1x362x4xf32, #tpu.memory_space<vmem>>, vector<1x324x4xf32>
    %19 = vector.shape_cast %18 : vector<1x324x4xf32> to vector<324x4xf32>
    %c0_21 = arith.constant 0 : index
    %c38 = arith.constant 38 : index
    %c0_22 = arith.constant 0 : index
    %20 = vector.load %arg1[%c0_21, %c38, %c0_22] : memref<1x362x4xf32, #tpu.memory_space<vmem>>, vector<1x324x4xf32>
    %21 = vector.shape_cast %20 : vector<1x324x4xf32> to vector<324x4xf32>
    %22 = tpu.concatenate %5, %7, %9, %11, %13, %15, %17, %19, %21 in 1 : vector<324x4xf32>, vector<324x4xf32>, vector<324x4xf32>, vector<324x4xf32>, vector<324x4xf32>, vector<324x4xf32>, vector<324x4xf32>, vector<324x4xf32>, vector<324x4xf32> -> vector<324x36xf32>
    %c0_23 = arith.constant 0 : index
    %c0_24 = arith.constant 0 : index
    %23 = vector.load %arg2[%c0_23, %c0_24] : memref<36x4xf32, #tpu.memory_space<vmem>>, vector<36x4xf32>
    %cst_25 = arith.constant dense<0.000000e+00> : vector<324x4xf32>
    %24 = tpu.matmul %22, %23, %cst_25 {dimension_numbers = #tpu.dot_dimension_numbers<[1], [0], [0], [1], [0, 0, 1, 1], [], []>} : vector<324x36xf32>, vector<36x4xf32>, vector<324x4xf32> -> vector<324x4xf32>
    %c0_26 = arith.constant 0 : index
    %c0_27 = arith.constant 0 : index
    %25 = vector.load %arg3[%c0_26, %c0_27] : memref<1x4xf32, #tpu.memory_space<vmem>>, vector<1x4xf32>
    %26 = vector.broadcast %25 : vector<1x4xf32> to vector<324x4xf32>
    %27 = arith.mulf %24, %26 : vector<324x4xf32>
    %c0_28 = arith.constant 0 : index
    %c0_29 = arith.constant 0 : index
    %28 = vector.load %arg4[%c0_28, %c0_29] : memref<1x4xf32, #tpu.memory_space<vmem>>, vector<1x4xf32>
    %29 = vector.broadcast %28 : vector<1x4xf32> to vector<324x4xf32>
    %30 = arith.addf %27, %29 : vector<324x4xf32>
    %cst_30 = arith.constant 0.000000e+00 : f32
    %31 = vector.broadcast %cst_30 : f32 to vector<324x4xf32>
    %32 = arith.cmpf ogt, %30, %31 : vector<324x4xf32>
    %cst_31 = arith.constant 0.00999999977 : f32
    %33 = vector.broadcast %cst_31 : f32 to vector<324x4xf32>
    %34 = arith.mulf %33, %30 : vector<324x4xf32>
    %35 = arith.select %32, %30, %34 : vector<324x4xi1>, vector<324x4xf32>
    %36 = vector.extract_strided_slice %35 {offsets = [0, 0], sizes = [16, 4], strides = [1, 1]} : vector<324x4xf32> to vector<16x4xf32>
    %c19_32 = arith.constant 19 : index
    %c0_33 = arith.constant 0 : index
    %37 = vector.load %arg16[%c19_32, %c0_33] : memref<368x4xf32, #tpu.memory_space<vmem>>, vector<16x4xf32>
    tpu.vector_store %arg16[%c19_32, %c0_33], %36 {strides = array<i32>} : memref<368x4xf32, #tpu.memory_space<vmem>>, vector<16x4xf32>,
    %38 = vector.extract_strided_slice %35 {offsets = [18, 0], sizes = [16, 4], strides = [1, 1]} : vector<324x4xf32> to vector<16x4xf32>
    %c37_34 = arith.constant 37 : index
    %c0_35 = arith.constant 0 : index
    %39 = vector.load %arg16[%c37_34, %c0_35] : memref<368x4xf32, #tpu.memory_space<vmem>>, vector<16x4xf32>
    tpu.vector_store %arg16[%c37_34, %c0_35], %38 {strides = array<i32>} : memref<368x4xf32, #tpu.memory_space<vmem>>, vector<16x4xf32>,
    %40 = vector.extract_strided_slice %35 {offsets = [36, 0], sizes = [16, 4], strides = [1, 1]} : vector<324x4xf32> to vector<16x4xf32>
    %c55 = arith.constant 55 : index
    %c0_36 = arith.constant 0 : index
    %41 = vector.load %arg16[%c55, %c0_36] : memref<368x4xf32, #tpu.memory_space<vmem>>, vector<16x4xf32>
    tpu.vector_store %arg16[%c55, %c0_36], %40 {strides = array<i32>} : memref<368x4xf32, #tpu.memory_space<vmem>>, vector<16x4xf32>,
    %42 = vector.extract_strided_slice %35 {offsets = [54, 0], sizes = [16, 4], strides = [1, 1]} : vector<324x4xf32> to vector<16x4xf32>
    %c73 = arith.constant 73 : index
    %c0_37 = arith.constant 0 : index
    %43 = vector.load %arg16[%c73, %c0_37] : memref<368x4xf32, #tpu.memory_space<vmem>>, vector<16x4xf32>
    tpu.vector_store %arg16[%c73, %c0_37], %42 {strides = array<i32>} : memref<368x4xf32, #tpu.memory_space<vmem>>, vector<16x4xf32>,
    %44 = vector.extract_strided_slice %35 {offsets = [72, 0], sizes = [16, 4], strides = [1, 1]} : vector<324x4xf32> to vector<16x4xf32>
    %c91 = arith.constant 91 : index
    %c0_38 = arith.constant 0 : index
    %45 = vector.load %arg16[%c91, %c0_38] : memref<368x4xf32, #tpu.memory_space<vmem>>, vector<16x4xf32>
    tpu.vector_store %arg16[%c91, %c0_38], %44 {strides = array<i32>} : memref<368x4xf32, #tpu.memory_space<vmem>>, vector<16x4xf32>,
    %46 = vector.extract_strided_slice %35 {offsets = [90, 0], sizes = [16, 4], strides = [1, 1]} : vector<324x4xf32> to vector<16x4xf32>
    %c109 = arith.constant 109 : index
    %c0_39 = arith.constant 0 : index
    %47 = vector.load %arg16[%c109, %c0_39] : memref<368x4xf32, #tpu.memory_space<vmem>>, vector<16x4xf32>
    tpu.vector_store %arg16[%c109, %c0_39], %46 {strides = array<i32>} : memref<368x4xf32, #tpu.memory_space<vmem>>, vector<16x4xf32>,
    %48 = vector.extract_strided_slice %35 {offsets = [108, 0], sizes = [16, 4], strides = [1, 1]} : vector<324x4xf32> to vector<16x4xf32>
    %c127 = arith.constant 127 : index
    %c0_40 = arith.constant 0 : index
    %49 = vector.load %arg16[%c127, %c0_40] : memref<368x4xf32, #tpu.memory_space<vmem>>, vector<16x4xf32>
    tpu.vector_store %arg16[%c127, %c0_40], %48 {strides = array<i32>} : memref<368x4xf32, #tpu.memory_space<vmem>>, vector<16x4xf32>,
    %50 = vector.extract_strided_slice %35 {offsets = [126, 0], sizes = [16, 4], strides = [1, 1]} : vector<324x4xf32> to vector<16x4xf32>
    %c145 = arith.constant 145 : index
    %c0_41 = arith.constant 0 : index
    %51 = vector.load %arg16[%c145, %c0_41] : memref<368x4xf32, #tpu.memory_space<vmem>>, vector<16x4xf32>
    tpu.vector_store %arg16[%c145, %c0_41], %50 {strides = array<i32>} : memref<368x4xf32, #tpu.memory_space<vmem>>, vector<16x4xf32>,
    %52 = vector.extract_strided_slice %35 {offsets = [144, 0], sizes = [16, 4], strides = [1, 1]} : vector<324x4xf32> to vector<16x4xf32>
    %c163 = arith.constant 163 : index
    %c0_42 = arith.constant 0 : index
    %53 = vector.load %arg16[%c163, %c0_42] : memref<368x4xf32, #tpu.memory_space<vmem>>, vector<16x4xf32>
    tpu.vector_store %arg16[%c163, %c0_42], %52 {strides = array<i32>} : memref<368x4xf32, #tpu.memory_space<vmem>>, vector<16x4xf32>,
    %54 = vector.extract_strided_slice %35 {offsets = [162, 0], sizes = [16, 4], strides = [1, 1]} : vector<324x4xf32> to vector<16x4xf32>
    %c181 = arith.constant 181 : index
    %c0_43 = arith.constant 0 : index
    %55 = vector.load %arg16[%c181, %c0_43] : memref<368x4xf32, #tpu.memory_space<vmem>>, vector<16x4xf32>
    tpu.vector_store %arg16[%c181, %c0_43], %54 {strides = array<i32>} : memref<368x4xf32, #tpu.memory_space<vmem>>, vector<16x4xf32>,
    %56 = vector.extract_strided_slice %35 {offsets = [180, 0], sizes = [16, 4], strides = [1, 1]} : vector<324x4xf32> to vector<16x4xf32>
    %c199 = arith.constant 199 : index
    %c0_44 = arith.constant 0 : index
    %57 = vector.load %arg16[%c199, %c0_44] : memref<368x4xf32, #tpu.memory_space<vmem>>, vector<16x4xf32>
    tpu.vector_store %arg16[%c199, %c0_44], %56 {strides = array<i32>} : memref<368x4xf32, #tpu.memory_space<vmem>>, vector<16x4xf32>,
    %58 = vector.extract_strided_slice %35 {offsets = [198, 0], sizes = [16, 4], strides = [1, 1]} : vector<324x4xf32> to vector<16x4xf32>
    %c217 = arith.constant 217 : index
    %c0_45 = arith.constant 0 : index
    %59 = vector.load %arg16[%c217, %c0_45] : memref<368x4xf32, #tpu.memory_space<vmem>>, vector<16x4xf32>
    tpu.vector_store %arg16[%c217, %c0_45], %58 {strides = array<i32>} : memref<368x4xf32, #tpu.memory_space<vmem>>, vector<16x4xf32>,
    %60 = vector.extract_strided_slice %35 {offsets = [216, 0], sizes = [16, 4], strides = [1, 1]} : vector<324x4xf32> to vector<16x4xf32>
    %c235 = arith.constant 235 : index
    %c0_46 = arith.constant 0 : index
    %61 = vector.load %arg16[%c235, %c0_46] : memref<368x4xf32, #tpu.memory_space<vmem>>, vector<16x4xf32>
    tpu.vector_store %arg16[%c235, %c0_46], %60 {strides = array<i32>} : memref<368x4xf32, #tpu.memory_space<vmem>>, vector<16x4xf32>,
    %62 = vector.extract_strided_slice %35 {offsets = [234, 0], sizes = [16, 4], strides = [1, 1]} : vector<324x4xf32> to vector<16x4xf32>
    %c253 = arith.constant 253 : index
    %c0_47 = arith.constant 0 : index
    %63 = vector.load %arg16[%c253, %c0_47] : memref<368x4xf32, #tpu.memory_space<vmem>>, vector<16x4xf32>
    tpu.vector_store %arg16[%c253, %c0_47], %62 {strides = array<i32>} : memref<368x4xf32, #tpu.memory_space<vmem>>, vector<16x4xf32>,
    %64 = vector.extract_strided_slice %35 {offsets = [252, 0], sizes = [16, 4], strides = [1, 1]} : vector<324x4xf32> to vector<16x4xf32>
    %c271 = arith.constant 271 : index
    %c0_48 = arith.constant 0 : index
    %65 = vector.load %arg16[%c271, %c0_48] : memref<368x4xf32, #tpu.memory_space<vmem>>, vector<16x4xf32>
    tpu.vector_store %arg16[%c271, %c0_48], %64 {strides = array<i32>} : memref<368x4xf32, #tpu.memory_space<vmem>>, vector<16x4xf32>,
    %66 = vector.extract_strided_slice %35 {offsets = [270, 0], sizes = [16, 4], strides = [1, 1]} : vector<324x4xf32> to vector<16x4xf32>
    %c289 = arith.constant 289 : index
    %c0_49 = arith.constant 0 : index
    %67 = vector.load %arg16[%c289, %c0_49] : memref<368x4xf32, #tpu.memory_space<vmem>>, vector<16x4xf32>
    tpu.vector_store %arg16[%c289, %c0_49], %66 {strides = array<i32>} : memref<368x4xf32, #tpu.memory_space<vmem>>, vector<16x4xf32>,
    %c0_50 = arith.constant 0 : index
    %c0_51 = arith.constant 0 : index
    %68 = vector.load %arg16[%c0_50, %c0_51] : memref<368x4xf32, #tpu.memory_space<vmem>>, vector<324x4xf32>
    %c1_52 = arith.constant 1 : index
    %c0_53 = arith.constant 0 : index
    %69 = vector.load %arg16[%c1_52, %c0_53] : memref<368x4xf32, #tpu.memory_space<vmem>>, vector<324x4xf32>
    %c2_54 = arith.constant 2 : index
    %c0_55 = arith.constant 0 : index
    %70 = vector.load %arg16[%c2_54, %c0_55] : memref<368x4xf32, #tpu.memory_space<vmem>>, vector<324x4xf32>
    %c18_56 = arith.constant 18 : index
    %c0_57 = arith.constant 0 : index
    %71 = vector.load %arg16[%c18_56, %c0_57] : memref<368x4xf32, #tpu.memory_space<vmem>>, vector<324x4xf32>
    %c19_58 = arith.constant 19 : index
    %c0_59 = arith.constant 0 : index
    %72 = vector.load %arg16[%c19_58, %c0_59] : memref<368x4xf32, #tpu.memory_space<vmem>>, vector<324x4xf32>
    %c20_60 = arith.constant 20 : index
    %c0_61 = arith.constant 0 : index
    %73 = vector.load %arg16[%c20_60, %c0_61] : memref<368x4xf32, #tpu.memory_space<vmem>>, vector<324x4xf32>
    %c36_62 = arith.constant 36 : index
    %c0_63 = arith.constant 0 : index
    %74 = vector.load %arg16[%c36_62, %c0_63] : memref<368x4xf32, #tpu.memory_space<vmem>>, vector<324x4xf32>
    %c37_64 = arith.constant 37 : index
    %c0_65 = arith.constant 0 : index
    %75 = vector.load %arg16[%c37_64, %c0_65] : memref<368x4xf32, #tpu.memory_space<vmem>>, vector<324x4xf32>
    %c38_66 = arith.constant 38 : index
    %c0_67 = arith.constant 0 : index
    %76 = vector.load %arg16[%c38_66, %c0_67] : memref<368x4xf32, #tpu.memory_space<vmem>>, vector<324x4xf32>
    %77 = tpu.concatenate %68, %69, %70, %71, %72, %73, %74, %75, %76 in 1 : vector<324x4xf32>, vector<324x4xf32>, vector<324x4xf32>, vector<324x4xf32>, vector<324x4xf32>, vector<324x4xf32>, vector<324x4xf32>, vector<324x4xf32>, vector<324x4xf32> -> vector<324x36xf32>
    %c0_68 = arith.constant 0 : index
    %c0_69 = arith.constant 0 : index
    %78 = vector.load %arg5[%c0_68, %c0_69] : memref<36x8xf32, #tpu.memory_space<vmem>>, vector<36x8xf32>
    %cst_70 = arith.constant dense<0.000000e+00> : vector<324x8xf32>
    %79 = tpu.matmul %77, %78, %cst_70 {dimension_numbers = #tpu.dot_dimension_numbers<[1], [0], [0], [1], [0, 0, 1, 1], [], []>} : vector<324x36xf32>, vector<36x8xf32>, vector<324x8xf32> -> vector<324x8xf32>
    %c0_71 = arith.constant 0 : index
    %c0_72 = arith.constant 0 : index
    %80 = vector.load %arg6[%c0_71, %c0_72] : memref<1x8xf32, #tpu.memory_space<vmem>>, vector<1x8xf32>
    %81 = vector.broadcast %80 : vector<1x8xf32> to vector<324x8xf32>
    %82 = arith.mulf %79, %81 : vector<324x8xf32>
    %c0_73 = arith.constant 0 : index
    %c0_74 = arith.constant 0 : index
    %83 = vector.load %arg7[%c0_73, %c0_74] : memref<1x8xf32, #tpu.memory_space<vmem>>, vector<1x8xf32>
    %84 = vector.broadcast %83 : vector<1x8xf32> to vector<324x8xf32>
    %85 = arith.addf %82, %84 : vector<324x8xf32>
    %cst_75 = arith.constant 0.000000e+00 : f32
    %86 = vector.broadcast %cst_75 : f32 to vector<324x8xf32>
    %87 = arith.cmpf ogt, %85, %86 : vector<324x8xf32>
    %cst_76 = arith.constant 0.00999999977 : f32
    %88 = vector.broadcast %cst_76 : f32 to vector<324x8xf32>
    %89 = arith.mulf %88, %85 : vector<324x8xf32>
    %90 = arith.select %87, %85, %89 : vector<324x8xi1>, vector<324x8xf32>
    %91 = vector.extract_strided_slice %90 {offsets = [0, 0], sizes = [16, 8], strides = [1, 1]} : vector<324x8xf32> to vector<16x8xf32>
    %92 = vector.extract_strided_slice %90 {offsets = [36, 0], sizes = [16, 8], strides = [1, 1]} : vector<324x8xf32> to vector<16x8xf32>
    %93 = vector.extract_strided_slice %90 {offsets = [72, 0], sizes = [16, 8], strides = [1, 1]} : vector<324x8xf32> to vector<16x8xf32>
    %94 = vector.extract_strided_slice %90 {offsets = [108, 0], sizes = [16, 8], strides = [1, 1]} : vector<324x8xf32> to vector<16x8xf32>
    %95 = vector.extract_strided_slice %90 {offsets = [144, 0], sizes = [16, 8], strides = [1, 1]} : vector<324x8xf32> to vector<16x8xf32>
    %96 = vector.extract_strided_slice %90 {offsets = [180, 0], sizes = [16, 8], strides = [1, 1]} : vector<324x8xf32> to vector<16x8xf32>
    %97 = vector.extract_strided_slice %90 {offsets = [216, 0], sizes = [16, 8], strides = [1, 1]} : vector<324x8xf32> to vector<16x8xf32>
    %98 = vector.extract_strided_slice %90 {offsets = [252, 0], sizes = [16, 8], strides = [1, 1]} : vector<324x8xf32> to vector<16x8xf32>
    %99 = tpu.concatenate %91, %92, %93, %94, %95, %96, %97, %98 in 0 : vector<16x8xf32>, vector<16x8xf32>, vector<16x8xf32>, vector<16x8xf32>, vector<16x8xf32>, vector<16x8xf32>, vector<16x8xf32>, vector<16x8xf32> -> vector<128x8xf32>
    %100 = vector.extract_strided_slice %90 {offsets = [18, 0], sizes = [16, 8], strides = [1, 1]} : vector<324x8xf32> to vector<16x8xf32>
    %101 = vector.extract_strided_slice %90 {offsets = [54, 0], sizes = [16, 8], strides = [1, 1]} : vector<324x8xf32> to vector<16x8xf32>
    %102 = vector.extract_strided_slice %90 {offsets = [90, 0], sizes = [16, 8], strides = [1, 1]} : vector<324x8xf32> to vector<16x8xf32>
    %103 = vector.extract_strided_slice %90 {offsets = [126, 0], sizes = [16, 8], strides = [1, 1]} : vector<324x8xf32> to vector<16x8xf32>
    %104 = vector.extract_strided_slice %90 {offsets = [162, 0], sizes = [16, 8], strides = [1, 1]} : vector<324x8xf32> to vector<16x8xf32>
    %105 = vector.extract_strided_slice %90 {offsets = [198, 0], sizes = [16, 8], strides = [1, 1]} : vector<324x8xf32> to vector<16x8xf32>
    %106 = vector.extract_strided_slice %90 {offsets = [234, 0], sizes = [16, 8], strides = [1, 1]} : vector<324x8xf32> to vector<16x8xf32>
    %107 = vector.extract_strided_slice %90 {offsets = [270, 0], sizes = [16, 8], strides = [1, 1]} : vector<324x8xf32> to vector<16x8xf32>
    %108 = tpu.concatenate %100, %101, %102, %103, %104, %105, %106, %107 in 0 : vector<16x8xf32>, vector<16x8xf32>, vector<16x8xf32>, vector<16x8xf32>, vector<16x8xf32>, vector<16x8xf32>, vector<16x8xf32>, vector<16x8xf32> -> vector<128x8xf32>
    %109 = arith.maximumf %99, %108 : vector<128x8xf32>
    %110 = vector.extract_strided_slice %109 {offsets = [1, 0], sizes = [127, 8], strides = [1, 1]} : vector<128x8xf32> to vector<127x8xf32>
    %111 = vector.extract_strided_slice %109 {offsets = [0, 0], sizes = [1, 8], strides = [1, 1]} : vector<128x8xf32> to vector<1x8xf32>
    %112 = tpu.concatenate %110, %111 in 0 : vector<127x8xf32>, vector<1x8xf32> -> vector<128x8xf32>
    %113 = arith.maximumf %109, %112 : vector<128x8xf32>
    %c0_77 = arith.constant 0 : index
    %c0_78 = arith.constant 0 : index
    %114 = vector.load %arg18[%c0_77, %c0_78] : memref<128x8xf32, #tpu.memory_space<vmem>>, vector<128x8xf32>
    tpu.vector_store %arg18[%c0_77, %c0_78], %113 {strides = array<i32>} : memref<128x8xf32, #tpu.memory_space<vmem>>, vector<128x8xf32>,
    %c0_79 = arith.constant 0 : index
    %c0_80 = arith.constant 0 : index
    %115 = tpu.strided_load %arg18[%c0_79, %c0_80] {strides = array<i32: 2, 1>} : memref<128x8xf32, #tpu.memory_space<vmem>>, vector<64x8xf32>
    %116 = vector.extract_strided_slice %115 {offsets = [0, 0], sizes = [8, 8], strides = [1, 1]} : vector<64x8xf32> to vector<8x8xf32>
    %c11 = arith.constant 11 : index
    %c0_81 = arith.constant 0 : index
    %117 = vector.load %arg17[%c11, %c0_81] : memref<128x8xf32, #tpu.memory_space<vmem>>, vector<8x8xf32>
    tpu.vector_store %arg17[%c11, %c0_81], %116 {strides = array<i32>} : memref<128x8xf32, #tpu.memory_space<vmem>>, vector<8x8xf32>,
    %118 = vector.extract_strided_slice %115 {offsets = [8, 0], sizes = [8, 8], strides = [1, 1]} : vector<64x8xf32> to vector<8x8xf32>
    %c21 = arith.constant 21 : index
    %c0_82 = arith.constant 0 : index
    %119 = vector.load %arg17[%c21, %c0_82] : memref<128x8xf32, #tpu.memory_space<vmem>>, vector<8x8xf32>
    tpu.vector_store %arg17[%c21, %c0_82], %118 {strides = array<i32>} : memref<128x8xf32, #tpu.memory_space<vmem>>, vector<8x8xf32>,
    %120 = vector.extract_strided_slice %115 {offsets = [16, 0], sizes = [8, 8], strides = [1, 1]} : vector<64x8xf32> to vector<8x8xf32>
    %c31 = arith.constant 31 : index
    %c0_83 = arith.constant 0 : index
    %121 = vector.load %arg17[%c31, %c0_83] : memref<128x8xf32, #tpu.memory_space<vmem>>, vector<8x8xf32>
    tpu.vector_store %arg17[%c31, %c0_83], %120 {strides = array<i32>} : memref<128x8xf32, #tpu.memory_space<vmem>>, vector<8x8xf32>,
    %122 = vector.extract_strided_slice %115 {offsets = [24, 0], sizes = [8, 8], strides = [1, 1]} : vector<64x8xf32> to vector<8x8xf32>
    %c41 = arith.constant 41 : index
    %c0_84 = arith.constant 0 : index
    %123 = vector.load %arg17[%c41, %c0_84] : memref<128x8xf32, #tpu.memory_space<vmem>>, vector<8x8xf32>
    tpu.vector_store %arg17[%c41, %c0_84], %122 {strides = array<i32>} : memref<128x8xf32, #tpu.memory_space<vmem>>, vector<8x8xf32>,
    %124 = vector.extract_strided_slice %115 {offsets = [32, 0], sizes = [8, 8], strides = [1, 1]} : vector<64x8xf32> to vector<8x8xf32>
    %c51 = arith.constant 51 : index
    %c0_85 = arith.constant 0 : index
    %125 = vector.load %arg17[%c51, %c0_85] : memref<128x8xf32, #tpu.memory_space<vmem>>, vector<8x8xf32>
    tpu.vector_store %arg17[%c51, %c0_85], %124 {strides = array<i32>} : memref<128x8xf32, #tpu.memory_space<vmem>>, vector<8x8xf32>,
    %126 = vector.extract_strided_slice %115 {offsets = [40, 0], sizes = [8, 8], strides = [1, 1]} : vector<64x8xf32> to vector<8x8xf32>
    %c61 = arith.constant 61 : index
    %c0_86 = arith.constant 0 : index
    %127 = vector.load %arg17[%c61, %c0_86] : memref<128x8xf32, #tpu.memory_space<vmem>>, vector<8x8xf32>
    tpu.vector_store %arg17[%c61, %c0_86], %126 {strides = array<i32>} : memref<128x8xf32, #tpu.memory_space<vmem>>, vector<8x8xf32>,
    %128 = vector.extract_strided_slice %115 {offsets = [48, 0], sizes = [8, 8], strides = [1, 1]} : vector<64x8xf32> to vector<8x8xf32>
    %c71 = arith.constant 71 : index
    %c0_87 = arith.constant 0 : index
    %129 = vector.load %arg17[%c71, %c0_87] : memref<128x8xf32, #tpu.memory_space<vmem>>, vector<8x8xf32>
    tpu.vector_store %arg17[%c71, %c0_87], %128 {strides = array<i32>} : memref<128x8xf32, #tpu.memory_space<vmem>>, vector<8x8xf32>,
    %130 = vector.extract_strided_slice %115 {offsets = [56, 0], sizes = [8, 8], strides = [1, 1]} : vector<64x8xf32> to vector<8x8xf32>
    %c81 = arith.constant 81 : index
    %c0_88 = arith.constant 0 : index
    %131 = vector.load %arg17[%c81, %c0_88] : memref<128x8xf32, #tpu.memory_space<vmem>>, vector<8x8xf32>
    tpu.vector_store %arg17[%c81, %c0_88], %130 {strides = array<i32>} : memref<128x8xf32, #tpu.memory_space<vmem>>, vector<8x8xf32>,
    %c0_89 = arith.constant 0 : index
    %c0_90 = arith.constant 0 : index
    %132 = vector.load %arg17[%c0_89, %c0_90] : memref<128x8xf32, #tpu.memory_space<vmem>>, vector<100x8xf32>
    %c1_91 = arith.constant 1 : index
    %c0_92 = arith.constant 0 : index
    %133 = vector.load %arg17[%c1_91, %c0_92] : memref<128x8xf32, #tpu.memory_space<vmem>>, vector<100x8xf32>
    %c2_93 = arith.constant 2 : index
    %c0_94 = arith.constant 0 : index
    %134 = vector.load %arg17[%c2_93, %c0_94] : memref<128x8xf32, #tpu.memory_space<vmem>>, vector<100x8xf32>
    %c10 = arith.constant 10 : index
    %c0_95 = arith.constant 0 : index
    %135 = vector.load %arg17[%c10, %c0_95] : memref<128x8xf32, #tpu.memory_space<vmem>>, vector<100x8xf32>
    %c11_96 = arith.constant 11 : index
    %c0_97 = arith.constant 0 : index
    %136 = vector.load %arg17[%c11_96, %c0_97] : memref<128x8xf32, #tpu.memory_space<vmem>>, vector<100x8xf32>
    %c12 = arith.constant 12 : index
    %c0_98 = arith.constant 0 : index
    %137 = vector.load %arg17[%c12, %c0_98] : memref<128x8xf32, #tpu.memory_space<vmem>>, vector<100x8xf32>
    %c20_99 = arith.constant 20 : index
    %c0_100 = arith.constant 0 : index
    %138 = vector.load %arg17[%c20_99, %c0_100] : memref<128x8xf32, #tpu.memory_space<vmem>>, vector<100x8xf32>
    %c21_101 = arith.constant 21 : index
    %c0_102 = arith.constant 0 : index
    %139 = vector.load %arg17[%c21_101, %c0_102] : memref<128x8xf32, #tpu.memory_space<vmem>>, vector<100x8xf32>
    %c22 = arith.constant 22 : index
    %c0_103 = arith.constant 0 : index
    %140 = vector.load %arg17[%c22, %c0_103] : memref<128x8xf32, #tpu.memory_space<vmem>>, vector<100x8xf32>
    %141 = tpu.concatenate %132, %133, %134, %135, %136, %137, %138, %139, %140 in 1 : vector<100x8xf32>, vector<100x8xf32>, vector<100x8xf32>, vector<100x8xf32>, vector<100x8xf32>, vector<100x8xf32>, vector<100x8xf32>, vector<100x8xf32>, vector<100x8xf32> -> vector<100x72xf32>
    %c0_104 = arith.constant 0 : index
    %c0_105 = arith.constant 0 : index
    %142 = vector.load %arg8[%c0_104, %c0_105] : memref<72x16xf32, #tpu.memory_space<vmem>>, vector<72x16xf32>
    %cst_106 = arith.constant dense<0.000000e+00> : vector<100x16xf32>
    %143 = tpu.matmul %141, %142, %cst_106 {dimension_numbers = #tpu.dot_dimension_numbers<[1], [0], [0], [1], [0, 0, 1, 1], [], []>} : vector<100x72xf32>, vector<72x16xf32>, vector<100x16xf32> -> vector<100x16xf32>
    %c0_107 = arith.constant 0 : index
    %c0_108 = arith.constant 0 : index
    %144 = vector.load %arg9[%c0_107, %c0_108] : memref<1x16xf32, #tpu.memory_space<vmem>>, vector<1x16xf32>
    %145 = vector.broadcast %144 : vector<1x16xf32> to vector<100x16xf32>
    %146 = arith.mulf %143, %145 : vector<100x16xf32>
    %c0_109 = arith.constant 0 : index
    %c0_110 = arith.constant 0 : index
    %147 = vector.load %arg10[%c0_109, %c0_110] : memref<1x16xf32, #tpu.memory_space<vmem>>, vector<1x16xf32>
    %148 = vector.broadcast %147 : vector<1x16xf32> to vector<100x16xf32>
    %149 = arith.addf %146, %148 : vector<100x16xf32>
    %cst_111 = arith.constant 0.000000e+00 : f32
    %150 = vector.broadcast %cst_111 : f32 to vector<100x16xf32>
    %151 = arith.cmpf ogt, %149, %150 : vector<100x16xf32>
    %cst_112 = arith.constant 0.00999999977 : f32
    %152 = vector.broadcast %cst_112 : f32 to vector<100x16xf32>
    %153 = arith.mulf %152, %149 : vector<100x16xf32>
    %154 = arith.select %151, %149, %153 : vector<100x16xi1>, vector<100x16xf32>
    %155 = vector.extract_strided_slice %154 {offsets = [0, 0], sizes = [8, 16], strides = [1, 1]} : vector<100x16xf32> to vector<8x16xf32>
    %156 = vector.extract_strided_slice %154 {offsets = [20, 0], sizes = [8, 16], strides = [1, 1]} : vector<100x16xf32> to vector<8x16xf32>
    %157 = vector.extract_strided_slice %154 {offsets = [40, 0], sizes = [8, 16], strides = [1, 1]} : vector<100x16xf32> to vector<8x16xf32>
    %158 = vector.extract_strided_slice %154 {offsets = [60, 0], sizes = [8, 16], strides = [1, 1]} : vector<100x16xf32> to vector<8x16xf32>
    %159 = tpu.concatenate %155, %156, %157, %158 in 0 : vector<8x16xf32>, vector<8x16xf32>, vector<8x16xf32>, vector<8x16xf32> -> vector<32x16xf32>
    %c0_113 = arith.constant 0 : index
    %c0_114 = arith.constant 0 : index
    %160 = vector.load %arg19[%c0_113, %c0_114] : memref<32x16xf32, #tpu.memory_space<vmem>>, vector<32x16xf32>
    tpu.vector_store %arg19[%c0_113, %c0_114], %159 {strides = array<i32>} : memref<32x16xf32, #tpu.memory_space<vmem>>, vector<32x16xf32>,
    %c0_115 = arith.constant 0 : index
    %c0_116 = arith.constant 0 : index
    %161 = tpu.strided_load %arg19[%c0_115, %c0_116] {strides = array<i32: 2, 1>} : memref<32x16xf32, #tpu.memory_space<vmem>>, vector<16x16xf32>
    %c0_117 = arith.constant 0 : index
    %c0_118 = arith.constant 0 : index
    %162 = vector.load %arg12[%c0_117, %c0_118] : memref<1x128xf32, #tpu.memory_space<vmem>>, vector<1x128xf32>
    %163 = vector.extract_strided_slice %161 {offsets = [0, 0], sizes = [1, 16], strides = [1, 1]} : vector<16x16xf32> to vector<1x16xf32>
    %c0_119 = arith.constant 0 : index
    %c0_120 = arith.constant 0 : index
    %c0_121 = arith.constant 0 : index
    %164 = vector.load %arg11[%c0_119, %c0_120, %c0_121] : memref<16x16x128xf32, #tpu.memory_space<vmem>>, vector<1x16x128xf32>
    %165 = vector.shape_cast %164 : vector<1x16x128xf32> to vector<16x128xf32>
    %cst_122 = arith.constant dense<0.000000e+00> : vector<1x128xf32>
    %166 = tpu.matmul %163, %165, %cst_122 {dimension_numbers = #tpu.dot_dimension_numbers<[1], [0], [0], [1], [0, 0, 1, 1], [], []>} : vector<1x16xf32>, vector<16x128xf32>, vector<1x128xf32> -> vector<1x128xf32>
    %167 = arith.addf %162, %166 : vector<1x128xf32>
    %168 = vector.extract_strided_slice %161 {offsets = [1, 0], sizes = [1, 16], strides = [1, 1]} : vector<16x16xf32> to vector<1x16xf32>
    %c1_123 = arith.constant 1 : index
    %c0_124 = arith.constant 0 : index
    %c0_125 = arith.constant 0 : index
    %169 = vector.load %arg11[%c1_123, %c0_124, %c0_125] : memref<16x16x128xf32, #tpu.memory_space<vmem>>, vector<1x16x128xf32>
    %170 = vector.shape_cast %169 : vector<1x16x128xf32> to vector<16x128xf32>
    %cst_126 = arith.constant dense<0.000000e+00> : vector<1x128xf32>
    %171 = tpu.matmul %168, %170, %cst_126 {dimension_numbers = #tpu.dot_dimension_numbers<[1], [0], [0], [1], [0, 0, 1, 1], [], []>} : vector<1x16xf32>, vector<16x128xf32>, vector<1x128xf32> -> vector<1x128xf32>
    %172 = arith.addf %167, %171 : vector<1x128xf32>
    %173 = vector.extract_strided_slice %161 {offsets = [2, 0], sizes = [1, 16], strides = [1, 1]} : vector<16x16xf32> to vector<1x16xf32>
    %c2_127 = arith.constant 2 : index
    %c0_128 = arith.constant 0 : index
    %c0_129 = arith.constant 0 : index
    %174 = vector.load %arg11[%c2_127, %c0_128, %c0_129] : memref<16x16x128xf32, #tpu.memory_space<vmem>>, vector<1x16x128xf32>
    %175 = vector.shape_cast %174 : vector<1x16x128xf32> to vector<16x128xf32>
    %cst_130 = arith.constant dense<0.000000e+00> : vector<1x128xf32>
    %176 = tpu.matmul %173, %175, %cst_130 {dimension_numbers = #tpu.dot_dimension_numbers<[1], [0], [0], [1], [0, 0, 1, 1], [], []>} : vector<1x16xf32>, vector<16x128xf32>, vector<1x128xf32> -> vector<1x128xf32>
    %177 = arith.addf %172, %176 : vector<1x128xf32>
    %178 = vector.extract_strided_slice %161 {offsets = [3, 0], sizes = [1, 16], strides = [1, 1]} : vector<16x16xf32> to vector<1x16xf32>
    %c3 = arith.constant 3 : index
    %c0_131 = arith.constant 0 : index
    %c0_132 = arith.constant 0 : index
    %179 = vector.load %arg11[%c3, %c0_131, %c0_132] : memref<16x16x128xf32, #tpu.memory_space<vmem>>, vector<1x16x128xf32>
    %180 = vector.shape_cast %179 : vector<1x16x128xf32> to vector<16x128xf32>
    %cst_133 = arith.constant dense<0.000000e+00> : vector<1x128xf32>
    %181 = tpu.matmul %178, %180, %cst_133 {dimension_numbers = #tpu.dot_dimension_numbers<[1], [0], [0], [1], [0, 0, 1, 1], [], []>} : vector<1x16xf32>, vector<16x128xf32>, vector<1x128xf32> -> vector<1x128xf32>
    %182 = arith.addf %177, %181 : vector<1x128xf32>
    %183 = vector.extract_strided_slice %161 {offsets = [4, 0], sizes = [1, 16], strides = [1, 1]} : vector<16x16xf32> to vector<1x16xf32>
    %c4 = arith.constant 4 : index
    %c0_134 = arith.constant 0 : index
    %c0_135 = arith.constant 0 : index
    %184 = vector.load %arg11[%c4, %c0_134, %c0_135] : memref<16x16x128xf32, #tpu.memory_space<vmem>>, vector<1x16x128xf32>
    %185 = vector.shape_cast %184 : vector<1x16x128xf32> to vector<16x128xf32>
    %cst_136 = arith.constant dense<0.000000e+00> : vector<1x128xf32>
    %186 = tpu.matmul %183, %185, %cst_136 {dimension_numbers = #tpu.dot_dimension_numbers<[1], [0], [0], [1], [0, 0, 1, 1], [], []>} : vector<1x16xf32>, vector<16x128xf32>, vector<1x128xf32> -> vector<1x128xf32>
    %187 = arith.addf %182, %186 : vector<1x128xf32>
    %188 = vector.extract_strided_slice %161 {offsets = [5, 0], sizes = [1, 16], strides = [1, 1]} : vector<16x16xf32> to vector<1x16xf32>
    %c5 = arith.constant 5 : index
    %c0_137 = arith.constant 0 : index
    %c0_138 = arith.constant 0 : index
    %189 = vector.load %arg11[%c5, %c0_137, %c0_138] : memref<16x16x128xf32, #tpu.memory_space<vmem>>, vector<1x16x128xf32>
    %190 = vector.shape_cast %189 : vector<1x16x128xf32> to vector<16x128xf32>
    %cst_139 = arith.constant dense<0.000000e+00> : vector<1x128xf32>
    %191 = tpu.matmul %188, %190, %cst_139 {dimension_numbers = #tpu.dot_dimension_numbers<[1], [0], [0], [1], [0, 0, 1, 1], [], []>} : vector<1x16xf32>, vector<16x128xf32>, vector<1x128xf32> -> vector<1x128xf32>
    %192 = arith.addf %187, %191 : vector<1x128xf32>
    %193 = vector.extract_strided_slice %161 {offsets = [6, 0], sizes = [1, 16], strides = [1, 1]} : vector<16x16xf32> to vector<1x16xf32>
    %c6 = arith.constant 6 : index
    %c0_140 = arith.constant 0 : index
    %c0_141 = arith.constant 0 : index
    %194 = vector.load %arg11[%c6, %c0_140, %c0_141] : memref<16x16x128xf32, #tpu.memory_space<vmem>>, vector<1x16x128xf32>
    %195 = vector.shape_cast %194 : vector<1x16x128xf32> to vector<16x128xf32>
    %cst_142 = arith.constant dense<0.000000e+00> : vector<1x128xf32>
    %196 = tpu.matmul %193, %195, %cst_142 {dimension_numbers = #tpu.dot_dimension_numbers<[1], [0], [0], [1], [0, 0, 1, 1], [], []>} : vector<1x16xf32>, vector<16x128xf32>, vector<1x128xf32> -> vector<1x128xf32>
    %197 = arith.addf %192, %196 : vector<1x128xf32>
    %198 = vector.extract_strided_slice %161 {offsets = [7, 0], sizes = [1, 16], strides = [1, 1]} : vector<16x16xf32> to vector<1x16xf32>
    %c7 = arith.constant 7 : index
    %c0_143 = arith.constant 0 : index
    %c0_144 = arith.constant 0 : index
    %199 = vector.load %arg11[%c7, %c0_143, %c0_144] : memref<16x16x128xf32, #tpu.memory_space<vmem>>, vector<1x16x128xf32>
    %200 = vector.shape_cast %199 : vector<1x16x128xf32> to vector<16x128xf32>
    %cst_145 = arith.constant dense<0.000000e+00> : vector<1x128xf32>
    %201 = tpu.matmul %198, %200, %cst_145 {dimension_numbers = #tpu.dot_dimension_numbers<[1], [0], [0], [1], [0, 0, 1, 1], [], []>} : vector<1x16xf32>, vector<16x128xf32>, vector<1x128xf32> -> vector<1x128xf32>
    %202 = arith.addf %197, %201 : vector<1x128xf32>
    %203 = vector.extract_strided_slice %161 {offsets = [8, 0], sizes = [1, 16], strides = [1, 1]} : vector<16x16xf32> to vector<1x16xf32>
    %c8 = arith.constant 8 : index
    %c0_146 = arith.constant 0 : index
    %c0_147 = arith.constant 0 : index
    %204 = vector.load %arg11[%c8, %c0_146, %c0_147] : memref<16x16x128xf32, #tpu.memory_space<vmem>>, vector<1x16x128xf32>
    %205 = vector.shape_cast %204 : vector<1x16x128xf32> to vector<16x128xf32>
    %cst_148 = arith.constant dense<0.000000e+00> : vector<1x128xf32>
    %206 = tpu.matmul %203, %205, %cst_148 {dimension_numbers = #tpu.dot_dimension_numbers<[1], [0], [0], [1], [0, 0, 1, 1], [], []>} : vector<1x16xf32>, vector<16x128xf32>, vector<1x128xf32> -> vector<1x128xf32>
    %207 = arith.addf %202, %206 : vector<1x128xf32>
    %208 = vector.extract_strided_slice %161 {offsets = [9, 0], sizes = [1, 16], strides = [1, 1]} : vector<16x16xf32> to vector<1x16xf32>
    %c9 = arith.constant 9 : index
    %c0_149 = arith.constant 0 : index
    %c0_150 = arith.constant 0 : index
    %209 = vector.load %arg11[%c9, %c0_149, %c0_150] : memref<16x16x128xf32, #tpu.memory_space<vmem>>, vector<1x16x128xf32>
    %210 = vector.shape_cast %209 : vector<1x16x128xf32> to vector<16x128xf32>
    %cst_151 = arith.constant dense<0.000000e+00> : vector<1x128xf32>
    %211 = tpu.matmul %208, %210, %cst_151 {dimension_numbers = #tpu.dot_dimension_numbers<[1], [0], [0], [1], [0, 0, 1, 1], [], []>} : vector<1x16xf32>, vector<16x128xf32>, vector<1x128xf32> -> vector<1x128xf32>
    %212 = arith.addf %207, %211 : vector<1x128xf32>
    %213 = vector.extract_strided_slice %161 {offsets = [10, 0], sizes = [1, 16], strides = [1, 1]} : vector<16x16xf32> to vector<1x16xf32>
    %c10_152 = arith.constant 10 : index
    %c0_153 = arith.constant 0 : index
    %c0_154 = arith.constant 0 : index
    %214 = vector.load %arg11[%c10_152, %c0_153, %c0_154] : memref<16x16x128xf32, #tpu.memory_space<vmem>>, vector<1x16x128xf32>
    %215 = vector.shape_cast %214 : vector<1x16x128xf32> to vector<16x128xf32>
    %cst_155 = arith.constant dense<0.000000e+00> : vector<1x128xf32>
    %216 = tpu.matmul %213, %215, %cst_155 {dimension_numbers = #tpu.dot_dimension_numbers<[1], [0], [0], [1], [0, 0, 1, 1], [], []>} : vector<1x16xf32>, vector<16x128xf32>, vector<1x128xf32> -> vector<1x128xf32>
    %217 = arith.addf %212, %216 : vector<1x128xf32>
    %218 = vector.extract_strided_slice %161 {offsets = [11, 0], sizes = [1, 16], strides = [1, 1]} : vector<16x16xf32> to vector<1x16xf32>
    %c11_156 = arith.constant 11 : index
    %c0_157 = arith.constant 0 : index
    %c0_158 = arith.constant 0 : index
    %219 = vector.load %arg11[%c11_156, %c0_157, %c0_158] : memref<16x16x128xf32, #tpu.memory_space<vmem>>, vector<1x16x128xf32>
    %220 = vector.shape_cast %219 : vector<1x16x128xf32> to vector<16x128xf32>
    %cst_159 = arith.constant dense<0.000000e+00> : vector<1x128xf32>
    %221 = tpu.matmul %218, %220, %cst_159 {dimension_numbers = #tpu.dot_dimension_numbers<[1], [0], [0], [1], [0, 0, 1, 1], [], []>} : vector<1x16xf32>, vector<16x128xf32>, vector<1x128xf32> -> vector<1x128xf32>
    %222 = arith.addf %217, %221 : vector<1x128xf32>
    %223 = vector.extract_strided_slice %161 {offsets = [12, 0], sizes = [1, 16], strides = [1, 1]} : vector<16x16xf32> to vector<1x16xf32>
    %c12_160 = arith.constant 12 : index
    %c0_161 = arith.constant 0 : index
    %c0_162 = arith.constant 0 : index
    %224 = vector.load %arg11[%c12_160, %c0_161, %c0_162] : memref<16x16x128xf32, #tpu.memory_space<vmem>>, vector<1x16x128xf32>
    %225 = vector.shape_cast %224 : vector<1x16x128xf32> to vector<16x128xf32>
    %cst_163 = arith.constant dense<0.000000e+00> : vector<1x128xf32>
    %226 = tpu.matmul %223, %225, %cst_163 {dimension_numbers = #tpu.dot_dimension_numbers<[1], [0], [0], [1], [0, 0, 1, 1], [], []>} : vector<1x16xf32>, vector<16x128xf32>, vector<1x128xf32> -> vector<1x128xf32>
    %227 = arith.addf %222, %226 : vector<1x128xf32>
    %228 = vector.extract_strided_slice %161 {offsets = [13, 0], sizes = [1, 16], strides = [1, 1]} : vector<16x16xf32> to vector<1x16xf32>
    %c13 = arith.constant 13 : index
    %c0_164 = arith.constant 0 : index
    %c0_165 = arith.constant 0 : index
    %229 = vector.load %arg11[%c13, %c0_164, %c0_165] : memref<16x16x128xf32, #tpu.memory_space<vmem>>, vector<1x16x128xf32>
    %230 = vector.shape_cast %229 : vector<1x16x128xf32> to vector<16x128xf32>
    %cst_166 = arith.constant dense<0.000000e+00> : vector<1x128xf32>
    %231 = tpu.matmul %228, %230, %cst_166 {dimension_numbers = #tpu.dot_dimension_numbers<[1], [0], [0], [1], [0, 0, 1, 1], [], []>} : vector<1x16xf32>, vector<16x128xf32>, vector<1x128xf32> -> vector<1x128xf32>
    %232 = arith.addf %227, %231 : vector<1x128xf32>
    %233 = vector.extract_strided_slice %161 {offsets = [14, 0], sizes = [1, 16], strides = [1, 1]} : vector<16x16xf32> to vector<1x16xf32>
    %c14 = arith.constant 14 : index
    %c0_167 = arith.constant 0 : index
    %c0_168 = arith.constant 0 : index
    %234 = vector.load %arg11[%c14, %c0_167, %c0_168] : memref<16x16x128xf32, #tpu.memory_space<vmem>>, vector<1x16x128xf32>
    %235 = vector.shape_cast %234 : vector<1x16x128xf32> to vector<16x128xf32>
    %cst_169 = arith.constant dense<0.000000e+00> : vector<1x128xf32>
    %236 = tpu.matmul %233, %235, %cst_169 {dimension_numbers = #tpu.dot_dimension_numbers<[1], [0], [0], [1], [0, 0, 1, 1], [], []>} : vector<1x16xf32>, vector<16x128xf32>, vector<1x128xf32> -> vector<1x128xf32>
    %237 = arith.addf %232, %236 : vector<1x128xf32>
    %238 = vector.extract_strided_slice %161 {offsets = [15, 0], sizes = [1, 16], strides = [1, 1]} : vector<16x16xf32> to vector<1x16xf32>
    %c15 = arith.constant 15 : index
    %c0_170 = arith.constant 0 : index
    %c0_171 = arith.constant 0 : index
    %239 = vector.load %arg11[%c15, %c0_170, %c0_171] : memref<16x16x128xf32, #tpu.memory_space<vmem>>, vector<1x16x128xf32>
    %240 = vector.shape_cast %239 : vector<1x16x128xf32> to vector<16x128xf32>
    %cst_172 = arith.constant dense<0.000000e+00> : vector<1x128xf32>
    %241 = tpu.matmul %238, %240, %cst_172 {dimension_numbers = #tpu.dot_dimension_numbers<[1], [0], [0], [1], [0, 0, 1, 1], [], []>} : vector<1x16xf32>, vector<16x128xf32>, vector<1x128xf32> -> vector<1x128xf32>
    %242 = arith.addf %237, %241 : vector<1x128xf32>
    %cst_173 = arith.constant 0.000000e+00 : f32
    %243 = vector.broadcast %cst_173 : f32 to vector<1x128xf32>
    %244 = arith.cmpf ogt, %242, %243 : vector<1x128xf32>
    %cst_174 = arith.constant 0.00999999977 : f32
    %245 = vector.broadcast %cst_174 : f32 to vector<1x128xf32>
    %246 = arith.mulf %245, %242 : vector<1x128xf32>
    %247 = arith.select %244, %242, %246 : vector<1x128xi1>, vector<1x128xf32>
    %c0_175 = arith.constant 0 : index
    %c0_176 = arith.constant 0 : index
    %248 = vector.load %arg13[%c0_175, %c0_176] : memref<128x128xf32, #tpu.memory_space<vmem>>, vector<128x128xf32>
    %cst_177 = arith.constant dense<0.000000e+00> : vector<1x128xf32>
    %249 = tpu.matmul %247, %248, %cst_177 {dimension_numbers = #tpu.dot_dimension_numbers<[1], [0], [0], [1], [0, 0, 1, 1], [], []>} : vector<1x128xf32>, vector<128x128xf32>, vector<1x128xf32> -> vector<1x128xf32>
    %c0_178 = arith.constant 0 : index
    %c0_179 = arith.constant 0 : index
    %250 = vector.load %arg14[%c0_178, %c0_179] : memref<1x128xf32, #tpu.memory_space<vmem>>, vector<1x128xf32>
    %251 = arith.addf %249, %250 : vector<1x128xf32>
    %c0_180 = arith.constant 0 : index
    %c0_181 = arith.constant 0 : index
    %c0_182 = arith.constant 0 : index
    %252 = vector.load %arg15[%c0_180, %c0_181, %c0_182] : memref<1x1x128xf32, #tpu.memory_space<vmem>>, vector<1x1x128xf32>
    %253 = vector.shape_cast %252 : vector<1x1x128xf32> to vector<1x128xf32>
    %254 = vector.shape_cast %251 : vector<1x128xf32> to vector<1x1x128xf32>
    tpu.vector_store %arg15[%c0_180, %c0_181, %c0_182], %254 {strides = array<i32>} : memref<1x1x128xf32, #tpu.memory_space<vmem>>, vector<1x1x128xf32>,
    return
  }
  func.func @transform_0(%arg0: i32) -> (i32, i32, i32) {
    %c0_i32 = arith.constant 0 : i32
    %c0_i32_0 = arith.constant 0 : i32
    %c0_i32_1 = arith.constant 0 : i32
    return %arg0, %c0_i32, %c0_i32_0 : i32, i32, i32
  }
  func.func @transform_1(%arg0: i32) -> (i32, i32) {
    %c0_i32 = arith.constant 0 : i32
    %c0_i32_0 = arith.constant 0 : i32
    %c0_i32_1 = arith.constant 0 : i32
    return %c0_i32, %c0_i32_0 : i32, i32
  }
  func.func @transform_2(%arg0: i32) -> (i32, i32) {
    %c0_i32 = arith.constant 0 : i32
    %c0_i32_0 = arith.constant 0 : i32
    %c0_i32_1 = arith.constant 0 : i32
    return %c0_i32, %c0_i32_0 : i32, i32
  }
  func.func @transform_3(%arg0: i32) -> (i32, i32) {
    %c0_i32 = arith.constant 0 : i32
    %c0_i32_0 = arith.constant 0 : i32
    %c0_i32_1 = arith.constant 0 : i32
    return %c0_i32, %c0_i32_0 : i32, i32
  }
  func.func @transform_4(%arg0: i32) -> (i32, i32) {
    %c0_i32 = arith.constant 0 : i32
    %c0_i32_0 = arith.constant 0 : i32
    %c0_i32_1 = arith.constant 0 : i32
    return %c0_i32, %c0_i32_0 : i32, i32
  }
  func.func @transform_5(%arg0: i32) -> (i32, i32) {
    %c0_i32 = arith.constant 0 : i32
    %c0_i32_0 = arith.constant 0 : i32
    %c0_i32_1 = arith.constant 0 : i32
    return %c0_i32, %c0_i32_0 : i32, i32
  }
  func.func @transform_6(%arg0: i32) -> (i32, i32) {
    %c0_i32 = arith.constant 0 : i32
    %c0_i32_0 = arith.constant 0 : i32
    %c0_i32_1 = arith.constant 0 : i32
    return %c0_i32, %c0_i32_0 : i32, i32
  }
  func.func @transform_7(%arg0: i32) -> (i32, i32) {
    %c0_i32 = arith.constant 0 : i32
    %c0_i32_0 = arith.constant 0 : i32
    %c0_i32_1 = arith.constant 0 : i32
    return %c0_i32, %c0_i32_0 : i32, i32
  }
  func.func @transform_8(%arg0: i32) -> (i32, i32) {
    %c0_i32 = arith.constant 0 : i32
    %c0_i32_0 = arith.constant 0 : i32
    %c0_i32_1 = arith.constant 0 : i32
    return %c0_i32, %c0_i32_0 : i32, i32
  }
  func.func @transform_9(%arg0: i32) -> (i32, i32) {
    %c0_i32 = arith.constant 0 : i32
    %c0_i32_0 = arith.constant 0 : i32
    %c0_i32_1 = arith.constant 0 : i32
    return %c0_i32, %c0_i32_0 : i32, i32
  }
  func.func @transform_10(%arg0: i32) -> (i32, i32, i32) {
    %c0_i32 = arith.constant 0 : i32
    %c0_i32_0 = arith.constant 0 : i32
    %c0_i32_1 = arith.constant 0 : i32
    %c0_i32_2 = arith.constant 0 : i32
    return %c0_i32, %c0_i32_0, %c0_i32_1 : i32, i32, i32
  }
  func.func @transform_11(%arg0: i32) -> (i32, i32) {
    %c0_i32 = arith.constant 0 : i32
    %c0_i32_0 = arith.constant 0 : i32
    %c0_i32_1 = arith.constant 0 : i32
    return %c0_i32, %c0_i32_0 : i32, i32
  }
  func.func @transform_12(%arg0: i32) -> (i32, i32) {
    %c0_i32 = arith.constant 0 : i32
    %c0_i32_0 = arith.constant 0 : i32
    %c0_i32_1 = arith.constant 0 : i32
    return %c0_i32, %c0_i32_0 : i32, i32
  }
  func.func @transform_13(%arg0: i32) -> (i32, i32) {
    %c0_i32 = arith.constant 0 : i32
    %c0_i32_0 = arith.constant 0 : i32
    %c0_i32_1 = arith.constant 0 : i32
    return %c0_i32, %c0_i32_0 : i32, i32
  }
  func.func @transform_14(%arg0: i32) -> (i32, i32, i32) {
    %c0_i32 = arith.constant 0 : i32
    %c0_i32_0 = arith.constant 0 : i32
    %c0_i32_1 = arith.constant 0 : i32
    return %arg0, %c0_i32, %c0_i32_0 : i32, i32, i32
  }
}

</mosaic_0001>

<bundles_post_ra>
// kernel: _lambda_.1
= control target key start
LH: loop header
LB: loop body
LE: loop exit
PB: predicated region body
PF: predicated region fallthrough
CT: control target
= control target key end

     0   :  { %s12911_s0 = inlined_call_operand.vmem [shape: f32[2,362,4], index: 0, kind: input, shape index: {}]   ;;  %s12912_s1 = inlined_call_operand.vmem [shape: f32[36,4], index: 1, kind: input, shape index: {}]   ;;  %s12913_s2 = inlined_call_operand.vmem [shape: f32[1,4], index: 2, kind: input, shape index: {}]   ;;  %s12914_s3 = inlined_call_operand.vmem [shape: f32[1,4], index: 3, kind: input, shape index: {}]   ;;  %s12915_s4 = inlined_call_operand.vmem [shape: f32[36,8], index: 4, kind: input, shape index: {}]   ;;  %s12916_s5 = inlined_call_operand.vmem [shape: f32[1,8], index: 5, kind: input, shape index: {}]   ;;  %s12917_s6 = inlined_call_operand.vmem [shape: f32[1,8], index: 6, kind: input, shape index: {}]   ;;  %s12918_s7 = inlined_call_operand.vmem [shape: f32[72,16], index: 7, kind: input, shape index: {}]   ;;  %s12919_s8 = inlined_call_operand.vmem [shape: f32[1,16], index: 8, kind: input, shape index: {}]   ;;  %s12920_s9 = inlined_call_operand.vmem [shape: f32[1,16], index: 9, kind: input, shape index: {}]   ;;  %s12921_s10 = inlined_call_operand.vmem [shape: f32[16,16,128], index: 10, kind: input, shape index: {}]   ;;  %s12922_s11 = inlined_call_operand.vmem [shape: f32[1,128], index: 11, kind: input, shape index: {}]   ;;  %s12923_s12 = inlined_call_operand.vmem [shape: f32[128,128], index: 12, kind: input, shape index: {}]   ;;  %s12924_s13 = inlined_call_operand.vmem [shape: f32[1,128], index: 13, kind: input, shape index: {}]   ;;  %s12925_s14 = inlined_call_operand.hbm [shape: f32[2,1,128], index: 14, kind: output, shape index: {}]  }
   0x1   :  { %12960 = sst [smem:[#allocation28_spill]] %s12911_s0 }
   0x2   :  { %12961 = sst [smem:[#allocation29_spill]] %s12912_s1 }
   0x3   :  { %12962 = sst [smem:[#allocation30_spill]] %s12913_s2 }
   0x4   :  { %12963 = sst [smem:[#allocation31_spill]] %s12914_s3 }
   0x5   :  { %19 = vsyncpa [#allocation7], 0 }
   0x6   :  { %21 = vsyncpa [#allocation7 + $0x1], 0  ;;  %s8983_s29 = smov 0   ;;  %s8985_s30 = smov 0  }
   0x7   :  { %s8987_s15 = smov 0   ;;  %s8989_s16 = smov 0  }
   0x8 LB: > { %12964 = sst [smem:[#allocation9_spill]] %s8887_s15  ;;  %s9004_s17 = sadd.s32 4294967295, %s8891_s16   ;;  %s8891_s16 = sphi %s8989_s16, %s13055_s16   ;;  %s8887_s15 = sphi %s8987_s15, %s13057_s15   ;;  %s8883_s30 = sphi %s8985_s30, %s13059_s30   ;;  %s8879_s29 = sphi %s8983_s29, %s13058_s29  }
   0x9   : > { %s7955_s18 = sadd.s32 4294967294, %s8891_s16   ;;  %s9008_s19 = sadd.s32 1, %s8891_s16  }
   0xa   : > { %12965 = sst [smem:[#allocation10_spill]] %s9008_s19  ;;  %s333_s20 = sadd.s32 1, %s8887_s15 }
   0xb   : > { %s330_s21 = ssub.s32 %s8891_s16, %s9008_s19  ;;  %p343_p0 = scmp.ne.s32.totalorder %s8887_s15, %s8883_s30 }
   0xc   : > { %p331_p1 = scmp.eq.s32.totalorder %s330_s21, 0  ;;  %p344_p2 = scmp.eq.s32.totalorder %s9004_s17, 1 }
   0xd   : > { %p349_p3 = scmp.ne.s32.totalorder %s8883_s30, %s8879_s29  ;;  %p350_p4 = scmp.eq.s32.totalorder %s7955_s18, 1 }
   0xe   : > { %s9019_s22 = scalar_select %p331_p1, %s8887_s15, %s333_s20  }
   0xf   : > { %p9021_p5 = por %p344_p2, %p343_p0  ;;  %p9025_p6 = por %p350_p4, %p349_p3 }
  0x10   : > { %12966 = sst [smem:[#allocation11_spill]] %s9019_s22  ;;  %p7958_p7 = scmp.ge.s32.totalorder %s8891_s16, 1 }
  0x11   : > { %s12968_s24 = scalar_select %p9025_p6, 1, 0 }
  0x12   : > { %p415_p8 = scmp.lt.s32.totalorder %s8891_s16, 3 }
  0x13   : > { %12969 = sst [smem:[#allocation12_spill]] %s12968_s24 }
  0x14   : > { %p416_p9 = pnand %p7958_p7, %p415_p8 }
  0x16   : > { %419 = sbr.rel (%p416_p9) target bundleno = 2319 (0x90f), region = 76 }
  0x1b   : > { %p460_p10 = scmp.lt.s32.totalorder %s9004_s17, 1  ;;  %s12970_s0 = sld [smem:[#allocation28_spill]]  ;;  %vm12957_vm0 = vcmask 31744   ;;  %vm512_vm1 = vcmask 64512   ;;  %v12930_v58 = vmov 0.0   ;;  %vm12950_vm2 = vcmask 1043456  }
  0x1c   : > { %s12926_s20 = smov 4   ;;  %s12928_s21 = smov 8   ;;  %8291 = vmatprep.subr.mxu0 %v12930_v58  ;;  %466 = vst.msk [vmem:[#allocation2] sm:$0xff] %vm12957_vm0, %v12930_v58  ;;  %467 = vst.msk [vmem:[#allocation2 + $0x8] sm:$0xff] %vm12957_vm0, %v12930_v58  ;;  %8424 = vmatprep.subr.mxu1 %v12930_v58  ;;  %vm8897_vm3 = vmmov 0   ;;  %vm12956_vm4 = vcmask 97280  }
  0x1d   : > { %s461_s25 = scalar_select %p460_p10, %s9004_s17, 1  ;;  %468 = vst.msk [vmem:[#allocation2 + $0x10] sm:$0xff] %vm12957_vm0, %v12930_v58  ;;  %469 = vst.msk [vmem:[#allocation2 + $0x18] sm:$0xff] %vm12957_vm0, %v12930_v58  ;;  %8301 = vmatprep.mubr.msk.f32.mxu0 %vm8897_vm3, %v12930_v58  ;;  %8434 = vmatprep.mubr.msk.f32.mxu1 %vm8897_vm3, %v12930_v58  ;;  %vm2182_vm5 = vcmask 130048   ;;  %vm12955_vm6 = vcmask 162816   ;;  %vm2266_vm7 = vcmask 195584  }
  0x1e   : > { %470 = vst.msk [vmem:[#allocation2 + $0x20] sm:$0xff] %vm12957_vm0, %v12930_v58  ;;  %471 = vst.msk [vmem:[#allocation2 + $0x28] sm:$0xff] %vm12957_vm0, %v12930_v58  ;;  %s12971_s1 = sld [smem:[#allocation29_spill]]  ;;  %s12932_s27 = smov 20   ;;  %vm12952_vm8 = vcmask 228352   ;;  %vm2350_vm9 = vcmask 261120  }
  0x1f   : > { %s8761_s26 = smul.u32 368, %s461_s25  ;;  %472 = vst.msk [vmem:[#allocation2 + $0x30] sm:$0xff] %vm12957_vm0, %v12930_v58  ;;  %473 = vst.msk [vmem:[#allocation2 + $0x38] sm:$0xff] %vm12957_vm0, %v12930_v58  ;;  %s12938_s28 = smov 16   ;;  %vm12951_vm10 = vcmask 293888   ;;  %vm2986_vm14 = vcmask 31746  }
  0x20   : > { %474 = vst.msk [vmem:[#allocation2 + $0x40] sm:$0xff] %vm12957_vm0, %v12930_v58  ;;  %475 = vst.msk [vmem:[#allocation2 + $0x48] sm:$0xff] %vm12957_vm0, %v12930_v58  ;;  %s12940_s25 = smov 24   ;;  %s12994_s2 = sld [smem:[#allocation30_spill]] }
  0x21   : > { %s9036_s18 = scalar_lea.vmem %s12970_s0, %s8761_s26  ;;  %476 = vst.msk [vmem:[#allocation2 + $0x50] sm:$0xff] %vm12957_vm0, %v12930_v58  ;;  %477 = vst.msk [vmem:[#allocation2 + $0x58] sm:$0xff] %vm12957_vm0, %v12930_v58  ;;  %s12934_s26 = smov 28  }
  0x22   : > { %v572_v0 = vld [vmem:[%s9036_s18 + $0x11] sm:$0xff]  ;;  %v570_v1 = vld [vmem:[%s9036_s18 + $0x1] sm:$0xff]  ;;  %v573_v2 = vld [vmem:[%s9036_s18 + $0x19] sm:$0xff]  ;;  %478 = vst.msk [vmem:[#allocation2 + $0x60] sm:$0xff] %vm12957_vm0, %v12930_v58  ;;  %s12993_s0 = smov 24   ;;  %s12995_s3 = sld [smem:[#allocation31_spill]] }
  0x23   : > { %867 = vrot.lane.b32.xlu1 %v572_v0, %s12926_s20  ;;  %863 = vrot.lane.b32.xlu0 %v570_v1, %s12926_s20  ;;  %v571_v3 = vld [vmem:[%s9036_s18 + $0x9] sm:$0xff]  ;;  %v574_v5 = vld [vmem:[%s9036_s18 + $0x21] sm:$0xff]  ;;  %479 = vst.msk [vmem:[#allocation2 + $0x68] sm:$0xff] %vm12957_vm0, %v12930_v58  ;;  %480 = vst.msk [vmem:[#allocation2 + $0x70] sm:$0xff] %vm12957_vm0, %v12930_v58  ;;  %s12999_s15 = smov 4   ;;  %s8903_s22 = smov 40  }
  0x24   : > { %v575_v4 = vld [vmem:[%s9036_s18 + $0x29] sm:$0xff]  ;;  %v577_v6 = vld [vmem:[%s9036_s18 + $0x39] sm:$0xff]  ;;  %v576_v7 = vld [vmem:[%s9036_s18 + $0x31] sm:$0xff]  ;;  %481 = vst.msk [vmem:[#allocation2 + $0x78] sm:$0xff] %vm12957_vm0, %v12930_v58  ;;  %s8904_s24 = smov 48  }
  0x25   : > { %v579_v8 = vld [vmem:[%s9036_s18 + $0x49] sm:$0xff]  ;;  %v578_v9 = vld [vmem:[%s9036_s18 + $0x41] sm:$0xff]  ;;  %v581_v10 = vld [vmem:[%s9036_s18 + $0x59] sm:$0xff]  ;;  %482 = vst.msk [vmem:[#allocation2 + $0x80] sm:$0xff] %vm12957_vm0, %v12930_v58 }
  0x26   : > { %v580_v11 = vld [vmem:[%s9036_s18 + $0x51] sm:$0xff]  ;;  %v583_v12 = vld [vmem:[%s9036_s18 + $0x69] sm:$0xff]  ;;  %v582_v13 = vld [vmem:[%s9036_s18 + $0x61] sm:$0xff]  ;;  %483 = vst.msk [vmem:[#allocation2 + $0x88] sm:$0xff] %vm12957_vm0, %v12930_v58 }
  0x27   : > { %869 = vrot.lane.b32.xlu1 %v573_v2, %s12926_s20  ;;  %865 = vrot.lane.b32.xlu0 %v571_v3, %s12926_s20  ;;  %v585_v14 = vld [vmem:[%s9036_s18 + $0x79] sm:$0xff]  ;;  %v584_v15 = vld [vmem:[%s9036_s18 + $0x71] sm:$0xff]  ;;  %484 = vst.msk [vmem:[#allocation2 + $0x90] sm:$0xff] %vm12957_vm0, %v12930_v58  ;;  %485 = vst.msk [vmem:[#allocation2 + $0x98] sm:$0xff] %vm12957_vm0, %v12930_v58 }
  0x28   : > { %v587_v16 = vld [vmem:[%s9036_s18 + $0x89] sm:$0xff]  ;;  %v586_v17 = vld [vmem:[%s9036_s18 + $0x81] sm:$0xff]  ;;  %v589_v18 = vld [vmem:[%s9036_s18 + $0x99] sm:$0xff]  ;;  %486 = vst.msk [vmem:[#allocation2 + $0xa0] sm:$0xff] %vm12957_vm0, %v12930_v58 }
  0x29   : > { %v588_v19 = vld [vmem:[%s9036_s18 + $0x91] sm:$0xff]  ;;  %v591_v20 = vld [vmem:[%s9036_s18 + $0xa9] sm:$0xff]  ;;  %v590_v21 = vld [vmem:[%s9036_s18 + $0xa1] sm:$0xff]  ;;  %487 = vst.msk [vmem:[#allocation2 + $0xa8] sm:$0xff] %vm12957_vm0, %v12930_v58 }
  0x2a   : > { %v593_v22 = vld [vmem:[%s9036_s18 + $0xb9] sm:$0xff]  ;;  %v592_v23 = vld [vmem:[%s9036_s18 + $0xb1] sm:$0xff]  ;;  %v595_v24 = vld [vmem:[%s9036_s18 + $0xc9] sm:$0xff]  ;;  %488 = vst.msk [vmem:[#allocation2 + $0xb0] sm:$0xff] %vm12957_vm0, %v12930_v58 }
  0x2b   : > { %873 = vrot.lane.b32.xlu1 %v575_v4, %s12926_s20  ;;  %871 = vrot.lane.b32.xlu0 %v574_v5, %s12926_s20  ;;  %v594_v25 = vld [vmem:[%s9036_s18 + $0xc1] sm:$0xff]  ;;  %v597_v26 = vld [vmem:[%s9036_s18 + $0xd9] sm:$0xff]  ;;  %489 = vst.msk [vmem:[#allocation2 + $0xb8] sm:$0xff] %vm12957_vm0, %v12930_v58  ;;  %490 = vst.msk [vmem:[#allocation2 + $0xc0] sm:$0xff] %vm12957_vm0, %v12930_v58 }
  0x2c   : > { %v596_v27 = vld [vmem:[%s9036_s18 + $0xd1] sm:$0xff]  ;;  %v599_v28 = vld [vmem:[%s9036_s18 + $0xe9] sm:$0xff]  ;;  %v598_v29 = vld [vmem:[%s9036_s18 + $0xe1] sm:$0xff]  ;;  %491 = vst.msk [vmem:[#allocation2 + $0xc8] sm:$0xff] %vm12957_vm0, %v12930_v58 }
  0x2d   : > { %v601_v30 = vld [vmem:[%s9036_s18 + $0xf9] sm:$0xff]  ;;  %v600_v31 = vld [vmem:[%s9036_s18 + $0xf1] sm:$0xff]  ;;  %v603_v32 = vld [vmem:[%s9036_s18 + $0x109] sm:$0xff]  ;;  %492 = vst.msk [vmem:[#allocation2 + $0xd0] sm:$0xff] %vm12957_vm0, %v12930_v58 }
  0x2e   : > { %v602_v33 = vld [vmem:[%s9036_s18 + $0x101] sm:$0xff]  ;;  %v605_v34 = vld [vmem:[%s9036_s18 + $0x119] sm:$0xff]  ;;  %v604_v35 = vld [vmem:[%s9036_s18 + $0x111] sm:$0xff]  ;;  %493 = vst.msk [vmem:[#allocation2 + $0xd8] sm:$0xff] %vm12957_vm0, %v12930_v58 }
  0x2f   : > { %877 = vrot.lane.b32.xlu1 %v577_v6, %s12926_s20  ;;  %875 = vrot.lane.b32.xlu0 %v576_v7, %s12926_s20  ;;  %v607_v36 = vld [vmem:[%s9036_s18 + $0x129] sm:$0xff]  ;;  %v606_v37 = vld [vmem:[%s9036_s18 + $0x121] sm:$0xff]  ;;  %494 = vst.msk [vmem:[#allocation2 + $0xe0] sm:$0xff] %vm12957_vm0, %v12930_v58  ;;  %495 = vst.msk [vmem:[#allocation2 + $0xe8] sm:$0xff] %vm12957_vm0, %v12930_v58 }
  0x30   : > { %v609_v38 = vld [vmem:[%s9036_s18 + $0x139] sm:$0xff]  ;;  %v608_v39 = vld [vmem:[%s9036_s18 + $0x131] sm:$0xff]  ;;  %v611_v40 = vld [vmem:[%s9036_s18 + $0x2] sm:$0xff]  ;;  %496 = vst.msk [vmem:[#allocation2 + $0xf0] sm:$0xff] %vm12957_vm0, %v12930_v58 }
  0x31   : > { %v610_v41 = vld [vmem:[%s9036_s18 + $0x141] sm:$0xf]  ;;  %v9123_v42 = vld [vmem:[%s9036_s18 + $0x12] sm:$0xff]  ;;  %v612_v43 = vld [vmem:[%s9036_s18 + $0xa] sm:$0xff]  ;;  %497 = vst.msk [vmem:[#allocation2 + $0xf8] sm:$0xff] %vm12957_vm0, %v12930_v58 }
  0x32   : > { %v9130_v44 = vld [vmem:[%s9036_s18 + $0x22] sm:$0xff]  ;;  %v9133_v45 = vld [vmem:[%s9036_s18 + $0x1a] sm:$0xff]  ;;  %v9140_v46 = vld [vmem:[%s9036_s18 + $0x32] sm:$0xff]  ;;  %498 = vst.msk [vmem:[#allocation2 + $0x100] sm:$0xff] %vm12957_vm0, %v12930_v58 }
  0x33   : > { %881 = vrot.lane.b32.xlu1 %v579_v8, %s12926_s20  ;;  %879 = vrot.lane.b32.xlu0 %v578_v9, %s12926_s20  ;;  %v9143_v47 = vld [vmem:[%s9036_s18 + $0x2a] sm:$0xff]  ;;  %v9150_v48 = vld [vmem:[%s9036_s18 + $0x42] sm:$0xff]  ;;  %499 = vst.msk [vmem:[#allocation2 + $0x108] sm:$0xff] %vm12957_vm0, %v12930_v58  ;;  %500 = vst.msk [vmem:[#allocation2 + $0x110] sm:$0xff] %vm12957_vm0, %v12930_v58 }
  0x34   : > { %v9153_v49 = vld [vmem:[%s9036_s18 + $0x3a] sm:$0xff]  ;;  %v9160_v50 = vld [vmem:[%s9036_s18 + $0x52] sm:$0xff]  ;;  %v9163_v51 = vld [vmem:[%s9036_s18 + $0x4a] sm:$0xff]  ;;  %501 = vst.msk [vmem:[#allocation2 + $0x118] sm:$0xff] %vm12957_vm0, %v12930_v58 }
  0x35   : > { %v9170_v52 = vld [vmem:[%s9036_s18 + $0x62] sm:$0xff]  ;;  %v9173_v53 = vld [vmem:[%s9036_s18 + $0x5a] sm:$0xff]  ;;  %v9180_v54 = vld [vmem:[%s9036_s18 + $0x72] sm:$0xff]  ;;  %502 = vst.msk [vmem:[#allocation2 + $0x120] sm:$0xff] %vm12957_vm0, %v12930_v58 }
  0x36   : > { %v9183_v55 = vld [vmem:[%s9036_s18 + $0x6a] sm:$0xff]  ;;  %v9190_v56 = vld [vmem:[%s9036_s18 + $0x82] sm:$0xff]  ;;  %v9193_v57 = vld [vmem:[%s9036_s18 + $0x7a] sm:$0xff]  ;;  %503 = vst.msk [vmem:[#allocation2 + $0x128] sm:$0xff] %vm12957_vm0, %v12930_v58 }
  0x37   : > { %885 = vrot.lane.b32.xlu1 %v581_v10, %s12926_s20  ;;  %883 = vrot.lane.b32.xlu0 %v580_v11, %s12926_s20  ;;  %504 = vst.msk [vmem:[#allocation2 + $0x130] sm:$0xff] %vm12957_vm0, %v12930_v58  ;;  %505 = vst.msk [vmem:[#allocation2 + $0x138] sm:$0xff] %vm12957_vm0, %v12930_v58  ;;  %v2396_v59 = vld [vmem:[%s12971_s1 + $0x20] sm:$0xf]  ;;  %v2395_v60 = vld [vmem:[%s12971_s1 + $0x18] sm:$0xff] }
  0x38   : > { %506 = vst.msk [vmem:[#allocation2 + $0x140] sm:$0xff] %vm12957_vm0, %v12930_v58  ;;  %507 = vst.msk [vmem:[#allocation2 + $0x148] sm:$0xff] %vm12957_vm0, %v12930_v58  ;;  %8292 = vmatpush3.msk.msra.mxu0 %vm12950_vm2, %v2396_v59  ;;  %v9333_v61 = vld [vmem:[%s9036_s18 + $0x8a] sm:$0xff]  ;;  %v696_v2 = vld [vmem:[%s9036_s18 + $0x14] sm:$0xff] }
  0x39   : > { %508 = vst.msk [vmem:[#allocation2 + $0x150] sm:$0xff] %vm12957_vm0, %v12930_v58  ;;  %509 = vst.msk [vmem:[#allocation2 + $0x158] sm:$0xff] %vm12957_vm0, %v12930_v58  ;;  %8293 = vmatprep.subr.mxu0 %v12930_v58  ;;  %v2394_v0 = vld [vmem:[%s12971_s1 + $0x10] sm:$0xff]  ;;  %v2393_v1 = vld [vmem:[%s12971_s1 + $0x8] sm:$0xff] }
  0x3a   : > { %510 = vst.msk [vmem:[#allocation2 + $0x160] sm:$0xff] %vm12957_vm0, %v12930_v58  ;;  %511 = vst.msk [vmem:[#allocation2 + $0x168] sm:$0xff] %vm12957_vm0, %v12930_v58  ;;  %8294 = vmatpush3.msra.mxu0 %v2395_v60  ;;  %v655_v3 = vld [vmem:[%s9036_s18 + $0x13] sm:$0xff]  ;;  %v2392_v6 = vld [vmem:[%s12971_s1] sm:$0xff]  ;;  %s12996_s1 = smov 12  }
  0x3b   : > { %889 = vrot.lane.b32.xlu1 %v583_v12, %s12926_s20  ;;  %887 = vrot.lane.b32.xlu0 %v582_v13, %s12926_s20  ;;  %513 = vst.msk [vmem:[#allocation3] sm:$0xff] %vm512_vm1, %v12930_v58  ;;  %514 = vst.msk [vmem:[#allocation3 + $0x8] sm:$0xff] %vm512_vm1, %v12930_v58  ;;  %v698_v7 = vld [vmem:[%s9036_s18 + $0x24] sm:$0xff]  ;;  %v656_v10 = vld [vmem:[%s9036_s18 + $0x1b] sm:$0xff] }
  0x3c   : > { %515 = vst.msk [vmem:[#allocation3 + $0x10] sm:$0xff] %vm512_vm1, %v12930_v58  ;;  %516 = vst.msk [vmem:[#allocation3 + $0x18] sm:$0xff] %vm512_vm1, %v12930_v58  ;;  %8295 = vmatprep.subr.mxu0 %v12930_v58  ;;  %v740_v11 = vld [vmem:[%s9036_s18 + $0x25] sm:$0xff] }
  0x3d   : > { %517 = vst.msk [vmem:[#allocation3 + $0x20] sm:$0xff] %vm512_vm1, %v12930_v58  ;;  %518 = vst.msk [vmem:[#allocation3 + $0x28] sm:$0xff] %vm512_vm1, %v12930_v58  ;;  %8296 = vmatpush3.msra.mxu0 %v2394_v0 }
  0x3e   : > { %519 = vst.msk [vmem:[#allocation3 + $0x30] sm:$0xff] %vm512_vm1, %v12930_v58  ;;  %520 = vst.msk [vmem:[#allocation3 + $0x38] sm:$0xff] %vm512_vm1, %v12930_v58  ;;  %8297 = vmatprep.subr.mxu0 %v12930_v58 }
  0x3f   : > { %893 = vrot.lane.b32.xlu1 %v585_v14, %s12926_s20  ;;  %891 = vrot.lane.b32.xlu0 %v584_v15, %s12926_s20  ;;  %521 = vst.msk [vmem:[#allocation3 + $0x40] sm:$0xff] %vm512_vm1, %v12930_v58  ;;  %522 = vst.msk [vmem:[#allocation3 + $0x48] sm:$0xff] %vm512_vm1, %v12930_v58  ;;  %v697_v14 = vld [vmem:[%s9036_s18 + $0x1c] sm:$0xff]  ;;  %v781_v15 = vld [vmem:[%s9036_s18 + $0x26] sm:$0xff] }
  0x40   : > { %523 = vst.msk [vmem:[#allocation3 + $0x50] sm:$0xff] %vm512_vm1, %v12930_v58  ;;  %524 = vst.msk [vmem:[#allocation3 + $0x58] sm:$0xff] %vm512_vm1, %v12930_v58  ;;  %8298 = vmatpush3.msra.mxu0 %v2393_v1  ;;  %v660_v1 = vld [vmem:[%s9036_s18 + $0x3b] sm:$0xff] }
  0x41   : > { %525 = vst.msk [vmem:[#allocation3 + $0x60] sm:$0xff] %vm512_vm1, %v12930_v58  ;;  %526 = vst.msk [vmem:[#allocation3 + $0x68] sm:$0xff] %vm512_vm1, %v12930_v58  ;;  %8299 = vmatprep.subr.mxu0 %v12930_v58 }
  0x42   : > { %527 = vst.msk [vmem:[#allocation3 + $0x70] sm:$0xff] %vm512_vm1, %v12930_v58  ;;  %528 = vst.msk [vmem:[#allocation3 + $0x78] sm:$0xff] %vm512_vm1, %v12930_v58  ;;  %8300 = vmatpush3.msra.mxu0 %v2392_v6 }
  0x43   : > { %897 = vrot.lane.b32.xlu1 %v587_v16, %s12926_s20  ;;  %895 = vrot.lane.b32.xlu0 %v586_v17, %s12926_s20 }
  0x44   : > { %8557 = vmatprep.subr.mxu0 %v12930_v58 }
  0x47   : > { %901 = vrot.lane.b32.xlu1 %v589_v18, %s12926_s20  ;;  %899 = vrot.lane.b32.xlu0 %v588_v19, %s12926_s20  ;;  %v699_v18 = vld [vmem:[%s9036_s18 + $0x2c] sm:$0xff] }
  0x4b   : > { %905 = vrot.lane.b32.xlu1 %v591_v20, %s12926_s20  ;;  %903 = vrot.lane.b32.xlu0 %v590_v21, %s12926_s20  ;;  %v657_v21 = vld [vmem:[%s9036_s18 + $0x23] sm:$0xff] }
  0x4f   : > { %909 = vrot.lane.b32.xlu1 %v593_v22, %s12926_s20  ;;  %907 = vrot.lane.b32.xlu0 %v592_v23, %s12926_s20  ;;  %v741_v22 = vld [vmem:[%s9036_s18 + $0x2d] sm:$0xff] }
  0x53   : > { %913 = vrot.lane.b32.xlu1 %v595_v24, %s12926_s20  ;;  %911 = vrot.lane.b32.xlu0 %v594_v25, %s12926_s20  ;;  %v782_v25 = vld [vmem:[%s9036_s18 + $0x2e] sm:$0xff] }
  0x57   : > { %917 = vrot.lane.b32.xlu1 %v597_v26, %s12926_s20  ;;  %915 = vrot.lane.b32.xlu0 %v596_v27, %s12926_s20 }
  0x5b   : > { %921 = vrot.lane.b32.xlu1 %v599_v28, %s12926_s20  ;;  %919 = vrot.lane.b32.xlu0 %v598_v29, %s12926_s20  ;;  %v700_v28 = vld [vmem:[%s9036_s18 + $0x34] sm:$0xff] }
  0x5f   : > { %925 = vrot.lane.b32.xlu1 %v601_v30, %s12926_s20  ;;  %923 = vrot.lane.b32.xlu0 %v600_v31, %s12926_s20  ;;  %v658_v31 = vld [vmem:[%s9036_s18 + $0x2b] sm:$0xff] }
  0x63   : > { %929 = vrot.lane.b32.xlu1 %v603_v32, %s12926_s20  ;;  %927 = vrot.lane.b32.xlu0 %v602_v33, %s12926_s20  ;;  %v742_v32 = vld [vmem:[%s9036_s18 + $0x35] sm:$0xff] }
  0x67   : > { %933 = vrot.lane.b32.xlu1 %v605_v34, %s12926_s20  ;;  %931 = vrot.lane.b32.xlu0 %v604_v35, %s12926_s20  ;;  %v783_v35 = vld [vmem:[%s9036_s18 + $0x36] sm:$0xff] }
  0x6b   : > { %937 = vrot.lane.b32.xlu1 %v607_v36, %s12926_s20  ;;  %935 = vrot.lane.b32.xlu0 %v606_v37, %s12926_s20 }
  0x6f   : > { %941 = vrot.lane.b32.xlu1 %v609_v38, %s12926_s20  ;;  %939 = vrot.lane.b32.xlu0 %v608_v39, %s12926_s20  ;;  %v701_v38 = vld [vmem:[%s9036_s18 + $0x3c] sm:$0xff] }
  0x73   : > { %1027 = vrot.lane.b32.xlu1 %v611_v40, %s12928_s21  ;;  %943 = vrot.lane.b32.xlu0 %v610_v41, %s12926_s20  ;;  %s12942_s20 = smov 12   ;;  %v659_v41 = vld [vmem:[%s9036_s18 + $0x33] sm:$0xff] }
  0x77   : > { %1031 = vrot.lane.b32.xlu1 %v9123_v42, %s12928_s21  ;;  %1029 = vrot.lane.b32.xlu0 %v612_v43, %s12928_s21 }
  0x7b   : > { %1035 = vrot.lane.b32.xlu1 %v9130_v44, %s12928_s21  ;;  %1033 = vrot.lane.b32.xlu0 %v9133_v45, %s12928_s21 }
  0x7f   : > { %1039 = vrot.lane.b32.xlu1 %v9140_v46, %s12928_s21  ;;  %1037 = vrot.lane.b32.xlu0 %v9143_v47, %s12928_s21 }
  0x83   : > { %1043 = vrot.lane.b32.xlu1 %v9150_v48, %s12928_s21  ;;  %1041 = vrot.lane.b32.xlu0 %v9153_v49, %s12928_s21 }
  0x87   : > { %1047 = vrot.lane.b32.xlu1 %v9160_v50, %s12928_s21  ;;  %1045 = vrot.lane.b32.xlu0 %v9163_v51, %s12928_s21 }
  0x8b   : > { %1051 = vrot.lane.b32.xlu1 %v9170_v52, %s12928_s21  ;;  %1049 = vrot.lane.b32.xlu0 %v9173_v53, %s12928_s21 }
  0x8f   : > { %1055 = vrot.lane.b32.xlu1 %v9180_v54, %s12928_s21  ;;  %1053 = vrot.lane.b32.xlu0 %v9183_v55, %s12928_s21 }
  0x93   : > { %1059 = vrot.lane.b32.xlu1 %v9190_v56, %s12928_s21  ;;  %1057 = vrot.lane.b32.xlu0 %v9193_v57, %s12928_s21 }
  0x95   : > { %v9336_v62 = vpop.permute.xlu1 %867  ;;  %v9338_v63 = vpop.permute.xlu0 %863 }
  0x97   : > { %1153 = vrot.lane.b32.xlu1 %v9123_v42, %s12942_s20  ;;  %1061 = vrot.lane.b32.xlu0 %v9333_v61, %s12928_s21  ;;  %s12936_s21 = smov 32   ;;  %v743_v42 = vld [vmem:[%s9036_s18 + $0x3d] sm:$0xff] }
  0x99   : > { %v9353_v4 = vpop.permute.xlu1 %869  ;;  %v9355_v5 = vpop.permute.xlu0 %865 }
  0x9b   : > { %1481 = vrot.lane.b32.xlu1 %v696_v2, %s12932_s27  ;;  %1317 = vrot.lane.b32.xlu0 %v655_v3, %s12938_s28  ;;  %v744_v2 = vld [vmem:[%s9036_s18 + $0x45] sm:$0xff] }
  0x9d   : > { %v9369_v8 = vpop.permute.xlu1 %873  ;;  %v9371_v9 = vpop.permute.xlu0 %871 }
  0x9f   : > { %1155 = vrot.lane.b32.xlu1 %v9133_v45, %s12942_s20  ;;  %1607 = vrot.lane.b32.xlu0 %v698_v7, %s12940_s25  ;;  %v784_v45 = vld [vmem:[%s9036_s18 + $0x3e] sm:$0xff] }
  0xa1   : > { %v9379_v12 = vpop.permute.xlu1 %877  ;;  %v9381_v13 = vpop.permute.xlu0 %875 }
  0xa3   : > { %1319 = vrot.lane.b32.xlu1 %v656_v10, %s12938_s28  ;;  %1771 = vrot.lane.b32.xlu0 %v740_v11, %s12934_s26 }
  0xa5   : > { %v9387_v16 = vpop.permute.xlu1 %881  ;;  %v9389_v17 = vpop.permute.xlu0 %879 }
  0xa7   : > { %1483 = vrot.lane.b32.xlu1 %v697_v14, %s12932_s27  ;;  %1935 = vrot.lane.b32.xlu0 %v781_v15, %s12936_s21 }
  0xa9   : > { %v9394_v19 = vpop.permute.xlu1 %885  ;;  %v9396_v20 = vpop.permute.xlu0 %883 }
  0xab   : > { %1157 = vrot.lane.b32.xlu1 %v9130_v44, %s12942_s20  ;;  %1609 = vrot.lane.b32.xlu0 %v699_v18, %s12940_s25 }
  0xad   : > { %v9403_v23 = vpop.permute.xlu1 %889  ;;  %v9405_v24 = vpop.permute.xlu0 %887 }
  0xaf   : > { %1321 = vrot.lane.b32.xlu1 %v657_v21, %s12938_s28  ;;  %1773 = vrot.lane.b32.xlu0 %v741_v22, %s12934_s26  ;;  %v745_v21 = vld [vmem:[%s9036_s18 + $0x4d] sm:$0xff] }
  0xb1   : > { %v9410_v26 = vpop.permute.xlu1 %893  ;;  %v9412_v27 = vpop.permute.xlu0 %891 }
  0xb3   : > { %1485 = vrot.lane.b32.xlu1 %v698_v7, %s12932_s27  ;;  %1937 = vrot.lane.b32.xlu0 %v782_v25, %s12936_s21  ;;  %v785_v7 = vld [vmem:[%s9036_s18 + $0x46] sm:$0xff] }
  0xb5   : > { %v9417_v29 = vpop.permute.xlu1 %897  ;;  %v9419_v30 = vpop.permute.xlu0 %895 }
  0xb7   : > { %1159 = vrot.lane.b32.xlu1 %v9143_v47, %s12942_s20  ;;  %1611 = vrot.lane.b32.xlu0 %v700_v28, %s12940_s25 }
  0xb9   : > { %v9426_v33 = vpop.permute.xlu1 %901  ;;  %v9428_v34 = vpop.permute.xlu0 %899 }
  0xbb   : > { %1323 = vrot.lane.b32.xlu1 %v658_v31, %s12938_s28  ;;  %1775 = vrot.lane.b32.xlu0 %v742_v32, %s12934_s26 }
  0xbd   : > { %v9433_v36 = vpop.permute.xlu1 %905  ;;  %v9435_v37 = vpop.permute.xlu0 %903 }
  0xbf   : > { %1487 = vrot.lane.b32.xlu1 %v699_v18, %s12932_s27  ;;  %1939 = vrot.lane.b32.xlu0 %v783_v35, %s12936_s21  ;;  %v661_v18 = vld [vmem:[%s9036_s18 + $0x43] sm:$0xff] }
  0xc1   : > { %v9440_v39 = vpop.permute.xlu1 %909  ;;  %v9442_v40 = vpop.permute.xlu0 %907 }
  0xc3   : > { %1161 = vrot.lane.b32.xlu1 %v9140_v46, %s12942_s20  ;;  %1613 = vrot.lane.b32.xlu0 %v701_v38, %s12940_s25  ;;  %v702_v46 = vld [vmem:[%s9036_s18 + $0x44] sm:$0xff] }
  0xc5   : > { %v9449_v43 = vpop.permute.xlu1 %913  ;;  %v9451_v44 = vpop.permute.xlu0 %911 }
  0xc7   : > { %1325 = vrot.lane.b32.xlu1 %v659_v41, %s12938_s28  ;;  %1777 = vrot.lane.b32.xlu0 %v743_v42, %s12934_s26  ;;  %v662_v41 = vld [vmem:[%s9036_s18 + $0x4b] sm:$0xff]  ;;  %v746_v42 = vld [vmem:[%s9036_s18 + $0x55] sm:$0xff] }
  0xc9   : > { %v9456_v47 = vpop.permute.xlu1 %917  ;;  %v9458_v59 = vpop.permute.xlu0 %915 }
  0xca   : > { %12972 = vst [vmem:[#allocation13_spill] sm:$0xff] %v9456_v47  ;;  %12973 = vst [vmem:[#allocation14_spill] sm:$0xff] %v9458_v59 }
  0xcb   : > { %1489 = vrot.lane.b32.xlu1 %v700_v28, %s12932_s27  ;;  %1941 = vrot.lane.b32.xlu0 %v784_v45, %s12936_s21  ;;  %v786_v28 = vld [vmem:[%s9036_s18 + $0x4e] sm:$0xff] }
  0xcd   : > { %v9463_v60 = vpop.permute.xlu1 %921  ;;  %v9465_v0 = vpop.permute.xlu0 %919 }
  0xce   : > { %12974 = vst [vmem:[#allocation15_spill] sm:$0xff] %v9463_v60  ;;  %12975 = vst [vmem:[#allocation16_spill] sm:$0xff] %v9465_v0 }
  0xcf   : > { %1163 = vrot.lane.b32.xlu1 %v9153_v49, %s12942_s20  ;;  %1615 = vrot.lane.b32.xlu0 %v702_v46, %s12940_s25  ;;  %v703_v49 = vld [vmem:[%s9036_s18 + $0x4c] sm:$0xff] }
  0xd1   : > { %v9472_v3 = vpop.permute.xlu1 %925  ;;  %v9474_v6 = vpop.permute.xlu0 %923 }
  0xd2   : > { %12976 = vst [vmem:[#allocation17_spill] sm:$0xff] %v9472_v3  ;;  %12977 = vst [vmem:[#allocation18_spill] sm:$0xff] %v9474_v6  ;;  %v529_v6 = vld [vmem:[%s9036_s18] sm:$0xff] }
  0xd3   : > { %1327 = vrot.lane.b32.xlu1 %v660_v1, %s12938_s28  ;;  %1779 = vrot.lane.b32.xlu0 %v744_v2, %s12934_s26  ;;  %v787_v1 = vld [vmem:[%s9036_s18 + $0x56] sm:$0xff] }
  0xd5   : > { %v9479_v10 = vpop.permute.xlu1 %929  ;;  %v9481_v11 = vpop.permute.xlu0 %927 }
  0xd6   : > { %12978 = vst [vmem:[#allocation19_spill] sm:$0xff] %v9479_v10  ;;  %12979 = vst [vmem:[#allocation20_spill] sm:$0xff] %v9481_v11 }
  0xd7   : > { %1491 = vrot.lane.b32.xlu1 %v701_v38, %s12932_s27  ;;  %1943 = vrot.lane.b32.xlu0 %v785_v7, %s12936_s21 }
  0xd9   : > { %v9486_v14 = vpop.permute.xlu1 %933  ;;  %v9488_v15 = vpop.permute.xlu0 %931 }
  0xda   : > { %12980 = vst [vmem:[#allocation21_spill] sm:$0xff] %v9486_v14  ;;  %12981 = vst [vmem:[#allocation22_spill] sm:$0xff] %v9488_v15 }
  0xdb   : > { %1165 = vrot.lane.b32.xlu1 %v9150_v48, %s12942_s20  ;;  %1617 = vrot.lane.b32.xlu0 %v703_v49, %s12940_s25  ;;  %v704_v48 = vld [vmem:[%s9036_s18 + $0x54] sm:$0xff] }
  0xdd   : > { %v9495_v22 = vpop.permute.xlu1 %937  ;;  %v9497_v25 = vpop.permute.xlu0 %935 }
  0xde   : > { %12982 = vst [vmem:[#allocation23_spill] sm:$0xff] %v9495_v22  ;;  %12983 = vst [vmem:[#allocation24_spill] sm:$0xff] %v9497_v25 }
  0xdf   : > { %1329 = vrot.lane.b32.xlu1 %v661_v18, %s12938_s28  ;;  %1781 = vrot.lane.b32.xlu0 %v745_v21, %s12934_s26 }
  0xe1   : > { %v9502_v31 = vpop.permute.xlu1 %941  ;;  %v9504_v32 = vpop.permute.xlu0 %939 }
  0xe2   : > { %12984 = vst [vmem:[#allocation25_spill] sm:$0xff] %v9502_v31  ;;  %12985 = vst [vmem:[#allocation26_spill] sm:$0xff] %v9504_v32 }
  0xe3   : > { %1493 = vrot.lane.b32.xlu1 %v702_v46, %s12932_s27  ;;  %1945 = vrot.lane.b32.xlu0 %v786_v28, %s12936_s21  ;;  %v663_v28 = vld [vmem:[%s9036_s18 + $0x53] sm:$0xff] }
  0xe5   : > { %v9509_v35 = vpop.permute.xlu1 %1027  ;;  %v9511_v38 = vpop.permute.xlu0 %943 }
  0xe6   : > { %12986 = vst [vmem:[#allocation27_spill] sm:$0xff] %v9511_v38 }
  0xe7   : > { %1167 = vrot.lane.b32.xlu1 %v9163_v51, %s12942_s20  ;;  %1619 = vrot.lane.b32.xlu0 %v704_v48, %s12940_s25  ;;  %v705_v51 = vld [vmem:[%s9036_s18 + $0x5c] sm:$0xff] }
  0xe9   : > { %v9518_v45 = vpop.permute.xlu1 %1031  ;;  %v9520_v46 = vpop.permute.xlu0 %1029 }
  0xeb   : > { %1331 = vrot.lane.b32.xlu1 %v662_v41, %s12938_s28  ;;  %1783 = vrot.lane.b32.xlu0 %v746_v42, %s12934_s26  ;;  %v747_v41 = vld [vmem:[%s9036_s18 + $0x5d] sm:$0xff] }
  0xed   : > { %v9525_v2 = vpop.permute.xlu1 %1035  ;;  %v9527_v7 = vpop.permute.xlu0 %1033 }
  0xef   : > { %1495 = vrot.lane.b32.xlu1 %v703_v49, %s12932_s27  ;;  %1947 = vrot.lane.b32.xlu0 %v787_v1, %s12936_s21  ;;  %v788_v1 = vld [vmem:[%s9036_s18 + $0x5e] sm:$0xff] }
  0xf1   : > { %v9532_v18 = vpop.permute.xlu1 %1039  ;;  %v9534_v21 = vpop.permute.xlu0 %1037 }
  0xf3   : > { %1169 = vrot.lane.b32.xlu1 %v9160_v50, %s12942_s20  ;;  %1621 = vrot.lane.b32.xlu0 %v705_v51, %s12940_s25  ;;  %v706_v50 = vld [vmem:[%s9036_s18 + $0x64] sm:$0xff] }
  0xf5   : > { %v9541_v42 = vpop.permute.xlu1 %1043  ;;  %v9543_v49 = vpop.permute.xlu0 %1041 }
  0xf7   : > { %1333 = vrot.lane.b32.xlu1 %v663_v28, %s12938_s28  ;;  %1785 = vrot.lane.b32.xlu0 %v747_v41, %s12934_s26  ;;  %v664_v28 = vld [vmem:[%s9036_s18 + $0x5b] sm:$0xff]  ;;  %v748_v41 = vld [vmem:[%s9036_s18 + $0x65] sm:$0xff] }
  0xf9   : > { %v9548_v58 = vpop.permute.xlu1 %1047  ;;  %v9550_v38 = vpop.permute.xlu0 %1045 }
  0xfb   : > { %1497 = vrot.lane.b32.xlu1 %v704_v48, %s12932_s27  ;;  %1949 = vrot.lane.b32.xlu0 %v788_v1, %s12936_s21  ;;  %v789_v1 = vld [vmem:[%s9036_s18 + $0x66] sm:$0xff] }
  0xfd   : > { %v9555_v31 = vpop.permute.xlu1 %1051  ;;  %v9557_v32 = vpop.permute.xlu0 %1049 }
  0xff   : > { %1171 = vrot.lane.b32.xlu1 %v9173_v53, %s12942_s20  ;;  %1623 = vrot.lane.b32.xlu0 %v706_v50, %s12940_s25  ;;  %v707_v53 = vld [vmem:[%s9036_s18 + $0x6c] sm:$0xff] }
 0x101   : > { %v9564_v22 = vpop.permute.xlu1 %1055  ;;  %v9566_v48 = vpop.permute.xlu0 %1053 }
 0x103   : > { %1335 = vrot.lane.b32.xlu1 %v664_v28, %s12938_s28  ;;  %1787 = vrot.lane.b32.xlu0 %v748_v41, %s12934_s26  ;;  %v665_v28 = vld [vmem:[%s9036_s18 + $0x63] sm:$0xff]  ;;  %v749_v41 = vld [vmem:[%s9036_s18 + $0x6d] sm:$0xff] }
 0x105   : > { %v9571_v25 = vpop.permute.xlu1 %1059  ;;  %v9573_v14 = vpop.permute.xlu0 %1057 }
 0x107   : > { %1499 = vrot.lane.b32.xlu1 %v705_v51, %s12932_s27  ;;  %1951 = vrot.lane.b32.xlu0 %v789_v1, %s12936_s21  ;;  %v790_v51 = vld [vmem:[%s9036_s18 + $0x6e] sm:$0xff]  ;;  %v2058_v1 = vsel %vm12957_vm0, %v529_v6, %v9338_v63 }
 0x108   : > { %v2099_v0 = vsel %vm512_vm1, %v2058_v1, %v9509_v35 }
 0x109   : > { %v1154_v15 = vpop.permute.xlu1 %1153  ;;  %v9578_v10 = vpop.permute.xlu0 %1061 }
 0x10a   : > { %v2141_v47 = vsel %vm12956_vm4, %v2099_v0, %v1154_v15  ;;  %v666_v15 = vld [vmem:[%s9036_s18 + $0x6b] sm:$0xff] }
 0x10b   : > { %1173 = vrot.lane.b32.xlu1 %v9170_v52, %s12942_s20  ;;  %1625 = vrot.lane.b32.xlu0 %v707_v53, %s12940_s25 }
 0x10d   : > { %v1482_v11 = vpop.permute.xlu1 %1481  ;;  %v1318_v3 = vpop.permute.xlu0 %1317 }
 0x10f   : > { %1337 = vrot.lane.b32.xlu1 %v665_v28, %s12938_s28  ;;  %1789 = vrot.lane.b32.xlu0 %v749_v41, %s12934_s26  ;;  %v2183_v28 = vsel %vm2182_vm5, %v2141_v47, %v1318_v3  ;;  %v708_v41 = vld [vmem:[%s9036_s18 + $0x74] sm:$0xff] }
 0x110   : > { %v2225_v59 = vsel %vm12955_vm6, %v2183_v28, %v1482_v11  ;;  %v750_v47 = vld [vmem:[%s9036_s18 + $0x75] sm:$0xff] }
 0x111   : > { %v1156_v60 = vpop.permute.xlu1 %1155  ;;  %v1608_v52 = vpop.permute.xlu0 %1607  ;;  %v791_v11 = vld [vmem:[%s9036_s18 + $0x76] sm:$0xff] }
 0x112   : > { %v2267_v0 = vsel %vm2266_vm7, %v2225_v59, %v1608_v52  ;;  %v12987_v52 = vmov 0.0  }
 0x113   : > { %1501 = vrot.lane.b32.xlu1 %v706_v50, %s12932_s27  ;;  %1953 = vrot.lane.b32.xlu0 %v790_v51, %s12936_s21 }
 0x115   : > { %v1320_v63 = vpop.permute.xlu1 %1319  ;;  %v1772_v6 = vpop.permute.xlu0 %1771 }
 0x116   : > { %v2309_v3 = vsel %vm12952_vm8, %v2267_v0, %v1772_v6  ;;  %v709_v0 = vld [vmem:[%s9036_s18 + $0x7c] sm:$0xff] }
 0x117   : > { %1175 = vrot.lane.b32.xlu1 %v9183_v55, %s12942_s20  ;;  %1627 = vrot.lane.b32.xlu0 %v708_v41, %s12940_s25  ;;  %v530_v55 = vld [vmem:[%s9036_s18 + $0x8] sm:$0xff] }
 0x118   : > { %v2059_v28 = vsel %vm12957_vm0, %v530_v55, %v9355_v5 }
 0x119   : > { %v1484_v35 = vpop.permute.xlu1 %1483  ;;  %v1936_v50 = vpop.permute.xlu0 %1935  ;;  %v2100_v6 = vsel %vm512_vm1, %v2059_v28, %v9520_v46  ;;  %v751_v46 = vld [vmem:[%s9036_s18 + $0x7d] sm:$0xff] }
 0x11a   : > { %v2351_v51 = vsel %vm2350_vm9, %v2309_v3, %v1936_v50 }
 0x11b   : > { %1339 = vrot.lane.b32.xlu1 %v666_v15, %s12938_s28  ;;  %1791 = vrot.lane.b32.xlu0 %v750_v47, %s12934_s26  ;;  %v2142_v15 = vsel %vm12956_vm4, %v2100_v6, %v1156_v60 }
 0x11c   : > { %8302 = vmatmul.mubr.msk.f32.vlgmr.msra.gmra.mxu0 %vm12951_vm10, %v2351_v51  ;;  %v2184_v50 = vsel %vm2182_vm5, %v2142_v15, %v1320_v63  ;;  %v531_v63 = vld [vmem:[%s9036_s18 + $0x10] sm:$0xff] }
 0x11d   : > { %v1158_v1 = vpop.permute.xlu1 %1157  ;;  %v1610_v59 = vpop.permute.xlu0 %1609  ;;  %8304 = vmatprep.mubr.msk.f32.mxu0 %vm8897_vm3, %v12987_v52  ;;  %v2226_v51 = vsel %vm12955_vm6, %v2184_v50, %v1484_v35  ;;  %v2060_v6 = vsel %vm12957_vm0, %v531_v63, %v9336_v62 }
 0x11e   : > { %v2268_v5 = vsel %vm2266_vm7, %v2226_v51, %v1610_v59  ;;  %v2101_v15 = vsel %vm512_vm1, %v2060_v6, %v9518_v45  ;;  %v752_v45 = vld [vmem:[%s9036_s18 + $0x85] sm:$0xff] }
 0x11f   : > { %1503 = vrot.lane.b32.xlu1 %v707_v53, %s12932_s27  ;;  %1955 = vrot.lane.b32.xlu0 %v791_v11, %s12936_s21  ;;  %v667_v53 = vld [vmem:[%s9036_s18 + $0x73] sm:$0xff]  ;;  %v2143_v50 = vsel %vm12956_vm4, %v2101_v15, %v1158_v1 }
 0x120   : > { %v711_v6 = vld [vmem:[%s9036_s18 + $0x8c] sm:$0xff] }
 0x121   : > { %v1322_v47 = vpop.permute.xlu1 %1321  ;;  %v1774_v3 = vpop.permute.xlu0 %1773 }
 0x122   : > { %v2310_v55 = vsel %vm12952_vm8, %v2268_v5, %v1774_v3  ;;  %v710_v3 = vld [vmem:[%s9036_s18 + $0x84] sm:$0xff] }
 0x123   : > { %1177 = vrot.lane.b32.xlu1 %v9180_v54, %s12942_s20  ;;  %1629 = vrot.lane.b32.xlu0 %v709_v0, %s12940_s25  ;;  %v792_v54 = vld [vmem:[%s9036_s18 + $0x7e] sm:$0xff] }
 0x125   : > { %v1486_v60 = vpop.permute.xlu1 %1485  ;;  %v1938_v11 = vpop.permute.xlu0 %1937 }
 0x126   : > { %v2352_v28 = vsel %vm2350_vm9, %v2310_v55, %v1938_v11 }
 0x127   : > { %1341 = vrot.lane.b32.xlu1 %v667_v53, %s12938_s28  ;;  %1793 = vrot.lane.b32.xlu0 %v751_v46, %s12934_s26  ;;  %v2185_v53 = vsel %vm2182_vm5, %v2143_v50, %v1322_v47  ;;  %v532_v47 = vld [vmem:[%s9036_s18 + $0x18] sm:$0xff] }
 0x128   : > { %8305 = vmatmul.mubr.msk.f32.gmra.mxu0 %vm12951_vm10, %v2352_v28  ;;  %v2227_v46 = vsel %vm12955_vm6, %v2185_v53, %v1486_v60 }
 0x129   : > { %v1160_v35 = vpop.permute.xlu1 %1159  ;;  %v1612_v59 = vpop.permute.xlu0 %1611  ;;  %8307 = vmatprep.mubr.msk.f32.mxu0 %vm8897_vm3, %v12987_v52 }
 0x12a   : > { %v2269_v62 = vsel %vm2266_vm7, %v2227_v46, %v1612_v59 }
 0x12b   : > { %1505 = vrot.lane.b32.xlu1 %v708_v41, %s12932_s27  ;;  %1957 = vrot.lane.b32.xlu0 %v792_v54, %s12936_s21  ;;  %v668_v41 = vld [vmem:[%s9036_s18 + $0x7b] sm:$0xff]  ;;  %v2061_v54 = vsel %vm12957_vm0, %v532_v47, %v9353_v4 }
 0x12c   : > { %v2102_v59 = vsel %vm512_vm1, %v2061_v54, %v9527_v7  ;;  %v753_v7 = vld [vmem:[%s9036_s18 + $0x8d] sm:$0xff] }
 0x12d   : > { %v1324_v51 = vpop.permute.xlu1 %1323  ;;  %v1776_v5 = vpop.permute.xlu0 %1775  ;;  %v2144_v15 = vsel %vm12956_vm4, %v2102_v59, %v1160_v35  ;;  %v712_v47 = vld [vmem:[%s9036_s18 + $0x94] sm:$0xff] }
 0x12e   : > { %v2311_v55 = vsel %vm12952_vm8, %v2269_v62, %v1776_v5  ;;  %v2186_v53 = vsel %vm2182_vm5, %v2144_v15, %v1324_v51  ;;  %v533_v51 = vld [vmem:[%s9036_s18 + $0x20] sm:$0xff] }
 0x12f   : > { %1179 = vrot.lane.b32.xlu1 %v9193_v57, %s12942_s20  ;;  %1631 = vrot.lane.b32.xlu0 %v710_v3, %s12940_s25  ;;  %v793_v57 = vld [vmem:[%s9036_s18 + $0x86] sm:$0xff] }
 0x131   : > { %v1488_v1 = vpop.permute.xlu1 %1487  ;;  %v1940_v11 = vpop.permute.xlu0 %1939 }
 0x132   : > { %v2353_v28 = vsel %vm2350_vm9, %v2311_v55, %v1940_v11  ;;  %v2228_v46 = vsel %vm12955_vm6, %v2186_v53, %v1488_v1  ;;  %v2062_v11 = vsel %vm12957_vm0, %v533_v51, %v9371_v9 }
 0x133   : > { %1343 = vrot.lane.b32.xlu1 %v668_v41, %s12938_s28  ;;  %1795 = vrot.lane.b32.xlu0 %v752_v45, %s12934_s26 }
 0x134   : > { %8308 = vmatmul.mubr.msk.f32.gmra.mxu0 %vm12951_vm10, %v2353_v28  ;;  %v2103_v28 = vsel %vm512_vm1, %v2062_v11, %v9525_v2  ;;  %v754_v2 = vld [vmem:[%s9036_s18 + $0x95] sm:$0xff]  ;;  %v755_v11 = vld [vmem:[%s9036_s18 + $0x9d] sm:$0xff] }
 0x135   : > { %v1162_v60 = vpop.permute.xlu1 %1161  ;;  %v1614_v63 = vpop.permute.xlu0 %1613  ;;  %8310 = vmatprep.mubr.msk.f32.mxu0 %vm8897_vm3, %v12987_v52 }
 0x136   : > { %v2270_v4 = vsel %vm2266_vm7, %v2228_v46, %v1614_v63 }
 0x137   : > { %1507 = vrot.lane.b32.xlu1 %v709_v0, %s12932_s27  ;;  %1959 = vrot.lane.b32.xlu0 %v793_v57, %s12936_s21  ;;  %v669_v0 = vld [vmem:[%s9036_s18 + $0x83] sm:$0xff]  ;;  %v2145_v57 = vsel %vm12956_vm4, %v2103_v28, %v1162_v60 }
 0x139   : > { %v1326_v50 = vpop.permute.xlu1 %1325  ;;  %v1778_v5 = vpop.permute.xlu0 %1777 }
 0x13a   : > { %v2312_v62 = vsel %vm12952_vm8, %v2270_v4, %v1778_v5  ;;  %v2187_v59 = vsel %vm2182_vm5, %v2145_v57, %v1326_v50  ;;  %v534_v50 = vld [vmem:[%s9036_s18 + $0x28] sm:$0xff] }
 0x13b   : > { %1181 = vrot.lane.b32.xlu1 %v9190_v56, %s12942_s20  ;;  %1633 = vrot.lane.b32.xlu0 %v711_v6, %s12940_s25  ;;  %v794_v56 = vld [vmem:[%s9036_s18 + $0x8e] sm:$0xff] }
 0x13d   : > { %v1490_v35 = vpop.permute.xlu1 %1489  ;;  %v1942_v41 = vpop.permute.xlu0 %1941 }
 0x13e   : > { %v2354_v45 = vsel %vm2350_vm9, %v2312_v62, %v1942_v41  ;;  %v2229_v15 = vsel %vm12955_vm6, %v2187_v59, %v1490_v35  ;;  %v9721_v35 = vld [vmem:[%s9036_s18 + $0x92] sm:$0xff]  ;;  %v713_v41 = vld [vmem:[%s9036_s18 + $0x9c] sm:$0xff] }
 0x13f   : > { %1345 = vrot.lane.b32.xlu1 %v669_v0, %s12938_s28  ;;  %1797 = vrot.lane.b32.xlu0 %v753_v7, %s12934_s26  ;;  %v2063_v7 = vsel %vm12957_vm0, %v534_v50, %v9369_v8  ;;  %v796_v59 = vld [vmem:[%s9036_s18 + $0x9e] sm:$0xff] }
 0x140   : > { %8311 = vmatmul.mubr.msk.f32.gmra.mxu0 %vm12951_vm10, %v2354_v45  ;;  %v2104_v62 = vsel %vm512_vm1, %v2063_v7, %v9534_v21 }
 0x141   : > { %v1164_v55 = vpop.permute.xlu1 %1163  ;;  %v1616_v1 = vpop.permute.xlu0 %1615  ;;  %8313 = vmatprep.mubr.msk.f32.mxu0 %vm8897_vm3, %v12987_v52 }
 0x142   : > { %v2271_v9 = vsel %vm2266_vm7, %v2229_v15, %v1616_v1  ;;  %v2146_v45 = vsel %vm12956_vm4, %v2104_v62, %v1164_v55 }
 0x143   : > { %1509 = vrot.lane.b32.xlu1 %v710_v3, %s12932_s27  ;;  %1961 = vrot.lane.b32.xlu0 %v794_v56, %s12936_s21  ;;  %v670_v3 = vld [vmem:[%s9036_s18 + $0x8b] sm:$0xff] }
 0x145   : > { %v1328_v63 = vpop.permute.xlu1 %1327  ;;  %v1780_v54 = vpop.permute.xlu0 %1779 }
 0x146   : > { %v2313_v5 = vsel %vm12952_vm8, %v2271_v9, %v1780_v54  ;;  %v2188_v1 = vsel %vm2182_vm5, %v2146_v45, %v1328_v63  ;;  %v535_v63 = vld [vmem:[%s9036_s18 + $0x30] sm:$0xff] }
 0x147   : > { %1183 = vrot.lane.b32.xlu1 %v9333_v61, %s12942_s20  ;;  %1635 = vrot.lane.b32.xlu0 %v712_v47, %s12940_s25  ;;  %v795_v61 = vld [vmem:[%s9036_s18 + $0x96] sm:$0xff] }
 0x149   : > { %v1492_v60 = vpop.permute.xlu1 %1491  ;;  %v1944_v53 = vpop.permute.xlu0 %1943 }
 0x14a   : > { %v2355_v46 = vsel %vm2350_vm9, %v2313_v5, %v1944_v53  ;;  %v2230_v8 = vsel %vm12955_vm6, %v2188_v1, %v1492_v60  ;;  %v630_v5 = vld [vmem:[%s9036_s18 + $0x9a] sm:$0xff]  ;;  %v714_v60 = vld [vmem:[%s9036_s18 + $0xa4] sm:$0xff] }
 0x14b   : > { %1347 = vrot.lane.b32.xlu1 %v670_v3, %s12938_s28  ;;  %1799 = vrot.lane.b32.xlu0 %v754_v2, %s12934_s26  ;;  %v2064_v3 = vsel %vm12957_vm0, %v535_v63, %v9381_v13 }
 0x14c   : > { %8314 = vmatmul.mubr.msk.f32.gmra.mxu0 %vm12951_vm10, %v2355_v46  ;;  %v2105_v2 = vsel %vm512_vm1, %v2064_v3, %v9532_v18  ;;  %v756_v18 = vld [vmem:[%s9036_s18 + $0xa5] sm:$0xff] }
 0x14d   : > { %v1166_v4 = vpop.permute.xlu1 %1165  ;;  %v1618_v0 = vpop.permute.xlu0 %1617  ;;  %8316 = vmatprep.mubr.msk.f32.mxu0 %vm8897_vm3, %v12987_v52 }
 0x14e   : > { %v2272_v21 = vsel %vm2266_vm7, %v2230_v8, %v1618_v0  ;;  %v2147_v53 = vsel %vm12956_vm4, %v2105_v2, %v1166_v4  ;;  %v537_v2 = vld [vmem:[%s9036_s18 + $0x40] sm:$0xff] }
 0x14f   : > { %1511 = vrot.lane.b32.xlu1 %v711_v6, %s12932_s27  ;;  %1963 = vrot.lane.b32.xlu0 %v795_v61, %s12936_s21  ;;  %v671_v6 = vld [vmem:[%s9036_s18 + $0x93] sm:$0xff] }
 0x151   : > { %v1330_v51 = vpop.permute.xlu1 %1329  ;;  %v1782_v56 = vpop.permute.xlu0 %1781 }
 0x152   : > { %v2314_v28 = vsel %vm12952_vm8, %v2272_v21, %v1782_v56  ;;  %v2189_v61 = vsel %vm2182_vm5, %v2147_v53, %v1330_v51  ;;  %v536_v51 = vld [vmem:[%s9036_s18 + $0x38] sm:$0xff]  ;;  %v797_v56 = vld [vmem:[%s9036_s18 + $0xa6] sm:$0xff]  ;;  %v798_v53 = vld [vmem:[%s9036_s18 + $0xae] sm:$0xff] }
 0x153   : > { %1185 = vrot.lane.b32.xlu1 %v9721_v35, %s12942_s20  ;;  %1637 = vrot.lane.b32.xlu0 %v713_v41, %s12940_s25  ;;  %v2065_v21 = vsel %vm12957_vm0, %v536_v51, %v9379_v12 }
 0x155   : > { %v1494_v55 = vpop.permute.xlu1 %1493  ;;  %v1946_v57 = vpop.permute.xlu0 %1945 }
 0x156   : > { %v2356_v54 = vsel %vm2350_vm9, %v2314_v28, %v1946_v57  ;;  %v2231_v0 = vsel %vm12955_vm6, %v2189_v61, %v1494_v55  ;;  %v2066_v61 = vsel %vm12957_vm0, %v537_v2, %v9389_v17 }
 0x157   : > { %1349 = vrot.lane.b32.xlu1 %v671_v6, %s12938_s28  ;;  %1801 = vrot.lane.b32.xlu0 %v755_v11, %s12934_s26  ;;  %v2106_v6 = vsel %vm512_vm1, %v2065_v21, %v9543_v49  ;;  %v715_v11 = vld [vmem:[%s9036_s18 + $0xac] sm:$0xff] }
 0x158   : > { %8317 = vmatmul.mubr.msk.f32.gmra.mxu0 %vm12951_vm10, %v2356_v54  ;;  %v757_v49 = vld [vmem:[%s9036_s18 + $0xad] sm:$0xff] }
 0x159   : > { %v1168_v15 = vpop.permute.xlu1 %1167  ;;  %v1620_v9 = vpop.permute.xlu0 %1619  ;;  %8319 = vmatprep.mubr.msk.f32.mxu0 %vm8897_vm3, %v12987_v52 }
 0x15a   : > { %v2273_v13 = vsel %vm2266_vm7, %v2231_v0, %v1620_v9  ;;  %v2148_v28 = vsel %vm12956_vm4, %v2106_v6, %v1168_v15  ;;  %v2107_v0 = vsel %vm512_vm1, %v2066_v61, %v9541_v42 }
 0x15b   : > { %1513 = vrot.lane.b32.xlu1 %v712_v47, %s12932_s27  ;;  %1965 = vrot.lane.b32.xlu0 %v796_v59, %s12936_s21  ;;  %v672_v47 = vld [vmem:[%s9036_s18 + $0x9b] sm:$0xff] }
 0x15d   : > { %v1332_v46 = vpop.permute.xlu1 %1331  ;;  %v1784_v50 = vpop.permute.xlu0 %1783 }
 0x15e   : > { %v2315_v7 = vsel %vm12952_vm8, %v2273_v13, %v1784_v50  ;;  %v2190_v54 = vsel %vm2182_vm5, %v2148_v28, %v1332_v46  ;;  %v673_v46 = vld [vmem:[%s9036_s18 + $0xa3] sm:$0xff] }
 0x15f   : > { %1187 = vrot.lane.b32.xlu1 %v630_v5, %s12942_s20  ;;  %1639 = vrot.lane.b32.xlu0 %v714_v60, %s12940_s25 }
 0x161   : > { %v1496_v4 = vpop.permute.xlu1 %1495  ;;  %v1948_v62 = vpop.permute.xlu0 %1947 }
 0x162   : > { %v2357_v45 = vsel %vm2350_vm9, %v2315_v7, %v1948_v62  ;;  %v2232_v63 = vsel %vm12955_vm6, %v2190_v54, %v1496_v4  ;;  %v632_v62 = vld [vmem:[%s9036_s18 + $0xaa] sm:$0xff] }
 0x163   : > { %1351 = vrot.lane.b32.xlu1 %v672_v47, %s12938_s28  ;;  %1803 = vrot.lane.b32.xlu0 %v756_v18, %s12934_s26 }
 0x164   : > { %8320 = vmatmul.mubr.msk.f32.gmra.mxu0 %vm12951_vm10, %v2357_v45  ;;  %v716_v45 = vld [vmem:[%s9036_s18 + $0xb4] sm:$0xff] }
 0x165   : > { %v1170_v1 = vpop.permute.xlu1 %1169  ;;  %v1622_v8 = vpop.permute.xlu0 %1621  ;;  %8322 = vmatprep.mubr.msk.f32.mxu0 %vm8897_vm3, %v12987_v52 }
 0x166   : > { %v2274_v12 = vsel %vm2266_vm7, %v2232_v63, %v1622_v8  ;;  %v2149_v13 = vsel %vm12956_vm4, %v2107_v0, %v1170_v1  ;;  %v538_v8 = vld [vmem:[%s9036_s18 + $0x48] sm:$0xff]  ;;  %v800_v0 = vld [vmem:[%s9036_s18 + $0xbe] sm:$0xff] }
 0x167   : > { %1515 = vrot.lane.b32.xlu1 %v713_v41, %s12932_s27  ;;  %1967 = vrot.lane.b32.xlu0 %v797_v56, %s12936_s21  ;;  %s12988_s27 = smov 8   ;;  %v631_v41 = vld [vmem:[%s9036_s18 + $0xa2] sm:$0xff]  ;;  %v2067_v28 = vsel %vm12957_vm0, %v538_v8, %v9387_v16  ;;  %v634_v8 = vld [vmem:[%s9036_s18 + $0xba] sm:$0xff] }
 0x169   : > { %v1334_v55 = vpop.permute.xlu1 %1333  ;;  %v1786_v57 = vpop.permute.xlu0 %1785 }
 0x16a   : > { %v2316_v59 = vsel %vm12952_vm8, %v2274_v12, %v1786_v57  ;;  %v2191_v7 = vsel %vm2182_vm5, %v2149_v13, %v1334_v55  ;;  %v2108_v55 = vsel %vm512_vm1, %v2067_v28, %v9550_v38  ;;  %v799_v57 = vld [vmem:[%s9036_s18 + $0xb6] sm:$0xff]  ;;  %v760_v28 = vld [vmem:[%s9036_s18 + $0xc5] sm:$0xff] }
 0x16b   : > { %1641 = vrot.lane.b32.xlu1 %v715_v11, %s12940_s25  ;;  %1063 = vrot.lane.b32.xlu0 %v9721_v35, %s12988_s27  ;;  %v675_v13 = vld [vmem:[%s9036_s18 + $0xb3] sm:$0xff] }
 0x16d   : > { %v1498_v15 = vpop.permute.xlu1 %1497  ;;  %v1950_v9 = vpop.permute.xlu0 %1949 }
 0x16e   : > { %v2358_v3 = vsel %vm2350_vm9, %v2316_v59, %v1950_v9  ;;  %v2233_v4 = vsel %vm12955_vm6, %v2191_v7, %v1498_v15  ;;  %v717_v15 = vld [vmem:[%s9036_s18 + $0xbc] sm:$0xff] }
 0x16f   : > { %1805 = vrot.lane.b32.xlu1 %v757_v49, %s12934_s26  ;;  %1189 = vrot.lane.b32.xlu0 %v631_v41, %s12942_s20  ;;  %s12989_s26 = smov 20  }
 0x170   : > { %8323 = vmatmul.mubr.msk.f32.gmra.mxu0 %vm12951_vm10, %v2358_v3 }
 0x171   : > { %v1172_v35 = vpop.permute.xlu1 %1171  ;;  %v1624_v50 = vpop.permute.xlu0 %1623  ;;  %8325 = vmatprep.mubr.msk.f32.mxu0 %vm8897_vm3, %v12987_v52 }
 0x172   : > { %v2275_v17 = vsel %vm2266_vm7, %v2233_v4, %v1624_v50  ;;  %v2150_v54 = vsel %vm12956_vm4, %v2108_v55, %v1172_v35 }
 0x173   : > { %1969 = vrot.lane.b32.xlu1 %v798_v53, %s12936_s21  ;;  %1353 = vrot.lane.b32.xlu0 %v673_v46, %s12938_s28  ;;  %s12990_s21 = smov 28   ;;  %v539_v53 = vld [vmem:[%s9036_s18 + $0x50] sm:$0xff] }
 0x174   : > { %v633_v46 = vld [vmem:[%s9036_s18 + $0xb2] sm:$0xff]  ;;  %v2068_v61 = vsel %vm12957_vm0, %v539_v53, %v9396_v20 }
 0x175   : > { %v1336_v47 = vpop.permute.xlu1 %1335  ;;  %v1788_v18 = vpop.permute.xlu0 %1787 }
 0x176   : > { %v2317_v42 = vsel %vm12952_vm8, %v2275_v17, %v1788_v18  ;;  %v2192_v49 = vsel %vm2182_vm5, %v2150_v54, %v1336_v47 }
 0x177   : > { %1065 = vrot.lane.b32.xlu1 %v630_v5, %s12988_s27  ;;  %1517 = vrot.lane.b32.xlu0 %v714_v60, %s12989_s26  ;;  %v674_v5 = vld [vmem:[%s9036_s18 + $0xab] sm:$0xff]  ;;  %v758_v60 = vld [vmem:[%s9036_s18 + $0xb5] sm:$0xff] }
 0x179   : > { %v1500_v51 = vpop.permute.xlu1 %1499  ;;  %v1952_v56 = vpop.permute.xlu0 %1951 }
 0x17a   : > { %v2359_v1 = vsel %vm2350_vm9, %v2317_v42, %v1952_v56  ;;  %v2234_v59 = vsel %vm12955_vm6, %v2192_v49, %v1500_v51  ;;  %v801_v49 = vld [vmem:[%s9036_s18 + $0xc6] sm:$0xff] }
 0x17b   : > { %1191 = vrot.lane.b32.xlu1 %v632_v62, %s12942_s20  ;;  %1643 = vrot.lane.b32.xlu0 %v716_v45, %s12940_s25 }
 0x17c   : > { %8326 = vmatmul.mubr.msk.f32.gmra.mxu0 %vm12951_vm10, %v2359_v1  ;;  %v540_v1 = vld [vmem:[%s9036_s18 + $0x58] sm:$0xff] }
 0x17d   : > { %v1174_v21 = vpop.permute.xlu1 %1173  ;;  %v1626_v6 = vpop.permute.xlu0 %1625  ;;  %8328 = vmatprep.mubr.msk.f32.mxu0 %vm8897_vm3, %v12987_v52 }
 0x17e   : > { %v2276_v16 = vsel %vm2266_vm7, %v2234_v59, %v1626_v6  ;;  %v2069_v6 = vsel %vm12957_vm0, %v540_v1, %v9394_v19  ;;  %v636_v1 = vld [vmem:[%s9036_s18 + $0xca] sm:$0xff] }
 0x17f   : > { %1355 = vrot.lane.b32.xlu1 %v674_v5, %s12938_s28  ;;  %1807 = vrot.lane.b32.xlu0 %v758_v60, %s12990_s21  ;;  %s12991_s28 = smov 32   ;;  %v718_v5 = vld [vmem:[%s9036_s18 + $0xc4] sm:$0xff] }
 0x181   : > { %v1338_v63 = vpop.permute.xlu1 %1337  ;;  %v1790_v12 = vpop.permute.xlu0 %1789 }
 0x182   : > { %v2318_v38 = vsel %vm12952_vm8, %v2276_v16, %v1790_v12 }
 0x183   : > { %1519 = vrot.lane.b32.xlu1 %v715_v11, %s12989_s26  ;;  %1971 = vrot.lane.b32.xlu0 %v799_v57, %s12991_s28  ;;  %v759_v11 = vld [vmem:[%s9036_s18 + $0xbd] sm:$0xff] }
 0x185   : > { %v1502_v9 = vpop.permute.xlu1 %1501  ;;  %v1954_v3 = vpop.permute.xlu0 %1953 }
 0x186   : > { %v2360_v2 = vsel %vm2350_vm9, %v2318_v38, %v1954_v3  ;;  %v719_v3 = vld [vmem:[%s9036_s18 + $0xcc] sm:$0xff] }
 0x187   : > { %1645 = vrot.lane.b32.xlu1 %v717_v15, %s12940_s25  ;;  %1067 = vrot.lane.b32.xlu0 %v631_v41, %s12988_s27  ;;  %v2109_v41 = vsel %vm512_vm1, %v2068_v61, %v9548_v58  ;;  %s12992_s25 = smov 16  }
 0x188   : > { %8329 = vmatmul.mubr.msk.f32.gmra.mxu0 %vm12951_vm10, %v2360_v2  ;;  %v2151_v47 = vsel %vm12956_vm4, %v2109_v41, %v1174_v21 }
 0x189   : > { %v1176_v35 = vpop.permute.xlu1 %1175  ;;  %v1628_v50 = vpop.permute.xlu0 %1627  ;;  %8331 = vmatprep.mubr.msk.f32.mxu0 %vm8897_vm3, %v12987_v52  ;;  %v2193_v4 = vsel %vm2182_vm5, %v2151_v47, %v1338_v63 }
 0x18a   : > { %v2235_v20 = vsel %vm12955_vm6, %v2193_v4, %v1502_v9  ;;  %v541_v9 = vld [vmem:[%s9036_s18 + $0x60] sm:$0xff] }
 0x18b   : > { %1809 = vrot.lane.b32.xlu1 %v759_v11, %s12990_s21  ;;  %1193 = vrot.lane.b32.xlu0 %v633_v46, %s12942_s20  ;;  %v2277_v17 = vsel %vm2266_vm7, %v2235_v20, %v1628_v50  ;;  %v2070_v11 = vsel %vm12957_vm0, %v541_v9, %v9405_v24  ;;  %v635_v50 = vld [vmem:[%s9036_s18 + $0xc2] sm:$0xff] }
 0x18d   : > { %v1340_v18 = vpop.permute.xlu1 %1339  ;;  %v1792_v7 = vpop.permute.xlu0 %1791 }
 0x18e   : > { %v2319_v58 = vsel %vm12952_vm8, %v2277_v17, %v1792_v7  ;;  %v542_v17 = vld [vmem:[%s9036_s18 + $0x68] sm:$0xff] }
 0x18f   : > { %1973 = vrot.lane.b32.xlu1 %v800_v0, %s12991_s28  ;;  %1357 = vrot.lane.b32.xlu0 %v675_v13, %s12992_s25 }
 0x191   : > { %v1504_v42 = vpop.permute.xlu1 %1503  ;;  %v1956_v51 = vpop.permute.xlu0 %1955 }
 0x192   : > { %v2361_v56 = vsel %vm2350_vm9, %v2319_v58, %v1956_v51  ;;  %v2071_v51 = vsel %vm12957_vm0, %v542_v17, %v9403_v23 }
 0x193   : > { %1069 = vrot.lane.b32.xlu1 %v632_v62, %s12988_s27  ;;  %1521 = vrot.lane.b32.xlu0 %v716_v45, %s12989_s26  ;;  %v2110_v62 = vsel %vm512_vm1, %v2069_v6, %v9557_v32  ;;  %v676_v45 = vld [vmem:[%s9036_s18 + $0xbb] sm:$0xff] }
 0x194   : > { %8332 = vmatmul.mubr.msk.f32.gmra.mxu0 %vm12951_vm10, %v2361_v56  ;;  %v2152_v55 = vsel %vm12956_vm4, %v2110_v62, %v1176_v35  ;;  %v761_v35 = vld [vmem:[%s9036_s18 + $0xcd] sm:$0xff]  ;;  %v2112_v56 = vsel %vm512_vm1, %v2071_v51, %v9566_v48  ;;  %v762_v48 = vld [vmem:[%s9036_s18 + $0xd5] sm:$0xff] }
 0x195   : > { %v1178_v60 = vpop.permute.xlu1 %1177  ;;  %v1630_v21 = vpop.permute.xlu0 %1629  ;;  %8334 = vmatprep.mubr.msk.f32.mxu0 %vm8897_vm3, %v12987_v52  ;;  %v2194_v63 = vsel %vm2182_vm5, %v2152_v55, %v1340_v18  ;;  %v677_v18 = vld [vmem:[%s9036_s18 + $0xc3] sm:$0xff] }
 0x196   : > { %v2236_v12 = vsel %vm12955_vm6, %v2194_v63, %v1504_v42  ;;  %v543_v63 = vld [vmem:[%s9036_s18 + $0x70] sm:$0xff] }
 0x197   : > { %1195 = vrot.lane.b32.xlu1 %v634_v8, %s12942_s20  ;;  %1647 = vrot.lane.b32.xlu0 %v718_v5, %s12993_s0  ;;  %v2278_v19 = vsel %vm2266_vm7, %v2236_v12, %v1630_v21  ;;  %v803_v12 = vld [vmem:[%s9036_s18 + $0xd6] sm:$0xff] }
 0x199   : > { %v1342_v57 = vpop.permute.xlu1 %1341  ;;  %v1794_v54 = vpop.permute.xlu0 %1793 }
 0x19a   : > { %v2320_v32 = vsel %vm12952_vm8, %v2278_v19, %v1794_v54 }
 0x19b   : > { %1359 = vrot.lane.b32.xlu1 %v676_v45, %s12992_s25  ;;  %1811 = vrot.lane.b32.xlu0 %v760_v28, %s12990_s21 }
 0x19d   : > { %v1506_v59 = vpop.permute.xlu1 %1505  ;;  %v1958_v16 = vpop.permute.xlu0 %1957 }
 0x19e   : > { %v2362_v38 = vsel %vm2350_vm9, %v2320_v32, %v1958_v16  ;;  %v2072_v32 = vsel %vm12957_vm0, %v543_v63, %v9412_v27  ;;  %v721_v16 = vld [vmem:[%s9036_s18 + $0xdc] sm:$0xff]  ;;  %v10007_v63 = vld [vmem:[%s9036_s18 + $0xec] sm:$0xff] }
 0x19f   : > { %1523 = vrot.lane.b32.xlu1 %v717_v15, %s12989_s26  ;;  %1975 = vrot.lane.b32.xlu0 %v801_v49, %s12991_s28  ;;  %v2111_v15 = vsel %vm512_vm1, %v2070_v11, %v9555_v31 }
 0x1a0   : > { %8335 = vmatmul.mubr.msk.f32.gmra.mxu0 %vm12951_vm10, %v2362_v38  ;;  %v2153_v61 = vsel %vm12956_vm4, %v2111_v15, %v1178_v60  ;;  %v720_v60 = vld [vmem:[%s9036_s18 + $0xd4] sm:$0xff] }
 0x1a1   : > { %v1180_v2 = vpop.permute.xlu1 %1179  ;;  %v1632_v53 = vpop.permute.xlu0 %1631  ;;  %8337 = vmatprep.mubr.msk.f32.mxu0 %vm8897_vm3, %v12987_v52  ;;  %v2195_v13 = vsel %vm2182_vm5, %v2153_v61, %v1342_v57 }
 0x1a2   : > { %v2237_v47 = vsel %vm12955_vm6, %v2195_v13, %v1506_v59  ;;  %v2154_v21 = vsel %vm12956_vm4, %v2112_v56, %v1180_v2  ;;  %v2113_v59 = vsel %vm512_vm1, %v2072_v32, %v9564_v22  ;;  %v637_v22 = vld [vmem:[%s9036_s18 + $0xd2] sm:$0xff]  ;;  %v804_v13 = vld [vmem:[%s9036_s18 + $0xde] sm:$0xff] }
 0x1a3   : > { %1649 = vrot.lane.b32.xlu1 %v719_v3, %s12993_s0  ;;  %1071 = vrot.lane.b32.xlu0 %v633_v46, %s12988_s27  ;;  %v2279_v24 = vsel %vm2266_vm7, %v2237_v47, %v1632_v53  ;;  %v802_v46 = vld [vmem:[%s9036_s18 + $0xce] sm:$0xff]  ;;  %v10014_v32 = vld [vmem:[%s12994_s2] ss:$0 sm:$0xff] }
 0x1a4   : > { %v679_v47 = vld [vmem:[%s9036_s18 + $0xd3] sm:$0xff] }
 0x1a5   : > { %v1344_v41 = vpop.permute.xlu1 %1343  ;;  %v1796_v0 = vpop.permute.xlu0 %1795 }
 0x1a6   : > { %v2321_v31 = vsel %vm12952_vm8, %v2279_v24, %v1796_v0  ;;  %v2196_v45 = vsel %vm2182_vm5, %v2154_v21, %v1344_v41  ;;  %v544_v0 = vld [vmem:[%s9036_s18 + $0x78] sm:$0xff] }
 0x1a7   : > { %1813 = vrot.lane.b32.xlu1 %v761_v35, %s12990_s21  ;;  %1197 = vrot.lane.b32.xlu0 %v635_v50, %s12942_s20 }
 0x1a9   : > { %v1508_v7 = vpop.permute.xlu1 %1507  ;;  %v1960_v4 = vpop.permute.xlu0 %1959 }
 0x1aa   : > { %v2363_v20 = vsel %vm2350_vm9, %v2321_v31, %v1960_v4  ;;  %v2238_v28 = vsel %vm12955_vm6, %v2196_v45, %v1508_v7 }
 0x1ab   : > { %1977 = vrot.lane.b32.xlu1 %v802_v46, %s12991_s28  ;;  %1361 = vrot.lane.b32.xlu0 %v677_v18, %s12992_s25  ;;  %v2073_v46 = vsel %vm12957_vm0, %v544_v0, %v9410_v26 }
 0x1ac   : > { %8338 = vmatmul.mubr.msk.f32.gmra.mxu0 %vm12951_vm10, %v2363_v20  ;;  %v2114_v18 = vsel %vm512_vm1, %v2073_v46, %v9573_v14  ;;  %v9979_v14 = vld [vmem:[%s9036_s18 + $0xe4] sm:$0xff] }
 0x1ad   : > { %v1182_v58 = vpop.permute.xlu1 %1181  ;;  %v1634_v42 = vpop.permute.xlu0 %1633  ;;  %8340 = vmatprep.mubr.msk.f32.mxu0 %vm8897_vm3, %v12987_v52 }
 0x1ae   : > { %v2280_v23 = vsel %vm2266_vm7, %v2238_v28, %v1634_v42  ;;  %v2155_v38 = vsel %vm12956_vm4, %v2113_v59, %v1182_v58  ;;  %v9976_v58 = vld [vmem:[%s9036_s18 + $0xda] sm:$0xff]  ;;  %v546_v59 = vld [vmem:[%s9036_s18 + $0x88] sm:$0xff] }
 0x1af   : > { %1073 = vrot.lane.b32.xlu1 %v634_v8, %s12988_s27  ;;  %1525 = vrot.lane.b32.xlu0 %v718_v5, %s12989_s26  ;;  %v678_v8 = vld [vmem:[%s9036_s18 + $0xcb] sm:$0xff] }
 0x1b1   : > { %v1346_v6 = vpop.permute.xlu1 %1345  ;;  %v1798_v62 = vpop.permute.xlu0 %1797 }
 0x1b2   : > { %v2322_v5 = vsel %vm12952_vm8, %v2280_v23, %v1798_v62  ;;  %v2197_v53 = vsel %vm2182_vm5, %v2155_v38, %v1346_v6  ;;  %v764_v6 = vld [vmem:[%s9036_s18 + $0xe5] sm:$0xff]  ;;  %v10023_v38 = vld [vmem:[%s12995_s3] ss:$0 sm:$0xff] }
 0x1b3   : > { %1199 = vrot.lane.b32.xlu1 %v636_v1, %s12942_s20  ;;  %1651 = vrot.lane.b32.xlu0 %v720_v60, %s12993_s0 }
 0x1b5   : > { %v1510_v55 = vpop.permute.xlu1 %1509  ;;  %v1962_v57 = vpop.permute.xlu0 %1961 }
 0x1b6   : > { %v2364_v54 = vsel %vm2350_vm9, %v2322_v5, %v1962_v57  ;;  %v2239_v11 = vsel %vm12955_vm6, %v2197_v53, %v1510_v55 }
 0x1b7   : > { %1363 = vrot.lane.b32.xlu1 %v678_v8, %s12992_s25  ;;  %1815 = vrot.lane.b32.xlu0 %v762_v48, %s12990_s21  ;;  %v805_v8 = vld [vmem:[%s9036_s18 + $0xe6] sm:$0xff] }
 0x1b8   : > { %8341 = vmatmul.mubr.msk.f32.gmra.mxu0 %vm12951_vm10, %v2364_v54 }
 0x1b9   : > { %v1184_v19 = vpop.permute.xlu1 %1183  ;;  %v1636_v49 = vpop.permute.xlu0 %1635  ;;  %8343 = vmatprep.mubr.msk.f32.mxu0 %vm8897_vm3, %v12987_v52 }
 0x1ba   : > { %v2281_v27 = vsel %vm2266_vm7, %v2239_v11, %v1636_v49  ;;  %v2156_v31 = vsel %vm12956_vm4, %v2114_v18, %v1184_v19 }
 0x1bb   : > { %1527 = vrot.lane.b32.xlu1 %v719_v3, %s12989_s26  ;;  %1979 = vrot.lane.b32.xlu0 %v803_v12, %s12991_s28  ;;  %v763_v3 = vld [vmem:[%s9036_s18 + $0xdd] sm:$0xff] }
 0x1bd   : > { %v1348_v9 = vpop.permute.xlu1 %1347  ;;  %v1800_v2 = vpop.permute.xlu0 %1799 }
 0x1be   : > { %v2323_v15 = vsel %vm12952_vm8, %v2281_v27, %v1800_v2  ;;  %v2198_v20 = vsel %vm2182_vm5, %v2156_v31, %v1348_v9  ;;  %v765_v9 = vld [vmem:[%s9036_s18 + $0xed] sm:$0xff]  ;;  %v10028_v2 = vld [vmem:[%s9036_s18 + $0xe2] sm:$0xff] }
 0x1bf   : > { %1653 = vrot.lane.b32.xlu1 %v721_v16, %s12993_s0  ;;  %1075 = vrot.lane.b32.xlu0 %v635_v50, %s12988_s27 }
 0x1c1   : > { %v1512_v35 = vpop.permute.xlu1 %1511  ;;  %v1964_v61 = vpop.permute.xlu0 %1963 }
 0x1c2   : > { %v2365_v41 = vsel %vm2350_vm9, %v2323_v15, %v1964_v61  ;;  %v2240_v17 = vsel %vm12955_vm6, %v2198_v20, %v1512_v35  ;;  %v806_v61 = vld [vmem:[%s9036_s18 + $0xee] sm:$0xff] }
 0x1c3   : > { %1817 = vrot.lane.b32.xlu1 %v763_v3, %s12990_s21  ;;  %1201 = vrot.lane.b32.xlu0 %v637_v22, %s12942_s20 }
 0x1c4   : > { %8344 = vmatmul.mubr.msk.f32.gmra.mxu0 %vm12951_vm10, %v2365_v41  ;;  %v681_v41 = vld [vmem:[%s9036_s18 + $0xe3] sm:$0xff] }
 0x1c5   : > { %v1186_v50 = vpop.permute.xlu1 %1185  ;;  %v1638_v24 = vpop.permute.xlu0 %1637  ;;  %8346 = vmatprep.mubr.msk.f32.mxu0 %vm8897_vm3, %v12987_v52 }
 0x1c6   : > { %v2282_v26 = vsel %vm2266_vm7, %v2240_v17, %v1638_v24  ;;  %v10058_v17 = vld [vmem:[%s9036_s18 + $0xea] sm:$0xff] }
 0x1c7   : > { %1981 = vrot.lane.b32.xlu1 %v804_v13, %s12991_s28  ;;  %1365 = vrot.lane.b32.xlu0 %v679_v47, %s12992_s25 }
 0x1c9   : > { %v1350_v7 = vpop.permute.xlu1 %1349  ;;  %v1802_v4 = vpop.permute.xlu0 %1801 }
 0x1ca   : > { %v2324_v42 = vsel %vm12952_vm8, %v2282_v26, %v1802_v4  ;;  %v10061_v26 = vld [vmem:[%s9036_s18 + $0xf4] sm:$0xff] }
 0x1cb   : > { %1077 = vrot.lane.b32.xlu1 %v636_v1, %s12988_s27  ;;  %1529 = vrot.lane.b32.xlu0 %v720_v60, %s12989_s26  ;;  %v545_v1 = vld [vmem:[%s9036_s18 + $0x80] sm:$0xff] }
 0x1cc   : > { %v680_v60 = vld [vmem:[%s9036_s18 + $0xdb] sm:$0xff]  ;;  %v2074_v28 = vsel %vm12957_vm0, %v545_v1, %v9419_v30  ;;  %v682_v1 = vld [vmem:[%s9036_s18 + $0xeb] sm:$0xff] }
 0x1cd   : > { %v1514_v51 = vpop.permute.xlu1 %1513  ;;  %v1966_v56 = vpop.permute.xlu0 %1965  ;;  %v2115_v23 = vsel %vm512_vm1, %v2074_v28, %v9571_v25 }
 0x1ce   : > { %v2366_v21 = vsel %vm2350_vm9, %v2324_v42, %v1966_v56  ;;  %v2157_v48 = vsel %vm12956_vm4, %v2115_v23, %v1186_v50 }
 0x1cf   : > { %1203 = vrot.lane.b32.xlu1 %v9976_v58, %s12942_s20  ;;  %1655 = vrot.lane.b32.xlu0 %v9979_v14, %s12993_s0  ;;  %v2199_v57 = vsel %vm2182_vm5, %v2157_v48, %v1350_v7  ;;  %v807_v48 = vld [vmem:[%s9036_s18 + $0xf6] sm:$0xff] }
 0x1d0   : > { %8347 = vmatmul.mubr.msk.f32.gmra.mxu0 %vm12951_vm10, %v2366_v21  ;;  %v2241_v54 = vsel %vm12955_vm6, %v2199_v57, %v1514_v51 }
 0x1d1   : > { %v1188_v62 = vpop.permute.xlu1 %1187  ;;  %v1640_v45 = vpop.permute.xlu0 %1639  ;;  %8349 = vmatprep.mubr.msk.f32.mxu0 %vm8897_vm3, %v12987_v52 }
 0x1d2   : > { %v2283_v30 = vsel %vm2266_vm7, %v2241_v54, %v1640_v45 }
 0x1d3   : > { %1367 = vrot.lane.b32.xlu1 %v680_v60, %s12992_s25  ;;  %1819 = vrot.lane.b32.xlu0 %v764_v6, %s12990_s21  ;;  %v766_v60 = vld [vmem:[%s9036_s18 + $0xf5] sm:$0xff] }
 0x1d5   : > { %v1352_v5 = vpop.permute.xlu1 %1351  ;;  %v1804_v55 = vpop.permute.xlu0 %1803 }
 0x1d6   : > { %v2325_v25 = vsel %vm12952_vm8, %v2283_v30, %v1804_v55 }
 0x1d7   : > { %1531 = vrot.lane.b32.xlu1 %v721_v16, %s12989_s26  ;;  %1983 = vrot.lane.b32.xlu0 %v805_v8, %s12991_s28 }
 0x1d9   : > { %v1516_v12 = vpop.permute.xlu1 %1515  ;;  %v1968_v19 = vpop.permute.xlu0 %1967 }
 0x1da   : > { %v2367_v49 = vsel %vm2350_vm9, %v2325_v25, %v1968_v19 }
 0x1db   : > { %1657 = vrot.lane.b32.xlu1 %v10007_v63, %s12993_s0  ;;  %1079 = vrot.lane.b32.xlu0 %v637_v22, %s12988_s27  ;;  %v2075_v22 = vsel %vm12957_vm0, %v546_v59, %v9417_v29 }
 0x1dc   : > { %v2591_v16 = vpop.f32.mrf.mxu0  ;;  %8350 = vmatmul.mubr.msk.f32.gmra.mxu0 %vm12951_vm10, %v2367_v49  ;;  %v2116_v35 = vsel %vm512_vm1, %v2075_v22, %v9578_v10 }
 0x1dd   : > { %v2797_v53 = vmul.f32 %v10014_v32, %v2591_v16  ;;  %v1642_v11 = vpop.permute.xlu1 %1641  ;;  %v1064_v27 = vpop.permute.xlu0 %1063  ;;  %8352 = vmatprep.mubr.msk.f32.mxu0 %vm8897_vm3, %v12987_v52  ;;  %v2158_v0 = vsel %vm12956_vm4, %v2116_v35, %v1188_v62 }
 0x1de   : > { %v8303_v3 = vpop.f32.mrf.mxu0  ;;  %v2200_v29 = vsel %vm2182_vm5, %v2158_v0, %v1352_v5  ;;  %v808_v0 = vld [vmem:[%s9036_s18 + $0xfe] sm:$0xff] }
 0x1df   : > { %v2840_v15 = vadd.f32 %v10023_v38, %v2797_v53  ;;  %1821 = vrot.lane.b32.xlu1 %v765_v9, %s12990_s21  ;;  %1205 = vrot.lane.b32.xlu0 %v10028_v2, %s12996_s1  ;;  %v2242_v24 = vsel %vm12955_vm6, %v2200_v29, %v1516_v12  ;;  %v10089_v12 = vld [vmem:[%s9036_s18 + $0xfc] sm:$0xff]  ;;  %v10103_v3 = vld [vmem:[%s9036_s18 + $0xf2] sm:$0xff] }
 0x1e0   : > { %v2284_v10 = vsel %vm2266_vm7, %v2242_v24, %v1642_v11  ;;  %v548_v11 = vld [vmem:[%s9036_s18 + $0x98] sm:$0xff] }
 0x1e1   : > { %vm2876_vm11 = vcmp.gt.f32.partialorder %v2840_v15, 0.0  ;;  %v2912_v13 = vmul.f32 0.01, %v2840_v15  ;;  %v1806_v47 = vpop.permute.xlu1 %1805  ;;  %v1190_v50 = vpop.permute.xlu0 %1189 }
 0x1e2   : > { %v2326_v18 = vsel %vm12952_vm8, %v2284_v10, %v1806_v47 }
 0x1e3   : > { %v2948_v46 = vsel %vm2876_vm11, %v2840_v15, %v2912_v13  ;;  %1985 = vrot.lane.b32.xlu1 %v806_v61, %s12991_s28  ;;  %1369 = vrot.lane.b32.xlu0 %v681_v41, %s12992_s25  ;;  %v2077_v61 = vsel %vm12957_vm0, %v548_v11, %v9426_v33  ;;  %v683_v13 = vld [vmem:[%s9036_s18 + $0xf3] sm:$0xff]  ;;  %vm2989_vm11 = vcmask 25600  }
 0x1e4   : > { %2984 = vst.msk [vmem:[#allocation2 + $0x13] sm:$0xff] %vm12957_vm0, %v2948_v46 }
 0x1e5   : > { %v1970_v31 = vpop.permute.xlu1 %1969  ;;  %v1354_v7 = vpop.permute.xlu0 %1353 }
 0x1e6   : > { %v2368_v4 = vsel %vm2350_vm9, %v2326_v18, %v1970_v31 }
 0x1e7   : > { %1081 = vrot.lane.b32.xlu1 %v9976_v58, %s12988_s27  ;;  %1533 = vrot.lane.b32.xlu0 %v9979_v14, %s12989_s26  ;;  %v547_v14 = vld [vmem:[%s9036_s18 + $0x90] sm:$0xff] }
 0x1e8   : > { %v2596_v20 = vpop.f32.mrf.mxu0  ;;  %8353 = vmatmul.mubr.msk.f32.gmra.mxu0 %vm12951_vm10, %v2368_v4  ;;  %v2076_v28 = vsel %vm12957_vm0, %v547_v14, %v9428_v34 }
 0x1e9   : > { %v2798_v42 = vmul.f32 %v10014_v32, %v2596_v20  ;;  %v1066_v51 = vpop.permute.xlu1 %1065  ;;  %v1518_v56 = vpop.permute.xlu0 %1517  ;;  %8355 = vmatprep.mubr.msk.f32.mxu0 %vm8897_vm3, %v12987_v52  ;;  %v2117_v8 = vsel %vm512_vm1, %v2076_v28, %v1064_v27  ;;  %v767_v27 = vld [vmem:[%s9036_s18 + $0xfd] sm:$0xff] }
 0x1ea   : > { %v8306_v21 = vpop.f32.mrf.mxu0  ;;  %v2159_v5 = vsel %vm12956_vm4, %v2117_v8, %v1190_v50  ;;  %v2118_v41 = vsel %vm512_vm1, %v2077_v61, %v1066_v51 }
 0x1eb   : > { %v2841_v58 = vadd.f32 %v10023_v38, %v2798_v42  ;;  %1207 = vrot.lane.b32.xlu1 %v10058_v17, %s12996_s1  ;;  %1659 = vrot.lane.b32.xlu0 %v10061_v26, %s12993_s0  ;;  %v2201_v54 = vsel %vm2182_vm5, %v2159_v5, %v1354_v7  ;;  %v10135_v21 = vld [vmem:[%s9036_s18 + $0x104] sm:$0xff] }
 0x1ec   : > { %v2243_v34 = vsel %vm12955_vm6, %v2201_v54, %v1518_v56  ;;  %v10132_v56 = vld [vmem:[%s9036_s18 + $0xfa] sm:$0xff] }
 0x1ed   : > { %vm2877_vm12 = vcmp.gt.f32.partialorder %v2841_v58, 0.0  ;;  %v2913_v6 = vmul.f32 0.01, %v2841_v58  ;;  %v1192_v62 = vpop.permute.xlu1 %1191  ;;  %v1644_v45 = vpop.permute.xlu0 %1643 }
 0x1ee   : > { %v2285_v30 = vsel %vm2266_vm7, %v2243_v34, %v1644_v45  ;;  %v2160_v47 = vsel %vm12956_vm4, %v2118_v41, %v1192_v62  ;;  %v810_v41 = vld [vmem:[%s9036_s18 + $0x10e] sm:$0xff] }
 0x1ef   : > { %v2949_v23 = vsel %vm2877_vm12, %v2841_v58, %v2913_v6  ;;  %1371 = vrot.lane.b32.xlu1 %v682_v1, %s12992_s25  ;;  %1823 = vrot.lane.b32.xlu0 %v766_v60, %s12990_s21  ;;  %v768_v6 = vld [vmem:[%s9036_s18 + $0x105] sm:$0xff] }
 0x1f0   : > { %2985 = vst.msk [vmem:[#allocation2 + $0x1b] sm:$0xff] %vm12957_vm0, %v2949_v23 }
 0x1f1   : > { %v1356_v55 = vpop.permute.xlu1 %1355  ;;  %v1808_v57 = vpop.permute.xlu0 %1807 }
 0x1f2   : > { %v2327_v19 = vsel %vm12952_vm8, %v2285_v30, %v1808_v57  ;;  %v2202_v24 = vsel %vm2182_vm5, %v2160_v47, %v1356_v55 }
 0x1f3   : > { %1535 = vrot.lane.b32.xlu1 %v10007_v63, %s12989_s26  ;;  %1987 = vrot.lane.b32.xlu0 %v807_v48, %s12991_s28  ;;  %v809_v48 = vld [vmem:[%s9036_s18 + $0x106] sm:$0xff] }
 0x1f4   : > { %v2601_v25 = vpop.f32.mrf.mxu0 }
 0x1f5   : > { %v2799_v49 = vmul.f32 %v10014_v32, %v2601_v25  ;;  %v1520_v59 = vpop.permute.xlu1 %1519  ;;  %v1972_v16 = vpop.permute.xlu0 %1971 }
 0x1f6   : > { %v2369_v9 = vsel %vm2350_vm9, %v2327_v19, %v1972_v16  ;;  %v8309_v53 = vpop.f32.mrf.mxu0  ;;  %v2244_v33 = vsel %vm12955_vm6, %v2202_v24, %v1520_v59 }
 0x1f7   : > { %v2842_v63 = vadd.f32 %v10023_v38, %v2799_v49  ;;  %1661 = vrot.lane.b32.xlu1 %v10089_v12, %s12993_s0  ;;  %1083 = vrot.lane.b32.xlu0 %v10028_v2, %s12988_s27  ;;  %v10163_v49 = vld [vmem:[%s9036_s18 + $0x10c] sm:$0xff] }
 0x1f8   : > { %8356 = vmatmul.mubr.msk.f32.gmra.mxu0 %vm12951_vm10, %v2369_v9 }
 0x1f9   : > { %vm2878_vm13 = vcmp.gt.f32.partialorder %v2842_v63, 0.0  ;;  %v2914_v22 = vmul.f32 0.01, %v2842_v63  ;;  %v1646_v15 = vpop.permute.xlu1 %1645  ;;  %v1068_v35 = vpop.permute.xlu0 %1067  ;;  %8358 = vmatprep.mubr.msk.f32.mxu0 %vm8897_vm3, %v12987_v52 }
 0x1fa   : > { %v2286_v46 = vsel %vm2266_vm7, %v2244_v33, %v1646_v15 }
 0x1fb   : > { %v2950_v2 = vsel %vm2878_vm13, %v2842_v63, %v2914_v22  ;;  %1825 = vrot.lane.b32.xlu1 %v767_v27, %s12990_s21  ;;  %1209 = vrot.lane.b32.xlu0 %v10103_v3, %s12996_s1  ;;  %vm12945_vm13 = vcmask 31748   ;;  %v769_v27 = vld [vmem:[%s9036_s18 + $0x10d] sm:$0xff]  ;;  %v10177_v22 = vld [vmem:[%s9036_s18 + $0x102] sm:$0xff] }
 0x1fc   : > { %2987 = vst.msk [vmem:[#allocation2 + $0x23] sm:$0xfc] %vm2986_vm14, %v2950_v2 }
 0x1fd   : > { %v1810_v50 = vpop.permute.xlu1 %1809  ;;  %v1194_v29 = vpop.permute.xlu0 %1193 }
 0x1fe   : > { %v2328_v18 = vsel %vm12952_vm8, %v2286_v46, %v1810_v50 }
 0x1ff   : > { %1989 = vrot.lane.b32.xlu1 %v808_v0, %s12991_s28  ;;  %1373 = vrot.lane.b32.xlu0 %v683_v13, %s12992_s25  ;;  %v685_v0 = vld [vmem:[%s9036_s18 + $0x103] sm:$0xff] }
 0x200   : > { %v2606_v10 = vpop.f32.mrf.mxu0 }
 0x201   : > { %v2800_v31 = vmul.f32 %v10014_v32, %v2606_v10  ;;  %v1974_v7 = vpop.permute.xlu1 %1973  ;;  %v1358_v4 = vpop.permute.xlu0 %1357 }
 0x202   : > { %v2370_v20 = vsel %vm2350_vm9, %v2328_v18, %v1974_v7  ;;  %v8312_v42 = vpop.f32.mrf.mxu0 }
 0x203   : > { %v2843_v51 = vadd.f32 %v10023_v38, %v2800_v31  ;;  %1085 = vrot.lane.b32.xlu1 %v10058_v17, %s12988_s27  ;;  %1537 = vrot.lane.b32.xlu0 %v10061_v26, %s12989_s26  ;;  %v549_v17 = vld [vmem:[%s9036_s18 + $0xa0] sm:$0xff] }
 0x204   : > { %8359 = vmatmul.mubr.msk.f32.gmra.mxu0 %vm12951_vm10, %v2370_v20  ;;  %v684_v26 = vld [vmem:[%s9036_s18 + $0xfb] sm:$0xff]  ;;  %v2078_v28 = vsel %vm12957_vm0, %v549_v17, %v9435_v37 }
 0x205   : > { %vm2879_vm15 = vcmp.gt.f32.partialorder %v2843_v51, 0.0  ;;  %v2915_v58 = vmul.f32 0.01, %v2843_v51  ;;  %v1070_v14 = vpop.permute.xlu1 %1069  ;;  %v1522_v1 = vpop.permute.xlu0 %1521  ;;  %8361 = vmatprep.mubr.msk.f32.mxu0 %vm8897_vm3, %v12987_v52  ;;  %v2119_v23 = vsel %vm512_vm1, %v2078_v28, %v1068_v35  ;;  %v770_v17 = vld [vmem:[%s9036_s18 + $0x115] sm:$0xff] }
 0x206   : > { %v2161_v5 = vsel %vm12956_vm4, %v2119_v23, %v1194_v29 }
 0x207   : > { %v2951_v60 = vsel %vm2879_vm15, %v2843_v51, %v2915_v58  ;;  %1211 = vrot.lane.b32.xlu1 %v10132_v56, %s12996_s1  ;;  %1663 = vrot.lane.b32.xlu0 %v10135_v21, %s12993_s0  ;;  %v2203_v34 = vsel %vm2182_vm5, %v2161_v5, %v1358_v4  ;;  %v10206_v51 = vld [vmem:[%s9036_s18 + $0x10a] sm:$0xff]  ;;  %v10209_v58 = vld [vmem:[%s9036_s18 + $0x114] sm:$0xff] }
 0x208   : > { %2988 = vst.msk [vmem:[#allocation2 + $0x2b] sm:$0xff] %vm12957_vm0, %v2951_v60  ;;  %v2245_v37 = vsel %vm12955_vm6, %v2203_v34, %v1522_v1  ;;  %v686_v60 = vld [vmem:[%s9036_s18 + $0x10b] sm:$0xff] }
 0x209   : > { %v1196_v62 = vpop.permute.xlu1 %1195  ;;  %v1648_v45 = vpop.permute.xlu0 %1647 }
 0x20a   : > { %v2287_v19 = vsel %vm2266_vm7, %v2245_v37, %v1648_v45 }
 0x20b   : > { %1375 = vrot.lane.b32.xlu1 %v684_v26, %s12992_s25  ;;  %1827 = vrot.lane.b32.xlu0 %v768_v6, %s12990_s21 }
 0x20c   : > { %v2611_v8 = vpop.f32.mrf.mxu0 }
 0x20d   : > { %v2801_v55 = vmul.f32 %v10014_v32, %v2611_v8  ;;  %v1360_v57 = vpop.permute.xlu1 %1359  ;;  %v1812_v54 = vpop.permute.xlu0 %1811 }
 0x20e   : > { %v8315_v30 = vpop.f32.mrf.mxu0  ;;  %v2329_v16 = vsel %vm12952_vm8, %v2287_v19, %v1812_v54 }
 0x20f   : > { %v2844_v25 = vadd.f32 %v10023_v38, %v2801_v55  ;;  %1539 = vrot.lane.b32.xlu1 %v10089_v12, %s12989_s26  ;;  %1991 = vrot.lane.b32.xlu0 %v809_v48, %s12991_s28  ;;  %v550_v12 = vld [vmem:[%s9036_s18 + $0xa8] sm:$0xff]  ;;  %v811_v48 = vld [vmem:[%s9036_s18 + $0x116] sm:$0xff] }
 0x210   : > { %v2079_v61 = vsel %vm12957_vm0, %v550_v12, %v9433_v36 }
 0x211   : > { %vm2880_vm12 = vcmp.gt.f32.partialorder %v2844_v25, 0.0  ;;  %v2916_v59 = vmul.f32 0.01, %v2844_v25  ;;  %v1524_v9 = vpop.permute.xlu1 %1523  ;;  %v1976_v53 = vpop.permute.xlu0 %1975 }
 0x212   : > { %v2371_v63 = vsel %vm2350_vm9, %v2329_v16, %v1976_v53 }
 0x213   : > { %v2952_v11 = vsel %vm2880_vm12, %v2844_v25, %v2916_v59  ;;  %1665 = vrot.lane.b32.xlu1 %v10163_v49, %s12993_s0  ;;  %1087 = vrot.lane.b32.xlu0 %v10103_v3, %s12988_s27  ;;  %v2120_v3 = vsel %vm512_vm1, %v2079_v61, %v1070_v14  ;;  %vm2994_vm12 = vcmask 27648   ;;  %v10238_v25 = vld [vmem:[%s9036_s18 + $0x11c] sm:$0xff] }
 0x214   : > { %2990 = vst.msk [vmem:[#allocation2 + $0x33] sm:$0x3] %vm2989_vm11, %v2952_v11  ;;  %8362 = vmatmul.mubr.msk.f32.gmra.mxu0 %vm12951_vm10, %v2371_v63  ;;  %v2162_v13 = vsel %vm12956_vm4, %v2120_v3, %v1196_v62  ;;  %v771_v63 = vld [vmem:[%s9036_s18 + $0x11d] sm:$0xff] }
 0x215   : > { %2992 = vst.msk [vmem:[#allocation2 + $0x33] sm:$0xf0] %vm12945_vm13, %v2952_v11  ;;  %v1650_v15 = vpop.permute.xlu1 %1649  ;;  %v1072_v35 = vpop.permute.xlu0 %1071  ;;  %8364 = vmatprep.mubr.msk.f32.mxu0 %vm8897_vm3, %v12987_v52  ;;  %v2204_v24 = vsel %vm2182_vm5, %v2162_v13, %v1360_v57  ;;  %vm12946_vm13 = vcmask 31750   ;;  %v10250_v11 = vld [vmem:[%s9036_s18 + $0x112] sm:$0xff] }
 0x216   : > { %v2246_v36 = vsel %vm12955_vm6, %v2204_v24, %v1524_v9 }
 0x217   : > { %1829 = vrot.lane.b32.xlu1 %v769_v27, %s12990_s21  ;;  %1213 = vrot.lane.b32.xlu0 %v10177_v22, %s12996_s1  ;;  %v2288_v10 = vsel %vm2266_vm7, %v2246_v36, %v1650_v15 }
 0x218   : > { %v2616_v2 = vpop.f32.mrf.mxu0 }
 0x219   : > { %v2802_v47 = vmul.f32 %v10014_v32, %v2616_v2  ;;  %v1814_v50 = vpop.permute.xlu1 %1813  ;;  %v1198_v29 = vpop.permute.xlu0 %1197  ;;  %v812_v2 = vld [vmem:[%s9036_s18 + $0x11e] sm:$0xff] }
 0x21a   : > { %v8318_v33 = vpop.f32.mrf.mxu0  ;;  %v2330_v31 = vsel %vm12952_vm8, %v2288_v10, %v1814_v50 }
 0x21b   : > { %v2845_v46 = vadd.f32 %v10023_v38, %v2802_v47  ;;  %1993 = vrot.lane.b32.xlu1 %v810_v41, %s12991_s28  ;;  %1377 = vrot.lane.b32.xlu0 %v685_v0, %s12992_s25  ;;  %v687_v41 = vld [vmem:[%s9036_s18 + $0x113] sm:$0xff] }
 0x21d   : > { %vm2881_vm15 = vcmp.gt.f32.partialorder %v2845_v46, 0.0  ;;  %v2917_v18 = vmul.f32 0.01, %v2845_v46  ;;  %v1978_v7 = vpop.permute.xlu1 %1977  ;;  %v1362_v4 = vpop.permute.xlu0 %1361 }
 0x21e   : > { %v2372_v20 = vsel %vm2350_vm9, %v2330_v31, %v1978_v7  ;;  %v10279_v7 = vld [vmem:[%s9036_s18 + $0x11a] sm:$0xff] }
 0x21f   : > { %v2953_v42 = vsel %vm2881_vm15, %v2845_v46, %v2917_v18  ;;  %1089 = vrot.lane.b32.xlu1 %v10132_v56, %s12988_s27  ;;  %1541 = vrot.lane.b32.xlu0 %v10135_v21, %s12989_s26  ;;  %v551_v56 = vld [vmem:[%s9036_s18 + $0xb0] sm:$0xff] }
 0x220   : > { %2993 = vst.msk [vmem:[#allocation2 + $0x3b] sm:$0xff] %vm12957_vm0, %v2953_v42  ;;  %8365 = vmatmul.mubr.msk.f32.gmra.mxu0 %vm12951_vm10, %v2372_v20  ;;  %v2080_v28 = vsel %vm12957_vm0, %v551_v56, %v9442_v40  ;;  %v688_v56 = vld [vmem:[%s9036_s18 + $0x11b] sm:$0xff] }
 0x221   : > { %v1074_v14 = vpop.permute.xlu1 %1073  ;;  %v1526_v1 = vpop.permute.xlu0 %1525  ;;  %8367 = vmatprep.mubr.msk.f32.mxu0 %vm8897_vm3, %v12987_v52  ;;  %v2121_v8 = vsel %vm512_vm1, %v2080_v28, %v1072_v35  ;;  %v813_v28 = vld [vmem:[%s9036_s18 + $0x126] sm:$0xff] }
 0x222   : > { %v2163_v5 = vsel %vm12956_vm4, %v2121_v8, %v1198_v29 }
 0x223   : > { %1215 = vrot.lane.b32.xlu1 %v10206_v51, %s12996_s1  ;;  %1667 = vrot.lane.b32.xlu0 %v10209_v58, %s12993_s0  ;;  %v2205_v40 = vsel %vm2182_vm5, %v2163_v5, %v1362_v4  ;;  %v10282_v4 = vld [vmem:[%s9036_s18 + $0x124] sm:$0xff] }
 0x224   : > { %v2621_v21 = vpop.f32.mrf.mxu0  ;;  %v2247_v34 = vsel %vm12955_vm6, %v2205_v40, %v1526_v1 }
 0x225   : > { %v2803_v26 = vmul.f32 %v10014_v32, %v2621_v21  ;;  %v1200_v6 = vpop.permute.xlu1 %1199  ;;  %v1652_v62 = vpop.permute.xlu0 %1651  ;;  %v772_v21 = vld [vmem:[%s9036_s18 + $0x125] sm:$0xff] }
 0x226   : > { %v8321_v45 = vpop.f32.mrf.mxu0  ;;  %v2289_v37 = vsel %vm2266_vm7, %v2247_v34, %v1652_v62 }
 0x227   : > { %v2846_v23 = vadd.f32 %v10023_v38, %v2803_v26  ;;  %1379 = vrot.lane.b32.xlu1 %v686_v60, %s12992_s25  ;;  %1831 = vrot.lane.b32.xlu0 %v770_v17, %s12990_s21 }
 0x229   : > { %vm2882_vm15 = vcmp.gt.f32.partialorder %v2846_v23, 0.0  ;;  %v2918_v55 = vmul.f32 0.01, %v2846_v23  ;;  %v1364_v57 = vpop.permute.xlu1 %1363  ;;  %v1816_v54 = vpop.permute.xlu0 %1815 }
 0x22a   : > { %v2331_v19 = vsel %vm12952_vm8, %v2289_v37, %v1816_v54  ;;  %v10310_v54 = vld [vmem:[%s9036_s18 + $0x12c] sm:$0xff] }
 0x22b   : > { %v2954_v30 = vsel %vm2882_vm15, %v2846_v23, %v2918_v55  ;;  %1543 = vrot.lane.b32.xlu1 %v10163_v49, %s12989_s26  ;;  %1995 = vrot.lane.b32.xlu0 %v811_v48, %s12991_s28  ;;  %v552_v49 = vld [vmem:[%s9036_s18 + $0xb8] sm:$0xff] }
 0x22c   : > { %2995 = vst.msk [vmem:[#allocation2 + $0x43] sm:$0xf] %vm2994_vm12, %v2954_v30 }
 0x22d   : > { %2997 = vst.msk [vmem:[#allocation2 + $0x43] sm:$0xc0] %vm12946_vm13, %v2954_v30  ;;  %v1528_v59 = vpop.permute.xlu1 %1527  ;;  %v1980_v16 = vpop.permute.xlu0 %1979  ;;  %vm2999_vm13 = vcmask 29696  }
 0x22e   : > { %v2373_v9 = vsel %vm2350_vm9, %v2331_v19, %v1980_v16  ;;  %v554_v16 = vld [vmem:[%s9036_s18 + $0xc8] sm:$0xff] }
 0x22f   : > { %1669 = vrot.lane.b32.xlu1 %v10238_v25, %s12993_s0  ;;  %1091 = vrot.lane.b32.xlu0 %v10177_v22, %s12988_s27  ;;  %v2081_v22 = vsel %vm12957_vm0, %v552_v49, %v9440_v39  ;;  %v647_v49 = vld [vmem:[%s9036_s18 + $0x122] sm:$0xff] }
 0x230   : > { %v2626_v53 = vpop.f32.mrf.mxu0  ;;  %8368 = vmatmul.mubr.msk.f32.gmra.mxu0 %vm12951_vm10, %v2373_v9  ;;  %v2122_v3 = vsel %vm512_vm1, %v2081_v22, %v1074_v14  ;;  %v773_v9 = vld [vmem:[%s9036_s18 + $0x12d] sm:$0xff]  ;;  %v689_v22 = vld [vmem:[%s9036_s18 + $0x123] sm:$0xff] }
 0x231   : > { %v2804_v12 = vmul.f32 %v10014_v32, %v2626_v53  ;;  %v1654_v27 = vpop.permute.xlu1 %1653  ;;  %v1076_v15 = vpop.permute.xlu0 %1075  ;;  %8370 = vmatprep.mubr.msk.f32.mxu0 %vm8897_vm3, %v12987_v52  ;;  %v2164_v0 = vsel %vm12956_vm4, %v2122_v3, %v1200_v6 }
 0x232   : > { %v8324_v35 = vpop.f32.mrf.mxu0  ;;  %v2206_v39 = vsel %vm2182_vm5, %v2164_v0, %v1364_v57 }
 0x233   : > { %v2847_v61 = vadd.f32 %v10023_v38, %v2804_v12  ;;  %1833 = vrot.lane.b32.xlu1 %v771_v63, %s12990_s21  ;;  %1217 = vrot.lane.b32.xlu0 %v10250_v11, %s12996_s1  ;;  %v2248_v29 = vsel %vm12955_vm6, %v2206_v39, %v1528_v59  ;;  %v814_v35 = vld [vmem:[%s9036_s18 + $0x12e] sm:$0xff] }
 0x234   : > { %v2290_v33 = vsel %vm2266_vm7, %v2248_v29, %v1654_v27  ;;  %v2083_v27 = vsel %vm12957_vm0, %v554_v16, %v9449_v43 }
 0x235   : > { %vm2883_vm15 = vcmp.gt.f32.partialorder %v2847_v61, 0.0  ;;  %v2919_v13 = vmul.f32 0.01, %v2847_v61  ;;  %v1818_v47 = vpop.permute.xlu1 %1817  ;;  %v1202_v50 = vpop.permute.xlu0 %1201 }
 0x236   : > { %v2332_v36 = vsel %vm12952_vm8, %v2290_v33, %v1818_v47 }
 0x237   : > { %v2955_v24 = vsel %vm2883_vm15, %v2847_v61, %v2919_v13  ;;  %1997 = vrot.lane.b32.xlu1 %v812_v2, %s12991_s28  ;;  %1381 = vrot.lane.b32.xlu0 %v687_v41, %s12992_s25 }
 0x238   : > { %2998 = vst.msk [vmem:[#allocation2 + $0x4b] sm:$0xff] %vm12957_vm0, %v2955_v24 }
 0x239   : > { %v1982_v46 = vpop.permute.xlu1 %1981  ;;  %v1366_v10 = vpop.permute.xlu0 %1365 }
 0x23a   : > { %v2374_v18 = vsel %vm2350_vm9, %v2332_v36, %v1982_v46  ;;  %v648_v46 = vld [vmem:[%s9036_s18 + $0x12a] sm:$0xff] }
 0x23b   : > { %1093 = vrot.lane.b32.xlu1 %v10206_v51, %s12988_s27  ;;  %1545 = vrot.lane.b32.xlu0 %v10209_v58, %s12989_s26  ;;  %v553_v58 = vld [vmem:[%s9036_s18 + $0xc0] sm:$0xff] }
 0x23c   : > { %v2631_v31 = vpop.f32.mrf.mxu0  ;;  %8371 = vmatmul.mubr.msk.f32.gmra.mxu0 %vm12951_vm10, %v2374_v18  ;;  %v2082_v6 = vsel %vm12957_vm0, %v553_v58, %v9451_v44  ;;  %v12997_v58 = vld [vmem:[#allocation14_spill] sm:$0xff] }
 0x23d   : > { %v2805_v20 = vmul.f32 %v10014_v32, %v2631_v31  ;;  %v1078_v42 = vpop.permute.xlu1 %1077  ;;  %v1530_v14 = vpop.permute.xlu0 %1529  ;;  %8373 = vmatprep.mubr.msk.f32.mxu0 %vm8897_vm3, %v12987_v52  ;;  %v2123_v45 = vsel %vm512_vm1, %v2082_v6, %v1076_v15 }
 0x23e   : > { %v8327_v1 = vpop.f32.mrf.mxu0  ;;  %v2165_v23 = vsel %vm12956_vm4, %v2123_v45, %v1202_v50 }
 0x23f   : > { %v2848_v51 = vadd.f32 %v10023_v38, %v2805_v20  ;;  %1219 = vrot.lane.b32.xlu1 %v10279_v7, %s12996_s1  ;;  %1671 = vrot.lane.b32.xlu0 %v10282_v4, %s12993_s0  ;;  %v2207_v5 = vsel %vm2182_vm5, %v2165_v23, %v1366_v10  ;;  %v732_v10 = vld [vmem:[%s9036_s18 + $0x134] sm:$0xff] }
 0x240   : > { %v2249_v44 = vsel %vm12955_vm6, %v2207_v5, %v1530_v14  ;;  %v774_v14 = vld [vmem:[%s9036_s18 + $0x135] sm:$0xff] }
 0x241   : > { %vm2884_vm15 = vcmp.gt.f32.partialorder %v2848_v51, 0.0  ;;  %v2920_v60 = vmul.f32 0.01, %v2848_v51  ;;  %v1204_v17 = vpop.permute.xlu1 %1203  ;;  %v1656_v26 = vpop.permute.xlu0 %1655 }
 0x242   : > { %v2291_v55 = vsel %vm2266_vm7, %v2249_v44, %v1656_v26  ;;  %v775_v44 = vld [vmem:[%s9036_s18 + $0x13d] sm:$0xff] }
 0x243   : > { %v2956_v62 = vsel %vm2884_vm15, %v2848_v51, %v2920_v60  ;;  %1383 = vrot.lane.b32.xlu1 %v688_v56, %s12992_s25  ;;  %1835 = vrot.lane.b32.xlu0 %v772_v21, %s12990_s21 }
 0x244   : > { %3000 = vst.msk [vmem:[#allocation2 + $0x53] sm:$0x3f] %vm2999_vm13, %v2956_v62 }
 0x245   : > { %v1368_v8 = vpop.permute.xlu1 %1367  ;;  %v1820_v48 = vpop.permute.xlu0 %1819 }
 0x246   : > { %v2333_v40 = vsel %vm12952_vm8, %v2291_v55, %v1820_v48  ;;  %v733_v55 = vld [vmem:[%s9036_s18 + $0x13c] sm:$0xff] }
 0x247   : > { %1547 = vrot.lane.b32.xlu1 %v10238_v25, %s12989_s26  ;;  %1999 = vrot.lane.b32.xlu0 %v813_v28, %s12991_s28 }
 0x248   : > { %v2636_v57 = vpop.f32.mrf.mxu0 }
 0x249   : > { %v2806_v34 = vmul.f32 %v10014_v32, %v2636_v57  ;;  %v1532_v30 = vpop.permute.xlu1 %1531  ;;  %v1984_v37 = vpop.permute.xlu0 %1983 }
 0x24a   : > { %v2375_v19 = vsel %vm2350_vm9, %v2333_v40, %v1984_v37  ;;  %v8330_v59 = vpop.f32.mrf.mxu0 }
 0x24b   : > { %v2849_v25 = vadd.f32 %v10023_v38, %v2806_v34  ;;  %1673 = vrot.lane.b32.xlu1 %v10310_v54, %s12993_s0  ;;  %1095 = vrot.lane.b32.xlu0 %v10250_v11, %s12988_s27  ;;  %v2124_v11 = vsel %vm512_vm1, %v2083_v27, %v1078_v42  ;;  %v3075_v59 = vld [vmem:[#allocation2 + $0x1] sm:$0xff] }
 0x24c   : > { %8374 = vmatmul.mubr.msk.f32.gmra.mxu0 %vm12951_vm10, %v2375_v19  ;;  %v2166_v61 = vsel %vm12956_vm4, %v2124_v11, %v1204_v17  ;;  %v815_v17 = vld [vmem:[%s9036_s18 + $0x136] sm:$0xff]  ;;  %v3116_v27 = vld [vmem:[#allocation2 + $0x2] sm:$0xff] }
 0x24d   : > { %vm2885_vm15 = vcmp.gt.f32.partialorder %v2849_v25, 0.0  ;;  %v2921_v53 = vmul.f32 0.01, %v2849_v25  ;;  %v1658_v63 = vpop.permute.xlu1 %1657  ;;  %v1080_v12 = vpop.permute.xlu0 %1079  ;;  %8376 = vmatprep.mubr.msk.f32.mxu0 %vm8897_vm3, %v12987_v52  ;;  %v2208_v41 = vsel %vm2182_vm5, %v2166_v61, %v1368_v8 }
 0x24e   : > { %v2250_v43 = vsel %vm12955_vm6, %v2208_v41, %v1532_v30 }
 0x24f   : > { %v2957_v15 = vsel %vm2885_vm15, %v2849_v25, %v2921_v53  ;;  %1837 = vrot.lane.b32.xlu1 %v773_v9, %s12990_s21  ;;  %1221 = vrot.lane.b32.xlu0 %v647_v49, %s12996_s1  ;;  %v2292_v0 = vsel %vm2266_vm7, %v2250_v43, %v1658_v63  ;;  %v816_v25 = vld [vmem:[%s9036_s18 + $0x13e] sm:$0xff]  ;;  %v12998_v49 = vld [vmem:[#allocation13_spill] sm:$0xff] }
 0x250   : > { %3001 = vst.msk [vmem:[#allocation2 + $0x5b] sm:$0xff] %vm12957_vm0, %v2957_v15 }
 0x251   : > { %v1822_v3 = vpop.permute.xlu1 %1821  ;;  %v1206_v2 = vpop.permute.xlu0 %1205 }
 0x252   : > { %v2334_v47 = vsel %vm12952_vm8, %v2292_v0, %v1822_v3  ;;  %v4895_v0 = vld [vmem:[%s12915_s4 + $0x20] sm:$0xf] }
 0x253   : > { %2001 = vrot.lane.b32.xlu1 %v814_v35, %s12991_s28  ;;  %1385 = vrot.lane.b32.xlu0 %v689_v22, %s12992_s25 }
 0x254   : > { %v2641_v13 = vpop.f32.mrf.mxu0  ;;  %8425 = vmatpush3.msk.msra.mxu1 %vm12950_vm2, %v4895_v0  ;;  %vm13001_vm2 = vcmask 31748  }
 0x255   : > { %v2807_v50 = vmul.f32 %v10014_v32, %v2641_v13  ;;  %v1986_v39 = vpop.permute.xlu1 %1985  ;;  %v1370_v29 = vpop.permute.xlu0 %1369  ;;  %8426 = vmatprep.subr.mxu1 %v12987_v52 }
 0x256   : > { %v2376_v24 = vsel %vm2350_vm9, %v2334_v47, %v1986_v39  ;;  %v8333_v33 = vpop.f32.mrf.mxu0 }
 0x257   : > { %v2850_v36 = vadd.f32 %v10023_v38, %v2807_v50  ;;  %1097 = vrot.lane.b32.xlu1 %v10279_v7, %s12988_s27  ;;  %1549 = vrot.lane.b32.xlu0 %v10282_v4, %s12989_s26  ;;  %v555_v7 = vld [vmem:[%s9036_s18 + $0xd0] sm:$0xff]  ;;  %v4894_v33 = vld [vmem:[%s12915_s4 + $0x18] sm:$0xff] }
 0x258   : > { %8377 = vmatmul.mubr.msk.f32.gmra.mxu0 %vm12951_vm10, %v2376_v24  ;;  %v690_v4 = vld [vmem:[%s9036_s18 + $0x12b] sm:$0xff]  ;;  %v2084_v56 = vsel %vm12957_vm0, %v555_v7, %v12997_v58  ;;  %8427 = vmatpush3.msra.mxu1 %v4894_v33 }
 0x259   : > { %vm2886_vm15 = vcmp.gt.f32.partialorder %v2850_v36, 0.0  ;;  %v2922_v18 = vmul.f32 0.01, %v2850_v36  ;;  %v1082_v31 = vpop.permute.xlu1 %1081  ;;  %v1534_v20 = vpop.permute.xlu0 %1533  ;;  %8379 = vmatprep.mubr.msk.f32.mxu0 %vm8897_vm3, %v12987_v52  ;;  %v2125_v21 = vsel %vm512_vm1, %v2084_v56, %v1080_v12  ;;  %v3076_v24 = vld [vmem:[#allocation2 + $0x9] sm:$0xff]  ;;  %8428 = vmatprep.subr.mxu1 %v12987_v52 }
 0x25a   : > { %v2167_v26 = vsel %vm12956_vm4, %v2125_v21, %v1206_v2  ;;  %v10396_v2 = vld [vmem:[#allocation2 + $0x12] sm:$0xff]  ;;  %v4892_v7 = vld [vmem:[%s12915_s4 + $0x8] sm:$0xff] }
 0x25b   : > { %v2958_v42 = vsel %vm2886_vm15, %v2850_v36, %v2922_v18  ;;  %1223 = vrot.lane.b32.xlu1 %v648_v46, %s12996_s1  ;;  %1675 = vrot.lane.b32.xlu0 %v732_v10, %s12993_s0  ;;  %v2209_v28 = vsel %vm2182_vm5, %v2167_v26, %v1370_v29  ;;  %v3160_v46 = vld [vmem:[#allocation2 + $0x13] sm:$0xff]  ;;  %v13000_v26 = vld [vmem:[#allocation16_spill] sm:$0xff] }
 0x25c   : > { %3002 = vst.msk [vmem:[#allocation2 + $0x63] sm:$0xff] %vm12957_vm0, %v2958_v42  ;;  %v2251_v8 = vsel %vm12955_vm6, %v2209_v28, %v1534_v20  ;;  %v4893_v18 = vld [vmem:[%s12915_s4 + $0x10] sm:$0xff] }
 0x25d   : > { %v1208_v1 = vpop.permute.xlu1 %1207  ;;  %v1660_v51 = vpop.permute.xlu0 %1659  ;;  %v3117_v42 = vld [vmem:[#allocation2 + $0xa] sm:$0xff]  ;;  %8429 = vmatpush3.msra.mxu1 %v4893_v18  ;;  %v10500_v18 = vld [vmem:[%s12994_s2] ss:$0 sm:$0xff] }
 0x25e   : > { %v2293_v5 = vsel %vm2266_vm7, %v2251_v8, %v1660_v51  ;;  %8430 = vmatprep.subr.mxu1 %v12987_v52 }
 0x25f   : > { %1387 = vrot.lane.b32.xlu1 %v690_v4, %s12992_s25  ;;  %1839 = vrot.lane.b32.xlu0 %v774_v14, %s12990_s21  ;;  %v3201_v4 = vld [vmem:[#allocation2 + $0x14] sm:$0xff]  ;;  %v4891_v14 = vld [vmem:[%s12915_s4] sm:$0xff] }
 0x260   : > { %v2646_v60 = vpop.f32.mrf.mxu0  ;;  %8431 = vmatpush3.msra.mxu1 %v4892_v7 }
 0x261   : > { %v2808_v6 = vmul.f32 %v10014_v32, %v2646_v60  ;;  %v1372_v62 = vpop.permute.xlu1 %1371  ;;  %v1824_v45 = vpop.permute.xlu0 %1823  ;;  %8432 = vmatprep.subr.mxu1 %v12987_v52 }
 0x262   : > { %v8336_v23 = vpop.f32.mrf.mxu0  ;;  %v2335_v40 = vsel %vm12952_vm8, %v2293_v5, %v1824_v45  ;;  %8433 = vmatpush3.msra.mxu1 %v4891_v14  ;;  %v10443_v45 = vld [vmem:[#allocation2 + $0x1a] sm:$0xff] }
 0x263   : > { %v2851_v48 = vadd.f32 %v10023_v38, %v2808_v6  ;;  %1551 = vrot.lane.b32.xlu1 %v10310_v54, %s12989_s26  ;;  %2003 = vrot.lane.b32.xlu0 %v815_v17, %s12991_s28  ;;  %v556_v54 = vld [vmem:[%s9036_s18 + $0xd8] sm:$0xff]  ;;  %v10438_v17 = vld [vmem:[#allocation2 + $0x24] sm:$0xff]  ;;  %v10506_v14 = vld [vmem:[%s12995_s3] ss:$0 sm:$0xff] }
 0x264   : > { %v2085_v53 = vsel %vm12957_vm0, %v556_v54, %v12998_v49  ;;  %8635 = vmatprep.subr.mxu1 %v12987_v52 }
 0x265   : > { %vm2887_vm15 = vcmp.gt.f32.partialorder %v2851_v48, 0.0  ;;  %v2923_v57 = vmul.f32 0.01, %v2851_v48  ;;  %v1536_v34 = vpop.permute.xlu1 %1535  ;;  %v1988_v30 = vpop.permute.xlu0 %1987  ;;  %v2126_v63 = vsel %vm512_vm1, %v2085_v53, %v1082_v31 }
 0x266   : > { %v2377_v37 = vsel %vm2350_vm9, %v2335_v40, %v1988_v30  ;;  %v2168_v15 = vsel %vm12956_vm4, %v2126_v63, %v1208_v1  ;;  %v557_v1 = vld [vmem:[%s9036_s18 + $0xe0] sm:$0xff] }
 0x267   : > { %v2959_v19 = vsel %vm2887_vm15, %v2851_v48, %v2923_v57  ;;  %1841 = vrot.lane.b32.xlu1 %v775_v44, %s12990_s21  ;;  %1677 = vrot.lane.b32.xlu0 %v733_v55, %s12993_s0  ;;  %v2210_v61 = vsel %vm2182_vm5, %v2168_v15, %v1372_v62  ;;  %v2086_v6 = vsel %vm12957_vm0, %v557_v1, %v13000_v26  ;;  %v3245_v55 = vld [vmem:[#allocation2 + $0x25] sm:$0xff]  ;;  %v3202_v15 = vld [vmem:[#allocation2 + $0x1c] sm:$0xff] }
 0x268   : > { %3003 = vst.msk [vmem:[#allocation2 + $0x6b] sm:$0xfc] %vm2986_vm14, %v2959_v19  ;;  %8380 = vmatmul.mubr.msk.f32.gmra.mxu0 %vm12951_vm10, %v2377_v37  ;;  %v2252_v41 = vsel %vm12955_vm6, %v2210_v61, %v1536_v34  ;;  %v3161_v34 = vld [vmem:[#allocation2 + $0x1b] sm:$0xff] }
 0x269   : > { %v1662_v16 = vpop.permute.xlu1 %1661  ;;  %v10384_v9 = vpop.permute.xlu0 %1083  ;;  %8382 = vmatprep.mubr.msk.f32.mxu0 %vm8897_vm3, %v12987_v52  ;;  %v13003_v26 = vld [vmem:[#allocation18_spill] sm:$0xff] }
 0x26a   : > { %v2294_v13 = vsel %vm2266_vm7, %v2252_v41, %v1662_v16  ;;  %v2127_v28 = vsel %vm512_vm1, %v2086_v6, %v10384_v9  ;;  %v3077_v16 = vld [vmem:[#allocation2 + $0x11] sm:$0xff]  ;;  %v558_v9 = vld [vmem:[%s9036_s18 + $0xe8] sm:$0xff] }
 0x26b   : > { %3368 = vrot.lane.b32.xlu1 %v3075_v59, %s12999_s15  ;;  %2005 = vrot.lane.b32.xlu0 %v816_v25, %s12991_s28  ;;  %v3286_v25 = vld [vmem:[#allocation2 + $0x26] sm:$0xff] }
 0x26c   : > { %v2651_v12 = vpop.f32.mrf.mxu0 }
 0x26d   : > { %v2809_v11 = vmul.f32 %v10014_v32, %v2651_v12  ;;  %v1826_v35 = vpop.permute.xlu1 %1825  ;;  %v1210_v22 = vpop.permute.xlu0 %1209 }
 0x26e   : > { %v8339_v3 = vpop.f32.mrf.mxu0  ;;  %v2336_v50 = vsel %vm12952_vm8, %v2294_v13, %v1826_v35  ;;  %v2169_v23 = vsel %vm12956_vm4, %v2127_v28, %v1210_v22  ;;  %v10479_v13 = vld [vmem:[#allocation2 + $0x2c] sm:$0xff] }
 0x26f   : > { %v2852_v43 = vadd.f32 %v10023_v38, %v2809_v11  ;;  %3532 = vrot.lane.b32.xlu0 %v3116_v27, %s12988_s27  ;;  %3658 = vrot.lane.b32.xlu1 %v10396_v2, %s12996_s1  ;;  %v13002_v11 = vld [vmem:[#allocation15_spill] sm:$0xff] }
 0x270   : > { %v2087_v35 = vsel %vm12957_vm0, %v558_v9, %v13002_v11  ;;  %v560_v9 = vld [vmem:[%s9036_s18 + $0xf8] sm:$0xff] }
 0x271   : > { %vm2888_vm15 = vcmp.gt.f32.partialorder %v2852_v43, 0.0  ;;  %v2924_v47 = vmul.f32 0.01, %v2852_v43  ;;  %v1990_v39 = vpop.permute.xlu1 %1989  ;;  %v1374_v29 = vpop.permute.xlu0 %1373 }
 0x272   : > { %v2378_v36 = vsel %vm2350_vm9, %v2336_v50, %v1990_v39  ;;  %v2211_v44 = vsel %vm2182_vm5, %v2169_v23, %v1374_v29  ;;  %v10482_v50 = vld [vmem:[#allocation2 + $0x22] sm:$0xff] }
 0x273   : > { %v2960_v10 = vsel %vm2888_vm15, %v2852_v43, %v2924_v47  ;;  %8383 = vmatmul.mubr.msk.f32.gmra.mxu0 %vm12951_vm10, %v2378_v36  ;;  %3822 = vrot.lane.b32.xlu0 %v3160_v46, %s12992_s25  ;;  %v3246_v36 = vld [vmem:[#allocation2 + $0x2d] sm:$0xff]  ;;  %v3162_v46 = vld [vmem:[#allocation2 + $0x23] sm:$0xff] }
 0x274   : > { %3004 = vst.msk [vmem:[#allocation2 + $0x73] sm:$0xff] %vm12957_vm0, %v2960_v10  ;;  %3370 = vrot.lane.b32.xlu1 %v3076_v24, %s12999_s15  ;;  %8385 = vmatprep.mubr.msk.f32.mxu0 %vm8897_vm3, %v12987_v52 }
 0x275   : > { %v10423_v31 = vpop.permute.xlu1 %1085  ;;  %v1538_v20 = vpop.permute.xlu0 %1537 }
 0x276   : > { %v2253_v57 = vsel %vm12955_vm6, %v2211_v44, %v1538_v20  ;;  %v2128_v61 = vsel %vm512_vm1, %v2087_v35, %v10423_v31  ;;  %v10523_v44 = vld [vmem:[#allocation2 + $0x34] sm:$0xff]  ;;  %v3079_v35 = vld [vmem:[#allocation2 + $0x21] sm:$0xff] }
 0x277   : > { %3986 = vrot.lane.b32.xlu0 %v3201_v4, %s12989_s26  ;;  %v3287_v4 = vld [vmem:[#allocation2 + $0x2e] sm:$0xff] }
 0x278   : > { %3534 = vrot.lane.b32.xlu1 %v3117_v42, %s12988_s27  ;;  %v2656_v51 = vpop.f32.mrf.mxu0 }
 0x279   : > { %v2810_v58 = vmul.f32 %v10014_v32, %v2656_v51  ;;  %v1212_v56 = vpop.permute.xlu1 %1211  ;;  %v1664_v21 = vpop.permute.xlu0 %1663  ;;  %v3078_v51 = vld [vmem:[#allocation2 + $0x19] sm:$0xff] }
 0x27a   : > { %v8342_v60 = vpop.f32.mrf.mxu0  ;;  %v2295_v30 = vsel %vm2266_vm7, %v2253_v57, %v1664_v21  ;;  %v2170_v3 = vsel %vm12956_vm4, %v2128_v61, %v1212_v56 }
 0x27b   : > { %v2853_v62 = vadd.f32 %v10023_v38, %v2810_v58  ;;  %4112 = vrot.lane.b32.xlu0 %v10438_v17, %s12993_s0  ;;  %v559_v58 = vld [vmem:[%s9036_s18 + $0xf0] sm:$0xff] }
 0x27c   : > { %3660 = vrot.lane.b32.xlu1 %v10443_v45, %s12996_s1  ;;  %v2088_v6 = vsel %vm12957_vm0, %v559_v58, %v13003_v26  ;;  %v3289_v58 = vld [vmem:[#allocation2 + $0x3e] sm:$0xff] }
 0x27d   : > { %vm2889_vm15 = vcmp.gt.f32.partialorder %v2853_v62, 0.0  ;;  %v2925_v8 = vmul.f32 0.01, %v2853_v62  ;;  %v1376_v48 = vpop.permute.xlu1 %1375  ;;  %v1828_v5 = vpop.permute.xlu0 %1827 }
 0x27e   : > { %v2337_v37 = vsel %vm12952_vm8, %v2295_v30, %v1828_v5  ;;  %v2212_v0 = vsel %vm2182_vm5, %v2170_v3, %v1376_v48 }
 0x27f   : > { %v2961_v40 = vsel %vm2889_vm15, %v2853_v62, %v2925_v8  ;;  %4276 = vrot.lane.b32.xlu0 %v3245_v55, %s12990_s21 }
 0x280   : > { %3005 = vst.msk [vmem:[#allocation2 + $0x7b] sm:$0x3] %vm2989_vm11, %v2961_v40  ;;  %3824 = vrot.lane.b32.xlu1 %v3161_v34, %s12992_s25 }
 0x281   : > { %3006 = vst.msk [vmem:[#allocation2 + $0x7b] sm:$0xf0] %vm13001_vm2, %v2961_v40  ;;  %v1540_v19 = vpop.permute.xlu1 %1539  ;;  %v1992_v54 = vpop.permute.xlu0 %1991 }
 0x282   : > { %v2379_v59 = vsel %vm2350_vm9, %v2337_v37, %v1992_v54 }
 0x283   : > { %8386 = vmatmul.mubr.msk.f32.gmra.mxu0 %vm12951_vm10, %v2379_v59  ;;  %4440 = vrot.lane.b32.xlu0 %v3286_v25, %s12991_s28  ;;  %v3247_v59 = vld [vmem:[#allocation2 + $0x35] sm:$0xff] }
 0x284   : > { %3372 = vrot.lane.b32.xlu1 %v3077_v16, %s12999_s15  ;;  %v2661_v49 = vpop.f32.mrf.mxu0  ;;  %8388 = vmatprep.mubr.msk.f32.mxu0 %vm8897_vm3, %v12987_v52  ;;  %v3163_v16 = vld [vmem:[#allocation2 + $0x2b] sm:$0xff] }
 0x285   : > { %v2811_v53 = vmul.f32 %v10014_v32, %v2661_v49  ;;  %v1666_v63 = vpop.permute.xlu1 %1665  ;;  %v1088_v12 = vpop.permute.xlu0 %1087 }
 0x286   : > { %v8345_v27 = vpop.f32.mrf.mxu0  ;;  %v2129_v28 = vsel %vm512_vm1, %v2088_v6, %v1088_v12  ;;  %v3288_v12 = vld [vmem:[#allocation2 + $0x36] sm:$0xff] }
 0x287   : > { %v2854_v22 = vadd.f32 %v10023_v38, %v2811_v53  ;;  %3988 = vrot.lane.b32.xlu0 %v3202_v15, %s12989_s26  ;;  %v2254_v38 = vsel %vm12955_vm6, %v2212_v0, %v1540_v19  ;;  %v13005_v27 = vld [vmem:[#allocation17_spill] sm:$0xff] }
 0x288   : > { %3536 = vrot.lane.b32.xlu1 %v10396_v2, %s12988_s27  ;;  %v2296_v2 = vsel %vm2266_vm7, %v2254_v38, %v1666_v63  ;;  %v2089_v15 = vsel %vm12957_vm0, %v560_v9, %v13005_v27  ;;  %v13007_v9 = vld [vmem:[#allocation19_spill] sm:$0xff] }
 0x289   : > { %vm2890_vm2 = vcmp.gt.f32.partialorder %v2854_v22, 0.0  ;;  %v2926_v32 = vmul.f32 0.01, %v2854_v22  ;;  %v1830_v41 = vpop.permute.xlu1 %1829  ;;  %v1214_v43 = vpop.permute.xlu0 %1213 }
 0x28a   : > { %v2338_v39 = vsel %vm12952_vm8, %v2296_v2, %v1830_v41  ;;  %v2171_v23 = vsel %vm12956_vm4, %v2129_v28, %v1214_v43 }
 0x28b   : > { %v2962_v47 = vsel %vm2890_vm2, %v2854_v22, %v2926_v32  ;;  %4114 = vrot.lane.b32.xlu0 %v10479_v13, %s12993_s0  ;;  %vm13004_vm2 = vcmask 31750  }
 0x28c   : > { %3007 = vst.msk [vmem:[#allocation2 + $0x83] sm:$0xff] %vm12957_vm0, %v2962_v47  ;;  %3662 = vrot.lane.b32.xlu1 %v10482_v50, %s12996_s1 }
 0x28d   : > { %v1994_v29 = vpop.permute.xlu1 %1993  ;;  %v1378_v24 = vpop.permute.xlu0 %1377 }
 0x28e   : > { %v2380_v33 = vsel %vm2350_vm9, %v2338_v39, %v1994_v29  ;;  %v2213_v5 = vsel %vm2182_vm5, %v2171_v23, %v1378_v24 }
 0x28f   : > { %8389 = vmatmul.mubr.msk.f32.gmra.mxu0 %vm12951_vm10, %v2380_v33  ;;  %4278 = vrot.lane.b32.xlu0 %v3246_v36, %s12990_s21  ;;  %v10560_v36 = vld [vmem:[#allocation2 + $0x3c] sm:$0xff] }
 0x290   : > { %3826 = vrot.lane.b32.xlu1 %v3162_v46, %s12992_s25  ;;  %v2666_v10 = vpop.f32.mrf.mxu0  ;;  %8391 = vmatprep.mubr.msk.f32.mxu0 %vm8897_vm3, %v12987_v52  ;;  %v10564_v46 = vld [vmem:[#allocation2 + $0x32] sm:$0xff] }
 0x291   : > { %v2812_v31 = vmul.f32 %v10500_v18, %v2666_v10  ;;  %v1090_v20 = vpop.permute.xlu1 %1089  ;;  %v1542_v42 = vpop.permute.xlu0 %1541 }
 0x292   : > { %v8348_v7 = vpop.f32.mrf.mxu0  ;;  %v2255_v55 = vsel %vm12955_vm6, %v2213_v5, %v1542_v42  ;;  %v2130_v22 = vsel %vm512_vm1, %v2089_v15, %v1090_v20  ;;  %v3248_v20 = vld [vmem:[#allocation2 + $0x3d] sm:$0xff] }
 0x293   : > { %v2855_v1 = vadd.f32 %v10506_v14, %v2812_v31  ;;  %4442 = vrot.lane.b32.xlu0 %v3287_v4, %s12991_s28  ;;  %v3164_v7 = vld [vmem:[#allocation2 + $0x33] sm:$0xff]  ;;  %v561_v4 = vld [vmem:[%s9036_s18 + $0x100] sm:$0xff] }
 0x294   : > { %3374 = vrot.lane.b32.xlu1 %v3078_v51, %s12999_s15 }
 0x295   : > { %vm2891_vm15 = vcmp.gt.f32.partialorder %v2855_v1, 0.0  ;;  %v2927_v56 = vmul.f32 0.01, %v2855_v1  ;;  %v1216_v21 = vpop.permute.xlu1 %1215  ;;  %v1668_v60 = vpop.permute.xlu0 %1667 }
 0x296   : > { %v2297_v57 = vsel %vm2266_vm7, %v2255_v55, %v1668_v60  ;;  %v2172_v61 = vsel %vm12956_vm4, %v2130_v22, %v1216_v21  ;;  %v3080_v60 = vld [vmem:[#allocation2 + $0x29] sm:$0xff] }
 0x297   : > { %v2963_v62 = vsel %vm2891_vm15, %v2855_v1, %v2927_v56  ;;  %3990 = vrot.lane.b32.xlu0 %v10438_v17, %s12989_s26  ;;  %v10526_v17 = vld [vmem:[#allocation2 + $0x2a] sm:$0xff] }
 0x298   : > { %3008 = vst.msk [vmem:[#allocation2 + $0x8b] sm:$0xf] %vm2994_vm12, %v2963_v62  ;;  %3538 = vrot.lane.b32.xlu1 %v10443_v45, %s12988_s27  ;;  %v13006_v56 = vld [vmem:[#allocation20_spill] sm:$0xff] }
 0x299   : > { %3009 = vst.msk [vmem:[#allocation2 + $0x8b] sm:$0xc0] %vm13004_vm2, %v2963_v62  ;;  %v1380_v8 = vpop.permute.xlu1 %1379  ;;  %v1832_v48 = vpop.permute.xlu0 %1831  ;;  %v2090_v21 = vsel %vm12957_vm0, %v561_v4, %v13006_v56  ;;  %v3290_v22 = vld [vmem:[#allocation2 + $0x46] sm:$0xff] }
 0x29a   : > { %v2339_v40 = vsel %vm12952_vm8, %v2297_v57, %v1832_v48  ;;  %v2214_v41 = vsel %vm2182_vm5, %v2172_v61, %v1380_v8 }
 0x29b   : > { %4116 = vrot.lane.b32.xlu0 %v10523_v44, %s12993_s0 }
 0x29c   : > { %3664 = vrot.lane.b32.xlu1 %v10526_v17, %s12996_s1  ;;  %v2671_v45 = vpop.f32.mrf.mxu0 }
 0x29d   : > { %v2813_v34 = vmul.f32 %v10500_v18, %v2671_v45  ;;  %v1544_v30 = vpop.permute.xlu1 %1543  ;;  %v1996_v37 = vpop.permute.xlu0 %1995 }
 0x29e   : > { %v2381_v19 = vsel %vm2350_vm9, %v2339_v40, %v1996_v37  ;;  %v8351_v54 = vpop.f32.mrf.mxu0  ;;  %v2256_v43 = vsel %vm12955_vm6, %v2214_v41, %v1544_v30  ;;  %v10592_v37 = vld [vmem:[#allocation2 + $0x44] sm:$0xff] }
 0x29f   : > { %v2856_v25 = vadd.f32 %v10506_v14, %v2813_v34  ;;  %8392 = vmatmul.mubr.msk.f32.gmra.mxu0 %vm12951_vm10, %v2381_v19  ;;  %4280 = vrot.lane.b32.xlu0 %v3247_v59, %s12990_s21 }
 0x2a0   : > { %3828 = vrot.lane.b32.xlu1 %v3163_v16, %s12992_s25  ;;  %8394 = vmatprep.mubr.msk.f32.mxu0 %vm8897_vm3, %v12987_v52  ;;  %v3249_v16 = vld [vmem:[#allocation2 + $0x45] sm:$0xff] }
 0x2a1   : > { %vm2892_vm15 = vcmp.gt.f32.partialorder %v2856_v25, 0.0  ;;  %v2928_v49 = vmul.f32 0.01, %v2856_v25  ;;  %v1670_v53 = vpop.permute.xlu1 %1669  ;;  %v1092_v63 = vpop.permute.xlu0 %1091 }
 0x2a2   : > { %v2298_v0 = vsel %vm2266_vm7, %v2256_v43, %v1670_v53  ;;  %v2131_v26 = vsel %vm512_vm1, %v2090_v21, %v1092_v63  ;;  %v3165_v63 = vld [vmem:[#allocation2 + $0x3b] sm:$0xff] }
 0x2a3   : > { %v2964_v11 = vsel %vm2892_vm15, %v2856_v25, %v2928_v49  ;;  %4444 = vrot.lane.b32.xlu0 %v3288_v12, %s12991_s28 }
 0x2a4   : > { %3010 = vst.msk [vmem:[#allocation2 + $0x93] sm:$0xff] %vm12957_vm0, %v2964_v11  ;;  %3376 = vrot.lane.b32.xlu1 %v3079_v35, %s12999_s15 }
 0x2a5   : > { %v1834_v3 = vpop.permute.xlu1 %1833  ;;  %v1218_v32 = vpop.permute.xlu0 %1217 }
 0x2a6   : > { %v2340_v47 = vsel %vm12952_vm8, %v2298_v0, %v1834_v3  ;;  %v2173_v6 = vsel %vm12956_vm4, %v2131_v26, %v1218_v32  ;;  %v3081_v3 = vld [vmem:[#allocation2 + $0x31] sm:$0xff] }
 0x2a7   : > { %3992 = vrot.lane.b32.xlu0 %v10479_v13, %s12989_s26 }
 0x2a8   : > { %3540 = vrot.lane.b32.xlu1 %v10482_v50, %s12988_s27  ;;  %v2676_v38 = vpop.f32.mrf.mxu0 }
 0x2a9   : > { %v2814_v2 = vmul.f32 %v10500_v18, %v2676_v38  ;;  %v1998_v39 = vpop.permute.xlu1 %1997  ;;  %v1382_v29 = vpop.permute.xlu0 %1381 }
 0x2aa   : > { %v2382_v24 = vsel %vm2350_vm9, %v2340_v47, %v1998_v39  ;;  %v8354_v33 = vpop.f32.mrf.mxu0  ;;  %v2215_v23 = vsel %vm2182_vm5, %v2173_v6, %v1382_v29  ;;  %v3291_v6 = vld [vmem:[#allocation2 + $0x4e] sm:$0xff] }
 0x2ab   : > { %v2857_v13 = vadd.f32 %v10506_v14, %v2814_v2  ;;  %8395 = vmatmul.mubr.msk.f32.gmra.mxu0 %vm12951_vm10, %v2382_v24  ;;  %4118 = vrot.lane.b32.xlu0 %v10560_v36, %s12993_s0 }
 0x2ac   : > { %3666 = vrot.lane.b32.xlu1 %v10564_v46, %s12996_s1  ;;  %8397 = vmatprep.mubr.msk.f32.mxu0 %vm8897_vm3, %v12987_v52 }
 0x2ad   : > { %vm2893_vm2 = vcmp.gt.f32.partialorder %v2857_v13, 0.0  ;;  %v2929_v50 = vmul.f32 0.01, %v2857_v13  ;;  %v1094_v10 = vpop.permute.xlu1 %1093  ;;  %v1546_v31 = vpop.permute.xlu0 %1545 }
 0x2ae   : > { %v2257_v8 = vsel %vm12955_vm6, %v2215_v23, %v1546_v31  ;;  %v10630_v31 = vld [vmem:[#allocation2 + $0x42] sm:$0xff] }
 0x2af   : > { %v2965_v42 = vsel %vm2893_vm2, %v2857_v13, %v2929_v50  ;;  %4282 = vrot.lane.b32.xlu0 %v3248_v20, %s12990_s21  ;;  %v10628_v50 = vld [vmem:[#allocation2 + $0x4c] sm:$0xff] }
 0x2b0   : > { %3011 = vst.msk [vmem:[#allocation2 + $0x9b] sm:$0x3f] %vm2999_vm13, %v2965_v42  ;;  %3830 = vrot.lane.b32.xlu1 %v3164_v7, %s12992_s25  ;;  %v3250_v42 = vld [vmem:[#allocation2 + $0x4d] sm:$0xff]  ;;  %v13008_v7 = vld [vmem:[#allocation22_spill] sm:$0xff] }
 0x2b1   : > { %v1220_v1 = vpop.permute.xlu1 %1219  ;;  %v1672_v51 = vpop.permute.xlu0 %1671 }
 0x2b2   : > { %v2299_v48 = vsel %vm2266_vm7, %v2257_v8, %v1672_v51 }
 0x2b3   : > { %4446 = vrot.lane.b32.xlu0 %v3289_v58, %s12991_s28 }
 0x2b4   : > { %3378 = vrot.lane.b32.xlu1 %v3080_v60, %s12999_s15  ;;  %v564_v60 = vld [vmem:[%s9036_s18 + $0x118] sm:$0xff] }
 0x2b5   : > { %v1384_v62 = vpop.permute.xlu1 %1383  ;;  %v1836_v28 = vpop.permute.xlu0 %1835 }
 0x2b6   : > { %v2341_v55 = vsel %vm12952_vm8, %v2299_v48, %v1836_v28  ;;  %v3082_v28 = vld [vmem:[#allocation2 + $0x39] sm:$0xff] }
 0x2b7   : > { %3994 = vrot.lane.b32.xlu0 %v10523_v44, %s12989_s26  ;;  %v10596_v44 = vld [vmem:[#allocation2 + $0x3a] sm:$0xff]  ;;  %v13009_v48 = vld [vmem:[#allocation21_spill] sm:$0xff] }
 0x2b8   : > { %3542 = vrot.lane.b32.xlu1 %v10526_v17, %s12988_s27  ;;  %v2681_v5 = vpop.f32.mrf.mxu0  ;;  %v562_v17 = vld [vmem:[%s9036_s18 + $0x108] sm:$0xff] }
 0x2b9   : > { %v2815_v57 = vmul.f32 %v10500_v18, %v2681_v5  ;;  %v1548_v45 = vpop.permute.xlu1 %1547  ;;  %v2000_v40 = vpop.permute.xlu0 %1999  ;;  %v2091_v49 = vsel %vm12957_vm0, %v562_v17, %v13007_v9  ;;  %v2093_v5 = vsel %vm12957_vm0, %v564_v60, %v13009_v48 }
 0x2ba   : > { %v2383_v34 = vsel %vm2350_vm9, %v2341_v55, %v2000_v40  ;;  %v8357_v30 = vpop.f32.mrf.mxu0  ;;  %v2132_v12 = vsel %vm512_vm1, %v2091_v49, %v1094_v10 }
 0x2bb   : > { %v2858_v19 = vadd.f32 %v10506_v14, %v2815_v57  ;;  %8398 = vmatmul.mubr.msk.f32.gmra.mxu0 %vm12951_vm10, %v2383_v34  ;;  %4120 = vrot.lane.b32.xlu0 %v10592_v37, %s12993_s0  ;;  %v2174_v27 = vsel %vm12956_vm4, %v2132_v12, %v1220_v1  ;;  %v3166_v1 = vld [vmem:[#allocation2 + $0x43] sm:$0xff] }
 0x2bc   : > { %3668 = vrot.lane.b32.xlu1 %v10596_v44, %s12996_s1  ;;  %8400 = vmatprep.mubr.msk.f32.mxu0 %vm8897_vm3, %v12987_v52  ;;  %v2216_v35 = vsel %vm2182_vm5, %v2174_v27, %v1384_v62 }
 0x2bd   : > { %vm2894_vm15 = vcmp.gt.f32.partialorder %v2858_v19, 0.0  ;;  %v2930_v54 = vmul.f32 0.01, %v2858_v19  ;;  %v1674_v59 = vpop.permute.xlu1 %1673  ;;  %v1096_v25 = vpop.permute.xlu0 %1095  ;;  %v2258_v61 = vsel %vm12955_vm6, %v2216_v35, %v1548_v45  ;;  %v3251_v35 = vld [vmem:[#allocation2 + $0x55] sm:$0xff] }
 0x2be   : > { %v2300_v32 = vsel %vm2266_vm7, %v2258_v61, %v1674_v59 }
 0x2bf   : > { %v2966_v53 = vsel %vm2894_vm15, %v2858_v19, %v2930_v54  ;;  %4284 = vrot.lane.b32.xlu0 %v3249_v16, %s12990_s21 }
 0x2c0   : > { %3012 = vst.msk [vmem:[#allocation2 + $0xa3] sm:$0xff] %vm12957_vm0, %v2966_v53  ;;  %3832 = vrot.lane.b32.xlu1 %v3165_v63, %s12992_s25  ;;  %v10668_v63 = vld [vmem:[#allocation2 + $0x54] sm:$0xff] }
 0x2c1   : > { %v1838_v15 = vpop.permute.xlu1 %1837  ;;  %v1222_v11 = vpop.permute.xlu0 %1221 }
 0x2c2   : > { %v2342_v43 = vsel %vm12952_vm8, %v2300_v32, %v1838_v15 }
 0x2c3   : > { %4448 = vrot.lane.b32.xlu0 %v3290_v22, %s12991_s28  ;;  %v3167_v22 = vld [vmem:[#allocation2 + $0x4b] sm:$0xff] }
 0x2c4   : > { %3380 = vrot.lane.b32.xlu1 %v3081_v3, %s12999_s15  ;;  %v2686_v41 = vpop.f32.mrf.mxu0 }
 0x2c5   : > { %v2816_v0 = vmul.f32 %v10500_v18, %v2686_v41  ;;  %v2002_v38 = vpop.permute.xlu1 %2001  ;;  %v1386_v47 = vpop.permute.xlu0 %1385 }
 0x2c6   : > { %v2384_v2 = vsel %vm2350_vm9, %v2342_v43, %v2002_v38  ;;  %v8360_v39 = vpop.f32.mrf.mxu0 }
 0x2c7   : > { %v2859_v29 = vadd.f32 %v10506_v14, %v2816_v0  ;;  %8401 = vmatmul.mubr.msk.f32.gmra.mxu0 %vm12951_vm10, %v2384_v2  ;;  %3996 = vrot.lane.b32.xlu0 %v10560_v36, %s12989_s26  ;;  %v563_v36 = vld [vmem:[%s9036_s18 + $0x110] sm:$0xff] }
 0x2c8   : > { %3544 = vrot.lane.b32.xlu1 %v10564_v46, %s12988_s27  ;;  %8403 = vmatprep.mubr.msk.f32.mxu0 %vm8897_vm3, %v12987_v52  ;;  %v2092_v4 = vsel %vm12957_vm0, %v563_v36, %v13008_v7  ;;  %v3292_v0 = vld [vmem:[#allocation2 + $0x56] sm:$0xff] }
 0x2c9   : > { %vm2895_vm2 = vcmp.gt.f32.partialorder %v2859_v29, 0.0  ;;  %v2931_v24 = vmul.f32 0.01, %v2859_v29  ;;  %v1098_v33 = vpop.permute.xlu1 %1097  ;;  %v1550_v13 = vpop.permute.xlu0 %1549  ;;  %v2133_v51 = vsel %vm512_vm1, %v2092_v4, %v1096_v25  ;;  %v10693_v36 = vld [vmem:[#allocation2 + $0x5c] sm:$0xff] }
 0x2ca   : > { %v2175_v58 = vsel %vm12956_vm4, %v2133_v51, %v1222_v11  ;;  %v2134_v34 = vsel %vm512_vm1, %v2093_v5, %v1098_v33  ;;  %v3034_v33 = vld [vmem:[#allocation2] sm:$0xff] }
 0x2cb   : > { %v2967_v10 = vsel %vm2895_vm2, %v2859_v29, %v2931_v24  ;;  %4122 = vrot.lane.b32.xlu0 %v10628_v50, %s12993_s0  ;;  %v2217_v26 = vsel %vm2182_vm5, %v2175_v58, %v1386_v47  ;;  %v3083_v47 = vld [vmem:[#allocation2 + $0x41] sm:$0xff] }
 0x2cc   : > { %3013 = vst.msk [vmem:[#allocation2 + $0xab] sm:$0xff] %vm12957_vm0, %v2967_v10  ;;  %3670 = vrot.lane.b32.xlu1 %v10630_v31, %s12996_s1  ;;  %v2259_v62 = vsel %vm12955_vm6, %v2217_v26, %v1550_v13  ;;  %v3252_v4 = vld [vmem:[#allocation2 + $0x5d] sm:$0xff] }
 0x2cd   : > { %v1224_v46 = vpop.permute.xlu1 %1223  ;;  %v1676_v20 = vpop.permute.xlu0 %1675 }
 0x2ce   : > { %v2301_v23 = vsel %vm2266_vm7, %v2259_v62, %v1676_v20  ;;  %v2176_v17 = vsel %vm12956_vm4, %v2134_v34, %v1224_v46  ;;  %v10696_v20 = vld [vmem:[#allocation2 + $0x52] sm:$0xff]  ;;  %v3035_v34 = vld [vmem:[#allocation2 + $0x8] sm:$0xff] }
 0x2cf   : > { %4286 = vrot.lane.b32.xlu0 %v3250_v42, %s12990_s21 }
 0x2d0   : > { %3834 = vrot.lane.b32.xlu1 %v3166_v1, %s12992_s25 }
 0x2d1   : > { %v1388_v56 = vpop.permute.xlu1 %1387  ;;  %v1840_v21 = vpop.permute.xlu0 %1839 }
 0x2d2   : > { %v2343_v55 = vsel %vm12952_vm8, %v2301_v23, %v1840_v21  ;;  %v2218_v59 = vsel %vm2182_vm5, %v2176_v17, %v1388_v56  ;;  %v3084_v23 = vld [vmem:[#allocation2 + $0x49] sm:$0xff] }
 0x2d3   : > { %4450 = vrot.lane.b32.xlu0 %v3291_v6, %s12991_s28  ;;  %v3293_v6 = vld [vmem:[#allocation2 + $0x5e] sm:$0xff] }
 0x2d4   : > { %3382 = vrot.lane.b32.xlu1 %v3082_v28, %s12999_s15  ;;  %v2691_v8 = vpop.f32.mrf.mxu0  ;;  %v10726_v17 = vld [vmem:[#allocation2 + $0x64] sm:$0xff] }
 0x2d5   : > { %v2817_v57 = vmul.f32 %v10500_v18, %v2691_v8  ;;  %v1552_v45 = vpop.permute.xlu1 %1551  ;;  %v2004_v40 = vpop.permute.xlu0 %2003 }
 0x2d6   : > { %v2385_v30 = vsel %vm2350_vm9, %v2343_v55, %v2004_v40  ;;  %v8363_v19 = vpop.f32.mrf.mxu0  ;;  %v2260_v16 = vsel %vm12955_vm6, %v2218_v59, %v1552_v45  ;;  %v10729_v59 = vld [vmem:[#allocation2 + $0x5a] sm:$0xff] }
 0x2d7   : > { %v2860_v54 = vadd.f32 %v10506_v14, %v2817_v57  ;;  %8404 = vmatmul.mubr.msk.f32.gmra.mxu0 %vm12951_vm10, %v2385_v30  ;;  %3998 = vrot.lane.b32.xlu0 %v10592_v37, %s12989_s26  ;;  %v10670_v37 = vld [vmem:[#allocation2 + $0x4a] sm:$0xff] }
 0x2d8   : > { %3546 = vrot.lane.b32.xlu1 %v10596_v44, %s12988_s27  ;;  %8406 = vmatprep.mubr.msk.f32.mxu0 %vm8897_vm3, %v12987_v52 }
 0x2d9   : > { %vm2896_vm15 = vcmp.gt.f32.partialorder %v2860_v54, 0.0  ;;  %v2932_v25 = vmul.f32 0.01, %v2860_v54  ;;  %v1842_v9 = vpop.permute.xlu1 %1841  ;;  %v1678_v49 = vpop.permute.xlu0 %1677 }
 0x2da   : > { %v2302_v53 = vsel %vm2266_vm7, %v2260_v16, %v1678_v49 }
 0x2db   : > { %v2968_v12 = vsel %vm2896_vm15, %v2860_v54, %v2932_v25  ;;  %4124 = vrot.lane.b32.xlu0 %v10668_v63, %s12993_s0  ;;  %v2344_v15 = vsel %vm12952_vm8, %v2302_v53, %v1842_v9 }
 0x2dc   : > { %3014 = vst.msk [vmem:[#allocation2 + $0xb3] sm:$0xfc] %vm2986_vm14, %v2968_v12  ;;  %3672 = vrot.lane.b32.xlu1 %v10670_v37, %s12996_s1  ;;  %v3253_v12 = vld [vmem:[#allocation2 + $0x65] sm:$0xff] }
 0x2dd   : > { %v3369_v44 = vpop.permute.xlu1 %3368  ;;  %v2006_v27 = vpop.permute.xlu0 %2005 }
 0x2de   : > { %v2386_v11 = vsel %vm2350_vm9, %v2344_v15, %v2006_v27  ;;  %v4563_v46 = vsel %vm12957_vm0, %v3034_v33, %v3369_v44  ;;  %v3169_v44 = vld [vmem:[#allocation2 + $0x5b] sm:$0xff] }
 0x2df   : > { %8407 = vmatmul.mubr.msk.f32.gmra.mxu0 %vm12951_vm10, %v2386_v11  ;;  %4288 = vrot.lane.b32.xlu0 %v3251_v35, %s12990_s21  ;;  %v10760_v33 = vld [vmem:[#allocation2 + $0x62] sm:$0xff] }
 0x2e0   : > { %3836 = vrot.lane.b32.xlu1 %v3167_v22, %s12992_s25  ;;  %v2696_v61 = vpop.f32.mrf.mxu0  ;;  %8409 = vmatprep.mubr.msk.f32.mxu0 %vm8897_vm3, %v12987_v52 }
 0x2e1   : > { %v2818_v3 = vmul.f32 %v10500_v18, %v2696_v61  ;;  %v3533_v32 = vpop.permute.xlu0 %3532  ;;  %v3659_v41 = vpop.permute.xlu1 %3658  ;;  %v3294_v61 = vld [vmem:[#allocation2 + $0x66] sm:$0xff] }
 0x2e2   : > { %v8366_v43 = vpop.f32.mrf.mxu0  ;;  %v4604_v42 = vsel %vm512_vm1, %v4563_v46, %v3533_v32  ;;  %v3036_v46 = vld [vmem:[#allocation2 + $0x10] sm:$0xff] }
 0x2e3   : > { %v2861_v38 = vadd.f32 %v10506_v14, %v2818_v3  ;;  %4452 = vrot.lane.b32.xlu0 %v3292_v0, %s12991_s28  ;;  %v4645_v51 = vsel %vm12956_vm4, %v4604_v42, %v3659_v41  ;;  %v3085_v41 = vld [vmem:[#allocation2 + $0x51] sm:$0xff] }
 0x2e4   : > { %3384 = vrot.lane.b32.xlu1 %v3083_v47, %s12999_s15  ;;  %v3254_v42 = vld [vmem:[#allocation2 + $0x6d] sm:$0xff] }
 0x2e5   : > { %vm2897_vm2 = vcmp.gt.f32.partialorder %v2861_v38, 0.0  ;;  %v2933_v2 = vmul.f32 0.01, %v2861_v38  ;;  %v3823_v39 = vpop.permute.xlu0 %3822 }
 0x2e6   : > { %v3371_v29 = vpop.permute.xlu1 %3370  ;;  %v4686_v21 = vsel %vm2182_vm5, %v4645_v51, %v3823_v39 }
 0x2e7   : > { %v2969_v24 = vsel %vm2897_vm2, %v2861_v38, %v2933_v2  ;;  %4000 = vrot.lane.b32.xlu0 %v10628_v50, %s12989_s26  ;;  %vm13010_vm2 = vcmask 31748   ;;  %v4564_v54 = vsel %vm12957_vm0, %v3035_v34, %v3371_v29 }
 0x2e8   : > { %3015 = vst.msk [vmem:[#allocation2 + $0xbb] sm:$0xff] %vm12957_vm0, %v2969_v24  ;;  %3548 = vrot.lane.b32.xlu1 %v10630_v31, %s12988_s27  ;;  %v3168_v31 = vld [vmem:[#allocation2 + $0x53] sm:$0xff] }
 0x2e9   : > { %v3987_v13 = vpop.permute.xlu0 %3986  ;;  %v10758_v24 = vld [vmem:[#allocation2 + $0x6c] sm:$0xff] }
 0x2ea   : > { %v3535_v10 = vpop.permute.xlu1 %3534  ;;  %v4727_v62 = vsel %vm12955_vm6, %v4686_v21, %v3987_v13 }
 0x2eb   : > { %4126 = vrot.lane.b32.xlu0 %v10693_v36, %s12993_s0  ;;  %v4605_v49 = vsel %vm512_vm1, %v4564_v54, %v3535_v10 }
 0x2ec   : > { %3674 = vrot.lane.b32.xlu1 %v10696_v20, %s12996_s1 }
 0x2ed   : > { %v4113_v50 = vpop.permute.xlu0 %4112 }
 0x2ee   : > { %v3661_v7 = vpop.permute.xlu1 %3660  ;;  %v4768_v8 = vsel %vm2266_vm7, %v4727_v62, %v4113_v50 }
 0x2ef   : > { %4290 = vrot.lane.b32.xlu0 %v3252_v4, %s12990_s21  ;;  %v4646_v27 = vsel %vm12956_vm4, %v4605_v49, %v3661_v7  ;;  %v3255_v49 = vld [vmem:[#allocation2 + $0x75] sm:$0xff] }
 0x2f0   : > { %3838 = vrot.lane.b32.xlu1 %v3168_v31, %s12992_s25  ;;  %v2701_v1 = vpop.f32.mrf.mxu0  ;;  %v3170_v31 = vld [vmem:[#allocation2 + $0x63] sm:$0xff] }
 0x2f1   : > { %v2819_v58 = vmul.f32 %v10500_v18, %v2701_v1  ;;  %v4277_v56 = vpop.permute.xlu0 %4276 }
 0x2f2   : > { %v3825_v60 = vpop.permute.xlu1 %3824  ;;  %v8369_v26 = vpop.f32.mrf.mxu0  ;;  %v4809_v5 = vsel %vm12952_vm8, %v4768_v8, %v4277_v56 }
 0x2f3   : > { %v2862_v28 = vadd.f32 %v10506_v14, %v2819_v58  ;;  %4454 = vrot.lane.b32.xlu0 %v3293_v6, %s12991_s28  ;;  %v4687_v35 = vsel %vm2182_vm5, %v4646_v27, %v3825_v60  ;;  %v3295_v26 = vld [vmem:[#allocation2 + $0x6e] sm:$0xff] }
 0x2f4   : > { %3386 = vrot.lane.b32.xlu1 %v3084_v23, %s12999_s15 }
 0x2f5   : > { %vm2898_vm15 = vcmp.gt.f32.partialorder %v2862_v28, 0.0  ;;  %v2934_v48 = vmul.f32 0.01, %v2862_v28  ;;  %v4441_v55 = vpop.permute.xlu0 %4440 }
 0x2f6   : > { %v10714_v57 = vpop.permute.xlu1 %3372  ;;  %v4850_v45 = vsel %vm2350_vm9, %v4809_v5, %v4441_v55 }
 0x2f7   : > { %v2970_v40 = vsel %vm2898_vm15, %v2862_v28, %v2934_v48  ;;  %8435 = vmatmul.mubr.msk.f32.vlgmr.msra.gmra.mxu1 %vm12951_vm10, %v4850_v45  ;;  %4002 = vrot.lane.b32.xlu0 %v10668_v63, %s12989_s26  ;;  %v4565_v7 = vsel %vm12957_vm0, %v3036_v46, %v10714_v57  ;;  %v3086_v28 = vld [vmem:[#allocation2 + $0x59] sm:$0xff] }
 0x2f8   : > { %3016 = vst.msk [vmem:[#allocation2 + $0xc3] sm:$0x3] %vm2989_vm11, %v2970_v40  ;;  %3550 = vrot.lane.b32.xlu1 %v10670_v37, %s12988_s27  ;;  %8437 = vmatprep.mubr.msk.f32.mxu1 %vm8897_vm3, %v12987_v52  ;;  %v3038_v46 = vld [vmem:[#allocation2 + $0x20] sm:$0xff] }
 0x2f9   : > { %3017 = vst.msk [vmem:[#allocation2 + $0xc3] sm:$0xf0] %vm13010_vm2, %v2970_v40  ;;  %v3989_v30 = vpop.permute.xlu0 %3988 }
 0x2fa   : > { %v3537_v19 = vpop.permute.xlu1 %3536  ;;  %v4728_v3 = vsel %vm12955_vm6, %v4687_v35, %v3989_v30  ;;  %v3296_v35 = vld [vmem:[#allocation2 + $0x76] sm:$0xff] }
 0x2fb   : > { %4128 = vrot.lane.b32.xlu0 %v10726_v17, %s12993_s0  ;;  %v4606_v1 = vsel %vm512_vm1, %v4565_v7, %v3537_v19  ;;  %v10793_v19 = vld [vmem:[#allocation2 + $0x74] sm:$0xff] }
 0x2fc   : > { %3676 = vrot.lane.b32.xlu1 %v10729_v59, %s12996_s1  ;;  %v2706_v25 = vpop.f32.mrf.mxu0 }
 0x2fd   : > { %v2820_v16 = vmul.f32 %v10500_v18, %v2706_v25  ;;  %v4115_v9 = vpop.permute.xlu0 %4114  ;;  %v10796_v25 = vld [vmem:[#allocation2 + $0x6a] sm:$0xff] }
 0x2fe   : > { %v3663_v53 = vpop.permute.xlu1 %3662  ;;  %v8372_v63 = vpop.f32.mrf.mxu0  ;;  %v4769_v43 = vsel %vm2266_vm7, %v4728_v3, %v4115_v9 }
 0x2ff   : > { %v2863_v37 = vadd.f32 %v10506_v14, %v2820_v16  ;;  %4292 = vrot.lane.b32.xlu0 %v3253_v12, %s12990_s21  ;;  %v4647_v51 = vsel %vm12956_vm4, %v4606_v1, %v3663_v53  ;;  %v3037_v16 = vld [vmem:[#allocation2 + $0x18] sm:$0xff]  ;;  %v3171_v12 = vld [vmem:[#allocation2 + $0x6b] sm:$0xff] }
 0x300   : > { %3840 = vrot.lane.b32.xlu1 %v3169_v44, %s12992_s25 }
 0x301   : > { %vm2899_vm15 = vcmp.gt.f32.partialorder %v2863_v37, 0.0  ;;  %v2935_v15 = vmul.f32 0.01, %v2863_v37  ;;  %v4279_v11 = vpop.permute.xlu0 %4278 }
 0x302   : > { %v3827_v22 = vpop.permute.xlu1 %3826  ;;  %v4810_v0 = vsel %vm12952_vm8, %v4769_v43, %v4279_v11 }
 0x303   : > { %v2971_v32 = vsel %vm2899_vm15, %v2863_v37, %v2935_v15  ;;  %4456 = vrot.lane.b32.xlu0 %v3294_v61, %s12991_s28  ;;  %v4688_v21 = vsel %vm2182_vm5, %v4647_v51, %v3827_v22  ;;  %vm13011_vm15 = vcmask 31750   ;;  %v3087_v61 = vld [vmem:[#allocation2 + $0x61] sm:$0xff] }
 0x304   : > { %3018 = vst.msk [vmem:[#allocation2 + $0xcb] sm:$0xff] %vm12957_vm0, %v2971_v32  ;;  %3388 = vrot.lane.b32.xlu1 %v3085_v41, %s12999_s15 }
 0x305   : > { %v4443_v38 = vpop.permute.xlu0 %4442 }
 0x306   : > { %v10748_v47 = vpop.permute.xlu1 %3374  ;;  %v4851_v2 = vsel %vm2350_vm9, %v4810_v0, %v4443_v38 }
 0x307   : > { %8438 = vmatmul.mubr.msk.f32.gmra.mxu1 %vm12951_vm10, %v4851_v2  ;;  %4004 = vrot.lane.b32.xlu0 %v10693_v36, %s12989_s26  ;;  %v4566_v53 = vsel %vm12957_vm0, %v3037_v16, %v10748_v47  ;;  %v3257_v16 = vld [vmem:[#allocation2 + $0x85] sm:$0xff] }
 0x308   : > { %3552 = vrot.lane.b32.xlu1 %v10696_v20, %s12988_s27  ;;  %8440 = vmatprep.mubr.msk.f32.mxu1 %vm8897_vm3, %v12987_v52 }
 0x309   : > { %v3991_v39 = vpop.permute.xlu0 %3990 }
 0x30a   : > { %v3539_v29 = vpop.permute.xlu1 %3538  ;;  %v4729_v6 = vsel %vm12955_vm6, %v4688_v21, %v3991_v39  ;;  %v3297_v21 = vld [vmem:[#allocation2 + $0x7e] sm:$0xff] }
 0x30b   : > { %4130 = vrot.lane.b32.xlu0 %v10758_v24, %s12993_s0  ;;  %v4607_v37 = vsel %vm512_vm1, %v4566_v53, %v3539_v29 }
 0x30c   : > { %3678 = vrot.lane.b32.xlu1 %v10760_v33, %s12996_s1  ;;  %v2711_v13 = vpop.f32.mrf.mxu0 }
 0x30d   : > { %v2821_v10 = vmul.f32 %v10500_v18, %v2711_v13  ;;  %v4117_v36 = vpop.permute.xlu0 %4116  ;;  %v10826_v13 = vld [vmem:[#allocation2 + $0x7c] sm:$0xff] }
 0x30e   : > { %v3665_v20 = vpop.permute.xlu1 %3664  ;;  %v8375_v50 = vpop.f32.mrf.mxu0  ;;  %v4770_v23 = vsel %vm2266_vm7, %v4729_v6, %v4117_v36  ;;  %v10829_v36 = vld [vmem:[#allocation2 + $0x72] sm:$0xff] }
 0x30f   : > { %v2864_v4 = vadd.f32 %v10506_v14, %v2821_v10  ;;  %4294 = vrot.lane.b32.xlu0 %v3254_v42, %s12990_s21  ;;  %v4648_v44 = vsel %vm12956_vm4, %v4607_v37, %v3665_v20  ;;  %v3256_v50 = vld [vmem:[#allocation2 + $0x7d] sm:$0xff] }
 0x310   : > { %3842 = vrot.lane.b32.xlu1 %v3170_v31, %s12992_s25 }
 0x311   : > { %vm2900_vm2 = vcmp.gt.f32.partialorder %v2864_v4, 0.0  ;;  %v2936_v58 = vmul.f32 0.01, %v2864_v4  ;;  %v4281_v56 = vpop.permute.xlu0 %4280 }
 0x312   : > { %v3829_v60 = vpop.permute.xlu1 %3828  ;;  %v4811_v8 = vsel %vm12952_vm8, %v4770_v23, %v4281_v56 }
 0x313   : > { %v2972_v62 = vsel %vm2900_vm2, %v2864_v4, %v2936_v58  ;;  %4458 = vrot.lane.b32.xlu0 %v3295_v26, %s12991_s28  ;;  %v4689_v15 = vsel %vm2182_vm5, %v4648_v44, %v3829_v60  ;;  %v3172_v4 = vld [vmem:[#allocation2 + $0x73] sm:$0xff]  ;;  %v3088_v26 = vld [vmem:[#allocation2 + $0x69] sm:$0xff] }
 0x314   : > { %3019 = vst.msk [vmem:[#allocation2 + $0xd3] sm:$0xf] %vm2994_vm12, %v2972_v62  ;;  %3390 = vrot.lane.b32.xlu1 %v3086_v28, %s12999_s15 }
 0x315   : > { %3020 = vst.msk [vmem:[#allocation2 + $0xd3] sm:$0xc0] %vm13011_vm15, %v2972_v62  ;;  %v4445_v48 = vpop.permute.xlu0 %4444 }
 0x316   : > { %v10782_v5 = vpop.permute.xlu1 %3376  ;;  %v4852_v55 = vsel %vm2350_vm9, %v4811_v8, %v4445_v48 }
 0x317   : > { %8441 = vmatmul.mubr.msk.f32.gmra.mxu1 %vm12951_vm10, %v4852_v55  ;;  %4006 = vrot.lane.b32.xlu0 %v10726_v17, %s12989_s26  ;;  %v4567_v42 = vsel %vm12957_vm0, %v3038_v46, %v10782_v5  ;;  %v3174_v46 = vld [vmem:[#allocation2 + $0x83] sm:$0xff] }
 0x318   : > { %3554 = vrot.lane.b32.xlu1 %v10729_v59, %s12988_s27  ;;  %v2716_v57 = vpop.f32.mrf.mxu0  ;;  %8443 = vmatprep.mubr.msk.f32.mxu1 %vm8897_vm3, %v12987_v52 }
 0x319   : > { %v2822_v45 = vmul.f32 %v10500_v18, %v2716_v57  ;;  %v3993_v40 = vpop.permute.xlu0 %3992 }
 0x31a   : > { %v3541_v34 = vpop.permute.xlu1 %3540  ;;  %v8378_v30 = vpop.f32.mrf.mxu0  ;;  %v4730_v22 = vsel %vm12955_vm6, %v4689_v15, %v3993_v40 }
 0x31b   : > { %v2865_v54 = vadd.f32 %v10506_v14, %v2822_v45  ;;  %4132 = vrot.lane.b32.xlu0 %v10793_v19, %s12993_s0  ;;  %v4608_v31 = vsel %vm512_vm1, %v4567_v42, %v3541_v34  ;;  %v10907_v42 = vld [vmem:[%s12994_s2] ss:$0 sm:$0xff]  ;;  %s12953_s2 = smov 56  }
 0x31c   : > { %3680 = vrot.lane.b32.xlu1 %v10796_v25, %s12996_s1 }
 0x31d   : > { %vm2901_vm2 = vcmp.gt.f32.partialorder %v2865_v54, 0.0  ;;  %v2937_v17 = vmul.f32 0.01, %v2865_v54  ;;  %v4119_v59 = vpop.permute.xlu0 %4118 }
 0x31e   : > { %v3667_v9 = vpop.permute.xlu1 %3666  ;;  %v4771_v3 = vsel %vm2266_vm7, %v4730_v22, %v4119_v59 }
 0x31f   : > { %v2973_v63 = vsel %vm2901_vm2, %v2865_v54, %v2937_v17  ;;  %4296 = vrot.lane.b32.xlu0 %v3255_v49, %s12990_s21  ;;  %v4649_v1 = vsel %vm12956_vm4, %v4608_v31, %v3667_v9  ;;  %v10858_v54 = vld [vmem:[#allocation2 + $0x84] sm:$0xff]  ;;  %v10861_v17 = vld [vmem:[#allocation2 + $0x7a] sm:$0xff] }
 0x320   : > { %3021 = vst.msk [vmem:[#allocation2 + $0xdb] sm:$0xff] %vm12957_vm0, %v2973_v63  ;;  %3844 = vrot.lane.b32.xlu1 %v3171_v12, %s12992_s25  ;;  %v3173_v49 = vld [vmem:[#allocation2 + $0x7b] sm:$0xff] }
 0x321   : > { %v4283_v27 = vpop.permute.xlu0 %4282 }
 0x322   : > { %v3831_v11 = vpop.permute.xlu1 %3830  ;;  %v4812_v32 = vsel %vm12952_vm8, %v4771_v3, %v4283_v27  ;;  %v3298_v27 = vld [vmem:[#allocation2 + $0x86] sm:$0xff] }
 0x323   : > { %4460 = vrot.lane.b32.xlu0 %v3296_v35, %s12991_s28  ;;  %v4690_v58 = vsel %vm2182_vm5, %v4649_v1, %v3831_v11  ;;  %v3089_v11 = vld [vmem:[#allocation2 + $0x71] sm:$0xff] }
 0x324   : > { %3392 = vrot.lane.b32.xlu1 %v3087_v61, %s12999_s15 }
 0x325   : > { %v4447_v41 = vpop.permute.xlu0 %4446 }
 0x326   : > { %v10815_v43 = vpop.permute.xlu1 %3378  ;;  %v4853_v0 = vsel %vm2350_vm9, %v4812_v32, %v4447_v41 }
 0x327   : > { %8444 = vmatmul.mubr.msk.f32.gmra.mxu1 %vm12951_vm10, %v4853_v0  ;;  %4008 = vrot.lane.b32.xlu0 %v10758_v24, %s12989_s26 }
 0x328   : > { %3556 = vrot.lane.b32.xlu1 %v10760_v33, %s12988_s27  ;;  %v2721_v38 = vpop.f32.mrf.mxu0  ;;  %8446 = vmatprep.mubr.msk.f32.mxu1 %vm8897_vm3, %v12987_v52 }
 0x329   : > { %v2823_v47 = vmul.f32 %v10500_v18, %v2721_v38  ;;  %v3995_v2 = vpop.permute.xlu0 %3994 }
 0x32a   : > { %v3543_v39 = vpop.permute.xlu1 %3542  ;;  %v8381_v29 = vpop.f32.mrf.mxu0  ;;  %v4731_v60 = vsel %vm12955_vm6, %v4690_v58, %v3995_v2  ;;  %v10915_v58 = vld [vmem:[%s12995_s3] ss:$0 sm:$0xff]  ;;  %s12958_s3 = smov 64  }
 0x32b   : > { %v2866_v10 = vadd.f32 %v10506_v14, %v2823_v47  ;;  %4134 = vrot.lane.b32.xlu0 %v10826_v13, %s12993_s0  ;;  %v10894_v29 = vld [vmem:[#allocation2 + $0x82] sm:$0xff] }
 0x32c   : > { %3682 = vrot.lane.b32.xlu1 %v10829_v36, %s12996_s1 }
 0x32d   : > { %vm2902_vm15 = vcmp.gt.f32.partialorder %v2866_v10, 0.0  ;;  %v2938_v24 = vmul.f32 0.01, %v2866_v10  ;;  %v4121_v33 = vpop.permute.xlu0 %4120 }
 0x32e   : > { %v3669_v20 = vpop.permute.xlu1 %3668  ;;  %v4772_v62 = vsel %vm2266_vm7, %v4731_v60, %v4121_v33  ;;  %v3299_v60 = vld [vmem:[#allocation2 + $0x8e] sm:$0xff] }
 0x32f   : > { %v2974_v7 = vsel %vm2902_vm15, %v2866_v10, %v2938_v24  ;;  %4298 = vrot.lane.b32.xlu0 %v3256_v50, %s12990_s21  ;;  %v3040_v10 = vld [vmem:[#allocation2 + $0x30] sm:$0xff] }
 0x330   : > { %3022 = vst.msk [vmem:[#allocation2 + $0xe3] sm:$0x3f] %vm2999_vm13, %v2974_v7  ;;  %3846 = vrot.lane.b32.xlu1 %v3172_v4, %s12992_s25  ;;  %v3258_v24 = vld [vmem:[#allocation2 + $0x8d] sm:$0xff] }
 0x331   : > { %v4285_v51 = vpop.permute.xlu0 %4284 }
 0x332   : > { %v3833_v56 = vpop.permute.xlu1 %3832  ;;  %v4813_v23 = vsel %vm12952_vm8, %v4772_v62, %v4285_v51 }
 0x333   : > { %4462 = vrot.lane.b32.xlu0 %v3297_v21, %s12991_s28  ;;  %v2726_v6 = vpop.f32.mrf.mxu0 }
 0x334   : > { %3394 = vrot.lane.b32.xlu1 %v3088_v26, %s12999_s15  ;;  %v2824_v28 = vmul.f32 %v10500_v18, %v2726_v6  ;;  %v3090_v6 = vld [vmem:[#allocation2 + $0x79] sm:$0xff] }
 0x335   : > { %v4449_v8 = vpop.permute.xlu0 %4448  ;;  %v8384_v48 = vpop.f32.mrf.mxu0 }
 0x336   : > { %v2867_v5 = vadd.f32 %v10506_v14, %v2824_v28  ;;  %v3381_v55 = vpop.permute.xlu1 %3380  ;;  %v4854_v57 = vsel %vm2350_vm9, %v4813_v23, %v4449_v8 }
 0x337   : > { %8447 = vmatmul.mubr.msk.f32.gmra.mxu1 %vm12951_vm10, %v4854_v57  ;;  %4010 = vrot.lane.b32.xlu0 %v10793_v19, %s12989_s26  ;;  %v4569_v33 = vsel %vm12957_vm0, %v3040_v10, %v3381_v55  ;;  %v3042_v10 = vld [vmem:[#allocation2 + $0x40] sm:$0xff] }
 0x338   : > { %vm2903_vm2 = vcmp.gt.f32.partialorder %v2867_v5, 0.0  ;;  %v2939_v45 = vmul.f32 0.01, %v2867_v5  ;;  %3558 = vrot.lane.b32.xlu1 %v10796_v25, %s12988_s27  ;;  %8449 = vmatprep.mubr.msk.f32.mxu1 %vm8897_vm3, %v12987_v52  ;;  %v3039_v25 = vld [vmem:[#allocation2 + $0x28] sm:$0xff] }
 0x339   : > { %v3997_v40 = vpop.permute.xlu0 %3996  ;;  %v4568_v9 = vsel %vm12957_vm0, %v3039_v25, %v10815_v43  ;;  %v3259_v25 = vld [vmem:[#allocation2 + $0x95] sm:$0xff] }
 0x33a   : > { %v2975_v34 = vsel %vm2903_vm2, %v2867_v5, %v2939_v45  ;;  %v3545_v30 = vpop.permute.xlu1 %3544  ;;  %v4609_v53 = vsel %vm512_vm1, %v4568_v9, %v3543_v39  ;;  %v10891_v39 = vld [vmem:[#allocation2 + $0x8c] sm:$0xff] }
 0x33b   : > { %3023 = vst.msk [vmem:[#allocation2 + $0xeb] sm:$0xff] %vm12957_vm0, %v2975_v34  ;;  %4136 = vrot.lane.b32.xlu0 %v10858_v54, %s12993_s0  ;;  %v4650_v63 = vsel %vm12956_vm4, %v4609_v53, %v3669_v20  ;;  %v4610_v50 = vsel %vm512_vm1, %v4569_v33, %v3545_v30  ;;  %v10936_v34 = vld [vmem:[#allocation2 + $0x8a] sm:$0xff]  ;;  %v3260_v33 = vld [vmem:[#allocation2 + $0x9d] sm:$0xff] }
 0x33c   : > { %3684 = vrot.lane.b32.xlu1 %v10861_v17, %s12996_s1  ;;  %v4691_v37 = vsel %vm2182_vm5, %v4650_v63, %v3833_v56 }
 0x33d   : > { %v4123_v19 = vpop.permute.xlu0 %4122  ;;  %v4732_v15 = vsel %vm12955_vm6, %v4691_v37, %v3997_v40  ;;  %v10934_v40 = vld [vmem:[#allocation2 + $0x94] sm:$0xff] }
 0x33e   : > { %v3671_v59 = vpop.permute.xlu1 %3670  ;;  %v4773_v22 = vsel %vm2266_vm7, %v4732_v15, %v4123_v19  ;;  %v3300_v15 = vld [vmem:[#allocation2 + $0x96] sm:$0xff] }
 0x33f   : > { %4300 = vrot.lane.b32.xlu0 %v3257_v16, %s12990_s21  ;;  %v4651_v4 = vsel %vm12956_vm4, %v4610_v50, %v3671_v59  ;;  %v3175_v59 = vld [vmem:[#allocation2 + $0x8b] sm:$0xff] }
 0x340   : > { %3848 = vrot.lane.b32.xlu1 %v3173_v49, %s12992_s25 }
 0x341   : > { %v4287_v12 = vpop.permute.xlu0 %4286 }
 0x342   : > { %v3835_v44 = vpop.permute.xlu1 %3834  ;;  %v4814_v3 = vsel %vm12952_vm8, %v4773_v22, %v4287_v12 }
 0x343   : > { %4464 = vrot.lane.b32.xlu0 %v3298_v27, %s12991_s28  ;;  %v2731_v35 = vpop.f32.mrf.mxu0  ;;  %v4692_v51 = vsel %vm2182_vm5, %v4651_v4, %v3835_v44 }
 0x344   : > { %3396 = vrot.lane.b32.xlu1 %v3089_v11, %s12999_s15  ;;  %v2825_v61 = vmul.f32 %v10500_v18, %v2731_v35  ;;  %v3091_v35 = vld [vmem:[#allocation2 + $0x81] sm:$0xff] }
 0x345   : > { %v4451_v32 = vpop.permute.xlu0 %4450  ;;  %v8387_v41 = vpop.f32.mrf.mxu0 }
 0x346   : > { %v2868_v43 = vadd.f32 %v10506_v14, %v2825_v61  ;;  %v10881_v0 = vpop.permute.xlu1 %3382  ;;  %v4855_v38 = vsel %vm2350_vm9, %v4814_v3, %v4451_v32 }
 0x347   : > { %8450 = vmatmul.mubr.msk.f32.gmra.mxu1 %vm12951_vm10, %v4855_v38  ;;  %4012 = vrot.lane.b32.xlu0 %v10826_v13, %s12989_s26 }
 0x348   : > { %vm2904_vm15 = vcmp.gt.f32.partialorder %v2868_v43, 0.0  ;;  %v2940_v47 = vmul.f32 0.01, %v2868_v43  ;;  %3560 = vrot.lane.b32.xlu1 %v10829_v36, %s12988_s27  ;;  %8452 = vmatprep.mubr.msk.f32.mxu1 %vm8897_vm3, %v12987_v52 }
 0x349   : > { %v3999_v18 = vpop.permute.xlu0 %3998 }
 0x34a   : > { %v2976_v2 = vsel %vm2904_vm15, %v2868_v43, %v2940_v47  ;;  %v3547_v14 = vpop.permute.xlu1 %3546  ;;  %v4733_v26 = vsel %vm12955_vm6, %v4692_v51, %v3999_v18  ;;  %v10967_v18 = vld [vmem:[#allocation2 + $0x9c] sm:$0xff] }
 0x34b   : > { %3024 = vst.msk [vmem:[#allocation2 + $0xf3] sm:$0xff] %vm12957_vm0, %v2976_v2  ;;  %4138 = vrot.lane.b32.xlu0 %v10891_v39, %s12993_s0  ;;  %v10969_v2 = vld [vmem:[#allocation2 + $0x92] sm:$0xff] }
 0x34c   : > { %3686 = vrot.lane.b32.xlu1 %v10894_v29, %s12996_s1 }
 0x34d   : > { %v4125_v13 = vpop.permute.xlu0 %4124 }
 0x34e   : > { %v3673_v36 = vpop.permute.xlu1 %3672  ;;  %v4774_v62 = vsel %vm2266_vm7, %v4733_v26, %v4125_v13  ;;  %v3092_v26 = vld [vmem:[#allocation2 + $0x89] sm:$0xff] }
 0x34f   : > { %4302 = vrot.lane.b32.xlu0 %v3258_v24, %s12990_s21  ;;  %v2736_v20 = vpop.f32.mrf.mxu0 }
 0x350   : > { %3850 = vrot.lane.b32.xlu1 %v3174_v46, %s12992_s25  ;;  %v2826_v7 = vmul.f32 %v10907_v42, %v2736_v20  ;;  %v3176_v20 = vld [vmem:[#allocation2 + $0x93] sm:$0xff] }
 0x351   : > { %v4289_v31 = vpop.permute.xlu0 %4288  ;;  %v8390_v1 = vpop.f32.mrf.mxu0 }
 0x352   : > { %v2869_v56 = vadd.f32 %v10915_v58, %v2826_v7  ;;  %v3837_v21 = vpop.permute.xlu1 %3836  ;;  %v4815_v23 = vsel %vm12952_vm8, %v4774_v62, %v4289_v31 }
 0x353   : > { %4466 = vrot.lane.b32.xlu0 %v3299_v60, %s12991_s28 }
 0x354   : > { %vm2905_vm2 = vcmp.gt.f32.partialorder %v2869_v56, 0.0  ;;  %v2941_v28 = vmul.f32 0.01, %v2869_v56  ;;  %3398 = vrot.lane.b32.xlu1 %v3090_v6, %s12999_s15 }
 0x355   : > { %v4453_v8 = vpop.permute.xlu0 %4452 }
 0x356   : > { %v2977_v48 = vsel %vm2905_vm2, %v2869_v56, %v2941_v28  ;;  %v10923_v5 = vpop.permute.xlu1 %3384  ;;  %v4856_v55 = vsel %vm2350_vm9, %v4815_v23, %v4453_v8  ;;  %vm13012_vm2 = vcmask 31748  }
 0x357   : > { %3025 = vst.msk [vmem:[#allocation2 + $0xfb] sm:$0xfc] %vm2986_vm14, %v2977_v48  ;;  %8453 = vmatmul.mubr.msk.f32.gmra.mxu1 %vm12951_vm10, %v4856_v55  ;;  %4014 = vrot.lane.b32.xlu0 %v10858_v54, %s12989_s26  ;;  %v3041_v54 = vld [vmem:[#allocation2 + $0x38] sm:$0xff]  ;;  %v4571_v46 = vsel %vm12957_vm0, %v3042_v10, %v10923_v5  ;;  %v11003_v55 = vld [vmem:[#allocation2 + $0xa4] sm:$0xff] }
 0x358   : > { %3562 = vrot.lane.b32.xlu1 %v10861_v17, %s12988_s27  ;;  %8455 = vmatprep.mubr.msk.f32.mxu1 %vm8897_vm3, %v12987_v52  ;;  %v4570_v17 = vsel %vm12957_vm0, %v3041_v54, %v10881_v0  ;;  %v3043_v54 = vld [vmem:[#allocation2 + $0x48] sm:$0xff] }
 0x359   : > { %v4001_v57 = vpop.permute.xlu0 %4000  ;;  %v4611_v9 = vsel %vm512_vm1, %v4570_v17, %v3547_v14  ;;  %v3261_v17 = vld [vmem:[#allocation2 + $0xa5] sm:$0xff] }
 0x35a   : > { %v3549_v45 = vpop.permute.xlu1 %3548  ;;  %v4652_v53 = vsel %vm12956_vm4, %v4611_v9, %v3673_v36 }
 0x35b   : > { %4140 = vrot.lane.b32.xlu0 %v10934_v40, %s12993_s0  ;;  %v4693_v37 = vsel %vm2182_vm5, %v4652_v53, %v3837_v21  ;;  %v4612_v50 = vsel %vm512_vm1, %v4571_v46, %v3549_v45  ;;  %v3301_v21 = vld [vmem:[#allocation2 + $0x9e] sm:$0xff] }
 0x35c   : > { %3688 = vrot.lane.b32.xlu1 %v10936_v34, %s12996_s1  ;;  %v4734_v11 = vsel %vm12955_vm6, %v4693_v37, %v4001_v57  ;;  %v11005_v57 = vld [vmem:[#allocation2 + $0x9a] sm:$0xff]  ;;  %v3178_v46 = vld [vmem:[#allocation2 + $0xa3] sm:$0xff] }
 0x35d   : > { %v4127_v30 = vpop.permute.xlu0 %4126 }
 0x35e   : > { %v3675_v19 = vpop.permute.xlu1 %3674  ;;  %v4775_v22 = vsel %vm2266_vm7, %v4734_v11, %v4127_v30  ;;  %v3093_v11 = vld [vmem:[#allocation2 + $0x91] sm:$0xff] }
 0x35f   : > { %4304 = vrot.lane.b32.xlu0 %v3259_v25, %s12990_s21  ;;  %v2741_v16 = vpop.f32.mrf.mxu0  ;;  %v4653_v4 = vsel %vm12956_vm4, %v4612_v50, %v3675_v19 }
 0x360   : > { %3852 = vrot.lane.b32.xlu1 %v3175_v59, %s12992_s25  ;;  %v2827_v49 = vmul.f32 %v10907_v42, %v2741_v16  ;;  %v3177_v16 = vld [vmem:[#allocation2 + $0x9b] sm:$0xff] }
 0x361   : > { %v4291_v63 = vpop.permute.xlu0 %4290  ;;  %v8393_v12 = vpop.f32.mrf.mxu0 }
 0x362   : > { %v2870_v44 = vadd.f32 %v10915_v58, %v2827_v49  ;;  %v3839_v27 = vpop.permute.xlu1 %3838  ;;  %v4816_v3 = vsel %vm12952_vm8, %v4775_v22, %v4291_v63 }
 0x363   : > { %4468 = vrot.lane.b32.xlu0 %v3300_v15, %s12991_s28  ;;  %v4694_v1 = vsel %vm2182_vm5, %v4653_v4, %v3839_v27  ;;  %v3302_v27 = vld [vmem:[#allocation2 + $0xa6] sm:$0xff] }
 0x364   : > { %vm2906_vm14 = vcmp.gt.f32.partialorder %v2870_v44, 0.0  ;;  %v2942_v61 = vmul.f32 0.01, %v2870_v44  ;;  %3400 = vrot.lane.b32.xlu1 %v3091_v35, %s12999_s15 }
 0x365   : > { %v4455_v32 = vpop.permute.xlu0 %4454 }
 0x366   : > { %v2978_v41 = vsel %vm2906_vm14, %v2870_v44, %v2942_v61  ;;  %v10956_v43 = vpop.permute.xlu1 %3386  ;;  %v4857_v0 = vsel %vm2350_vm9, %v4816_v3, %v4455_v32 }
 0x367   : > { %3026 = vst.msk [vmem:[#allocation2 + $0x103] sm:$0xff] %vm12957_vm0, %v2978_v41  ;;  %8456 = vmatmul.mubr.msk.f32.gmra.mxu1 %vm12951_vm10, %v4857_v0  ;;  %4016 = vrot.lane.b32.xlu0 %v10891_v39, %s12989_s26  ;;  %v4572_v59 = vsel %vm12957_vm0, %v3043_v54, %v10956_v43 }
 0x368   : > { %3564 = vrot.lane.b32.xlu1 %v10894_v29, %s12988_s27  ;;  %8458 = vmatprep.mubr.msk.f32.mxu1 %vm8897_vm3, %v12987_v52 }
 0x369   : > { %v4003_v38 = vpop.permute.xlu0 %4002 }
 0x36a   : > { %v3551_v47 = vpop.permute.xlu1 %3550  ;;  %v4735_v60 = vsel %vm12955_vm6, %v4694_v1, %v4003_v38  ;;  %v3303_v1 = vld [vmem:[#allocation2 + $0xae] sm:$0xff] }
 0x36b   : > { %4142 = vrot.lane.b32.xlu0 %v10967_v18, %s12993_s0  ;;  %v2746_v14 = vpop.f32.mrf.mxu0  ;;  %v4613_v9 = vsel %vm512_vm1, %v4572_v59, %v3551_v47  ;;  %v3179_v59 = vld [vmem:[#allocation2 + $0xab] sm:$0xff] }
 0x36c   : > { %3690 = vrot.lane.b32.xlu1 %v10969_v2, %s12996_s1  ;;  %v2828_v39 = vmul.f32 %v10907_v42, %v2746_v14 }
 0x36d   : > { %v4129_v13 = vpop.permute.xlu0 %4128  ;;  %v8396_v29 = vpop.f32.mrf.mxu0 }
 0x36e   : > { %v2871_v36 = vadd.f32 %v10915_v58, %v2828_v39  ;;  %v3677_v24 = vpop.permute.xlu1 %3676  ;;  %v4776_v6 = vsel %vm2266_vm7, %v4735_v60, %v4129_v13  ;;  %v11038_v39 = vld [vmem:[#allocation2 + $0xac] sm:$0xff]  ;;  %v11040_v13 = vld [vmem:[#allocation2 + $0xa2] sm:$0xff] }
 0x36f   : > { %4306 = vrot.lane.b32.xlu0 %v3260_v33, %s12990_s21  ;;  %v4654_v53 = vsel %vm12956_vm4, %v4613_v9, %v3677_v24  ;;  %v3044_v29 = vld [vmem:[#allocation2 + $0x50] sm:$0xff] }
 0x370   : > { %vm2907_vm15 = vcmp.gt.f32.partialorder %v2871_v36, 0.0  ;;  %v2943_v7 = vmul.f32 0.01, %v2871_v36  ;;  %3854 = vrot.lane.b32.xlu1 %v3176_v20, %s12992_s25  ;;  %v3262_v24 = vld [vmem:[#allocation2 + $0xad] sm:$0xff] }
 0x371   : > { %v4293_v31 = vpop.permute.xlu0 %4292 }
 0x372   : > { %v2979_v51 = vsel %vm2907_vm15, %v2871_v36, %v2943_v7  ;;  %v3841_v56 = vpop.permute.xlu1 %3840  ;;  %v4817_v62 = vsel %vm12952_vm8, %v4776_v6, %v4293_v31  ;;  %vm13013_vm15 = vcmask 31750  }
 0x373   : > { %3027 = vst.msk [vmem:[#allocation2 + $0x10b] sm:$0x3] %vm2989_vm11, %v2979_v51  ;;  %4470 = vrot.lane.b32.xlu0 %v3301_v21, %s12991_s28  ;;  %v4695_v12 = vsel %vm2182_vm5, %v4654_v53, %v3841_v56  ;;  %v3094_v56 = vld [vmem:[#allocation2 + $0x99] sm:$0xff] }
 0x374   : > { %3028 = vst.msk [vmem:[#allocation2 + $0x10b] sm:$0xf0] %vm13012_vm2, %v2979_v51  ;;  %3402 = vrot.lane.b32.xlu1 %v3092_v26, %s12999_s15 }
 0x375   : > { %v4457_v28 = vpop.permute.xlu0 %4456 }
 0x376   : > { %v10991_v23 = vpop.permute.xlu1 %3388  ;;  %v4858_v8 = vsel %vm2350_vm9, %v4817_v62, %v4457_v28 }
 0x377   : > { %8459 = vmatmul.mubr.msk.f32.gmra.mxu1 %vm12951_vm10, %v4858_v8  ;;  %4018 = vrot.lane.b32.xlu0 %v10934_v40, %s12989_s26  ;;  %v4573_v33 = vsel %vm12957_vm0, %v3044_v29, %v10991_v23  ;;  %v3180_v29 = vld [vmem:[#allocation2 + $0xb3] sm:$0xff] }
 0x378   : > { %3566 = vrot.lane.b32.xlu1 %v10936_v34, %s12988_s27  ;;  %8461 = vmatprep.mubr.msk.f32.mxu1 %vm8897_vm3, %v12987_v52 }
 0x379   : > { %v4005_v48 = vpop.permute.xlu0 %4004 }
 0x37a   : > { %v11001_v5 = vpop.permute.xlu1 %3552  ;;  %v4736_v15 = vsel %vm12955_vm6, %v4695_v12, %v4005_v48 }
 0x37b   : > { %4144 = vrot.lane.b32.xlu0 %v11003_v55, %s12993_s0  ;;  %v2751_v45 = vpop.f32.mrf.mxu0  ;;  %v4614_v20 = vsel %vm512_vm1, %v4573_v33, %v11001_v5 }
 0x37c   : > { %3692 = vrot.lane.b32.xlu1 %v11005_v57, %s12996_s1  ;;  %v2829_v40 = vmul.f32 %v10907_v42, %v2751_v45 }
 0x37d   : > { %v4131_v34 = vpop.permute.xlu0 %4130  ;;  %v8399_v30 = vpop.f32.mrf.mxu0 }
 0x37e   : > { %v2872_v19 = vadd.f32 %v10915_v58, %v2829_v40  ;;  %v3679_v25 = vpop.permute.xlu1 %3678  ;;  %v4777_v35 = vsel %vm2266_vm7, %v4736_v15, %v4131_v34  ;;  %v11073_v40 = vld [vmem:[#allocation2 + $0xb4] sm:$0xff]  ;;  %v11075_v34 = vld [vmem:[#allocation2 + $0xaa] sm:$0xff] }
 0x37f   : > { %4308 = vrot.lane.b32.xlu0 %v3261_v17, %s12990_s21  ;;  %v4655_v50 = vsel %vm12956_vm4, %v4614_v20, %v3679_v25  ;;  %v3045_v30 = vld [vmem:[#allocation2 + $0x58] sm:$0xff] }
 0x380   : > { %vm2908_vm11 = vcmp.gt.f32.partialorder %v2872_v19, 0.0  ;;  %v2944_v49 = vmul.f32 0.01, %v2872_v19  ;;  %3856 = vrot.lane.b32.xlu1 %v3177_v16, %s12992_s25  ;;  %v3263_v25 = vld [vmem:[#allocation2 + $0xb5] sm:$0xff]  ;;  %v3305_v20 = vld [vmem:[#allocation2 + $0xbe] sm:$0xff] }
 0x381   : > { %v4295_v63 = vpop.permute.xlu0 %4294  ;;  %v3304_v15 = vld [vmem:[#allocation2 + $0xb6] sm:$0xff] }
 0x382   : > { %v2980_v37 = vsel %vm2908_vm11, %v2872_v19, %v2944_v49  ;;  %v3843_v44 = vpop.permute.xlu1 %3842  ;;  %v4818_v22 = vsel %vm12952_vm8, %v4777_v35, %v4295_v63  ;;  %v3095_v35 = vld [vmem:[#allocation2 + $0xa1] sm:$0xff] }
 0x383   : > { %3029 = vst.msk [vmem:[#allocation2 + $0x113] sm:$0xff] %vm12957_vm0, %v2980_v37  ;;  %4472 = vrot.lane.b32.xlu0 %v3302_v27, %s12991_s28  ;;  %v4696_v4 = vsel %vm2182_vm5, %v4655_v50, %v3843_v44 }
 0x384   : > { %3404 = vrot.lane.b32.xlu1 %v3093_v11, %s12999_s15 }
 0x385   : > { %v4459_v61 = vpop.permute.xlu0 %4458 }
 0x386   : > { %v11026_v3 = vpop.permute.xlu1 %3390  ;;  %v4859_v32 = vsel %vm2350_vm9, %v4818_v22, %v4459_v61 }
 0x387   : > { %8462 = vmatmul.mubr.msk.f32.gmra.mxu1 %vm12951_vm10, %v4859_v32  ;;  %4020 = vrot.lane.b32.xlu0 %v10967_v18, %s12989_s26  ;;  %v2756_v41 = vpop.f32.mrf.mxu0  ;;  %v4574_v17 = vsel %vm12957_vm0, %v3045_v30, %v11026_v3 }
 0x388   : > { %3568 = vrot.lane.b32.xlu1 %v10969_v2, %s12988_s27  ;;  %v2830_v43 = vmul.f32 %v10907_v42, %v2756_v41  ;;  %8464 = vmatprep.mubr.msk.f32.mxu1 %vm8897_vm3, %v12987_v52 }
 0x389   : > { %v4007_v0 = vpop.permute.xlu0 %4006  ;;  %v8402_v38 = vpop.f32.mrf.mxu0 }
 0x38a   : > { %v2873_v47 = vadd.f32 %v10915_v58, %v2830_v43  ;;  %v3555_v14 = vpop.permute.xlu1 %3554  ;;  %v4737_v51 = vsel %vm12955_vm6, %v4696_v4, %v4007_v0  ;;  %v11105_v38 = vld [vmem:[#allocation2 + $0xbc] sm:$0xff] }
 0x38b   : > { %4146 = vrot.lane.b32.xlu0 %v11038_v39, %s12993_s0  ;;  %v4615_v9 = vsel %vm512_vm1, %v4574_v17, %v3555_v14  ;;  %v3097_v17 = vld [vmem:[#allocation2 + $0xb1] sm:$0xff] }
 0x38c   : > { %vm2909_vm14 = vcmp.gt.f32.partialorder %v2873_v47, 0.0  ;;  %v2945_v18 = vmul.f32 0.01, %v2873_v47  ;;  %3694 = vrot.lane.b32.xlu1 %v11040_v13, %s12996_s1 }
 0x38d   : > { %v4133_v2 = vpop.permute.xlu0 %4132 }
 0x38e   : > { %v2981_v10 = vsel %vm2909_vm14, %v2873_v47, %v2945_v18  ;;  %v3681_v36 = vpop.permute.xlu1 %3680  ;;  %v4778_v21 = vsel %vm2266_vm7, %v4737_v51, %v4133_v2  ;;  %v11107_v47 = vld [vmem:[#allocation2 + $0xb2] sm:$0xff]  ;;  %v3264_v2 = vld [vmem:[#allocation2 + $0xbd] sm:$0xff]  ;;  %vm5523_vm14 = vcmask 1045504  }
 0x38f   : > { %3030 = vst.msk [vmem:[#allocation2 + $0x11b] sm:$0xf] %vm2994_vm12, %v2981_v10  ;;  %4310 = vrot.lane.b32.xlu0 %v3262_v24, %s12990_s21  ;;  %v4656_v53 = vsel %vm12956_vm4, %v4615_v9, %v3681_v36 }
 0x390   : > { %3031 = vst.msk [vmem:[#allocation2 + $0x11b] sm:$0xc0] %vm13013_vm15, %v2981_v10  ;;  %3858 = vrot.lane.b32.xlu1 %v3178_v46, %s12992_s25 }
 0x391   : > { %v4297_v7 = vpop.permute.xlu0 %4296 }
 0x392   : > { %v3845_v31 = vpop.permute.xlu1 %3844  ;;  %v4819_v60 = vsel %vm12952_vm8, %v4778_v21, %v4297_v7  ;;  %v3096_v7 = vld [vmem:[#allocation2 + $0xa9] sm:$0xff] }
 0x393   : > { %4474 = vrot.lane.b32.xlu0 %v3303_v1, %s12991_s28  ;;  %v4697_v37 = vsel %vm2182_vm5, %v4656_v53, %v3845_v31 }
 0x394   : > { %3406 = vrot.lane.b32.xlu1 %v3094_v56, %s12999_s15 }
 0x395   : > { %v4461_v26 = vpop.permute.xlu0 %4460 }
 0x396   : > { %v11061_v6 = vpop.permute.xlu1 %3392  ;;  %v4860_v62 = vsel %vm2350_vm9, %v4819_v60, %v4461_v26 }
 0x397   : > { %8465 = vmatmul.mubr.msk.f32.gmra.mxu1 %vm12951_vm10, %v4860_v62  ;;  %4022 = vrot.lane.b32.xlu0 %v11003_v55, %s12989_s26  ;;  %v2761_v28 = vpop.f32.mrf.mxu0  ;;  %v11135_v62 = vld [vmem:[#allocation2 + $0xc4] sm:$0xff] }
 0x398   : > { %3570 = vrot.lane.b32.xlu1 %v11005_v57, %s12988_s27  ;;  %v2831_v23 = vmul.f32 %v10907_v42, %v2761_v28  ;;  %8467 = vmatprep.mubr.msk.f32.mxu1 %vm8897_vm3, %v12987_v52  ;;  %v11137_v28 = vld [vmem:[#allocation2 + $0xba] sm:$0xff] }
 0x399   : > { %v4009_v8 = vpop.permute.xlu0 %4008  ;;  %v8405_v48 = vpop.f32.mrf.mxu0 }
 0x39a   : > { %v2874_v5 = vadd.f32 %v10915_v58, %v2831_v23  ;;  %v3557_v45 = vpop.permute.xlu1 %3556  ;;  %v4738_v11 = vsel %vm12955_vm6, %v4697_v37, %v4009_v8  ;;  %v3047_v8 = vld [vmem:[#allocation2 + $0x68] sm:$0xff] }
 0x39b   : > { %4148 = vrot.lane.b32.xlu0 %v11073_v40, %s12993_s0 }
 0x39c   : > { %vm2910_vm12 = vcmp.gt.f32.partialorder %v2874_v5, 0.0  ;;  %v2946_v55 = vmul.f32 0.01, %v2874_v5  ;;  %3696 = vrot.lane.b32.xlu1 %v11075_v34, %s12996_s1 }
 0x39d   : > { %v4135_v57 = vpop.permute.xlu0 %4134 }
 0x39e   : > { %v2982_v54 = vsel %vm2910_vm12, %v2874_v5, %v2946_v55  ;;  %v3683_v19 = vpop.permute.xlu1 %3682  ;;  %v4779_v22 = vsel %vm2266_vm7, %v4738_v11, %v4135_v57  ;;  %v3265_v5 = vld [vmem:[#allocation2 + $0xc5] sm:$0xff] }
 0x39f   : > { %3032 = vst.msk [vmem:[#allocation2 + $0x123] sm:$0xff] %vm12957_vm0, %v2982_v54  ;;  %4312 = vrot.lane.b32.xlu0 %v3263_v25, %s12990_s21  ;;  %v2766_v16 = vpop.f32.mrf.mxu0 }
 0x3a0   : > { %3860 = vrot.lane.b32.xlu1 %v3179_v59, %s12992_s25  ;;  %v2832_v49 = vmul.f32 %v10907_v42, %v2766_v16 }
 0x3a1   : > { %v4299_v63 = vpop.permute.xlu0 %4298  ;;  %v8408_v12 = vpop.f32.mrf.mxu0 }
 0x3a2   : > { %v2875_v44 = vadd.f32 %v10915_v58, %v2832_v49  ;;  %v3847_v27 = vpop.permute.xlu1 %3846  ;;  %v4820_v42 = vsel %vm12952_vm8, %v4779_v22, %v4299_v63 }
 0x3a3   : > { %4476 = vrot.lane.b32.xlu0 %v3304_v15, %s12991_s28  ;;  %v11166_v15 = vld [vmem:[#allocation2 + $0xc2] sm:$0xff] }
 0x3a4   : > { %vm2911_vm2 = vcmp.gt.f32.partialorder %v2875_v44, 0.0  ;;  %v2947_v61 = vmul.f32 0.01, %v2875_v44  ;;  %3408 = vrot.lane.b32.xlu1 %v3095_v35, %s12999_s15  ;;  %v3048_v35 = vld [vmem:[#allocation2 + $0x70] sm:$0xff] }
 0x3a5   : > { %v4463_v3 = vpop.permute.xlu0 %4462 }
 0x3a6   : > { %v2983_v32 = vsel %vm2911_vm2, %v2875_v44, %v2947_v61  ;;  %v3395_v41 = vpop.permute.xlu1 %3394  ;;  %v4861_v58 = vsel %vm2350_vm9, %v4820_v42, %v4463_v3  ;;  %v3266_v61 = vld [vmem:[#allocation2 + $0xcd] sm:$0xff]  ;;  %v3182_v3 = vld [vmem:[#allocation2 + $0xc3] sm:$0xff] }
 0x3a7   : > { %3033 = vst.msk [vmem:[#allocation2 + $0x12b] sm:$0x3f] %vm2999_vm13, %v2983_v32  ;;  %8468 = vmatmul.mubr.msk.f32.gmra.mxu1 %vm12951_vm10, %v4861_v58  ;;  %4024 = vrot.lane.b32.xlu0 %v11038_v39, %s12989_s26  ;;  %v3046_v39 = vld [vmem:[#allocation2 + $0x60] sm:$0xff] }
 0x3a8   : > { %3572 = vrot.lane.b32.xlu1 %v11040_v13, %s12988_s27  ;;  %8470 = vmatprep.mubr.msk.f32.mxu1 %vm8897_vm3, %v12987_v52  ;;  %v4575_v13 = vsel %vm12957_vm0, %v3046_v39, %v11061_v6 }
 0x3a9   : > { %v4011_v43 = vpop.permute.xlu0 %4010  ;;  %v4616_v10 = vsel %vm512_vm1, %v4575_v13, %v3557_v45  ;;  %v4576_v45 = vsel %vm12957_vm0, %v3047_v8, %v3395_v41  ;;  %v3099_v8 = vld [vmem:[#allocation2 + $0xc1] sm:$0xff] }
 0x3aa   : > { %v3559_v0 = vpop.permute.xlu1 %3558  ;;  %v4657_v36 = vsel %vm12956_vm4, %v4616_v10, %v3683_v19  ;;  %v3306_v19 = vld [vmem:[#allocation2 + $0xc6] sm:$0xff] }
 0x3ab   : > { %4150 = vrot.lane.b32.xlu0 %v11105_v38, %s12993_s0  ;;  %v4698_v33 = vsel %vm2182_vm5, %v4657_v36, %v3847_v27  ;;  %v11164_v27 = vld [vmem:[#allocation2 + $0xcc] sm:$0xff] }
 0x3ac   : > { %3698 = vrot.lane.b32.xlu1 %v11107_v47, %s12996_s1  ;;  %v4739_v50 = vsel %vm12955_vm6, %v4698_v33, %v4011_v43 }
 0x3ad   : > { %v4137_v14 = vpop.permute.xlu0 %4136 }
 0x3ae   : > { %v3685_v18 = vpop.permute.xlu1 %3684  ;;  %v4780_v4 = vsel %vm2266_vm7, %v4739_v50, %v4137_v14  ;;  %v3098_v14 = vld [vmem:[#allocation2 + $0xb9] sm:$0xff] }
 0x3af   : > { %4314 = vrot.lane.b32.xlu0 %v3264_v2, %s12990_s21 }
 0x3b0   : > { %3862 = vrot.lane.b32.xlu1 %v3180_v29, %s12992_s25 }
 0x3b1   : > { %v4301_v24 = vpop.permute.xlu0 %4300 }
 0x3b2   : > { %v3849_v46 = vpop.permute.xlu1 %3848  ;;  %v4821_v31 = vsel %vm12952_vm8, %v4780_v4, %v4301_v24 }
 0x3b3   : > { %4478 = vrot.lane.b32.xlu0 %v3305_v20, %s12991_s28  ;;  %v11193_v20 = vld [vmem:[#allocation2 + $0xca] sm:$0xff] }
 0x3b4   : > { %3410 = vrot.lane.b32.xlu1 %v3096_v7, %s12999_s15  ;;  %v3049_v7 = vld [vmem:[#allocation2 + $0x78] sm:$0xff] }
 0x3b5   : > { %v4465_v1 = vpop.permute.xlu0 %4464 }
 0x3b6   : > { %v3397_v51 = vpop.permute.xlu1 %3396  ;;  %v4862_v56 = vsel %vm2350_vm9, %v4821_v31, %v4465_v1  ;;  %v3267_v31 = vld [vmem:[#allocation2 + $0xd5] sm:$0xff] }
 0x3b7   : > { %v11126_v21 = vpop.f32.mrf.mxu1  ;;  %8471 = vmatmul.mubr.msk.f32.gmra.mxu1 %vm12951_vm10, %v4862_v56  ;;  %4026 = vrot.lane.b32.xlu0 %v11073_v40, %s12989_s26  ;;  %v3181_v40 = vld [vmem:[#allocation2 + $0xbb] sm:$0xff]  ;;  %v4577_v42 = vsel %vm12957_vm0, %v3048_v35, %v3397_v51  ;;  %v3183_v51 = vld [vmem:[#allocation2 + $0xcb] sm:$0xff] }
 0x3b8   : > { %3574 = vrot.lane.b32.xlu1 %v11075_v34, %s12988_s27  ;;  %8473 = vmatprep.mubr.msk.f32.mxu1 %vm8897_vm3, %v12987_v52  ;;  %v4617_v34 = vsel %vm512_vm1, %v4576_v45, %v3559_v0 }
 0x3b9   : > { %v8436_v60 = vpop.f32.mrf.mxu1  ;;  %v4013_v26 = vpop.permute.xlu0 %4012  ;;  %v4658_v55 = vsel %vm12956_vm4, %v4617_v34, %v3685_v18 }
 0x3ba   : > { %v3561_v6 = vpop.permute.xlu1 %3560  ;;  %v4699_v30 = vsel %vm2182_vm5, %v4658_v55, %v3849_v46  ;;  %v11191_v46 = vld [vmem:[#allocation2 + $0xd4] sm:$0xff] }
 0x3bb   : > { %4152 = vrot.lane.b32.xlu0 %v11135_v62, %s12993_s0  ;;  %v4740_v25 = vsel %vm12955_vm6, %v4699_v30, %v4013_v26  ;;  %v4618_v32 = vsel %vm512_vm1, %v4577_v42, %v3561_v6 }
 0x3bc   : > { %3700 = vrot.lane.b32.xlu1 %v11137_v28, %s12996_s1 }
 0x3bd   : > { %v4139_v23 = vpop.permute.xlu0 %4138 }
 0x3be   : > { %v3687_v48 = vpop.permute.xlu1 %3686  ;;  %v4781_v59 = vsel %vm2266_vm7, %v4740_v25, %v4139_v23 }
 0x3bf   : > { %4316 = vrot.lane.b32.xlu0 %v3265_v5, %s12990_s21  ;;  %v4659_v41 = vsel %vm12956_vm4, %v4618_v32, %v3687_v48 }
 0x3c0   : > { %3864 = vrot.lane.b32.xlu1 %v3181_v40, %s12992_s25 }
 0x3c1   : > { %v4303_v57 = vpop.permute.xlu0 %4302 }
 0x3c2   : > { %v3851_v54 = vpop.permute.xlu1 %3850  ;;  %v4822_v16 = vsel %vm12952_vm8, %v4781_v59, %v4303_v57  ;;  %v11223_v57 = vld [vmem:[%s12916_s5] ss:$0 sm:$0xff]  ;;  %v11230_v59 = vld [vmem:[#allocation2 + $0xd2] sm:$0xff] }
 0x3c3   : > { %4480 = vrot.lane.b32.xlu0 %v3306_v19, %s12991_s28  ;;  %v4700_v43 = vsel %vm2182_vm5, %v4659_v41, %v3851_v54  ;;  %v3309_v41 = vld [vmem:[#allocation2 + $0xde] sm:$0xff] }
 0x3c4   : > { %3412 = vrot.lane.b32.xlu1 %v3097_v17, %s12999_s15  ;;  %v11228_v17 = vld [vmem:[#allocation2 + $0xdc] sm:$0xff] }
 0x3c5   : > { %v4467_v9 = vpop.permute.xlu0 %4466 }
 0x3c6   : > { %v3399_v49 = vpop.permute.xlu1 %3398  ;;  %v4863_v53 = vsel %vm2350_vm9, %v4822_v16, %v4467_v9  ;;  %v11240_v9 = vld [vmem:[%s12917_s6] ss:$0 sm:$0xff] }
 0x3c7   : > { %v11155_v63 = vpop.f32.mrf.mxu1  ;;  %8474 = vmatmul.mubr.msk.f32.gmra.mxu1 %vm12951_vm10, %v4863_v53  ;;  %4028 = vrot.lane.b32.xlu0 %v11105_v38, %s12989_s26  ;;  %v3307_v38 = vld [vmem:[#allocation2 + $0xce] sm:$0xff]  ;;  %v4578_v1 = vsel %vm12957_vm0, %v3049_v7, %v3399_v49  ;;  %v3050_v53 = vld [vmem:[#allocation2 + $0x80] sm:$0xff] }
 0x3c8   : > { %3576 = vrot.lane.b32.xlu1 %v11107_v47, %s12988_s27  ;;  %8476 = vmatprep.mubr.msk.f32.mxu1 %vm8897_vm3, %v12987_v52 }
 0x3c9   : > { %v8439_v12 = vpop.f32.mrf.mxu1  ;;  %v4015_v37 = vpop.permute.xlu0 %4014 }
 0x3ca   : > { %v3563_v44 = vpop.permute.xlu1 %3562  ;;  %v4741_v47 = vsel %vm12955_vm6, %v4700_v43, %v4015_v37 }
 0x3cb   : > { %4154 = vrot.lane.b32.xlu0 %v11164_v27, %s12993_s0  ;;  %v4619_v56 = vsel %vm512_vm1, %v4578_v1, %v3563_v44  ;;  %v3268_v44 = vld [vmem:[#allocation2 + $0xdd] sm:$0xff] }
 0x3cc   : > { %3702 = vrot.lane.b32.xlu1 %v11166_v15, %s12996_s1 }
 0x3cd   : > { %v4141_v11 = vpop.permute.xlu0 %4140 }
 0x3ce   : > { %v3689_v22 = vpop.permute.xlu1 %3688  ;;  %v4782_v39 = vsel %vm2266_vm7, %v4741_v47, %v4141_v11 }
 0x3cf   : > { %4318 = vrot.lane.b32.xlu0 %v3266_v61, %s12990_s21  ;;  %v4660_v60 = vsel %vm12956_vm4, %v4619_v56, %v3689_v22  ;;  %v11279_v56 = vld [vmem:[#allocation2 + $0xda] sm:$0xff] }
 0x3d0   : > { %3866 = vrot.lane.b32.xlu1 %v3182_v3, %s12992_s25 }
 0x3d1   : > { %v4305_v58 = vpop.permute.xlu0 %4304 }
 0x3d2   : > { %v3853_v0 = vpop.permute.xlu1 %3852  ;;  %v4823_v18 = vsel %vm12952_vm8, %v4782_v39, %v4305_v58  ;;  %v5294_v58 = vmul.f32 %v11223_v57, %v11126_v21 }
 0x3d3   : > { %4482 = vrot.lane.b32.xlu0 %v3307_v38, %s12991_s28  ;;  %v4701_v6 = vsel %vm2182_vm5, %v4660_v60, %v3853_v0  ;;  %v3100_v0 = vld [vmem:[#allocation2 + $0xc9] sm:$0xff] }
 0x3d4   : > { %3414 = vrot.lane.b32.xlu1 %v3098_v14, %s12999_s15  ;;  %v5295_v14 = vmul.f32 %v11223_v57, %v11155_v63 }
 0x3d5   : > { %v4469_v2 = vpop.permute.xlu0 %4468 }
 0x3d6   : > { %v3401_v13 = vpop.permute.xlu1 %3400  ;;  %v4864_v29 = vsel %vm2350_vm9, %v4823_v18, %v4469_v2 }
 0x3d7   : > { %v5098_v10 = vpop.f32.mrf.mxu1  ;;  %8477 = vmatmul.mubr.msk.f32.gmra.mxu1 %vm12951_vm10, %v4864_v29  ;;  %4030 = vrot.lane.b32.xlu0 %v11135_v62, %s12989_s26  ;;  %v5337_v29 = vadd.f32 %v11240_v9, %v5294_v58 }
 0x3d8   : > { %3578 = vrot.lane.b32.xlu1 %v11137_v28, %s12988_s27  ;;  %8479 = vmatprep.mubr.msk.f32.mxu1 %vm8897_vm3, %v12987_v52  ;;  %v3308_v28 = vld [vmem:[#allocation2 + $0xd6] sm:$0xff]  ;;  %v5296_v16 = vmul.f32 %v11223_v57, %v5098_v10 }
 0x3d9   : > { %v8442_v36 = vpop.f32.mrf.mxu1  ;;  %v4017_v24 = vpop.permute.xlu0 %4016  ;;  %v5409_v1 = vmul.f32 0.01, %v5337_v29  ;;  %vm5373_vm15 = vcmp.gt.f32.partialorder %v5337_v29, 0.0 }
 0x3da   : > { %v3565_v33 = vpop.permute.xlu1 %3564  ;;  %v4742_v23 = vsel %vm12955_vm6, %v4701_v6, %v4017_v24  ;;  %v5339_v11 = vadd.f32 %v11240_v9, %v5296_v16  ;;  %v5338_v24 = vadd.f32 %v11240_v9, %v5295_v14 }
 0x3db   : > { %4156 = vrot.lane.b32.xlu0 %v11191_v46, %s12993_s0 }
 0x3dc   : > { %3704 = vrot.lane.b32.xlu1 %v11193_v20, %s12996_s1  ;;  %v5411_v38 = vmul.f32 0.01, %v5339_v11  ;;  %vm5375_vm11 = vcmp.gt.f32.partialorder %v5339_v11, 0.0  ;;  %v5410_v60 = vmul.f32 0.01, %v5338_v24  ;;  %vm5374_vm2 = vcmp.gt.f32.partialorder %v5338_v24, 0.0 }
 0x3dd   : > { %v4143_v50 = vpop.permute.xlu0 %4142 }
 0x3de   : > { %v3691_v4 = vpop.permute.xlu1 %3690  ;;  %v4783_v48 = vsel %vm2266_vm7, %v4742_v23, %v4143_v50  ;;  %v5447_v36 = vsel %vm5375_vm11, %v5339_v11, %v5411_v38  ;;  %v11325_v38 = vld [vmem:[#allocation2 + $0xec] sm:$0xff] }
 0x3df   : > { %4320 = vrot.lane.b32.xlu0 %v3267_v31, %s12990_s21 }
 0x3e0   : > { %3868 = vrot.lane.b32.xlu1 %v3183_v51, %s12992_s25  ;;  %v5524_v51 = vrot.slane %v5447_v36, 2 }
 0x3e1   : > { %v4307_v26 = vpop.permute.xlu0 %4306 }
 0x3e2   : > { %v3855_v62 = vpop.permute.xlu1 %3854  ;;  %v4824_v5 = vsel %vm12952_vm8, %v4783_v48, %v4307_v26  ;;  %v5445_v48 = vsel %vm5373_vm15, %v5337_v29, %v5409_v1 }
 0x3e3   : > { %4484 = vrot.lane.b32.xlu0 %v3308_v28, %s12991_s28 }
 0x3e4   : > { %3416 = vrot.lane.b32.xlu1 %v3099_v8, %s12999_s15  ;;  %v3269_v8 = vld [vmem:[#allocation2 + $0xe5] sm:$0xff] }
 0x3e5   : > { %v4471_v45 = vpop.permute.xlu0 %4470 }
 0x3e6   : > { %v11210_v40 = vpop.permute.xlu1 %3402  ;;  %v4865_v34 = vsel %vm2350_vm9, %v4824_v5, %v4471_v45 }
 0x3e7   : > { %v5103_v55 = vpop.f32.mrf.mxu1  ;;  %8480 = vmatmul.mubr.msk.f32.gmra.mxu1 %vm12951_vm10, %v4865_v34  ;;  %4032 = vrot.lane.b32.xlu0 %v11164_v27, %s12989_s26  ;;  %v4579_v27 = vsel %vm12957_vm0, %v3050_v53, %v3401_v13  ;;  %v3185_v34 = vld [vmem:[#allocation2 + $0xdb] sm:$0xff] }
 0x3e8   : > { %3580 = vrot.lane.b32.xlu1 %v11166_v15, %s12988_s27  ;;  %8482 = vmatprep.mubr.msk.f32.mxu1 %vm8897_vm3, %v12987_v52  ;;  %v5297_v19 = vmul.f32 %v11223_v57, %v5103_v55  ;;  %v3184_v15 = vld [vmem:[#allocation2 + $0xd3] sm:$0xff]  ;;  %v4620_v35 = vsel %vm512_vm1, %v4579_v27, %v3565_v33 }
 0x3e9   : > { %v8445_v30 = vpop.f32.mrf.mxu1  ;;  %v4019_v54 = vpop.permute.xlu0 %4018  ;;  %v4661_v22 = vsel %vm12956_vm4, %v4620_v35, %v3691_v4 }
 0x3ea   : > { %v11226_v25 = vpop.permute.xlu1 %3566  ;;  %v5340_v12 = vadd.f32 %v11240_v9, %v5297_v19  ;;  %v4702_v42 = vsel %vm2182_vm5, %v4661_v22, %v3855_v62  ;;  %v3051_v62 = vld [vmem:[#allocation2 + $0x88] sm:$0xff] }
 0x3eb   : > { %4158 = vrot.lane.b32.xlu0 %v11228_v17, %s12993_s0  ;;  %v4743_v43 = vsel %vm12955_vm6, %v4702_v42, %v4019_v54  ;;  %v4580_v5 = vsel %vm12957_vm0, %v3051_v62, %v11210_v40  ;;  %v5446_v54 = vsel %vm5374_vm2, %v5338_v24, %v5410_v60  ;;  %v3311_v24 = vld [vmem:[#allocation2 + $0xee] sm:$0xff]  ;;  %vm5533_vm2 = vcmask 1041408  }
 0x3ec   : > { %3706 = vrot.lane.b32.xlu1 %v11230_v59, %s12996_s1  ;;  %v5412_v3 = vmul.f32 0.01, %v5340_v12  ;;  %vm5376_vm13 = vcmp.gt.f32.partialorder %v5340_v12, 0.0  ;;  %v4621_v30 = vsel %vm512_vm1, %v4580_v5, %v11226_v25  ;;  %v11360_v62 = vld [vmem:[#allocation2 + $0xea] sm:$0xff] }
 0x3ed   : > { %v4145_v49 = vpop.permute.xlu0 %4144 }
 0x3ee   : > { %v11243_v37 = vpop.permute.xlu1 %3692  ;;  %v4784_v47 = vsel %vm2266_vm7, %v4743_v43, %v4145_v49  ;;  %v5448_v2 = vsel %vm5376_vm13, %v5340_v12, %v5412_v3  ;;  %vm5627_vm13 = vcmask 1046528  }
 0x3ef   : > { %4322 = vrot.lane.b32.xlu0 %v3268_v44, %s12990_s21  ;;  %v5525_v33 = vrot.slane %v5448_v2, 2  ;;  %v4662_v19 = vsel %vm12956_vm4, %v4621_v30, %v11243_v37  ;;  %v3310_v44 = vld [vmem:[#allocation2 + $0xe6] sm:$0xff] }
 0x3f0   : > { %3870 = vrot.lane.b32.xlu1 %v3184_v15, %s12992_s25  ;;  %v3101_v15 = vld [vmem:[#allocation2 + $0xd1] sm:$0xff]  ;;  %v3186_v2 = vld [vmem:[#allocation2 + $0xe3] sm:$0xff] }
 0x3f1   : > { %v4309_v61 = vpop.permute.xlu0 %4308  ;;  %v5526_v26 = vsel %vm5523_vm14, %v5524_v51, %v5525_v33 }
 0x3f2   : > { %v3857_v32 = vpop.permute.xlu1 %3856  ;;  %v4825_v39 = vsel %vm12952_vm8, %v4784_v47, %v4309_v61  ;;  %v11292_v55 = vmax.f32 %v5445_v48, %v5526_v26  ;;  %v11327_v47 = vld [vmem:[#allocation2 + $0xe2] sm:$0xff]  ;;  %v3271_v48 = vld [vmem:[#allocation2 + $0xf5] sm:$0xff] }
 0x3f3   : > { %4486 = vrot.lane.b32.xlu0 %v3309_v41, %s12991_s28  ;;  %v4703_v40 = vsel %vm2182_vm5, %v4662_v19, %v3857_v32 }
 0x3f4   : > { %3418 = vrot.lane.b32.xlu1 %v3100_v0, %s12999_s15  ;;  %v5628_v25 = vrot.slane %v11292_v55, 1 }
 0x3f5   : > { %v4473_v18 = vpop.permute.xlu0 %4472 }
 0x3f6   : > { %v11261_v21 = vpop.permute.xlu1 %3404  ;;  %v4866_v13 = vsel %vm2350_vm9, %v4825_v39, %v4473_v18  ;;  %v3270_v39 = vld [vmem:[#allocation2 + $0xed] sm:$0xff] }
 0x3f7   : > { %v5108_v10 = vpop.f32.mrf.mxu1  ;;  %8483 = vmatmul.mubr.msk.f32.gmra.mxu1 %vm12951_vm10, %v4866_v13  ;;  %4034 = vrot.lane.b32.xlu0 %v11191_v46, %s12989_s26  ;;  %v11277_v46 = vld [vmem:[#allocation2 + $0xe4] sm:$0xff] }
 0x3f8   : > { %v5298_v63 = vmul.f32 %v11223_v57, %v5108_v10  ;;  %3582 = vrot.lane.b32.xlu1 %v11193_v20, %s12988_s27  ;;  %8485 = vmatprep.mubr.msk.f32.mxu1 %vm8897_vm3, %v12987_v52 }
 0x3f9   : > { %v8448_v50 = vpop.f32.mrf.mxu1  ;;  %v4021_v7 = vpop.permute.xlu0 %4020 }
 0x3fa   : > { %v5341_v4 = vadd.f32 %v11240_v9, %v5298_v63  ;;  %v11275_v31 = vpop.permute.xlu1 %3568  ;;  %v4744_v27 = vsel %vm12955_vm6, %v4703_v40, %v4021_v7  ;;  %v3102_v50 = vld [vmem:[#allocation2 + $0xd9] sm:$0xff] }
 0x3fb   : > { %4160 = vrot.lane.b32.xlu0 %v11277_v46, %s12993_s0 }
 0x3fc   : > { %vm5377_vm12 = vcmp.gt.f32.partialorder %v5341_v4, 0.0  ;;  %v5413_v20 = vmul.f32 0.01, %v5341_v4  ;;  %3708 = vrot.lane.b32.xlu1 %v11279_v56, %s12996_s1 }
 0x3fd   : > { %v4147_v6 = vpop.permute.xlu0 %4146 }
 0x3fe   : > { %v11286_v28 = vsel %vm5377_vm12, %v5341_v4, %v5413_v20  ;;  %v3695_v23 = vpop.permute.xlu1 %3694  ;;  %v4785_v37 = vsel %vm2266_vm7, %v4744_v27, %v4147_v6  ;;  %v11358_v6 = vld [vmem:[#allocation2 + $0xf4] sm:$0xff]  ;;  %v3103_v27 = vld [vmem:[#allocation2 + $0xe1] sm:$0xff] }
 0x3ff   : > { %v5527_v45 = vrot.slane %v11286_v28, 2  ;;  %4324 = vrot.lane.b32.xlu0 %v3269_v8, %s12990_s21 }
 0x400   : > { %3872 = vrot.lane.b32.xlu1 %v3185_v34, %s12992_s25 }
 0x401   : > { %v5528_v16 = vsel %vm5523_vm14, %v5525_v33, %v5527_v45  ;;  %v4311_v49 = vpop.permute.xlu0 %4310  ;;  %v3187_v45 = vld [vmem:[#allocation2 + $0xeb] sm:$0xff] }
 0x402   : > { %v11301_v53 = vmax.f32 %v5446_v54, %v5528_v16  ;;  %v3859_v12 = vpop.permute.xlu1 %3858  ;;  %v4826_v35 = vsel %vm12952_vm8, %v4785_v37, %v4311_v49 }
 0x403   : > { %4488 = vrot.lane.b32.xlu0 %v3310_v44, %s12991_s28 }
 0x404   : > { %v5629_v11 = vrot.slane %v11301_v53, 1  ;;  %3420 = vrot.lane.b32.xlu1 %v3101_v15, %s12999_s15 }
 0x405   : > { %v4475_v22 = vpop.permute.xlu0 %4474 }
 0x406   : > { %v5630_v61 = vsel %vm5627_vm13, %v5628_v25, %v5629_v11  ;;  %v3407_v42 = vpop.permute.xlu1 %3406  ;;  %v4867_v3 = vsel %vm2350_vm9, %v4826_v35, %v4475_v22 }
 0x407   : > { %v5677_v32 = vmax.f32 %v11292_v55, %v5630_v61  ;;  %v5113_v41 = vpop.f32.mrf.mxu1  ;;  %8486 = vmatmul.mubr.msk.f32.gmra.mxu1 %vm12951_vm10, %v4867_v3  ;;  %4036 = vrot.lane.b32.xlu0 %v11228_v17, %s12989_s26 }
 0x408   : > { %3584 = vrot.lane.b32.xlu1 %v11230_v59, %s12988_s27  ;;  %8488 = vmatprep.mubr.msk.f32.mxu1 %vm8897_vm3, %v12987_v52  ;;  %v3052_v59 = vld [vmem:[#allocation2 + $0x90] sm:$0xff] }
 0x409   : > { %5693 = vst.msk [vmem:[#allocation4] sm:$0xff] %vm512_vm1, %v5677_v32  ;;  %v8451_v58 = vpop.f32.mrf.mxu1  ;;  %v4023_v43 = vpop.permute.xlu0 %4022  ;;  %v4581_v18 = vsel %vm12957_vm0, %v3052_v59, %v11261_v21 }
 0x40a   : > { %v3571_v0 = vpop.permute.xlu1 %3570  ;;  %v4622_v13 = vsel %vm512_vm1, %v4581_v18, %v11275_v31 }
 0x40b   : > { %4162 = vrot.lane.b32.xlu0 %v11325_v38, %s12993_s0  ;;  %v4663_v29 = vsel %vm12956_vm4, %v4622_v13, %v3695_v23  ;;  %v3053_v23 = vld [vmem:[#allocation2 + $0x98] sm:$0xff] }
 0x40c   : > { %3710 = vrot.lane.b32.xlu1 %v11327_v47, %s12996_s1  ;;  %v4704_v36 = vsel %vm2182_vm5, %v4663_v29, %v3859_v12  ;;  %v4582_v5 = vsel %vm12957_vm0, %v3053_v23, %v3407_v42  ;;  %v3312_v12 = vld [vmem:[#allocation2 + $0xf6] sm:$0xff]  ;;  %v3054_v29 = vld [vmem:[#allocation2 + $0xa0] sm:$0xff] }
 0x40d   : > { %v4149_v17 = vpop.permute.xlu0 %4148  ;;  %v4745_v33 = vsel %vm12955_vm6, %v4704_v36, %v4023_v43  ;;  %v4623_v34 = vsel %vm512_vm1, %v4582_v5, %v3571_v0  ;;  %v3313_v23 = vld [vmem:[#allocation2 + $0xfe] sm:$0xff] }
 0x40e   : > { %v3697_v14 = vpop.permute.xlu1 %3696  ;;  %v4786_v21 = vsel %vm2266_vm7, %v4745_v33, %v4149_v17 }
 0x40f   : > { %4326 = vrot.lane.b32.xlu0 %v3270_v39, %s12990_s21  ;;  %v4664_v54 = vsel %vm12956_vm4, %v4623_v34, %v3697_v14  ;;  %v11399_v39 = vld [vmem:[#allocation2 + $0xfc] sm:$0xff] }
 0x410   : > { %3874 = vrot.lane.b32.xlu1 %v3186_v2, %s12992_s25 }
 0x411   : > { %v4313_v10 = vpop.permute.xlu0 %4312 }
 0x412   : > { %v3861_v63 = vpop.permute.xlu1 %3860  ;;  %v4827_v7 = vsel %vm12952_vm8, %v4786_v21, %v4313_v10 }
 0x413   : > { %4490 = vrot.lane.b32.xlu0 %v3311_v24, %s12991_s28  ;;  %v4705_v49 = vsel %vm2182_vm5, %v4664_v54, %v3861_v63  ;;  %v3272_v63 = vld [vmem:[#allocation2 + $0xfd] sm:$0xff]  ;;  %v5484_v24 = vrot.slane %v11286_v28, 4 }
 0x414   : > { %3422 = vrot.lane.b32.xlu1 %v3102_v50, %s12999_s15 }
 0x415   : > { %v4477_v4 = vpop.permute.xlu0 %4476 }
 0x416   : > { %v11346_v31 = vpop.permute.xlu1 %3408  ;;  %v4868_v1 = vsel %vm2350_vm9, %v4827_v7, %v4477_v4  ;;  %v3188_v7 = vld [vmem:[#allocation2 + $0xf3] sm:$0xff] }
 0x417   : > { %v5118_v51 = vpop.f32.mrf.mxu1  ;;  %8489 = vmatmul.mubr.msk.f32.gmra.mxu1 %vm12951_vm10, %v4868_v1  ;;  %4038 = vrot.lane.b32.xlu0 %v11277_v46, %s12989_s26  ;;  %v4583_v33 = vsel %vm12957_vm0, %v3054_v29, %v11346_v31 }
 0x418   : > { %3586 = vrot.lane.b32.xlu1 %v11279_v56, %s12988_s27  ;;  %8491 = vmatprep.mubr.msk.f32.mxu1 %vm8897_vm3, %v12987_v52  ;;  %v5299_v56 = vmul.f32 %v11223_v57, %v5113_v41  ;;  %v5300_v30 = vmul.f32 %v11223_v57, %v5118_v51 }
 0x419   : > { %v8454_v20 = vpop.f32.mrf.mxu1  ;;  %v4025_v60 = vpop.permute.xlu0 %4024 }
 0x41a   : > { %v11356_v26 = vpop.permute.xlu1 %3572  ;;  %v5342_v16 = vadd.f32 %v11240_v9, %v5299_v56  ;;  %v4746_v44 = vsel %vm12955_vm6, %v4705_v49, %v4025_v60  ;;  %v5343_v15 = vadd.f32 %v11240_v9, %v5300_v30  ;;  %v3104_v56 = vld [vmem:[#allocation2 + $0xe9] sm:$0xff] }
 0x41b   : > { %4164 = vrot.lane.b32.xlu0 %v11358_v6, %s12993_s0  ;;  %v4624_v4 = vsel %vm512_vm1, %v4583_v33, %v11356_v26 }
 0x41c   : > { %3712 = vrot.lane.b32.xlu1 %v11360_v62, %s12996_s1  ;;  %v5414_v61 = vmul.f32 0.01, %v5342_v16  ;;  %vm5378_vm11 = vcmp.gt.f32.partialorder %v5342_v16, 0.0  ;;  %v5415_v41 = vmul.f32 0.01, %v5343_v15  ;;  %vm5379_vm15 = vcmp.gt.f32.partialorder %v5343_v15, 0.0 }
 0x41d   : > { %v4151_v46 = vpop.permute.xlu0 %4150 }
 0x41e   : > { %v11367_v8 = vpop.permute.xlu1 %3698  ;;  %v4787_v37 = vsel %vm2266_vm7, %v4746_v44, %v4151_v46  ;;  %v11394_v17 = vsel %vm5378_vm11, %v5342_v16, %v5414_v61  ;;  %vm13014_vm11 = vcmask 1043456   ;;  %v11453_v44 = vld [vmem:[#allocation2 + $0x104] sm:$0xff] }
 0x41f   : > { %4328 = vrot.lane.b32.xlu0 %v3271_v48, %s12990_s21  ;;  %v5485_v2 = vrot.slane %v11394_v17, 4  ;;  %v4665_v28 = vsel %vm12956_vm4, %v4624_v4, %v11367_v8  ;;  %v3273_v61 = vld [vmem:[#allocation2 + $0x105] sm:$0xff] }
 0x420   : > { %3876 = vrot.lane.b32.xlu1 %v3187_v45, %s12992_s25 }
 0x421   : > { %v4315_v19 = vpop.permute.xlu0 %4314  ;;  %v5486_v1 = vsel %vm13014_vm11, %v5484_v24, %v5485_v2 }
 0x422   : > { %v3863_v40 = vpop.permute.xlu1 %3862  ;;  %v4828_v35 = vsel %vm12952_vm8, %v4787_v37, %v4315_v19  ;;  %v3055_v37 = vld [vmem:[#allocation2 + $0xa8] sm:$0xff] }
 0x423   : > { %4492 = vrot.lane.b32.xlu0 %v3312_v12, %s12991_s28  ;;  %v4706_v20 = vsel %vm2182_vm5, %v4665_v28, %v3863_v40 }
 0x424   : > { %3424 = vrot.lane.b32.xlu1 %v3103_v27, %s12999_s15  ;;  %v11455_v27 = vld [vmem:[#allocation2 + $0xfa] sm:$0xff] }
 0x425   : > { %v4479_v22 = vpop.permute.xlu0 %4478 }
 0x426   : > { %v11383_v42 = vpop.permute.xlu1 %3410  ;;  %v4869_v3 = vsel %vm2350_vm9, %v4828_v35, %v4479_v22 }
 0x427   : > { %v5123_v32 = vpop.f32.mrf.mxu1  ;;  %8492 = vmatmul.mubr.msk.f32.gmra.mxu1 %vm12951_vm10, %v4869_v3  ;;  %4040 = vrot.lane.b32.xlu0 %v11325_v38, %s12989_s26  ;;  %v11401_v38 = vld [vmem:[#allocation2 + $0xf2] sm:$0xff]  ;;  %v4584_v3 = vsel %vm12957_vm0, %v3055_v37, %v11383_v42  ;;  %v11530_v37 = vld [vmem:[#allocation2 + $0x10a] sm:$0xff] }
 0x428   : > { %v5301_v58 = vmul.f32 %v11223_v57, %v5123_v32  ;;  %3588 = vrot.lane.b32.xlu1 %v11327_v47, %s12988_s27  ;;  %8494 = vmatprep.mubr.msk.f32.mxu1 %vm8897_vm3, %v12987_v52  ;;  %v11405_v47 = vsel %vm5379_vm15, %v5343_v15, %v5415_v41  ;;  %v3189_v41 = vld [vmem:[#allocation2 + $0xfb] sm:$0xff] }
 0x429   : > { %v8457_v43 = vpop.f32.mrf.mxu1  ;;  %v4027_v0 = vpop.permute.xlu0 %4026  ;;  %v5534_v50 = vrot.slane %v11405_v47, 6 }
 0x42a   : > { %v5344_v59 = vadd.f32 %v11240_v9, %v5301_v58  ;;  %v11397_v14 = vpop.permute.xlu1 %3574  ;;  %v4747_v26 = vsel %vm12955_vm6, %v4706_v20, %v4027_v0  ;;  %v11500_v20 = vld [vmem:[#allocation2 + $0x102] sm:$0xff] }
 0x42b   : > { %4166 = vrot.lane.b32.xlu0 %v11399_v39, %s12993_s0  ;;  %v4625_v58 = vsel %vm512_vm1, %v4584_v3, %v11397_v14  ;;  %v3314_v14 = vld [vmem:[#allocation2 + $0x106] sm:$0xff] }
 0x42c   : > { %vm5380_vm12 = vcmp.gt.f32.partialorder %v5344_v59, 0.0  ;;  %v5416_v18 = vmul.f32 0.01, %v5344_v59  ;;  %3714 = vrot.lane.b32.xlu1 %v11401_v38, %s12996_s1  ;;  %v3191_v3 = vld [vmem:[#allocation2 + $0x10b] sm:$0xff] }
 0x42d   : > { %v4153_v13 = vpop.permute.xlu0 %4152 }
 0x42e   : > { %v11410_v10 = vsel %vm5380_vm12, %v5344_v59, %v5416_v18  ;;  %v3701_v36 = vpop.permute.xlu1 %3700  ;;  %v4788_v5 = vsel %vm2266_vm7, %v4747_v26, %v4153_v13  ;;  %vm13015_vm12 = vmmov %vm13014_vm11  ;;  %v3190_v26 = vld [vmem:[#allocation2 + $0x103] sm:$0xff] }
 0x42f   : > { %v5535_v21 = vrot.slane %v11410_v10, 6  ;;  %4330 = vrot.lane.b32.xlu0 %v3272_v63, %s12990_s21  ;;  %v4666_v59 = vsel %vm12956_vm4, %v4625_v58, %v3701_v36  ;;  %v3105_v63 = vld [vmem:[#allocation2 + $0xf1] sm:$0xff] }
 0x430   : > { %3878 = vrot.lane.b32.xlu1 %v3188_v7, %s12992_s25 }
 0x431   : > { %v5536_v31 = vsel %vm5533_vm2, %v5534_v50, %v5535_v21  ;;  %v4317_v51 = vpop.permute.xlu0 %4316 }
 0x432   : > { %v11428_v60 = vmax.f32 %v5486_v1, %v5536_v31  ;;  %v3865_v46 = vpop.permute.xlu1 %3864  ;;  %v4829_v8 = vsel %vm12952_vm8, %v4788_v5, %v4317_v51  ;;  %v11498_v51 = vld [vmem:[#allocation2 + $0x10c] sm:$0xff] }
 0x433   : > { %4494 = vrot.lane.b32.xlu0 %v3313_v23, %s12991_s28  ;;  %v4707_v42 = vsel %vm2182_vm5, %v4666_v59, %v3865_v46  ;;  %v3274_v46 = vld [vmem:[#allocation2 + $0x10d] sm:$0xff]  ;;  %v3316_v59 = vld [vmem:[#allocation2 + $0x116] sm:$0xff] }
 0x434   : > { %v5631_v48 = vrot.slane %v11428_v60, 1  ;;  %3426 = vrot.lane.b32.xlu1 %v3104_v56, %s12999_s15 }
 0x435   : > { %v4481_v45 = vpop.permute.xlu0 %4480 }
 0x436   : > { %v5632_v34 = vsel %vm5627_vm13, %v5629_v11, %v5631_v48  ;;  %v11439_v30 = vpop.permute.xlu1 %3412  ;;  %v4870_v54 = vsel %vm2350_vm9, %v4829_v8, %v4481_v45 }
 0x437   : > { %v5678_v19 = vmax.f32 %v11301_v53, %v5632_v34  ;;  %v5128_v16 = vpop.f32.mrf.mxu1  ;;  %8495 = vmatmul.mubr.msk.f32.gmra.mxu1 %vm12951_vm10, %v4870_v54  ;;  %4042 = vrot.lane.b32.xlu0 %v11358_v6, %s12989_s26  ;;  %v3315_v34 = vld [vmem:[#allocation2 + $0x10e] sm:$0xff] }
 0x438   : > { %v5302_v49 = vmul.f32 %v11223_v57, %v5128_v16  ;;  %3590 = vrot.lane.b32.xlu1 %v11360_v62, %s12988_s27  ;;  %8497 = vmatprep.mubr.msk.f32.mxu1 %vm8897_vm3, %v12987_v52  ;;  %v5487_v62 = vrot.slane %v11405_v47, 4 }
 0x439   : > { %5694 = vst.msk [vmem:[#allocation4 + $0x8] sm:$0xff] %vm512_vm1, %v5678_v19  ;;  %v8460_v11 = vpop.f32.mrf.mxu1  ;;  %v4029_v40 = vpop.permute.xlu0 %4028  ;;  %v3106_v19 = vld [vmem:[#allocation2 + $0xf9] sm:$0xff] }
 0x43a   : > { %v5345_v53 = vadd.f32 %v11240_v9, %v5302_v49  ;;  %v3577_v12 = vpop.permute.xlu1 %3576  ;;  %v5488_v0 = vsel %vm13015_vm12, %v5485_v2, %v5487_v62  ;;  %v4748_v10 = vsel %vm12955_vm6, %v4707_v42, %v4029_v40 }
 0x43b   : > { %4168 = vrot.lane.b32.xlu0 %v11453_v44, %s12993_s0 }
 0x43c   : > { %vm5381_vm15 = vcmp.gt.f32.partialorder %v5345_v53, 0.0  ;;  %v5417_v6 = vmul.f32 0.01, %v5345_v53  ;;  %3716 = vrot.lane.b32.xlu1 %v11455_v27, %s12996_s1 }
 0x43d   : > { %v4155_v15 = vpop.permute.xlu0 %4154 }
 0x43e   : > { %v5453_v35 = vsel %vm5381_vm15, %v5345_v53, %v5417_v6  ;;  %v3703_v22 = vpop.permute.xlu1 %3702  ;;  %v4789_v2 = vsel %vm2266_vm7, %v4748_v10, %v4155_v15  ;;  %v11528_v15 = vld [vmem:[#allocation2 + $0x114] sm:$0xff] }
 0x43f   : > { %v5537_v32 = vrot.slane %v5453_v35, 6  ;;  %4332 = vrot.lane.b32.xlu0 %v3273_v61, %s12990_s21  ;;  %v3057_v35 = vld [vmem:[#allocation2 + $0xb8] sm:$0xff] }
 0x440   : > { %3880 = vrot.lane.b32.xlu1 %v3189_v41, %s12992_s25  ;;  %v5709_v43 = vld [vmem:[#allocation4] ss:$2 sm:$0xff] }
 0x441   : > { %v5538_v47 = vsel %vm5533_vm2, %v5535_v21, %v5537_v32  ;;  %v4319_v18 = vpop.permute.xlu0 %4318  ;;  %5724 = vst.msk [vmem:[#allocation3 + $0xb] sm:$0xff] %vm512_vm1, %v5709_v43 }
 0x442   : > { %v11475_v13 = vmax.f32 %v5488_v0, %v5538_v47  ;;  %v3867_v29 = vpop.permute.xlu1 %3866  ;;  %v4830_v36 = vsel %vm12952_vm8, %v4789_v2, %v4319_v18  ;;  %v3107_v18 = vld [vmem:[#allocation2 + $0x101] sm:$0xff] }
 0x443   : > { %4496 = vrot.lane.b32.xlu0 %v3314_v14, %s12991_s28 }
 0x444   : > { %v5633_v17 = vrot.slane %v11475_v13, 1  ;;  %3428 = vrot.lane.b32.xlu1 %v3105_v63, %s12999_s15 }
 0x445   : > { %v4483_v24 = vpop.permute.xlu0 %4482 }
 0x446   : > { %v5634_v33 = vsel %vm5627_vm13, %v5631_v48, %v5633_v17  ;;  %v3415_v50 = vpop.permute.xlu1 %3414  ;;  %v4871_v21 = vsel %vm2350_vm9, %v4830_v36, %v4483_v24 }
 0x447   : > { %v5679_v7 = vmax.f32 %v11428_v60, %v5634_v33  ;;  %v11488_v4 = vpop.f32.mrf.mxu1  ;;  %8498 = vmatmul.mubr.msk.f32.gmra.mxu1 %vm12951_vm10, %v4871_v21  ;;  %4044 = vrot.lane.b32.xlu0 %v11399_v39, %s12989_s26  ;;  %v4586_v61 = vsel %vm12957_vm0, %v3057_v35, %v3415_v50  ;;  %v11559_v50 = vld [vmem:[#allocation2 + $0x11c] sm:$0xff]  ;;  %v11561_v21 = vld [vmem:[#allocation2 + $0x112] sm:$0xff]  ;;  %v11597_v35 = vld [vmem:[#allocation2 + $0x124] sm:$0xff] }
 0x448   : > { %3592 = vrot.lane.b32.xlu1 %v11401_v38, %s12988_s27  ;;  %8500 = vmatprep.mubr.msk.f32.mxu1 %vm8897_vm3, %v12987_v52  ;;  %v3056_v38 = vld [vmem:[#allocation2 + $0xb0] sm:$0xff] }
 0x449   : > { %5695 = vst.msk [vmem:[#allocation4 + $0x10] sm:$0xff] %vm512_vm1, %v5679_v7  ;;  %v8463_v1 = vpop.f32.mrf.mxu1  ;;  %v4031_v28 = vpop.permute.xlu0 %4030  ;;  %v4585_v23 = vsel %vm12957_vm0, %v3056_v38, %v11439_v30 }
 0x44a   : > { %v3579_v31 = vpop.permute.xlu1 %3578  ;;  %v4626_v56 = vsel %vm512_vm1, %v4585_v23, %v3577_v12  ;;  %v3058_v1 = vld [vmem:[#allocation2 + $0xc0] sm:$0xff] }
 0x44b   : > { %4170 = vrot.lane.b32.xlu0 %v11498_v51, %s12993_s0  ;;  %v4667_v48 = vsel %vm12956_vm4, %v4626_v56, %v3703_v22  ;;  %v4627_v32 = vsel %vm512_vm1, %v4586_v61, %v3579_v31  ;;  %v3276_v31 = vld [vmem:[#allocation2 + $0x11d] sm:$0xff] }
 0x44c   : > { %3718 = vrot.lane.b32.xlu1 %v11500_v20, %s12996_s1  ;;  %v4708_v8 = vsel %vm2182_vm5, %v4667_v48, %v3867_v29  ;;  %v3317_v56 = vld [vmem:[#allocation2 + $0x11e] sm:$0xff] }
 0x44d   : > { %v4157_v39 = vpop.permute.xlu0 %4156  ;;  %v4749_v54 = vsel %vm12955_vm6, %v4708_v8, %v4031_v28 }
 0x44e   : > { %v3705_v60 = vpop.permute.xlu1 %3704  ;;  %v4790_v30 = vsel %vm2266_vm7, %v4749_v54, %v4157_v39 }
 0x44f   : > { %4334 = vrot.lane.b32.xlu0 %v3274_v46, %s12990_s21  ;;  %v4668_v41 = vsel %vm12956_vm4, %v4627_v32, %v3705_v60 }
 0x450   : > { %3882 = vrot.lane.b32.xlu1 %v3190_v26, %s12992_s25 }
 0x451   : > { %v4321_v5 = vpop.permute.xlu0 %4320 }
 0x452   : > { %v3869_v45 = vpop.permute.xlu1 %3868  ;;  %v4831_v16 = vsel %vm12952_vm8, %v4790_v30, %v4321_v5  ;;  %v3108_v5 = vld [vmem:[#allocation2 + $0x109] sm:$0xff] }
 0x453   : > { %4498 = vrot.lane.b32.xlu0 %v3315_v34, %s12991_s28  ;;  %v4709_v43 = vsel %vm2182_vm5, %v4668_v41, %v3869_v45  ;;  %v5303_v34 = vmul.f32 %v11223_v57, %v11488_v4 }
 0x454   : > { %3430 = vrot.lane.b32.xlu1 %v3106_v19, %s12999_s15 }
 0x455   : > { %v4485_v49 = vpop.permute.xlu0 %4484  ;;  %v5346_v4 = vadd.f32 %v11240_v9, %v5303_v34 }
 0x456   : > { %v3417_v11 = vpop.permute.xlu1 %3416  ;;  %v4872_v40 = vsel %vm2350_vm9, %v4831_v16, %v4485_v49 }
 0x457   : > { %v11519_v53 = vpop.f32.mrf.mxu1  ;;  %8501 = vmatmul.mubr.msk.f32.gmra.mxu1 %vm12951_vm10, %v4872_v40  ;;  %4046 = vrot.lane.b32.xlu0 %v11453_v44, %s12989_s26  ;;  %vm5382_vm12 = vcmp.gt.f32.partialorder %v5346_v4, 0.0 }
 0x458   : > { %3594 = vrot.lane.b32.xlu1 %v11455_v27, %s12988_s27  ;;  %8503 = vmatprep.mubr.msk.f32.mxu1 %vm8897_vm3, %v12987_v52  ;;  %v3275_v27 = vld [vmem:[#allocation2 + $0x115] sm:$0xff] }
 0x459   : > { %v8466_v12 = vpop.f32.mrf.mxu1  ;;  %v4033_v6 = vpop.permute.xlu0 %4032 }
 0x45a   : > { %v3581_v62 = vpop.permute.xlu1 %3580  ;;  %v4750_v47 = vsel %vm12955_vm6, %v4709_v43, %v4033_v6 }
 0x45b   : > { %4172 = vrot.lane.b32.xlu0 %v11528_v15, %s12993_s0 }
 0x45c   : > { %3720 = vrot.lane.b32.xlu1 %v11530_v37, %s12996_s1 }
 0x45d   : > { %v4159_v44 = vpop.permute.xlu0 %4158 }
 0x45e   : > { %v3707_v22 = vpop.permute.xlu1 %3706  ;;  %v4791_v42 = vsel %vm2266_vm7, %v4750_v47, %v4159_v44  ;;  %v3193_v47 = vld [vmem:[#allocation2 + $0x11b] sm:$0xff] }
 0x45f   : > { %4336 = vrot.lane.b32.xlu0 %v3275_v27, %s12990_s21  ;;  %v5418_v27 = vmul.f32 0.01, %v5346_v4 }
 0x460   : > { %3884 = vrot.lane.b32.xlu1 %v3191_v3, %s12992_s25  ;;  %v3059_v3 = vld [vmem:[#allocation2 + $0xc8] sm:$0xff] }
 0x461   : > { %v4323_v58 = vpop.permute.xlu0 %4322 }
 0x462   : > { %v3871_v0 = vpop.permute.xlu1 %3870  ;;  %v4832_v29 = vsel %vm12952_vm8, %v4791_v42, %v4323_v58  ;;  %v3277_v58 = vld [vmem:[#allocation2 + $0x125] sm:$0xff]  ;;  %v5454_v42 = vsel %vm5382_vm12, %v5346_v4, %v5418_v27  ;;  %v3319_v27 = vld [vmem:[#allocation2 + $0x12e] sm:$0xff] }
 0x463   : > { %4500 = vrot.lane.b32.xlu0 %v3316_v59, %s12991_s28 }
 0x464   : > { %3432 = vrot.lane.b32.xlu1 %v3107_v18, %s12999_s15 }
 0x465   : > { %v4487_v14 = vpop.permute.xlu0 %4486 }
 0x466   : > { %v11547_v10 = vpop.permute.xlu1 %3418  ;;  %v4873_v63 = vsel %vm2350_vm9, %v4832_v29, %v4487_v14 }
 0x467   : > { %v5143_v2 = vpop.f32.mrf.mxu1  ;;  %8504 = vmatmul.mubr.msk.f32.gmra.mxu1 %vm12951_vm10, %v4873_v63  ;;  %4048 = vrot.lane.b32.xlu0 %v11498_v51, %s12989_s26  ;;  %v4587_v51 = vsel %vm12957_vm0, %v3058_v1, %v3417_v11  ;;  %v4588_v43 = vsel %vm12957_vm0, %v3059_v3, %v11547_v10  ;;  %v3109_v1 = vld [vmem:[#allocation2 + $0x111] sm:$0xff] }
 0x468   : > { %3596 = vrot.lane.b32.xlu1 %v11500_v20, %s12988_s27  ;;  %8506 = vmatprep.mubr.msk.f32.mxu1 %vm8897_vm3, %v12987_v52  ;;  %v3192_v20 = vld [vmem:[#allocation2 + $0x113] sm:$0xff]  ;;  %v4628_v39 = vsel %vm512_vm1, %v4587_v51, %v3581_v62  ;;  %v5305_v38 = vmul.f32 %v11223_v57, %v5143_v2 }
 0x469   : > { %v8469_v36 = vpop.f32.mrf.mxu1  ;;  %v4035_v24 = vpop.permute.xlu0 %4034  ;;  %v4669_v60 = vsel %vm12956_vm4, %v4628_v39, %v3707_v22 }
 0x46a   : > { %v11557_v33 = vpop.permute.xlu1 %3582  ;;  %v4710_v23 = vsel %vm2182_vm5, %v4669_v60, %v3871_v0  ;;  %v5348_v8 = vadd.f32 %v11240_v9, %v5305_v38 }
 0x46b   : > { %4174 = vrot.lane.b32.xlu0 %v11559_v50, %s12993_s0  ;;  %v4751_v48 = vsel %vm12955_vm6, %v4710_v23, %v4035_v24  ;;  %v4629_v18 = vsel %vm512_vm1, %v4588_v43, %v11557_v33  ;;  %v3318_v24 = vld [vmem:[#allocation2 + $0x126] sm:$0xff] }
 0x46c   : > { %3722 = vrot.lane.b32.xlu1 %v11561_v21, %s12996_s1  ;;  %v5420_v11 = vmul.f32 0.01, %v5348_v8  ;;  %vm5384_vm11 = vcmp.gt.f32.partialorder %v5348_v8, 0.0 }
 0x46d   : > { %v4161_v7 = vpop.permute.xlu0 %4160 }
 0x46e   : > { %v3709_v28 = vpop.permute.xlu1 %3708  ;;  %v4792_v45 = vsel %vm2266_vm7, %v4751_v48, %v4161_v7 }
 0x46f   : > { %4338 = vrot.lane.b32.xlu0 %v3276_v31, %s12990_s21  ;;  %v4670_v29 = vsel %vm12956_vm4, %v4629_v18, %v3709_v28  ;;  %v5304_v28 = vmul.f32 %v11223_v57, %v11519_v53 }
 0x470   : > { %3886 = vrot.lane.b32.xlu1 %v3192_v20, %s12992_s25 }
 0x471   : > { %v4325_v46 = vpop.permute.xlu0 %4324 }
 0x472   : > { %v3873_v26 = vpop.permute.xlu1 %3872  ;;  %v4833_v54 = vsel %vm12952_vm8, %v4792_v45, %v4325_v46  ;;  %v3060_v45 = vld [vmem:[#allocation2 + $0xd0] sm:$0xff] }
 0x473   : > { %4502 = vrot.lane.b32.xlu0 %v3317_v56, %s12991_s28  ;;  %v4711_v2 = vsel %vm2182_vm5, %v4670_v29, %v3873_v26 }
 0x474   : > { %3434 = vrot.lane.b32.xlu1 %v3108_v5, %s12999_s15  ;;  %v11649_v5 = vld [vmem:[#allocation2 + $0x12c] sm:$0xff] }
 0x475   : > { %v4489_v19 = vpop.permute.xlu0 %4488 }
 0x476   : > { %v11582_v30 = vpop.permute.xlu1 %3420  ;;  %v4874_v16 = vsel %vm2350_vm9, %v4833_v54, %v4489_v19 }
 0x477   : > { %v5148_v49 = vpop.f32.mrf.mxu1  ;;  %8507 = vmatmul.mubr.msk.f32.gmra.mxu1 %vm12951_vm10, %v4874_v16  ;;  %4050 = vrot.lane.b32.xlu0 %v11528_v15, %s12989_s26  ;;  %v11599_v15 = vld [vmem:[#allocation2 + $0x11a] sm:$0xff]  ;;  %v4589_v19 = vsel %vm12957_vm0, %v3060_v45, %v11582_v30 }
 0x478   : > { %v5306_v40 = vmul.f32 %v11223_v57, %v5148_v49  ;;  %3598 = vrot.lane.b32.xlu1 %v11530_v37, %s12988_s27  ;;  %8509 = vmatprep.mubr.msk.f32.mxu1 %vm8897_vm3, %v12987_v52  ;;  %v5456_v37 = vsel %vm5384_vm11, %v5348_v8, %v5420_v11  ;;  %v3194_v49 = vld [vmem:[#allocation2 + $0x123] sm:$0xff]  ;;  %v691_v45 = vld [vmem:[%s9036_s18 + $0x133] sm:$0xff] }
 0x479   : > { %v8472_v12 = vpop.f32.mrf.mxu1  ;;  %v4037_v6 = vpop.permute.xlu0 %4036  ;;  %v5543_v0 = vrot.slane %v5456_v37, 2 }
 0x47a   : > { %v5349_v62 = vadd.f32 %v11240_v9, %v5306_v40  ;;  %v11595_v44 = vpop.permute.xlu1 %3584  ;;  %v4752_v7 = vsel %vm12955_vm6, %v4711_v2, %v4037_v6  ;;  %v3153_v2 = vld [vmem:[#allocation2 + $0x12a] sm:$0xff] }
 0x47b   : > { %4176 = vrot.lane.b32.xlu0 %v11597_v35, %s12993_s0  ;;  %v4630_v11 = vsel %vm512_vm1, %v4589_v19, %v11595_v44 }
 0x47c   : > { %vm5385_vm15 = vcmp.gt.f32.partialorder %v5349_v62, 0.0  ;;  %v5421_v22 = vmul.f32 0.01, %v5349_v62  ;;  %3724 = vrot.lane.b32.xlu1 %v11599_v15, %s12996_s1 }
 0x47d   : > { %v4163_v61 = vpop.permute.xlu0 %4162 }
 0x47e   : > { %v11605_v32 = vsel %vm5385_vm15, %v5349_v62, %v5421_v22  ;;  %v11607_v41 = vpop.permute.xlu1 %3710  ;;  %v4793_v31 = vsel %vm2266_vm7, %v4752_v7, %v4163_v61  ;;  %v3110_v61 = vld [vmem:[#allocation2 + $0x119] sm:$0xff]  ;;  %v3195_v7 = vld [vmem:[#allocation2 + $0x12b] sm:$0xff] }
 0x47f   : > { %v5544_v59 = vrot.slane %v11605_v32, 2  ;;  %4340 = vrot.lane.b32.xlu0 %v3277_v58, %s12990_s21  ;;  %v4671_v12 = vsel %vm12956_vm4, %v4630_v11, %v11607_v41 }
 0x480   : > { %3888 = vrot.lane.b32.xlu1 %v3193_v47, %s12992_s25 }
 0x481   : > { %v5545_v14 = vsel %vm5523_vm14, %v5543_v0, %v5544_v59  ;;  %v4327_v63 = vpop.permute.xlu0 %4326 }
 0x482   : > { %v11619_v10 = vmax.f32 %v5454_v42, %v5545_v14  ;;  %v3875_v36 = vpop.permute.xlu1 %3874  ;;  %v4834_v51 = vsel %vm12952_vm8, %v4793_v31, %v4327_v63  ;;  %v3237_v42 = vld [vmem:[#allocation2 + $0x134] sm:$0xff] }
 0x483   : > { %4504 = vrot.lane.b32.xlu0 %v3318_v24, %s12991_s28  ;;  %v4712_v30 = vsel %vm2182_vm5, %v4671_v12, %v3875_v36 }
 0x484   : > { %v5635_v33 = vrot.slane %v11619_v10, 1  ;;  %3436 = vrot.lane.b32.xlu1 %v3109_v1, %s12999_s15 }
 0x485   : > { %v4491_v20 = vpop.permute.xlu0 %4490 }
 0x486   : > { %v5636_v39 = vsel %vm5627_vm13, %v5633_v17, %v5635_v33  ;;  %v11632_v38 = vpop.permute.xlu1 %3422  ;;  %v4875_v60 = vsel %vm2350_vm9, %v4834_v51, %v4491_v20  ;;  %v5347_v17 = vadd.f32 %v11240_v9, %v5304_v28 }
 0x487   : > { %v5680_v46 = vmax.f32 %v11475_v13, %v5636_v39  ;;  %v5153_v23 = vpop.f32.mrf.mxu1  ;;  %8510 = vmatmul.mubr.msk.f32.gmra.mxu1 %vm12951_vm10, %v4875_v60  ;;  %4052 = vrot.lane.b32.xlu0 %v11559_v50, %s12989_s26  ;;  %v3152_v50 = vld [vmem:[#allocation2 + $0x122] sm:$0xff] }
 0x488   : > { %v5307_v53 = vmul.f32 %v11223_v57, %v5153_v23  ;;  %3600 = vrot.lane.b32.xlu1 %v11561_v21, %s12988_s27  ;;  %8512 = vmatprep.mubr.msk.f32.mxu1 %vm8897_vm3, %v12987_v52  ;;  %v5419_v21 = vmul.f32 0.01, %v5347_v17  ;;  %vm5383_vm15 = vcmp.gt.f32.partialorder %v5347_v17, 0.0  ;;  %v3238_v60 = vld [vmem:[#allocation2 + $0x13c] sm:$0xff] }
 0x489   : > { %5696 = vst.msk [vmem:[#allocation4 + $0x18] sm:$0xff] %vm512_vm1, %v5680_v46  ;;  %v8475_v26 = vpop.f32.mrf.mxu1  ;;  %v4039_v13 = vpop.permute.xlu0 %4038 }
 0x48a   : > { %v5350_v56 = vadd.f32 %v11240_v9, %v5307_v53  ;;  %v11647_v48 = vpop.permute.xlu1 %3586  ;;  %v3278_v9 = vld [vmem:[#allocation2 + $0x12d] sm:$0xff]  ;;  %v5455_v4 = vsel %vm5383_vm15, %v5347_v17, %v5419_v21  ;;  %v4753_v44 = vsel %vm12955_vm6, %v4712_v30, %v4039_v13  ;;  %v3280_v53 = vld [vmem:[#allocation2 + $0x13d] sm:$0xff] }
 0x48b   : > { %4178 = vrot.lane.b32.xlu0 %v11649_v5, %s12993_s0  ;;  %v11719_v21 = vld [vmem:[%s9036_s18 + $0x132] sm:$0xff] }
 0x48c   : > { %vm5386_vm11 = vcmp.gt.f32.partialorder %v5350_v56, 0.0  ;;  %v5422_v57 = vmul.f32 0.01, %v5350_v56  ;;  %3726 = vrot.lane.b32.xlu1 %v3152_v50, %s12996_s1 }
 0x48d   : > { %v4165_v8 = vpop.permute.xlu0 %4164 }
 0x48e   : > { %v11654_v34 = vsel %vm5386_vm11, %v5350_v56, %v5422_v57  ;;  %v3713_v54 = vpop.permute.xlu1 %3712  ;;  %v4794_v32 = vsel %vm2266_vm7, %v4753_v44, %v4165_v8  ;;  %v3321_v56 = vld [vmem:[#allocation2 + $0x13e] sm:$0xff]  ;;  %v8822_v44 = vld [vmem:[%s9036_s18 + $0x134] sm:$0xff] }
 0x48f   : > { %v5546_v16 = vrot.slane %v11654_v34, 2  ;;  %4342 = vrot.lane.b32.xlu0 %v3278_v9, %s12990_s21  ;;  %v8819_v57 = vld [vmem:[%s9036_s18 + $0x122] sm:$0xff]  ;;  %v11725_v9 = vld [vmem:[%s12916_s5] ss:$0 sm:$0xff] }
 0x490   : > { %3890 = vrot.lane.b32.xlu1 %v3194_v49, %s12992_s25  ;;  %v5711_v40 = vld [vmem:[#allocation4 + $0x10] ss:$2 sm:$0xff] }
 0x491   : > { %v5547_v6 = vsel %vm5523_vm14, %v5544_v59, %v5546_v16  ;;  %v4329_v62 = vpop.permute.xlu0 %4328  ;;  %5725 = vst.msk [vmem:[#allocation3 + $0x15] sm:$0xff] %vm512_vm1, %v5711_v40 }
 0x492   : > { %v11668_v37 = vmax.f32 %v5455_v4, %v5547_v6  ;;  %v3877_v22 = vpop.permute.xlu1 %3876  ;;  %v4835_v41 = vsel %vm12952_vm8, %v4794_v32, %v4329_v62  ;;  %v11740_v6 = vld [vmem:[%s12917_s6] ss:$0 sm:$0xff] }
 0x493   : > { %4506 = vrot.lane.b32.xlu0 %v3319_v27, %s12991_s28 }
 0x494   : > { %v5637_v3 = vrot.slane %v11668_v37, 1  ;;  %3438 = vrot.lane.b32.xlu1 %v3110_v61, %s12999_s15 }
 0x495   : > { %v4493_v58 = vpop.permute.xlu0 %4492 }
 0x496   : > { %v5638_v43 = vsel %vm5627_vm13, %v5635_v33, %v5637_v3  ;;  %v3425_v0 = vpop.permute.xlu1 %3424  ;;  %v4876_v59 = vsel %vm2350_vm9, %v4835_v41, %v4493_v58  ;;  %v3320_v33 = vld [vmem:[#allocation2 + $0x136] sm:$0xff]  ;;  %v8823_v41 = vld [vmem:[%s9036_s18 + $0x12a] sm:$0xff] }
 0x497   : > { %v5681_v47 = vmax.f32 %v11619_v10, %v5638_v43  ;;  %v5158_v18 = vpop.f32.mrf.mxu1  ;;  %8513 = vmatmul.mubr.msk.f32.gmra.mxu1 %vm12951_vm10, %v4876_v59  ;;  %4054 = vrot.lane.b32.xlu0 %v11597_v35, %s12989_s26  ;;  %v3279_v10 = vld [vmem:[#allocation2 + $0x135] sm:$0xff]  ;;  %v11752_v58 = vld [vmem:[%s9036_s18 + $0x144] sm:$0xff] }
 0x498   : > { %3602 = vrot.lane.b32.xlu1 %v11599_v15, %s12988_s27  ;;  %8515 = vmatprep.mubr.msk.f32.mxu1 %vm8897_vm3, %v12987_v52  ;;  %v3061_v35 = vld [vmem:[#allocation2 + $0xd8] sm:$0xff]  ;;  %v5308_v19 = vmul.f32 %v11725_v9, %v5158_v18 }
 0x499   : > { %5697 = vst.msk [vmem:[#allocation4 + $0x20] sm:$0xff] %vm512_vm1, %v5681_v47  ;;  %v8478_v29 = vpop.f32.mrf.mxu1  ;;  %v4041_v14 = vpop.permute.xlu0 %4040  ;;  %v4590_v15 = vsel %vm12957_vm0, %v3061_v35, %v11632_v38  ;;  %v11756_v59 = vld [vmem:[%s9036_s18 + $0x13a] sm:$0xff] }
 0x49a   : > { %v3589_v63 = vpop.permute.xlu1 %3588  ;;  %v4631_v1 = vsel %vm512_vm1, %v4590_v15, %v11647_v48  ;;  %v5351_v62 = vadd.f32 %v11740_v6, %v5308_v19  ;;  %v692_v35 = vld [vmem:[%s9036_s18 + $0x13b] sm:$0xff] }
 0x49b   : > { %4180 = vrot.lane.b32.xlu0 %v3237_v42, %s12993_s0  ;;  %v4672_v31 = vsel %vm12956_vm4, %v4631_v1, %v3713_v54  ;;  %v3062_v54 = vld [vmem:[#allocation2 + $0xe0] sm:$0xff] }
 0x49c   : > { %3728 = vrot.lane.b32.xlu1 %v3153_v2, %s12996_s1  ;;  %v4713_v51 = vsel %vm2182_vm5, %v4672_v31, %v3877_v22  ;;  %v4591_v49 = vsel %vm12957_vm0, %v3062_v54, %v3425_v0  ;;  %v5423_v47 = vmul.f32 0.01, %v5351_v62  ;;  %vm5387_vm12 = vcmp.gt.f32.partialorder %v5351_v62, 0.0  ;;  %v776_v2 = vld [vmem:[%s9036_s18 + $0x145] sm:$0xff] }
 0x49d   : > { %v4167_v36 = vpop.permute.xlu0 %4166  ;;  %v4754_v39 = vsel %vm12955_vm6, %v4713_v51, %v4041_v14  ;;  %v4632_v11 = vsel %vm512_vm1, %v4591_v49, %v3589_v63  ;;  %v817_v31 = vld [vmem:[%s9036_s18 + $0x146] sm:$0xff] }
 0x49e   : > { %v3715_v24 = vpop.permute.xlu1 %3714  ;;  %v4795_v38 = vsel %vm2266_vm7, %v4754_v39, %v4167_v36 }
 0x49f   : > { %4344 = vrot.lane.b32.xlu0 %v3279_v10, %s12990_s21  ;;  %v4673_v4 = vsel %vm12956_vm4, %v4632_v11, %v3715_v24  ;;  %v11771_v24 = vsel %vm5387_vm12, %v5351_v62, %v5423_v47  ;;  %vm13016_vm12 = vcmask 1043456   ;;  %v3064_v47 = vld [vmem:[#allocation2 + $0xf0] sm:$0xff] }
 0x4a0   : > { %3892 = vrot.lane.b32.xlu1 %v3195_v7, %s12992_s25 }
 0x4a1   : > { %v4331_v28 = vpop.permute.xlu0 %4330 }
 0x4a2   : > { %v3879_v20 = vpop.permute.xlu1 %3878  ;;  %v4836_v46 = vsel %vm12952_vm8, %v4795_v38, %v4331_v28  ;;  %v5495_v28 = vrot.slane %v11771_v24, 4 }
 0x4a3   : > { %4508 = vrot.lane.b32.xlu0 %v3320_v33, %s12991_s28  ;;  %v4714_v30 = vsel %vm2182_vm5, %v4673_v4, %v3879_v20  ;;  %v3063_v20 = vld [vmem:[#allocation2 + $0xe8] sm:$0xff] }
 0x4a4   : > { %4056 = vrot.lane.b32.xlu1 %v11649_v5, %s12989_s26 }
 0x4a5   : > { %v4495_v23 = vpop.permute.xlu0 %4494 }
 0x4a6   : > { %v11705_v17 = vpop.permute.xlu1 %3426  ;;  %v4877_v26 = vsel %vm2350_vm9, %v4836_v46, %v4495_v23 }
 0x4a7   : > { %v5163_v13 = vpop.f32.mrf.mxu1  ;;  %8516 = vmatmul.mubr.msk.f32.gmra.mxu1 %vm12951_vm10, %v4877_v26  ;;  %4182 = vrot.lane.b32.xlu0 %v3238_v60, %s12993_s0  ;;  %v5494_v60 = vrot.slane %v11654_v34, 4  ;;  %v4592_v46 = vsel %vm12957_vm0, %v3063_v20, %v11705_v17 }
 0x4a8   : > { %4346 = vrot.lane.b32.xlu1 %v3280_v53, %s12990_s21  ;;  %8518 = vmatprep.mubr.msk.f32.mxu1 %vm8897_vm3, %v12987_v52  ;;  %v5309_v40 = vmul.f32 %v11725_v9, %v5163_v13  ;;  %v8824_v13 = vld [vmem:[%s9036_s18 + $0x13c] sm:$0xff] }
 0x4a9   : > { %v8481_v48 = vpop.f32.mrf.mxu1  ;;  %v4043_v5 = vpop.permute.xlu0 %4042  ;;  %v5496_v34 = vsel %vm13016_vm12, %v5494_v60, %v5495_v28 }
 0x4aa   : > { %v11713_v50 = vpop.permute.xlu1 %3590  ;;  %v4755_v27 = vsel %vm12955_vm6, %v4714_v30, %v4043_v5  ;;  %v5352_v61 = vadd.f32 %v11740_v6, %v5309_v40  ;;  %v11801_v5 = vld [vmem:[%s9036_s18 + $0x14c] sm:$0xff] }
 0x4ab   : > { %4510 = vrot.lane.b32.xlu0 %v3321_v56, %s12991_s28  ;;  %v4633_v26 = vsel %vm512_vm1, %v4592_v46, %v11713_v50  ;;  %v777_v40 = vld [vmem:[%s9036_s18 + $0x14d] sm:$0xff] }
 0x4ac   : > { %1099 = vrot.lane.b32.xlu1 %v8819_v57, %s12988_s27  ;;  %v5424_v14 = vmul.f32 0.01, %v5352_v61  ;;  %vm5388_vm11 = vcmp.gt.f32.partialorder %v5352_v61, 0.0 }
 0x4ad   : > { %v4169_v8 = vpop.permute.xlu0 %4168 }
 0x4ae   : > { %v11728_v16 = vpop.permute.xlu1 %3716  ;;  %v4796_v32 = vsel %vm2266_vm7, %v4755_v27, %v4169_v8  ;;  %v11777_v1 = vsel %vm5388_vm11, %v5352_v61, %v5424_v14  ;;  %v693_v27 = vld [vmem:[%s9036_s18 + $0x143] sm:$0xff]  ;;  %v818_v61 = vld [vmem:[%s9036_s18 + $0x14e] sm:$0xff] }
 0x4af   : > { %1225 = vrot.lane.b32.xlu0 %v11719_v21, %s12996_s1  ;;  %v5552_v23 = vrot.slane %v11777_v1, 6  ;;  %v4674_v17 = vsel %vm12956_vm4, %v4633_v26, %v11728_v16  ;;  %v652_v16 = vld [vmem:[%s9036_s18 + $0x142] sm:$0xff] }
 0x4b0   : > { %1389 = vrot.lane.b32.xlu1 %v691_v45, %s12992_s25 }
 0x4b1   : > { %v4333_v12 = vpop.permute.xlu0 %4332 }
 0x4b2   : > { %v3881_v22 = vpop.permute.xlu1 %3880  ;;  %v4837_v43 = vsel %vm12952_vm8, %v4796_v32, %v4333_v12 }
 0x4b3   : > { %1553 = vrot.lane.b32.xlu0 %v8822_v44, %s12989_s26  ;;  %v4715_v57 = vsel %vm2182_vm5, %v4674_v17, %v3881_v22 }
 0x4b4   : > { %1101 = vrot.lane.b32.xlu1 %v8823_v41, %s12988_s27 }
 0x4b5   : > { %v4497_v0 = vpop.permute.xlu0 %4496 }
 0x4b6   : > { %v11758_v18 = vpop.permute.xlu1 %3428  ;;  %v4878_v42 = vsel %vm2350_vm9, %v4837_v43, %v4497_v0  ;;  %v5497_v43 = vrot.slane %v11777_v1, 4 }
 0x4b7   : > { %v5168_v29 = vpop.f32.mrf.mxu1  ;;  %8519 = vmatmul.mubr.msk.f32.gmra.mxu1 %vm12951_vm10, %v4878_v42  ;;  %1679 = vrot.lane.b32.xlu0 %v11752_v58, %s12993_s0  ;;  %v4593_v14 = vsel %vm12957_vm0, %v3064_v47, %v11758_v18  ;;  %v739_v47 = vld [vmem:[%s9036_s18 + $0x164] sm:$0xf] }
 0x4b8   : > { %v5310_v63 = vmul.f32 %v11725_v9, %v5168_v29  ;;  %1227 = vrot.lane.b32.xlu1 %v11756_v59, %s12996_s1  ;;  %8521 = vmatprep.mubr.msk.f32.mxu1 %vm8897_vm3, %v12987_v52 }
 0x4b9   : > { %v8484_v10 = vpop.f32.mrf.mxu1  ;;  %v4045_v36 = vpop.permute.xlu0 %4044 }
 0x4ba   : > { %v5353_v15 = vadd.f32 %v11740_v6, %v5310_v63  ;;  %v11774_v7 = vpop.permute.xlu1 %3592  ;;  %v4756_v45 = vsel %vm12955_vm6, %v4715_v57, %v4045_v36  ;;  %v737_v10 = vld [vmem:[%s9036_s18 + $0x154] sm:$0xff] }
 0x4bb   : > { %1843 = vrot.lane.b32.xlu0 %v776_v2, %s12990_s21  ;;  %v4634_v2 = vsel %vm512_vm1, %v4593_v14, %v11774_v7  ;;  %v6337_v14 = vld [vmem:[%s12918_s7 + $0x40] sm:$0xff] }
 0x4bc   : > { %vm5389_vm15 = vcmp.gt.f32.partialorder %v5353_v15, 0.0  ;;  %v5425_v33 = vmul.f32 0.01, %v5353_v15  ;;  %1391 = vrot.lane.b32.xlu1 %v692_v35, %s12992_s25  ;;  %8558 = vmatpush3.msra.mxu0 %v6337_v14 }
 0x4bd   : > { %v4171_v51 = vpop.permute.xlu0 %4170  ;;  %8559 = vmatprep.subr.mxu0 %v12987_v52 }
 0x4be   : > { %v11782_v39 = vsel %vm5389_vm15, %v5353_v15, %v5425_v33  ;;  %v3719_v38 = vpop.permute.xlu1 %3718  ;;  %v4797_v19 = vsel %vm2266_vm7, %v4756_v45, %v4171_v51  ;;  %vm13017_vm15 = vmmov %vm13016_vm12  ;;  %v778_v51 = vld [vmem:[%s9036_s18 + $0x155] sm:$0xff] }
 0x4bf   : > { %v5553_v53 = vrot.slane %v11782_v39, 6  ;;  %2007 = vrot.lane.b32.xlu0 %v817_v31, %s12991_s28  ;;  %v5498_v35 = vsel %vm13017_vm15, %v5495_v28, %v5497_v43  ;;  %v4675_v15 = vsel %vm12956_vm4, %v4634_v2, %v3719_v38  ;;  %v694_v38 = vld [vmem:[%s9036_s18 + $0x14b] sm:$0xff] }
 0x4c0   : > { %1555 = vrot.lane.b32.xlu1 %v8824_v13, %s12989_s26  ;;  %v819_v13 = vld [vmem:[%s9036_s18 + $0x156] sm:$0xff] }
 0x4c1   : > { %v5554_v56 = vsel %vm5533_vm2, %v5552_v23, %v5553_v53  ;;  %v4335_v48 = vpop.permute.xlu0 %4334  ;;  %v5745_v43 = vld [vmem:[#allocation3 + $0x1] sm:$0xff] }
 0x4c2   : > { %v11804_v50 = vmax.f32 %v5496_v34, %v5554_v56  ;;  %v3883_v8 = vpop.permute.xlu1 %3882  ;;  %v4838_v49 = vsel %vm12952_vm8, %v4797_v19, %v4335_v48  ;;  %v651_v48 = vld [vmem:[%s9036_s18 + $0x142] sm:$0xf] }
 0x4c3   : > { %1103 = vrot.lane.b32.xlu0 %v11719_v21, %s12988_s27  ;;  %v4716_v7 = vsel %vm2182_vm5, %v4675_v15, %v3883_v8  ;;  %v3065_v8 = vld [vmem:[#allocation2 + $0xf8] sm:$0xff] }
 0x4c4   : > { %v5639_v54 = vrot.slane %v11804_v50, 1  ;;  %1681 = vrot.lane.b32.xlu1 %v11801_v5, %s12993_s0 }
 0x4c5   : > { %v4499_v11 = vpop.permute.xlu0 %4498 }
 0x4c6   : > { %v5640_v4 = vsel %vm5627_vm13, %v5637_v3, %v5639_v54  ;;  %v11819_v12 = vpop.permute.xlu1 %3430  ;;  %v4879_v21 = vsel %vm2350_vm9, %v4838_v49, %v4499_v11  ;;  %v779_v11 = vld [vmem:[%s9036_s18 + $0x15d] sm:$0xff] }
 0x4c7   : > { %v5682_v62 = vmax.f32 %v11668_v37, %v5640_v4  ;;  %v5173_v30 = vpop.f32.mrf.mxu1  ;;  %8522 = vmatmul.mubr.msk.f32.gmra.mxu1 %vm12951_vm10, %v4879_v21  ;;  %1229 = vrot.lane.b32.xlu0 %v652_v16, %s12996_s1  ;;  %v654_v16 = vld [vmem:[%s9036_s18 + $0x152] sm:$0xf] }
 0x4c8   : > { %v5311_v22 = vmul.f32 %v11725_v9, %v5173_v30  ;;  %1845 = vrot.lane.b32.xlu1 %v777_v40, %s12990_s21  ;;  %8524 = vmatprep.mubr.msk.f32.mxu1 %vm8897_vm3, %v12987_v52 }
 0x4c9   : > { %5698 = vst.msk [vmem:[#allocation4 + $0x28] sm:$0xff] %vm512_vm1, %v5682_v62  ;;  %v8487_v3 = vpop.f32.mrf.mxu1  ;;  %v4047_v44 = vpop.permute.xlu0 %4046  ;;  %v695_v62 = vld [vmem:[%s9036_s18 + $0x153] sm:$0xf] }
 0x4ca   : > { %v5354_v37 = vadd.f32 %v11740_v6, %v5311_v22  ;;  %v3595_v32 = vpop.permute.xlu1 %3594  ;;  %v4757_v31 = vsel %vm12955_vm6, %v4716_v7, %v4047_v44  ;;  %v6334_v7 = vld [vmem:[%s12918_s7 + $0x28] sm:$0xff] }
 0x4cb   : > { %1393 = vrot.lane.b32.xlu0 %v693_v27, %s12992_s25  ;;  %v820_v27 = vld [vmem:[%s9036_s18 + $0x15e] sm:$0xff] }
 0x4cc   : > { %vm5390_vm11 = vcmp.gt.f32.partialorder %v5354_v37, 0.0  ;;  %v5426_v41 = vmul.f32 0.01, %v5354_v37  ;;  %2009 = vrot.lane.b32.xlu1 %v818_v61, %s12991_s28 }
 0x4cd   : > { %v4173_v0 = vpop.permute.xlu0 %4172 }
 0x4ce   : > { %v5462_v42 = vsel %vm5390_vm11, %v5354_v37, %v5426_v41  ;;  %v3721_v29 = vpop.permute.xlu1 %3720  ;;  %v4798_v28 = vsel %vm2266_vm7, %v4757_v31, %v4173_v0  ;;  %v736_v37 = vld [vmem:[%s9036_s18 + $0x154] sm:$0xf] }
 0x4cf   : > { %v5555_v63 = vrot.slane %v5462_v42, 6  ;;  %1557 = vrot.lane.b32.xlu0 %v11752_v58, %s12989_s26  ;;  %v653_v58 = vld [vmem:[%s9036_s18 + $0x14a] sm:$0xff] }
 0x4d0   : > { %1105 = vrot.lane.b32.xlu1 %v11756_v59, %s12988_s27  ;;  %v5713_v36 = vld [vmem:[#allocation4 + $0x20] ss:$2 sm:$0xff] }
 0x4d1   : > { %v5556_v18 = vsel %vm5533_vm2, %v5553_v53, %v5555_v63  ;;  %v4337_v1 = vpop.permute.xlu0 %4336  ;;  %5726 = vst.msk [vmem:[#allocation3 + $0x1f] sm:$0xff] %vm512_vm1, %v5713_v36  ;;  %v3066_v63 = vld [vmem:[#allocation2 + $0x100] sm:$0xff] }
 0x4d2   : > { %v11853_v33 = vmax.f32 %v5498_v35, %v5556_v18  ;;  %v3885_v59 = vpop.permute.xlu1 %3884  ;;  %v4839_v20 = vsel %vm12952_vm8, %v4798_v28, %v4337_v1  ;;  %v6335_v35 = vld [vmem:[%s12918_s7 + $0x30] sm:$0xff]  ;;  %v780_v18 = vld [vmem:[%s9036_s18 + $0x165] sm:$0xf] }
 0x4d3   : > { %1683 = vrot.lane.b32.xlu0 %v737_v10, %s12993_s0  ;;  %v6336_v10 = vld [vmem:[%s12918_s7 + $0x38] sm:$0xff] }
 0x4d4   : > { %v5641_v24 = vrot.slane %v11853_v33, 1  ;;  %1231 = vrot.lane.b32.xlu1 %v653_v58, %s12996_s1  ;;  %8560 = vmatpush3.msra.mxu0 %v6336_v10 }
 0x4d5   : > { %v4501_v39 = vpop.permute.xlu0 %4500  ;;  %8561 = vmatprep.subr.mxu0 %v12987_v52 }
 0x4d6   : > { %v5642_v60 = vsel %vm5627_vm13, %v5639_v54, %v5641_v24  ;;  %v3433_v46 = vpop.permute.xlu1 %3432  ;;  %v4880_v23 = vsel %vm2350_vm9, %v4839_v20, %v4501_v39  ;;  %v4594_v54 = vsel %vm12957_vm0, %v3065_v8, %v11819_v12  ;;  %8562 = vmatpush3.msra.mxu0 %v6335_v35  ;;  %v6333_v20 = vld [vmem:[%s12918_s7 + $0x20] sm:$0xff] }
 0x4d7   : > { %v5683_v53 = vmax.f32 %v11804_v50, %v5642_v60  ;;  %v11868_v26 = vpop.f32.mrf.mxu1  ;;  %8525 = vmatmul.mubr.msk.f32.gmra.mxu1 %vm12951_vm10, %v4880_v23  ;;  %1847 = vrot.lane.b32.xlu0 %v778_v51, %s12990_s21  ;;  %v738_v50 = vld [vmem:[%s9036_s18 + $0x15c] sm:$0xff]  ;;  %v4635_v19 = vsel %vm512_vm1, %v4594_v54, %v3595_v32  ;;  %v4595_v36 = vsel %vm12957_vm0, %v3066_v63, %v3433_v46  ;;  %v6330_v54 = vld [vmem:[%s12918_s7 + $0x8] sm:$0xff] }
 0x4d8   : > { %1395 = vrot.lane.b32.xlu1 %v694_v38, %s12992_s25  ;;  %8527 = vmatprep.mubr.msk.f32.mxu1 %vm8897_vm3, %v12987_v52  ;;  %v4676_v49 = vsel %vm12956_vm4, %v4635_v19, %v3721_v29  ;;  %v5758_v29 = vld [vmem:[#allocation3 + $0x2] sm:$0xff]  ;;  %v5759_v51 = vld [vmem:[#allocation3 + $0xa] sm:$0xff]  ;;  %v821_v38 = vld [vmem:[%s9036_s18 + $0x166] sm:$0xf] }
 0x4d9   : > { %5699 = vst.msk [vmem:[#allocation4 + $0x30] sm:$0xff] %vm512_vm1, %v5683_v53  ;;  %v8490_v34 = vpop.f32.mrf.mxu1  ;;  %v4049_v17 = vpop.permute.xlu0 %4048  ;;  %v4717_v40 = vsel %vm2182_vm5, %v4676_v49, %v3885_v59  ;;  %8563 = vmatprep.subr.mxu0 %v12987_v52  ;;  %v5746_v8 = vld [vmem:[#allocation3 + $0x9] sm:$0xff]  ;;  %v3067_v49 = vld [vmem:[#allocation2 + $0x108] sm:$0xff] }
 0x4da   : > { %v3597_v56 = vpop.permute.xlu1 %3596  ;;  %v4758_v21 = vsel %vm12955_vm6, %v4717_v40, %v4049_v17  ;;  %8564 = vmatpush3.msra.mxu0 %v6334_v7  ;;  %v5773_v34 = vld [vmem:[#allocation3 + $0xb] sm:$0xff]  ;;  %v5787_v40 = vld [vmem:[#allocation3 + $0x14] sm:$0xff] }
 0x4db   : > { %2011 = vrot.lane.b32.xlu0 %v819_v13, %s12991_s28  ;;  %v4636_v15 = vsel %vm512_vm1, %v4595_v36, %v3597_v56  ;;  %8565 = vmatprep.subr.mxu0 %v12987_v52  ;;  %v6332_v17 = vld [vmem:[%s12918_s7 + $0x18] sm:$0xff]  ;;  %v5814_v63 = vld [vmem:[#allocation3 + $0x16] sm:$0xff] }
 0x4dc   : > { %1559 = vrot.lane.b32.xlu1 %v11801_v5, %s12989_s26  ;;  %8566 = vmatpush3.msra.mxu0 %v6333_v20 }
 0x4dd   : > { %v4175_v57 = vpop.permute.xlu0 %4174  ;;  %8567 = vmatprep.subr.mxu0 %v12987_v52 }
 0x4de   : > { %v3723_v45 = vpop.permute.xlu1 %3722  ;;  %v4799_v12 = vsel %vm2266_vm7, %v4758_v21, %v4175_v57  ;;  %v6331_v57 = vld [vmem:[%s12918_s7 + $0x10] sm:$0xff]  ;;  %8568 = vmatpush3.msra.mxu0 %v6332_v17 }
 0x4df   : > { %1107 = vrot.lane.b32.xlu0 %v651_v48, %s12988_s27  ;;  %v4677_v1 = vsel %vm12956_vm4, %v4636_v15, %v3723_v45  ;;  %v5786_v45 = vld [vmem:[#allocation3 + $0xc] sm:$0xff]  ;;  %8569 = vmatprep.subr.mxu0 %v12987_v52 }
 0x4e0   : > { %1685 = vrot.lane.b32.xlu1 %v738_v50, %s12993_s0  ;;  %8570 = vmatpush3.msra.mxu0 %v6331_v57 }
 0x4e1   : > { %v4339_v5 = vpop.permute.xlu0 %4338  ;;  %8571 = vmatprep.subr.mxu0 %v12987_v52 }
 0x4e2   : > { %v3887_v4 = vpop.permute.xlu1 %3886  ;;  %v4840_v30 = vsel %vm12952_vm8, %v4799_v12, %v4339_v5  ;;  %8572 = vmatpush3.msra.mxu0 %v6330_v54  ;;  %v3069_v54 = vld [vmem:[#allocation2 + $0x118] sm:$0xff] }
 0x4e3   : > { %1233 = vrot.lane.b32.xlu0 %v654_v16, %s12996_s1  ;;  %v4718_v59 = vsel %vm2182_vm5, %v4677_v1, %v3887_v4  ;;  %v6329_v16 = vld [vmem:[%s12918_s7] sm:$0xff]  ;;  %8573 = vmatprep.subr.mxu0 %v12987_v52 }
 0x4e4   : > { %1849 = vrot.lane.b32.xlu1 %v779_v11, %s12990_s21  ;;  %8574 = vmatpush3.msra.mxu0 %v6329_v16  ;;  %v5747_v1 = vld [vmem:[#allocation3 + $0x11] sm:$0xff] }
 0x4e5   : > { %v4503_v22 = vpop.permute.xlu0 %4502  ;;  %8614 = vmatprep.subr.mxu0 %v12987_v52 }
 0x4e6   : > { %v11898_v3 = vpop.permute.xlu1 %3434  ;;  %v4881_v44 = vsel %vm2350_vm9, %v4840_v30, %v4503_v22 }
 0x4e7   : > { %v11901_v61 = vpop.f32.mrf.mxu1  ;;  %8528 = vmatmul.mubr.msk.f32.gmra.mxu1 %vm12951_vm10, %v4881_v44  ;;  %1397 = vrot.lane.b32.xlu0 %v695_v62, %s12992_s25  ;;  %v4596_v11 = vsel %vm12957_vm0, %v3067_v49, %v11898_v3  ;;  %v5801_v44 = vld [vmem:[#allocation3 + $0x15] sm:$0xff] }
 0x4e8   : > { %2013 = vrot.lane.b32.xlu1 %v820_v27, %s12991_s28  ;;  %8530 = vmatprep.mubr.msk.f32.mxu1 %vm8897_vm3, %v12987_v52  ;;  %v5760_v27 = vld [vmem:[#allocation3 + $0x12] sm:$0xff]  ;;  %v5313_v49 = vmul.f32 %v11725_v9, %v11901_v61 }
 0x4e9   : > { %v8493_v32 = vpop.f32.mrf.mxu1  ;;  %v4051_v41 = vpop.permute.xlu0 %4050 }
 0x4ea   : > { %v11909_v0 = vpop.permute.xlu1 %3598  ;;  %v4759_v28 = vsel %vm12955_vm6, %v4718_v59, %v4051_v41  ;;  %v5312_v41 = vmul.f32 %v11725_v9, %v11868_v26 }
 0x4eb   : > { %1561 = vrot.lane.b32.xlu0 %v736_v37, %s12989_s26  ;;  %v4637_v4 = vsel %vm512_vm1, %v4596_v11, %v11909_v0 }
 0x4ec   : > { %5840 = vrot.lane.b32.xlu1 %v5745_v43, %s12988_s27  ;;  %v5355_v26 = vadd.f32 %v11740_v6, %v5312_v41 }
 0x4ed   : > { %v4177_v42 = vpop.permute.xlu0 %4176 }
 0x4ee   : > { %v11917_v2 = vpop.permute.xlu1 %3724  ;;  %v4800_v39 = vsel %vm2266_vm7, %v4759_v28, %v4177_v42  ;;  %v5427_v59 = vmul.f32 0.01, %v5355_v26  ;;  %vm5391_vm15 = vcmp.gt.f32.partialorder %v5355_v26, 0.0  ;;  %v3068_v28 = vld [vmem:[#allocation2 + $0x110] sm:$0xff] }
 0x4ef   : > { %1687 = vrot.lane.b32.xlu0 %v739_v47, %s12993_s0  ;;  %v4678_v12 = vsel %vm12956_vm4, %v4637_v4, %v11917_v2 }
 0x4f0   : > { %5892 = vrot.lane.b32.xlu1 %v5758_v29, %s12992_s25  ;;  %v5774_v29 = vld [vmem:[#allocation3 + $0x13] sm:$0xff] }
 0x4f1   : > { %v4341_v58 = vpop.permute.xlu0 %4340 }
 0x4f2   : > { %v3889_v31 = vpop.permute.xlu1 %3888  ;;  %v4841_v60 = vsel %vm12952_vm8, %v4800_v39, %v4341_v58 }
 0x4f3   : > { %1851 = vrot.lane.b32.xlu0 %v780_v18, %s12990_s21  ;;  %v4719_v30 = vsel %vm2182_vm5, %v4678_v12, %v3889_v31 }
 0x4f4   : > { %5933 = vrot.lane.b32.xlu1 %v5759_v51, %s12993_s0 }
 0x4f5   : > { %v4505_v46 = vpop.permute.xlu0 %4504 }
 0x4f6   : > { %v11948_v23 = vpop.permute.xlu1 %3436  ;;  %v4882_v53 = vsel %vm2350_vm9, %v4841_v60, %v4505_v46  ;;  %v5788_v46 = vld [vmem:[#allocation3 + $0x1c] sm:$0xff] }
 0x4f7   : > { %v5188_v13 = vpop.f32.mrf.mxu1  ;;  %2015 = vrot.lane.b32.xlu0 %v821_v38, %s12991_s28  ;;  %8531 = vmatmul.mubr.msk.f32.gmra.mxu1 %vm12951_vm10, %v4882_v53  ;;  %v4597_v39 = vsel %vm12957_vm0, %v3068_v28, %v11948_v23 }
 0x4f8   : > { %5985 = vrot.lane.b32.xlu1 %v5773_v34, %s12991_s28  ;;  %8533 = vmatprep.mubr.msk.f32.mxu1 %vm8897_vm3, %v12987_v52  ;;  %v5314_v21 = vmul.f32 %v11725_v9, %v5188_v13  ;;  %v5463_v13 = vsel %vm5391_vm15, %v5355_v26, %v5427_v59 }
 0x4f9   : > { %v8496_v56 = vpop.f32.mrf.mxu1  ;;  %v4053_v48 = vpop.permute.xlu0 %4052 }
 0x4fa   : > { %v11963_v50 = vpop.permute.xlu1 %3600  ;;  %v4760_v3 = vsel %vm12955_vm6, %v4719_v30, %v4053_v48  ;;  %v5357_v37 = vadd.f32 %v11740_v6, %v5314_v21  ;;  %v5775_v30 = vld [vmem:[#allocation3 + $0x1b] sm:$0xff] }
 0x4fb   : > { %5842 = vrot.lane.b32.xlu0 %v5746_v8, %s12988_s27  ;;  %v4638_v53 = vsel %vm512_vm1, %v4597_v39, %v11963_v50  ;;  %v5761_v8 = vld [vmem:[#allocation3 + $0x1a] sm:$0xff] }
 0x4fc   : > { %6037 = vrot.lane.b32.xlu1 %v5786_v45, %s8903_s22  ;;  %v5429_v2 = vmul.f32 0.01, %v5357_v37  ;;  %vm5393_vm12 = vcmp.gt.f32.partialorder %v5357_v37, 0.0  ;;  %v5802_v50 = vld [vmem:[#allocation3 + $0x1d] sm:$0xff] }
 0x4fd   : > { %v4179_v19 = vpop.permute.xlu0 %4178 }
 0x4fe   : > { %v11975_v5 = vpop.permute.xlu1 %3726  ;;  %v4801_v32 = vsel %vm2266_vm7, %v4760_v3, %v4179_v19  ;;  %v5465_v58 = vsel %vm5393_vm12, %v5357_v37, %v5429_v2  ;;  %v5815_v3 = vld [vmem:[#allocation3 + $0x1e] sm:$0xff]  ;;  %v5356_v37 = vadd.f32 %v11740_v6, %v5313_v49 }
 0x4ff   : > { %5894 = vrot.lane.b32.xlu0 %v5759_v51, %s12992_s25  ;;  %v5561_v38 = vrot.slane %v5465_v58, 2  ;;  %v4679_v34 = vsel %vm12956_vm4, %v4638_v53, %v11975_v5 }
 0x500   : > { %6078 = vrot.lane.b32.xlu1 %v5787_v40, %s8904_s24 }
 0x501   : > { %v4343_v62 = vpop.permute.xlu0 %4342 }
 0x502   : > { %v3891_v22 = vpop.permute.xlu1 %3890  ;;  %v4842_v43 = vsel %vm12952_vm8, %v4801_v32, %v4343_v62 }
 0x503   : > { %5935 = vrot.lane.b32.xlu0 %v5760_v27, %s12993_s0  ;;  %v4720_v56 = vsel %vm2182_vm5, %v4679_v34, %v3891_v22 }
 0x504   : > { %6130 = vrot.lane.b32.xlu1 %v5801_v44, %s12953_s2 }
 0x505   : > { %v4507_v0 = vpop.permute.xlu0 %4506 }
 0x506   : > { %v3439_v47 = vpop.permute.xlu1 %3438  ;;  %v4883_v42 = vsel %vm2350_vm9, %v4842_v43, %v4507_v0 }
 0x507   : > { %v5193_v14 = vpop.f32.mrf.mxu1  ;;  %5987 = vrot.lane.b32.xlu0 %v5774_v29, %s12991_s28  ;;  %8534 = vmatmul.mubr.msk.f32.gmra.mxu1 %vm12951_vm10, %v4883_v42  ;;  %v4598_v5 = vsel %vm12957_vm0, %v3069_v54, %v3439_v47  ;;  %v5748_v42 = vld [vmem:[#allocation3 + $0x19] sm:$0xff] }
 0x508   : > { %v5315_v10 = vmul.f32 %v11725_v9, %v5193_v14  ;;  %6182 = vrot.lane.b32.xlu1 %v5814_v63, %s12958_s3  ;;  %8536 = vmatprep.mubr.msk.f32.mxu1 %vm8897_vm3, %v12987_v52  ;;  %v5428_v14 = vmul.f32 0.01, %v5356_v37 }
 0x509   : > { %v8499_v36 = vpop.f32.mrf.mxu1  ;;  %v4055_v35 = vpop.permute.xlu0 %4054 }
 0x50a   : > { %v5358_v15 = vadd.f32 %v11740_v6, %v5315_v10  ;;  %v3603_v18 = vpop.permute.xlu1 %3602  ;;  %v4761_v45 = vsel %vm12955_vm6, %v4720_v56, %v4055_v35 }
 0x50b   : > { %5844 = vrot.lane.b32.xlu0 %v5747_v1, %s12988_s27  ;;  %v4639_v21 = vsel %vm512_vm1, %v4598_v5, %v3603_v18 }
 0x50c   : > { %vm5394_vm11 = vcmp.gt.f32.partialorder %v5358_v15, 0.0  ;;  %v5430_v7 = vmul.f32 0.01, %v5358_v15  ;;  %6039 = vrot.lane.b32.xlu1 %v5787_v40, %s8903_s22 }
 0x50d   : > { %v4181_v31 = vpop.permute.xlu0 %4180 }
 0x50e   : > { %v12008_v51 = vsel %vm5394_vm11, %v5358_v15, %v5430_v7  ;;  %v3729_v20 = vpop.permute.xlu1 %3728  ;;  %v4802_v16 = vsel %vm2266_vm7, %v4761_v45, %v4181_v31  ;;  %vm5392_vm11 = vcmp.gt.f32.partialorder %v5356_v37, 0.0 }
 0x50f   : > { %v5562_v60 = vrot.slane %v12008_v51, 2  ;;  %5896 = vrot.lane.b32.xlu0 %v5760_v27, %s12992_s25  ;;  %v4680_v27 = vsel %vm12956_vm4, %v4639_v21, %v3729_v20  ;;  %v5464_v18 = vsel %vm5392_vm11, %v5356_v37, %v5428_v14  ;;  %v565_v20 = vld [vmem:[%s9036_s18 + $0x120] sm:$0xff] }
 0x510   : > { %6080 = vrot.lane.b32.xlu1 %v5788_v46, %s8904_s24 }
 0x511   : > { %v5563_v17 = vsel %vm5523_vm14, %v5561_v38, %v5562_v60  ;;  %v4345_v23 = vpop.permute.xlu0 %4344 }
 0x512   : > { %v12023_v48 = vmax.f32 %v5463_v13, %v5563_v17  ;;  %v3893_v57 = vpop.permute.xlu1 %3892  ;;  %v4843_v11 = vsel %vm12952_vm8, %v4802_v16, %v4345_v23  ;;  %v13018_v13 = vld [vmem:[#allocation24_spill] sm:$0xff] }
 0x513   : > { %5937 = vrot.lane.b32.xlu0 %v5761_v8, %s12993_s0  ;;  %v4721_v44 = vsel %vm2182_vm5, %v4680_v27, %v3893_v57  ;;  %v2094_v34 = vsel %vm12957_vm0, %v565_v20, %v13018_v13 }
 0x514   : > { %v5643_v19 = vrot.slane %v12023_v48, 1  ;;  %6132 = vrot.lane.b32.xlu1 %v5802_v50, %s12953_s2 }
 0x515   : > { %v4509_v40 = vpop.permute.xlu0 %4508 }
 0x516   : > { %v5644_v4 = vsel %vm5627_vm13, %v5641_v24, %v5643_v19  ;;  %v4884_v12 = vsel %vm2350_vm9, %v4843_v11, %v4509_v40  ;;  %v4057_v62 = vpop.permute.xlu1 %4056 }
 0x517   : > { %v5684_v22 = vmax.f32 %v11853_v33, %v5644_v4  ;;  %v5198_v61 = vpop.f32.mrf.mxu1  ;;  %5989 = vrot.lane.b32.xlu0 %v5775_v30, %s12991_s28  ;;  %8537 = vmatmul.mubr.msk.f32.gmra.mxu1 %vm12951_vm10, %v4884_v12  ;;  %v4762_v33 = vsel %vm12955_vm6, %v4721_v44, %v4057_v62  ;;  %v5749_v12 = vld [vmem:[#allocation3 + $0x21] sm:$0xff]  ;;  %v566_v62 = vld [vmem:[%s9036_s18 + $0x128] sm:$0xff] }
 0x518   : > { %v5316_v24 = vmul.f32 %v11725_v9, %v5198_v61  ;;  %6184 = vrot.lane.b32.xlu1 %v5815_v3, %s12958_s3  ;;  %8539 = vmatprep.mubr.msk.f32.mxu1 %vm8897_vm3, %v12987_v52  ;;  %v13019_v61 = vld [vmem:[#allocation23_spill] sm:$0xff] }
 0x519   : > { %5700 = vst.msk [vmem:[#allocation4 + $0x38] sm:$0xff] %vm512_vm1, %v5684_v22  ;;  %v8502_v32 = vpop.f32.mrf.mxu1  ;;  %v4183_v41 = vpop.permute.xlu0 %4182  ;;  %v2095_v3 = vsel %vm12957_vm0, %v566_v62, %v13019_v61  ;;  %v568_v62 = vld [vmem:[%s9036_s18 + $0x138] sm:$0xff] }
 0x51a   : > { %v5359_v43 = vadd.f32 %v11740_v6, %v5316_v24  ;;  %v4803_v0 = vsel %vm2266_vm7, %v4762_v33, %v4183_v41  ;;  %v4347_v47 = vpop.permute.xlu1 %4346 }
 0x51b   : > { %5846 = vrot.lane.b32.xlu0 %v5748_v42, %s12988_s27  ;;  %v4844_v63 = vsel %vm12952_vm8, %v4803_v0, %v4347_v47 }
 0x51c   : > { %vm5395_vm12 = vcmp.gt.f32.partialorder %v5359_v43, 0.0  ;;  %v5431_v29 = vmul.f32 0.01, %v5359_v43  ;;  %6041 = vrot.lane.b32.xlu1 %v5788_v46, %s8903_s22 }
 0x51d   : > { %v4511_v2 = vpop.permute.xlu0 %4510 }
 0x51e   : > { %v12056_v10 = vsel %vm5395_vm12, %v5359_v43, %v5431_v29  ;;  %v4885_v26 = vsel %vm2350_vm9, %v4844_v63, %v4511_v2  ;;  %v1100_v36 = vpop.permute.xlu1 %1099 }
 0x51f   : > { %v5564_v35 = vrot.slane %v12056_v10, 2  ;;  %5898 = vrot.lane.b32.xlu0 %v5761_v8, %s12992_s25  ;;  %8540 = vmatmul.mubr.msk.f32.gmra.mxu1 %vm12951_vm10, %v4885_v26  ;;  %v2135_v56 = vsel %vm512_vm1, %v2094_v34, %v1100_v36 }
 0x520   : > { %v5715_v15 = vld [vmem:[#allocation4 + $0x30] ss:$2 sm:$0xff]  ;;  %8542 = vmatprep.mubr.msk.f32.mxu1 %vm8897_vm3, %v12987_v52 }
 0x521   : > { %v5565_v1 = vsel %vm5523_vm14, %v5562_v60, %v5564_v35  ;;  %v1226_v58 = vpop.permute.xlu0 %1225  ;;  %5727 = vst.msk [vmem:[#allocation3 + $0x29] sm:$0xff] %vm512_vm1, %v5715_v15 }
 0x522   : > { %v12068_v7 = vmax.f32 %v5464_v18, %v5565_v1  ;;  %v1390_v59 = vpop.permute.xlu1 %1389  ;;  %v2177_v8 = vsel %vm12956_vm4, %v2135_v56, %v1226_v58  ;;  %v567_v1 = vld [vmem:[%s9036_s18 + $0x130] sm:$0xff] }
 0x523   : > { %v2219_v54 = vsel %vm2182_vm5, %v2177_v8, %v1390_v59 }
 0x524   : > { %v5645_v31 = vrot.slane %v12068_v7, 1 }
 0x525   : > { %v1554_v28 = vpop.permute.xlu0 %1553 }
 0x526   : > { %v5646_v39 = vsel %vm5627_vm13, %v5643_v19, %v5645_v31  ;;  %v1102_v38 = vpop.permute.xlu1 %1101  ;;  %v2261_v16 = vsel %vm12955_vm6, %v2219_v54, %v1554_v28 }
 0x527   : > { %v5685_v46 = vmax.f32 %v12023_v48, %v5646_v39  ;;  %v5203_v51 = vpop.f32.mrf.mxu1  ;;  %v2136_v44 = vsel %vm512_vm1, %v2095_v3, %v1102_v38  ;;  %v13020_v39 = vld [vmem:[#allocation26_spill] sm:$0xff] }
 0x528   : > { %v5762_v53 = vld [vmem:[#allocation3 + $0x22] sm:$0xff]  ;;  %v5763_v0 = vld [vmem:[#allocation3 + $0x2a] sm:$0xff]  ;;  %v5317_v29 = vmul.f32 %v11725_v9, %v5203_v51  ;;  %v2096_v38 = vsel %vm12957_vm0, %v567_v1, %v13020_v39 }
 0x529   : > { %v5789_v60 = vld [vmem:[#allocation3 + $0x24] sm:$0xff]  ;;  %5701 = vst.msk [vmem:[#allocation4 + $0x40] sm:$0xff] %vm512_vm1, %v5685_v46  ;;  %v8505_v17 = vpop.f32.mrf.mxu1  ;;  %5939 = vrot.lane.b32.xlu0 %v5762_v53, %s12993_s0  ;;  %v1680_v23 = vpop.permute.xlu0 %1679 }
 0x52a   : > { %6082 = vrot.lane.b32.xlu1 %v5789_v60, %s8904_s24  ;;  %v1228_v57 = vpop.permute.xlu1 %1227  ;;  %v5776_v48 = vld [vmem:[#allocation3 + $0x23] sm:$0xff]  ;;  %v2303_v49 = vsel %vm2266_vm7, %v2261_v16, %v1680_v23  ;;  %v5360_v15 = vadd.f32 %v11740_v6, %v5317_v29 }
 0x52b   : > { %v5803_v45 = vld [vmem:[#allocation3 + $0x25] sm:$0xff]  ;;  %v2178_v33 = vsel %vm12956_vm4, %v2136_v44, %v1228_v57 }
 0x52c   : > { %v5816_v5 = vld [vmem:[#allocation3 + $0x26] sm:$0xff]  ;;  %v5432_v28 = vmul.f32 0.01, %v5360_v15  ;;  %vm5396_vm15 = vcmp.gt.f32.partialorder %v5360_v15, 0.0 }
 0x52d   : > { %5991 = vrot.lane.b32.xlu0 %v5776_v48, %s12991_s28  ;;  %v1844_v50 = vpop.permute.xlu0 %1843  ;;  %v5750_v36 = vld [vmem:[#allocation3 + $0x29] sm:$0xff] }
 0x52e   : > { %6134 = vrot.lane.b32.xlu1 %v5803_v45, %s12953_s2  ;;  %v1392_v19 = vpop.permute.xlu1 %1391  ;;  %v2345_v11 = vsel %vm12952_vm8, %v2303_v49, %v1844_v50  ;;  %v5468_v23 = vsel %vm5396_vm15, %v5360_v15, %v5432_v28  ;;  %vm13021_vm15 = vcmask 1043456   ;;  %v13022_v44 = vld [vmem:[#allocation25_spill] sm:$0xff]  ;;  %v569_v28 = vld [vmem:[%s9036_s18 + $0x140] sm:$0xf] }
 0x52f   : > { %v2220_v41 = vsel %vm2182_vm5, %v2178_v33, %v1392_v19  ;;  %v5505_v19 = vrot.slane %v5468_v23, 4 }
 0x531   : > { %6043 = vrot.lane.b32.xlu0 %v5789_v60, %s8903_s22  ;;  %v2008_v40 = vpop.permute.xlu0 %2007 }
 0x532   : > { %6186 = vrot.lane.b32.xlu1 %v5816_v5, %s12958_s3  ;;  %v2387_v4 = vsel %vm2350_vm9, %v2345_v11, %v2008_v40  ;;  %v1556_v21 = vpop.permute.xlu1 %1555 }
 0x533   : > { %8410 = vmatmul.mubr.msk.f32.gmra.mxu0 %vm12951_vm10, %v2387_v4  ;;  %v2262_v43 = vsel %vm12955_vm6, %v2220_v41, %v1556_v21  ;;  %v5504_v4 = vrot.slane %v12056_v10, 4 }
 0x534   : > { %8412 = vmatprep.mubr.msk.f32.mxu0 %vm8897_vm3, %v12987_v52 }
 0x535   : > { %5848 = vrot.lane.b32.xlu0 %v5749_v12, %s12988_s27  ;;  %v1104_v30 = vpop.permute.xlu0 %1103 }
 0x536   : > { %v1682_v22 = vpop.permute.xlu1 %1681  ;;  %v2137_v51 = vsel %vm512_vm1, %v2096_v38, %v1104_v30  ;;  %v5506_v30 = vsel %vm13021_vm15, %v5504_v4, %v5505_v19 }
 0x537   : > { %v5208_v27 = vpop.f32.mrf.mxu1  ;;  %v2304_v47 = vsel %vm2266_vm7, %v2262_v43, %v1682_v22 }
 0x538   : > { %v5318_v26 = vmul.f32 %v11725_v9, %v5208_v27 }
 0x539   : > { %v8508_v24 = vpop.f32.mrf.mxu1  ;;  %5900 = vrot.lane.b32.xlu0 %v5762_v53, %s12992_s25  ;;  %v1230_v37 = vpop.permute.xlu0 %1229 }
 0x53a   : > { %v1846_v32 = vpop.permute.xlu1 %1845  ;;  %v5361_v58 = vadd.f32 %v11740_v6, %v5318_v26  ;;  %v2179_v13 = vsel %vm12956_vm4, %v2137_v51, %v1230_v37  ;;  %v2097_v24 = vsel %vm12957_vm0, %v568_v62, %v13022_v44  ;;  %v5732_v62 = vld [vmem:[#allocation3] sm:$0xff] }
 0x53b   : > { %v2346_v14 = vsel %vm12952_vm8, %v2304_v47, %v1846_v32 }
 0x53c   : > { %v5433_v53 = vmul.f32 0.01, %v5361_v58  ;;  %vm5397_vm12 = vcmp.gt.f32.partialorder %v5361_v58, 0.0 }
 0x53d   : > { %5941 = vrot.lane.b32.xlu0 %v5763_v0, %s12993_s0  ;;  %v1394_v42 = vpop.permute.xlu0 %1393 }
 0x53e   : > { %v2010_v63 = vpop.permute.xlu1 %2009  ;;  %v2221_v56 = vsel %vm2182_vm5, %v2179_v13, %v1394_v42  ;;  %v5469_v45 = vsel %vm5397_vm12, %v5361_v58, %v5433_v53  ;;  %v13024_v53 = vld [vmem:[#allocation27_spill] sm:$0xff] }
 0x53f   : > { %v2388_v2 = vsel %vm2350_vm9, %v2346_v14, %v2010_v63  ;;  %v5570_v21 = vrot.slane %v5469_v45, 6 }
 0x540   : > { %8413 = vmatmul.mubr.msk.f32.gmra.mxu0 %vm12951_vm10, %v2388_v2 }
 0x541   : > { %5850 = vrot.lane.b32.xlu0 %v5750_v36, %s12988_s27  ;;  %v1558_v35 = vpop.permute.xlu0 %1557  ;;  %8415 = vmatprep.mubr.msk.f32.mxu0 %vm8897_vm3, %v12987_v52 }
 0x542   : > { %v1106_v18 = vpop.permute.xlu1 %1105  ;;  %v2263_v48 = vsel %vm12955_vm6, %v2221_v56, %v1558_v35 }
 0x543   : > { %v2138_v10 = vsel %vm512_vm1, %v2097_v24, %v1106_v18  ;;  %v5507_v18 = vrot.slane %v5469_v45, 4 }
 0x545   : > { %5902 = vrot.lane.b32.xlu0 %v5763_v0, %s12992_s25  ;;  %v1684_v59 = vpop.permute.xlu0 %1683 }
 0x546   : > { %v1232_v20 = vpop.permute.xlu1 %1231  ;;  %v2305_v50 = vsel %vm2266_vm7, %v2263_v48, %v1684_v59 }
 0x547   : > { %v5213_v46 = vpop.f32.mrf.mxu1  ;;  %v2180_v32 = vsel %vm12956_vm4, %v2138_v10, %v1232_v20 }
 0x548   : > { %v5319_v60 = vmul.f32 %v11725_v9, %v5213_v46 }
 0x549   : > { %v8511_v34 = vpop.f32.mrf.mxu1  ;;  %v1848_v17 = vpop.permute.xlu0 %1847 }
 0x54a   : > { %v5362_v57 = vadd.f32 %v11740_v6, %v5319_v60  ;;  %v1396_v8 = vpop.permute.xlu1 %1395  ;;  %v2347_v16 = vsel %vm12952_vm8, %v2305_v50, %v1848_v17  ;;  %v2098_v60 = vsel %vm12957_vm0, %v569_v28, %v13024_v53 }
 0x54b   : > { %v2222_v47 = vsel %vm2182_vm5, %v2180_v32, %v1396_v8 }
 0x54c   : > { %vm5398_vm11 = vcmp.gt.f32.partialorder %v5362_v57, 0.0  ;;  %v5434_v54 = vmul.f32 0.01, %v5362_v57 }
 0x54d   : > { %v2012_v49 = vpop.permute.xlu0 %2011 }
 0x54e   : > { %v5470_v5 = vsel %vm5398_vm11, %v5362_v57, %v5434_v54  ;;  %v2389_v11 = vsel %vm2350_vm9, %v2347_v16, %v2012_v49  ;;  %v1560_v40 = vpop.permute.xlu1 %1559  ;;  %vm13023_vm11 = vmmov %vm13021_vm15  ;;  %vm6273_vm15 = vcmask 326656  }
 0x54f   : > { %v5571_v12 = vrot.slane %v5470_v5, 6  ;;  %8416 = vmatmul.mubr.msk.f32.gmra.mxu0 %vm12951_vm10, %v2389_v11  ;;  %v2264_v29 = vsel %vm12955_vm6, %v2222_v47, %v1560_v40  ;;  %v5508_v39 = vsel %vm13023_vm11, %v5505_v19, %v5507_v18  ;;  %vm6301_vm11 = vcmask 457728  }
 0x550   : > { %8418 = vmatprep.mubr.msk.f32.mxu0 %vm8897_vm3, %v12987_v52 }
 0x551   : > { %v5572_v22 = vsel %vm5533_vm2, %v5570_v21, %v5571_v12  ;;  %v1108_v27 = vpop.permute.xlu0 %1107 }
 0x552   : > { %v5605_v61 = vmax.f32 %v5506_v30, %v5572_v22  ;;  %v1686_v3 = vpop.permute.xlu1 %1685  ;;  %v2139_v13 = vsel %vm512_vm1, %v2098_v60, %v1108_v27 }
 0x553   : > { %v2306_v63 = vsel %vm2266_vm7, %v2264_v29, %v1686_v3 }
 0x554   : > { %v5647_v37 = vrot.slane %v5605_v61, 1 }
 0x555   : > { %v1234_v33 = vpop.permute.xlu0 %1233 }
 0x556   : > { %v5648_v41 = vsel %vm5627_vm13, %v5645_v31, %v5647_v37  ;;  %v1850_v43 = vpop.permute.xlu1 %1849  ;;  %v2181_v17 = vsel %vm12956_vm4, %v2139_v13, %v1234_v33 }
 0x557   : > { %v5686_v0 = vmax.f32 %v12068_v7, %v5648_v41  ;;  %v5218_v42 = vpop.f32.mrf.mxu1  ;;  %v2348_v36 = vsel %vm12952_vm8, %v2306_v63, %v1850_v43 }
 0x558   : > { %v5320_v14 = vmul.f32 %v11725_v9, %v5218_v42 }
 0x559   : > { %5702 = vst.msk [vmem:[#allocation4 + $0x48] sm:$0xff] %vm512_vm1, %v5686_v0  ;;  %v8514_v2 = vpop.f32.mrf.mxu1  ;;  %v1398_v26 = vpop.permute.xlu0 %1397 }
 0x55a   : > { %v5363_v31 = vadd.f32 %v11740_v6, %v5320_v14  ;;  %v2014_v35 = vpop.permute.xlu1 %2013  ;;  %v2223_v57 = vsel %vm2182_vm5, %v2181_v17, %v1398_v26  ;;  %v12221_v17 = vld [vmem:[%s12916_s5] ss:$0 sm:$0xff] }
 0x55b   : > { %v2390_v7 = vsel %vm2350_vm9, %v2348_v36, %v2014_v35 }
 0x55c   : > { %vm5399_vm12 = vcmp.gt.f32.partialorder %v5363_v31, 0.0  ;;  %v5435_v15 = vmul.f32 0.01, %v5363_v31  ;;  %8419 = vmatmul.mubr.msk.f32.gmra.mxu0 %vm12951_vm10, %v2390_v7  ;;  %v5733_v7 = vld [vmem:[#allocation3 + $0x8] sm:$0xff] }
 0x55d   : > { %v1562_v9 = vpop.permute.xlu0 %1561  ;;  %8421 = vmatprep.mubr.msk.f32.mxu0 %vm8897_vm3, %v12987_v52 }
 0x55e   : > { %v5471_v1 = vsel %vm5399_vm12, %v5363_v31, %v5435_v15  ;;  %v5841_v58 = vpop.permute.xlu1 %5840  ;;  %v2265_v45 = vsel %vm12955_vm6, %v2223_v57, %v1562_v9  ;;  %vm6287_vm12 = vcmask 392192  }
 0x55f   : > { %v5573_v59 = vrot.slane %v5471_v1, 6  ;;  %v6221_v22 = vsel %vm512_vm1, %v5732_v62, %v5841_v58 }
 0x560   : > { %v5717_v20 = vld [vmem:[#allocation4 + $0x40] ss:$2 sm:$0xff] }
 0x561   : > { %v5574_v6 = vsel %vm5533_vm2, %v5571_v12, %v5573_v59  ;;  %v1688_v38 = vpop.permute.xlu0 %1687  ;;  %5728 = vst.msk [vmem:[#allocation3 + $0x33] sm:$0xff] %vm512_vm1, %v5717_v20 }
 0x562   : > { %v12159_v46 = vmax.f32 %v5508_v39, %v5574_v6  ;;  %v5893_v51 = vpop.permute.xlu1 %5892  ;;  %v2307_v54 = vsel %vm2266_vm7, %v2265_v45, %v1688_v38 }
 0x563   : > { %v6234_v24 = vsel %vm2182_vm5, %v6221_v22, %v5893_v51 }
 0x564   : > { %v5649_v34 = vrot.slane %v12159_v46, 1 }
 0x565   : > { %v1852_v23 = vpop.permute.xlu0 %1851 }
 0x566   : > { %v5650_v56 = vsel %vm5627_vm13, %v5647_v37, %v5649_v34  ;;  %v5934_v8 = vpop.permute.xlu1 %5933  ;;  %v2349_v49 = vsel %vm12952_vm8, %v2307_v54, %v1852_v23  ;;  %v5777_v37 = vld [vmem:[#allocation3 + $0x2b] sm:$0xff]  ;;  %vm6338_vm8 = vcmask 588800  }
 0x567   : > { %v5687_v48 = vmax.f32 %v5605_v61, %v5650_v56  ;;  %v12171_v50 = vpop.f32.mrf.mxu1  ;;  %v6247_v10 = vsel %vm2266_vm7, %v6234_v24, %v5934_v8  ;;  %v12227_v56 = vld [vmem:[%s12917_s6] ss:$0 sm:$0xff] }
 0x568   : > { %v5764_v19 = vld [vmem:[#allocation3 + $0x32] sm:$0xff]  ;;  %v5321_v8 = vmul.f32 %v12221_v17, %v12171_v50 }
 0x569   : > { %v5790_v16 = vld [vmem:[#allocation3 + $0x2c] sm:$0xff]  ;;  %5703 = vst.msk [vmem:[#allocation4 + $0x50] sm:$0xff] %vm512_vm1, %v5687_v48  ;;  %v8517_v5 = vpop.f32.mrf.mxu1  ;;  %5943 = vrot.lane.b32.xlu0 %v5764_v19, %s12993_s0  ;;  %v2016_v11 = vpop.permute.xlu0 %2015  ;;  %v12200_v2 = vld [vmem:[#allocation3 + $0x34] sm:$0xff] }
 0x56a   : > { %6084 = vrot.lane.b32.xlu1 %v5790_v16, %s8904_s24  ;;  %v2391_v40 = vsel %vm2350_vm9, %v2349_v49, %v2016_v11  ;;  %v5986_v4 = vpop.permute.xlu1 %5985  ;;  %v5778_v21 = vld [vmem:[#allocation3 + $0x33] sm:$0xff]  ;;  %v5364_v49 = vadd.f32 %v12227_v56, %v5321_v8 }
 0x56b   : > { %8422 = vmatmul.mubr.msk.f32.gmra.mxu0 %vm12951_vm10, %v2391_v40  ;;  %v5804_v12 = vld [vmem:[#allocation3 + $0x2d] sm:$0xff]  ;;  %v6260_v32 = vsel %vm2350_vm9, %v6247_v10, %v5986_v4  ;;  %vm6315_vm10 = vcmask 523264   ;;  %v5805_v31 = vld [vmem:[#allocation3 + $0x35] sm:$0xff] }
 0x56c   : > { %8575 = vmatprep.mubr.msk.f32.mxu0 %vm8897_vm3, %v12987_v52  ;;  %v5751_v27 = vld [vmem:[#allocation3 + $0x31] sm:$0xff]  ;;  %v5436_v62 = vmul.f32 0.01, %v5364_v49  ;;  %vm5400_vm0 = vcmp.gt.f32.partialorder %v5364_v49, 0.0 }
 0x56d   : > { %5995 = vrot.lane.b32.xlu0 %v5778_v21, %s12991_s28  ;;  %v5817_v61 = vld [vmem:[#allocation3 + $0x2e] sm:$0xff]  ;;  %v5843_v3 = vpop.permute.xlu0 %5842 }
 0x56e   : > { %6136 = vrot.lane.b32.xlu1 %v5804_v12, %s12953_s2  ;;  %v6038_v30 = vpop.permute.xlu1 %6037  ;;  %v6222_v15 = vsel %vm512_vm1, %v5733_v7, %v5843_v3  ;;  %v5734_v4 = vld [vmem:[#allocation3 + $0x10] sm:$0xff]  ;;  %v5472_v10 = vsel %vm5400_vm0, %v5364_v49, %v5436_v62 }
 0x56f   : > { %v6274_v43 = vsel %vm6273_vm15, %v6260_v32, %v6038_v30 }
 0x571   : > { %5852 = vrot.lane.b32.xlu0 %v5751_v27, %s12988_s27  ;;  %v5895_v0 = vpop.permute.xlu0 %5894 }
 0x572   : > { %6188 = vrot.lane.b32.xlu1 %v5817_v61, %s12958_s3  ;;  %v6079_v44 = vpop.permute.xlu1 %6078  ;;  %v6235_v9 = vsel %vm2182_vm5, %v6222_v15, %v5895_v0 }
 0x573   : > { %v6288_v47 = vsel %vm6287_vm12, %v6274_v43, %v6079_v44 }
 0x575   : > { %5904 = vrot.lane.b32.xlu0 %v5764_v19, %s12992_s25  ;;  %v5936_v26 = vpop.permute.xlu0 %5935 }
 0x576   : > { %5993 = vrot.lane.b32.xlu1 %v5777_v37, %s12991_s28  ;;  %v6131_v33 = vpop.permute.xlu1 %6130  ;;  %v6248_v1 = vsel %vm2266_vm7, %v6235_v9, %v5936_v26 }
 0x577   : > { %v12192_v41 = vpop.f32.mrf.mxu1  ;;  %v6302_v29 = vsel %vm6301_vm11, %v6288_v47, %v6131_v33 }
 0x579   : > { %v8520_v42 = vpop.f32.mrf.mxu1  ;;  %v5988_v18 = vpop.permute.xlu0 %5987 }
 0x57a   : > { %6045 = vrot.lane.b32.xlu1 %v5790_v16, %s8903_s22  ;;  %v6183_v14 = vpop.permute.xlu1 %6182  ;;  %v6261_v59 = vsel %vm2350_vm9, %v6248_v1, %v5988_v18 }
 0x57b   : > { %v6316_v63 = vsel %vm6315_vm10, %v6302_v29, %v6183_v14 }
 0x57c   : > { %8576 = vmatmul.mubr.msk.f32.vlgmr.msra.gmra.mxu0 %vm6338_vm8, %v6316_v63  ;;  %v5322_v63 = vmul.f32 %v12221_v17, %v12192_v41 }
 0x57d   : > { %8578 = vmatprep.mubr.msk.f32.mxu0 %vm8897_vm3, %v12987_v52  ;;  %v5845_v38 = vpop.permute.xlu0 %5844 }
 0x57e   : > { %6086 = vrot.lane.b32.xlu1 %v12200_v2, %s8904_s24  ;;  %v6040_v36 = vpop.permute.xlu1 %6039  ;;  %v6223_v50 = vsel %vm512_vm1, %v5734_v4, %v5845_v38  ;;  %v5365_v7 = vadd.f32 %v12227_v56, %v5322_v63 }
 0x57f   : > { %v6275_v20 = vsel %vm6273_vm15, %v6261_v59, %v6040_v36 }
 0x580   : > { %v5437_v9 = vmul.f32 0.01, %v5365_v7 }
 0x581   : > { %v5897_v13 = vpop.permute.xlu0 %5896 }
 0x582   : > { %6138 = vrot.lane.b32.xlu1 %v5805_v31, %s12953_s2  ;;  %v6081_v35 = vpop.permute.xlu1 %6080  ;;  %v6236_v22 = vsel %vm2182_vm5, %v6223_v50, %v5897_v13  ;;  %s13025_s2 = smov 56  }
 0x583   : > { %v6289_v39 = vsel %vm6287_vm12, %v6275_v20, %v6081_v35 }
 0x585   : > { %v5938_v48 = vpop.permute.xlu0 %5937 }
 0x586   : > { %v6133_v58 = vpop.permute.xlu1 %6132  ;;  %v6249_v61 = vsel %vm2266_vm7, %v6236_v22, %v5938_v48 }
 0x587   : > { %v5233_v28 = vpop.f32.mrf.mxu1  ;;  %v6303_v51 = vsel %vm6301_vm11, %v6289_v39, %v6133_v58 }
 0x588   : > { %v5323_v23 = vmul.f32 %v12221_v17, %v5233_v28 }
 0x589   : > { %v8523_v6 = vpop.f32.mrf.mxu1  ;;  %v5990_v30 = vpop.permute.xlu0 %5989 }
 0x58a   : > { %v6185_v53 = vpop.permute.xlu1 %6184  ;;  %v5366_v57 = vadd.f32 %v12227_v56, %v5323_v23  ;;  %v6262_v37 = vsel %vm2350_vm9, %v6249_v61, %v5990_v30 }
 0x58b   : > { %v6317_v60 = vsel %vm6315_vm10, %v6303_v51, %v6185_v53 }
 0x58c   : > { %8579 = vmatmul.mubr.msk.f32.gmra.mxu0 %vm6338_vm8, %v6317_v60  ;;  %v5438_v19 = vmul.f32 0.01, %v5366_v57  ;;  %vm5402_vm6 = vcmp.gt.f32.partialorder %v5366_v57, 0.0 }
 0x58d   : > { %8581 = vmatprep.mubr.msk.f32.mxu0 %vm8897_vm3, %v12987_v52 }
 0x58e   : > { %v6042_v45 = vpop.permute.xlu1 %6041  ;;  %v5474_v21 = vsel %vm5402_vm6, %v5366_v57, %v5438_v19 }
 0x58f   : > { %v5579_v3 = vrot.slane %v5474_v21, 2  ;;  %v6276_v33 = vsel %vm6273_vm15, %v6262_v37, %v6042_v45 }
 0x597   : > { %v5238_v54 = vpop.f32.mrf.mxu1 }
 0x598   : > { %v5324_v16 = vmul.f32 %v12221_v17, %v5238_v54  ;;  %v5847_v54 = vpop.permute.xlu0 %5846 }
 0x599   : > { %v8526_v5 = vpop.f32.mrf.mxu1 }
 0x59a   : > { %v5367_v11 = vadd.f32 %v12227_v56, %v5324_v16 }
 0x59c   : > { %v6083_v40 = vpop.permute.xlu1 %6082  ;;  %vm5403_vm4 = vcmp.gt.f32.partialorder %v5367_v11, 0.0  ;;  %v5439_v12 = vmul.f32 0.01, %v5367_v11  ;;  %v5899_v16 = vpop.permute.xlu0 %5898 }
 0x59d   : > { %v6290_v0 = vsel %vm6287_vm12, %v6276_v33, %v6083_v40 }
 0x59e   : > { %v5475_v27 = vsel %vm5403_vm4, %v5367_v11, %v5439_v12  ;;  %vm5401_vm4 = vcmp.gt.f32.partialorder %v5365_v7, 0.0 }
 0x59f   : > { %v5580_v44 = vrot.slane %v5475_v27, 2 }
 0x5a0   : > { %v6135_v24 = vpop.permute.xlu1 %6134  ;;  %v5940_v11 = vpop.permute.xlu0 %5939 }
 0x5a1   : > { %v5581_v32 = vsel %vm5523_vm14, %v5579_v3, %v5580_v44  ;;  %v6304_v47 = vsel %vm6301_vm11, %v6290_v0, %v6135_v24  ;;  %v5735_v24 = vld [vmem:[#allocation3 + $0x18] sm:$0xff] }
 0x5a2   : > { %v5607_v43 = vmax.f32 %v5472_v10, %v5581_v32  ;;  %v6224_v10 = vsel %vm512_vm1, %v5735_v24, %v5847_v54 }
 0x5a3   : > { %v6237_v32 = vsel %vm2182_vm5, %v6224_v10, %v5899_v16  ;;  %v3154_v10 = vld [vmem:[#allocation2 + $0x132] sm:$0xff] }
 0x5a4   : > { %v6187_v42 = vpop.permute.xlu1 %6186  ;;  %v5651_v29 = vrot.slane %v5607_v43, 1  ;;  %v5992_v50 = vpop.permute.xlu0 %5991 }
 0x5a5   : > { %v6318_v14 = vsel %vm6315_vm10, %v6304_v47, %v6187_v42 }
 0x5a6   : > { %8582 = vmatmul.mubr.msk.f32.gmra.mxu0 %vm6338_vm8, %v6318_v14  ;;  %v5652_v26 = vsel %vm5627_vm13, %v5649_v34, %v5651_v29  ;;  %v6250_v14 = vsel %vm2266_vm7, %v6237_v32, %v5940_v11 }
 0x5a7   : > { %8584 = vmatprep.mubr.msk.f32.mxu0 %vm8897_vm3, %v12987_v52  ;;  %v5688_v36 = vmax.f32 %v12159_v46, %v5652_v26  ;;  %v5243_v31 = vpop.f32.mrf.mxu1  ;;  %v5473_v46 = vsel %vm5401_vm4, %v5365_v7, %v5437_v9  ;;  %vm13026_vm4 = vcmask 1043456  }
 0x5a8   : > { %v5325_v35 = vmul.f32 %v12221_v17, %v5243_v31 }
 0x5a9   : > { %5704 = vst.msk [vmem:[#allocation4 + $0x58] sm:$0xff] %vm512_vm1, %v5688_v36  ;;  %v8529_v15 = vpop.f32.mrf.mxu1  ;;  %v6263_v36 = vsel %vm2350_vm9, %v6250_v14, %v5992_v50 }
 0x5aa   : > { %v5368_v41 = vadd.f32 %v12227_v56, %v5325_v35 }
 0x5ac   : > { %vm5404_vm0 = vcmp.gt.f32.partialorder %v5368_v41, 0.0  ;;  %v5440_v18 = vmul.f32 0.01, %v5368_v41 }
 0x5ae   : > { %v12257_v34 = vsel %vm5404_vm0, %v5368_v41, %v5440_v18 }
 0x5af   : > { %v5582_v1 = vrot.slane %v12257_v34, 2  ;;  %v5514_v0 = vrot.slane %v12257_v34, 4 }
 0x5b0   : > { %v5719_v58 = vld [vmem:[#allocation4 + $0x50] ss:$2 sm:$0xff] }
 0x5b1   : > { %v5583_v59 = vsel %vm5523_vm14, %v5580_v44, %v5582_v1  ;;  %5729 = vst.msk [vmem:[#allocation3 + $0x3d] sm:$0xff] %vm512_vm1, %v5719_v58 }
 0x5b2   : > { %v12262_v28 = vmax.f32 %v5473_v46, %v5583_v59 }
 0x5b4   : > { %v5653_v20 = vrot.slane %v12262_v28, 1 }
 0x5b6   : > { %v5654_v39 = vsel %vm5627_vm13, %v5651_v29, %v5653_v20 }
 0x5b7   : > { %v5689_v6 = vmax.f32 %v5607_v43, %v5654_v39  ;;  %v5248_v38 = vpop.f32.mrf.mxu1  ;;  %v6044_v43 = vpop.permute.xlu0 %6043 }
 0x5b8   : > { %v5765_v51 = vld [vmem:[#allocation3 + $0x3a] sm:$0xff]  ;;  %v6277_v15 = vsel %vm6273_vm15, %v6263_v36, %v6044_v43  ;;  %v8827_v43 = vld [vmem:[#allocation2 + $0x122] sm:$0xff] }
 0x5b9   : > { %v5818_v53 = vld [vmem:[#allocation3 + $0x36] sm:$0xff]  ;;  %5705 = vst.msk [vmem:[#allocation4 + $0x60] sm:$0xff] %vm512_vm1, %v5689_v6  ;;  %v8532_v60 = vpop.f32.mrf.mxu1  ;;  %5945 = vrot.lane.b32.xlu0 %v5765_v51, %s12993_s0  ;;  %v5819_v45 = vld [vmem:[#allocation3 + $0x3e] sm:$0xff] }
 0x5ba   : > { %6190 = vrot.lane.b32.xlu1 %v5818_v53, %s12958_s3  ;;  %v5779_v13 = vld [vmem:[#allocation3 + $0x3b] sm:$0xff] }
 0x5bb   : > { %v5752_v23 = vld [vmem:[#allocation3 + $0x39] sm:$0xff] }
 0x5bc   : > { %v5792_v57 = vld [vmem:[#allocation3 + $0x3c] sm:$0xff] }
 0x5bd   : > { %5997 = vrot.lane.b32.xlu0 %v5779_v13, %s12991_s28  ;;  %v5806_v8 = vld [vmem:[#allocation3 + $0x3d] sm:$0xff] }
 0x5be   : > { %6047 = vrot.lane.b32.xlu1 %v12200_v2, %s8903_s22  ;;  %v5326_v2 = vmul.f32 %v12221_v17, %v5248_v38 }
 0x5c0   : > { %v5369_v5 = vadd.f32 %v12227_v56, %v5326_v2 }
 0x5c1   : > { %5854 = vrot.lane.b32.xlu0 %v5752_v23, %s12988_s27 }
 0x5c2   : > { %6088 = vrot.lane.b32.xlu1 %v5792_v57, %s8904_s24  ;;  %v5441_v4 = vmul.f32 0.01, %v5369_v5  ;;  %vm5405_vm6 = vcmp.gt.f32.partialorder %v5369_v5, 0.0 }
 0x5c4   : > { %v5477_v22 = vsel %vm5405_vm6, %v5369_v5, %v5441_v4 }
 0x5c5   : > { %5906 = vrot.lane.b32.xlu0 %v5765_v51, %s12992_s25  ;;  %v5515_v37 = vrot.slane %v5477_v22, 4  ;;  %v5849_v22 = vpop.permute.xlu0 %5848 }
 0x5c6   : > { %6140 = vrot.lane.b32.xlu1 %v5806_v8, %s13025_s2 }
 0x5c7   : > { %v5253_v48 = vpop.f32.mrf.mxu1  ;;  %v5516_v31 = vsel %vm13026_vm4, %v5514_v0, %v5515_v37 }
 0x5c8   : > { %v5327_v49 = vmul.f32 %v12221_v17, %v5253_v48 }
 0x5c9   : > { %v8535_v19 = vpop.f32.mrf.mxu1 }
 0x5ca   : > { %6192 = vrot.lane.b32.xlu1 %v5819_v45, %s12958_s3  ;;  %v5370_v40 = vadd.f32 %v12227_v56, %v5327_v49 }
 0x5cc   : > { %v5442_v12 = vmul.f32 0.01, %v5370_v40  ;;  %vm5406_vm14 = vcmp.gt.f32.partialorder %v5370_v40, 0.0 }
 0x5ce   : > { %6049 = vrot.lane.b32.xlu1 %v5792_v57, %s8903_s22  ;;  %v5478_v3 = vsel %vm5406_vm14, %v5370_v40, %v5442_v12  ;;  %vm13027_vm14 = vmmov %vm13026_vm4  ;;  %vm13031_vm4 = vcmask 162816  }
 0x5cf   : > { %v5588_v47 = vrot.slane %v5478_v3, 6  ;;  %v5517_v46 = vrot.slane %v5478_v3, 4 }
 0x5d1   : > { %v5518_v51 = vsel %vm13027_vm14, %v5515_v37, %v5517_v46  ;;  %v5901_v37 = vpop.permute.xlu0 %5900  ;;  %vm13033_vm14 = vcmask 293888  }
 0x5d7   : > { %v5258_v21 = vpop.f32.mrf.mxu1 }
 0x5d8   : > { %v5328_v62 = vmul.f32 %v12221_v17, %v5258_v21 }
 0x5d9   : > { %v8538_v30 = vpop.f32.mrf.mxu1 }
 0x5da   : > { %v5371_v27 = vadd.f32 %v12227_v56, %v5328_v62 }
 0x5dc   : > { %v6085_v61 = vpop.permute.xlu1 %6084  ;;  %vm5407_vm0 = vcmp.gt.f32.partialorder %v5371_v27, 0.0  ;;  %v5443_v44 = vmul.f32 0.01, %v5371_v27 }
 0x5dd   : > { %v6291_v9 = vsel %vm6287_vm12, %v6277_v15, %v6085_v61  ;;  %v12349_v15 = vld [vmem:[#allocation2 + $0x144] sm:$0xff] }
 0x5de   : > { %v5479_v33 = vsel %vm5407_vm0, %v5371_v27, %v5443_v44  ;;  %v3111_v44 = vld [vmem:[#allocation2 + $0x121] sm:$0xff]  ;;  %vm13030_vm0 = vcmask 97280  }
 0x5df   : > { %v5589_v42 = vrot.slane %v5479_v33, 6  ;;  %v5263_v29 = vpop.f32.mrf.mxu1 }
 0x5e0   : > { %v5329_v63 = vmul.f32 %v12221_v17, %v5263_v29  ;;  %v6137_v26 = vpop.permute.xlu1 %6136  ;;  %v3112_v29 = vld [vmem:[#allocation2 + $0x129] sm:$0xff] }
 0x5e1   : > { %v5590_v35 = vsel %vm5533_vm2, %v5588_v47, %v5589_v42  ;;  %v8541_v7 = vpop.f32.mrf.mxu1  ;;  %v6305_v17 = vsel %vm6301_vm11, %v6291_v9, %v6137_v26  ;;  %v3196_v47 = vld [vmem:[#allocation2 + $0x133] sm:$0xff] }
 0x5e2   : > { %v5609_v41 = vmax.f32 %v5516_v31, %v5590_v35  ;;  %v5372_v18 = vadd.f32 %v12227_v56, %v5329_v63  ;;  %v5736_v63 = vld [vmem:[#allocation3 + $0x20] sm:$0xff] }
 0x5e3   : > { %v6225_v26 = vsel %vm512_vm1, %v5736_v63, %v5849_v22  ;;  %v8828_v31 = vld [vmem:[#allocation2 + $0x134] sm:$0xff]  ;;  %v8829_v35 = vld [vmem:[#allocation2 + $0x12a] sm:$0xff]  ;;  %v12394_v22 = vld [vmem:[%s12920_s9] ss:$0 sm:$0xff] }
 0x5e4   : > { %v5655_v34 = vrot.slane %v5609_v41, 1  ;;  %vm5408_vm6 = vcmp.gt.f32.partialorder %v5372_v18, 0.0  ;;  %v5444_v1 = vmul.f32 0.01, %v5372_v18  ;;  %v6189_v58 = vpop.permute.xlu1 %6188  ;;  %v6238_v7 = vsel %vm2182_vm5, %v6225_v26, %v5901_v37  ;;  %v3114_v37 = vld [vmem:[#allocation2 + $0x139] sm:$0xff] }
 0x5e5   : > { %v6319_v59 = vsel %vm6315_vm10, %v6305_v17, %v6189_v58  ;;  %v3281_v58 = vld [vmem:[#allocation2 + $0x145] sm:$0xff] }
 0x5e6   : > { %v5656_v39 = vsel %vm5627_vm13, %v5653_v20, %v5655_v34  ;;  %v5480_v6 = vsel %vm5408_vm6, %v5372_v18, %v5444_v1  ;;  %8585 = vmatmul.mubr.msk.f32.gmra.mxu0 %vm6338_vm8, %v6319_v59  ;;  %vm13032_vm6 = vcmask 228352  }
 0x5e7   : > { %v5690_v56 = vmax.f32 %v12262_v28, %v5656_v39  ;;  %v5591_v38 = vrot.slane %v5480_v6, 6  ;;  %8587 = vmatprep.mubr.msk.f32.mxu0 %vm8897_vm3, %v12987_v52  ;;  %v3197_v6 = vld [vmem:[#allocation2 + $0x13b] sm:$0xff] }
 0x5e8   : > { %v5994_v3 = vpop.permute.xlu1 %5993 }
 0x5e9   : > { %5706 = vst.msk [vmem:[#allocation4 + $0x68] sm:$0xff] %vm512_vm1, %v5690_v56  ;;  %v5592_v53 = vsel %vm5533_vm2, %v5589_v42, %v5591_v38  ;;  %v5942_v42 = vpop.permute.xlu0 %5941  ;;  %vm13029_vm2 = vcmask 31744  }
 0x5ea   : > { %v5610_v60 = vmax.f32 %v5518_v51, %v5592_v53  ;;  %v6251_v18 = vsel %vm2266_vm7, %v6238_v7, %v5942_v42  ;;  %v3322_v53 = vld [vmem:[#allocation2 + $0x146] sm:$0xff]  ;;  %v3115_v7 = vld [vmem:[#allocation2 + $0x141] sm:$0xf] }
 0x5ec   : > { %v5657_v13 = vrot.slane %v5610_v60, 1  ;;  %v6046_v33 = vpop.permute.xlu1 %6045 }
 0x5ed   : > { %v5851_v36 = vpop.permute.xlu0 %5850 }
 0x5ee   : > { %v5658_v23 = vsel %vm5627_vm13, %v5655_v34, %v5657_v13  ;;  %v5676_v20 = vsel %vm5627_vm13, %v5657_v13, %v5628_v25  ;;  %v6264_v34 = vsel %vm2350_vm9, %v6251_v18, %v5994_v3  ;;  %v3156_v18 = vld [vmem:[#allocation2 + $0x142] sm:$0xf] }
 0x5ef   : > { %v5691_v57 = vmax.f32 %v5609_v41, %v5658_v23  ;;  %v5692_v28 = vmax.f32 %v5610_v60, %v5676_v20  ;;  %v12351_v41 = vld [vmem:[#allocation2 + $0x13a] sm:$0xff]  ;;  %v6278_v1 = vsel %vm6273_vm15, %v6264_v34, %v6046_v33  ;;  %v3113_v23 = vld [vmem:[#allocation2 + $0x131] sm:$0xff] }
 0x5f0   : > { %v5721_v8 = vld [vmem:[#allocation4 + $0x60] ss:$2 sm:$0xff]  ;;  %v6087_v14 = vpop.permute.xlu1 %6086 }
 0x5f1   : > { %5707 = vst.msk [vmem:[#allocation4 + $0x70] sm:$0xff] %vm512_vm1, %v5691_v57  ;;  %5708 = vst.msk [vmem:[#allocation4 + $0x78] sm:$0xff] %vm512_vm1, %v5692_v28  ;;  %v6292_v17 = vsel %vm6287_vm12, %v6278_v1, %v6087_v14  ;;  %v5903_v46 = vpop.permute.xlu0 %5902  ;;  %v8071_v20 = vld [vmem:[%s12921_s10 + $0x38] sm:$0xff] }
 0x5f2   : > { %5730 = vst.msk [vmem:[#allocation3 + $0x47] sm:$0xff] %vm512_vm1, %v5721_v8  ;;  %8636 = vmatpush3.msra.mxu1 %v8071_v20  ;;  %v5737_v28 = vld [vmem:[#allocation3 + $0x28] sm:$0xff] }
 0x5f3   : > { %v2771_v48 = vpop.f32.mrf.mxu0  ;;  %8637 = vmatprep.subr.mxu1 %v12987_v52  ;;  %v6226_v8 = vsel %vm512_vm1, %v5737_v28, %v5851_v36  ;;  %v3283_v14 = vld [vmem:[#allocation2 + $0x155] sm:$0xff]  ;;  %v3199_v36 = vld [vmem:[#allocation2 + $0x14b] sm:$0xff] }
 0x5f4   : > { %v6139_v9 = vpop.permute.xlu1 %6138  ;;  %v3243_v34 = vld [vmem:[#allocation2 + $0x15c] sm:$0xff]  ;;  %v3200_v28 = vld [vmem:[#allocation2 + $0x153] sm:$0xf] }
 0x5f5   : > { %v8411_v45 = vpop.f32.mrf.mxu0  ;;  %v6306_v59 = vsel %vm6301_vm11, %v6292_v17, %v6139_v9  ;;  %v5944_v60 = vpop.permute.xlu0 %5943 }
 0x5f6   : > { %v8830_v45 = vld [vmem:[#allocation2 + $0x13c] sm:$0xff] }
 0x5f8   : > { %v5723_v55 = vld [vmem:[#allocation4 + $0x70] ss:$2 sm:$0xff] }
 0x5f9   : > { %v5766_v54 = vld [vmem:[#allocation3 + $0x42] sm:$0xff]  ;;  %5731 = vst.msk [vmem:[#allocation3 + $0x51] sm:$0xff] %vm512_vm1, %v5723_v55  ;;  %v5996_v48 = vpop.permute.xlu0 %5995 }
 0x5fa   : > { %v5793_v19 = vld [vmem:[#allocation3 + $0x44] sm:$0xff]  ;;  %5947 = vrot.lane.b32.xlu0 %v5766_v54, %s12993_s0 }
 0x5fb   : > { %6090 = vrot.lane.b32.xlu1 %v5793_v19, %s8904_s24  ;;  %v5780_v25 = vld [vmem:[#allocation3 + $0x43] sm:$0xff] }
 0x5fc   : > { %v5807_v2 = vld [vmem:[#allocation3 + $0x45] sm:$0xff] }
 0x5fd   : > { %v5753_v49 = vld [vmem:[#allocation3 + $0x41] sm:$0xff] }
 0x5fe   : > { %5999 = vrot.lane.b32.xlu0 %v5780_v25, %s12991_s28  ;;  %v5820_v5 = vld [vmem:[#allocation3 + $0x46] sm:$0xff] }
 0x5ff   : > { %6142 = vrot.lane.b32.xlu1 %v5807_v2, %s13025_s2  ;;  %v3157_v2 = vld [vmem:[#allocation2 + $0x142] sm:$0xff] }
 0x600   : > { %v2775_v16 = vpop.f32.mrf.mxu0  ;;  %v12325_v40 = vld [vmem:[#allocation3 + $0x4a] sm:$0xff]  ;;  %v5809_v27 = vld [vmem:[#allocation3 + $0x55] sm:$0xff] }
 0x601   : > { %v5794_v4 = vld [vmem:[#allocation3 + $0x4c] sm:$0xff]  ;;  %v12334_v61 = vld [vmem:[#allocation3 + $0x54] sm:$0xff] }
 0x602   : > { %5856 = vrot.lane.b32.xlu0 %v5753_v49, %s12988_s27  ;;  %v8414_v11 = vpop.f32.mrf.mxu0  ;;  %v5781_v21 = vld [vmem:[#allocation3 + $0x4b] sm:$0xff]  ;;  %v5822_v24 = vld [vmem:[#allocation3 + $0x56] sm:$0xff] }
 0x603   : > { %6194 = vrot.lane.b32.xlu1 %v5820_v5, %s12958_s3  ;;  %v5808_v12 = vld [vmem:[#allocation3 + $0x4d] sm:$0xff] }
 0x604   : > { %v5821_v50 = vld [vmem:[#allocation3 + $0x4e] sm:$0xff] }
 0x605   : > { %v12387_v11 = vld [vmem:[%s12919_s8] ss:$0 sm:$0xff]  ;;  %v5768_v26 = vld [vmem:[#allocation3 + $0x52] sm:$0xff] }
 0x606   : > { %5908 = vrot.lane.b32.xlu0 %v5766_v54, %s12992_s25  ;;  %v6239_v54 = vsel %vm2182_vm5, %v6226_v8, %v5903_v46 }
 0x607   : > { %6051 = vrot.lane.b32.xlu1 %v5793_v19, %s8903_s22  ;;  %v3240_v19 = vld [vmem:[#allocation2 + $0x14c] sm:$0xff]  ;;  %v6252_v55 = vsel %vm2266_vm7, %v6239_v54, %v5944_v60  ;;  %v3325_v54 = vld [vmem:[#allocation2 + $0x15e] sm:$0xff] }
 0x608   : > { %v6265_v16 = vsel %vm2350_vm9, %v6252_v55, %v5996_v48 }
 0x60a   : > { %5949 = vrot.lane.b32.xlu0 %v12325_v40, %s12993_s0 }
 0x60b   : > { %6092 = vrot.lane.b32.xlu1 %v5794_v4, %s8904_s24 }
 0x60e   : > { %6001 = vrot.lane.b32.xlu0 %v5781_v21, %s12991_s28 }
 0x60f   : > { %6144 = vrot.lane.b32.xlu1 %v5808_v12, %s13025_s2  ;;  %v2779_v62 = vpop.f32.mrf.mxu0 }
 0x610   : > { %v3198_v62 = vld [vmem:[#allocation2 + $0x143] sm:$0xff] }
 0x611   : > { %v8417_v30 = vpop.f32.mrf.mxu0 }
 0x612   : > { %6053 = vrot.lane.b32.xlu0 %v5794_v4, %s8903_s22  ;;  %v3282_v4 = vld [vmem:[#allocation2 + $0x14d] sm:$0xff] }
 0x613   : > { %6196 = vrot.lane.b32.xlu1 %v5821_v50, %s12958_s3 }
 0x616   : > { %6146 = vrot.lane.b32.xlu0 %v5809_v27, %s13025_s2 }
 0x617   : > { %6094 = vrot.lane.b32.xlu1 %v12334_v61, %s8904_s24 }
 0x61a   : > { %3440 = vrot.lane.b32.xlu0 %v3111_v44, %s12999_s15  ;;  %v3323_v44 = vld [vmem:[#allocation2 + $0x14e] sm:$0xff] }
 0x61b   : > { %6198 = vrot.lane.b32.xlu1 %v5822_v24, %s12958_s3 }
 0x61c   : > { %v2783_v32 = vpop.f32.mrf.mxu0 }
 0x61d   : > { %v5754_v32 = vld [vmem:[#allocation3 + $0x49] sm:$0xff] }
 0x61e   : > { %3730 = vrot.lane.b32.xlu0 %v3154_v10, %s12996_s1  ;;  %v8420_v0 = vpop.f32.mrf.mxu0 }
 0x61f   : > { %3604 = vrot.lane.b32.xlu1 %v8827_v43, %s12988_s27  ;;  %v3242_v43 = vld [vmem:[#allocation2 + $0x154] sm:$0xff]  ;;  %v5853_v0 = vpop.permute.xlu0 %5852 }
 0x622   : > { %3442 = vrot.lane.b32.xlu0 %v3112_v29, %s12999_s15 }
 0x623   : > { %3894 = vrot.lane.b32.xlu1 %v3196_v47, %s12992_s25  ;;  %v3158_v47 = vld [vmem:[#allocation2 + $0x14a] sm:$0xff]  ;;  %v5905_v63 = vpop.permute.xlu0 %5904 }
 0x626   : > { %3606 = vrot.lane.b32.xlu0 %v8829_v35, %s12988_s27 }
 0x627   : > { %4058 = vrot.lane.b32.xlu1 %v8828_v31, %s12989_s26  ;;  %v3324_v31 = vld [vmem:[#allocation2 + $0x156] sm:$0xff] }
 0x62a   : > { %3732 = vrot.lane.b32.xlu0 %v12351_v41, %s12996_s1 }
 0x62b   : > { %4184 = vrot.lane.b32.xlu1 %v12349_v15, %s12993_s0  ;;  %v2787_v38 = vpop.f32.mrf.mxu0  ;;  %v5946_v35 = vpop.permute.xlu0 %5945 }
 0x62c   : > { %v6191_v39 = vpop.permute.xlu1 %6190  ;;  %v5769_v38 = vld [vmem:[#allocation3 + $0x5a] sm:$0xff] }
 0x62d   : > { %v6320_v56 = vsel %vm6315_vm10, %v6306_v59, %v6191_v39  ;;  %v8423_v51 = vpop.f32.mrf.mxu0  ;;  %v3159_v39 = vld [vmem:[#allocation2 + $0x152] sm:$0xf] }
 0x62e   : > { %8588 = vmatmul.mubr.msk.f32.gmra.mxu0 %vm6338_vm8, %v6320_v56  ;;  %3896 = vrot.lane.b32.xlu0 %v3197_v6, %s12992_s25  ;;  %v3284_v6 = vld [vmem:[#allocation2 + $0x15d] sm:$0xff] }
 0x62f   : > { %4348 = vrot.lane.b32.xlu1 %v3281_v58, %s12990_s21  ;;  %8590 = vmatprep.mubr.msk.f32.mxu0 %vm8897_vm3, %v12987_v52  ;;  %v5796_v58 = vld [vmem:[#allocation3 + $0x5c] sm:$0xff]  ;;  %v5738_v51 = vld [vmem:[#allocation3 + $0x30] sm:$0xff] }
 0x630   : > { %v6048_v13 = vpop.permute.xlu1 %6047 }
 0x631   : > { %v6279_v49 = vsel %vm6273_vm15, %v6265_v16, %v6048_v13  ;;  %v5810_v13 = vld [vmem:[#allocation3 + $0x5d] sm:$0xff] }
 0x632   : > { %3444 = vrot.lane.b32.xlu0 %v3113_v23, %s12999_s15 }
 0x633   : > { %4512 = vrot.lane.b32.xlu1 %v3322_v53, %s12991_s28  ;;  %v6227_v53 = vsel %vm512_vm1, %v5738_v51, %v5853_v0  ;;  %v5740_v0 = vld [vmem:[#allocation3 + $0x40] sm:$0xff] }
 0x634   : > { %v6089_v57 = vpop.permute.xlu1 %6088  ;;  %v6240_v60 = vsel %vm2182_vm5, %v6227_v53, %v5905_v63  ;;  %v5757_v53 = vld [vmem:[#allocation3 + $0x61] sm:$0xf] }
 0x635   : > { %v6293_v5 = vsel %vm6287_vm12, %v6279_v49, %v6089_v57  ;;  %v6253_v23 = vsel %vm2266_vm7, %v6240_v60, %v5946_v35  ;;  %v5823_v49 = vld [vmem:[#allocation3 + $0x5e] sm:$0xff] }
 0x636   : > { %3608 = vrot.lane.b32.xlu0 %v3154_v10, %s12988_s27 }
 0x637   : > { %4060 = vrot.lane.b32.xlu1 %v8830_v45, %s12989_s26 }
 0x638   : > { %v6141_v25 = vpop.permute.xlu1 %6140 }
 0x639   : > { %v6307_v21 = vsel %vm6301_vm11, %v6293_v5, %v6141_v25 }
 0x63a   : > { %3734 = vrot.lane.b32.xlu0 %v3157_v2, %s12996_s1  ;;  %v5783_v2 = vld [vmem:[#allocation3 + $0x5b] sm:$0xff] }
 0x63b   : > { %4186 = vrot.lane.b32.xlu1 %v3240_v19, %s12993_s0 }
 0x63c   : > { %v6193_v12 = vpop.permute.xlu1 %6192  ;;  %v6444_v30 = vpop.f32.mrf.mxu0 }
 0x63d   : > { %v6321_v50 = vsel %vm6315_vm10, %v6307_v21, %v6193_v12  ;;  %v6508_v27 = vmul.f32 %v12387_v11, %v6444_v30  ;;  %v3241_v21 = vld [vmem:[#allocation2 + $0x154] sm:$0xf] }
 0x63e   : > { %8591 = vmatmul.mubr.msk.f32.gmra.mxu0 %vm6338_vm8, %v6321_v50  ;;  %3898 = vrot.lane.b32.xlu0 %v3198_v62, %s12992_s25  ;;  %v8577_v3 = vpop.f32.mrf.mxu0  ;;  %v8070_v12 = vld [vmem:[%s12921_s10 + $0x30] sm:$0xff] }
 0x63f   : > { %4350 = vrot.lane.b32.xlu1 %v3282_v4, %s12990_s21  ;;  %8593 = vmatprep.mubr.msk.f32.mxu0 %vm8897_vm3, %v12987_v52  ;;  %v6521_v24 = vadd.f32 %v12394_v22, %v6508_v27  ;;  %v5756_v62 = vld [vmem:[#allocation3 + $0x59] sm:$0xff] }
 0x640   : > { %v6050_v46 = vpop.permute.xlu1 %6049  ;;  %8638 = vmatpush3.msra.mxu1 %v8070_v12  ;;  %v5739_v27 = vld [vmem:[#allocation3 + $0x38] sm:$0xff] }
 0x641   : > { %vm6527_vm13 = vcmp.gt.f32.partialorder %v6521_v24, 0.0  ;;  %v6533_v10 = vmul.f32 0.01, %v6521_v24  ;;  %8642 = vmatprep.subr.mxu1 %v12987_v52 }
 0x642   : > { %3446 = vrot.lane.b32.xlu0 %v3114_v37, %s12999_s15 }
 0x643   : > { %4514 = vrot.lane.b32.xlu1 %v3323_v44, %s12991_s28  ;;  %v6539_v33 = vsel %vm6527_vm13, %v6521_v24, %v6533_v10  ;;  %v3244_v24 = vld [vmem:[#allocation2 + $0x164] sm:$0xf] }
 0x644   : > { %6557 = vst.msk [vmem:[#allocation5] sm:$0xff] %vm2182_vm5, %v6539_v33 }
 0x646   : > { %5858 = vrot.lane.b32.xlu0 %v5754_v32, %s12988_s27 }
 0x647   : > { %4062 = vrot.lane.b32.xlu1 %v12349_v15, %s12989_s26  ;;  %v5782_v15 = vld [vmem:[#allocation3 + $0x53] sm:$0xff] }
 0x64a   : > { %4188 = vrot.lane.b32.xlu0 %v3242_v43, %s12993_s0 }
 0x64b   : > { %3610 = vrot.lane.b32.xlu1 %v12351_v41, %s12988_s27  ;;  %v5755_v41 = vld [vmem:[#allocation3 + $0x51] sm:$0xff] }
 0x64c   : > { %v6449_v42 = vpop.f32.mrf.mxu0 }
 0x64d   : > { %v5797_v42 = vld [vmem:[#allocation3 + $0x64] sm:$0xff] }
 0x64e   : > { %3736 = vrot.lane.b32.xlu0 %v3158_v47, %s12996_s1  ;;  %v8580_v29 = vpop.f32.mrf.mxu0 }
 0x64f   : > { %5910 = vrot.lane.b32.xlu1 %v12325_v40, %s12992_s25  ;;  %v5998_v40 = vpop.permute.xlu0 %5997 }
 0x650   : > { %v6266_v8 = vsel %vm2350_vm9, %v6253_v23, %v5998_v40  ;;  %v5771_v40 = vld [vmem:[#allocation3 + $0x62] sm:$0xff] }
 0x651   : > { %v6280_v48 = vsel %vm6273_vm15, %v6266_v8, %v6050_v46  ;;  %v5770_v23 = vld [vmem:[#allocation3 + $0x62] sm:$0xf]  ;;  %v5772_v8 = vld [vmem:[#allocation3 + $0x6a] sm:$0xf] }
 0x652   : > { %5951 = vrot.lane.b32.xlu0 %v5768_v26, %s12993_s0 }
 0x653   : > { %4352 = vrot.lane.b32.xlu1 %v3283_v14, %s12990_s21  ;;  %v5855_v9 = vpop.permute.xlu0 %5854 }
 0x654   : > { %v6228_v3 = vsel %vm512_vm1, %v5739_v27, %v5855_v9 }
 0x656   : > { %4516 = vrot.lane.b32.xlu0 %v3324_v31, %s12991_s28 }
 0x657   : > { %3900 = vrot.lane.b32.xlu1 %v3199_v36, %s12992_s25  ;;  %v5907_v17 = vpop.permute.xlu0 %5906  ;;  %v3285_v36 = vld [vmem:[#allocation2 + $0x165] sm:$0xf] }
 0x658   : > { %v6241_v44 = vsel %vm2182_vm5, %v6228_v3, %v5907_v17 }
 0x65a   : > { %3448 = vrot.lane.b32.xlu0 %v3115_v7, %s12999_s15 }
 0x65b   : > { %6003 = vrot.lane.b32.xlu1 %v5782_v15, %s12991_s28 }
 0x65e   : > { %5860 = vrot.lane.b32.xlu0 %v5755_v41, %s12988_s27 }
 0x65f   : > { %4064 = vrot.lane.b32.xlu1 %v3240_v19, %s12989_s26 }
 0x662   : > { %3612 = vrot.lane.b32.xlu0 %v3156_v18, %s12988_s27 }
 0x663   : > { %6055 = vrot.lane.b32.xlu1 %v12334_v61, %s8903_s22 }
 0x666   : > { %v12427_v1 = vpop.f32.mrf.mxu0  ;;  %5912 = vrot.lane.b32.xlu0 %v5768_v26, %s12992_s25 }
 0x667   : > { %4190 = vrot.lane.b32.xlu1 %v3243_v34, %s12993_s0  ;;  %v5811_v34 = vld [vmem:[#allocation3 + $0x65] sm:$0xff] }
 0x668   : > { %v8583_v59 = vpop.f32.mrf.mxu0 }
 0x66a   : > { %3738 = vrot.lane.b32.xlu0 %v3159_v39, %s12996_s1  ;;  %s13028_s1 = smov 64  }
 0x66b   : > { %6096 = vrot.lane.b32.xlu1 %v5796_v58, %s8904_s24 }
 0x66c   : > { %v5948_v61 = vpop.permute.xlu0 %5947 }
 0x66d   : > { %v6091_v56 = vpop.permute.xlu1 %6090  ;;  %v6254_v37 = vsel %vm2266_vm7, %v6241_v44, %v5948_v61 }
 0x66e   : > { %5953 = vrot.lane.b32.xlu0 %v5769_v38, %s12993_s0  ;;  %v6294_v45 = vsel %vm6287_vm12, %v6280_v48, %v6091_v56  ;;  %v5824_v56 = vld [vmem:[#allocation3 + $0x66] sm:$0xff]  ;;  %v3070_v48 = vld [vmem:[#allocation2 + $0x120] sm:$0xff] }
 0x66f   : > { %4354 = vrot.lane.b32.xlu1 %v3284_v6, %s12990_s21  ;;  %v5784_v6 = vld [vmem:[#allocation3 + $0x63] sm:$0xff] }
 0x670   : > { %v6000_v20 = vpop.permute.xlu0 %5999 }
 0x671   : > { %v6143_v57 = vpop.permute.xlu1 %6142  ;;  %v6267_v32 = vsel %vm2350_vm9, %v6254_v37, %v6000_v20  ;;  %v5799_v20 = vld [vmem:[#allocation3 + $0x6c] sm:$0xff] }
 0x672   : > { %3902 = vrot.lane.b32.xlu0 %v3200_v28, %s12992_s25  ;;  %v6308_v19 = vsel %vm6301_vm11, %v6294_v45, %v6143_v57  ;;  %v5812_v45 = vld [vmem:[#allocation3 + $0x6d] sm:$0xff] }
 0x673   : > { %6148 = vrot.lane.b32.xlu1 %v5810_v13, %s13025_s2 }
 0x674   : > { %v5857_v55 = vpop.permute.xlu0 %5856 }
 0x675   : > { %v6195_v25 = vpop.permute.xlu1 %6194  ;;  %v6229_v29 = vsel %vm512_vm1, %v5740_v0, %v5857_v55  ;;  %v5826_v0 = vld [vmem:[#allocation3 + $0x76] sm:$0xf] }
 0x676   : > { %v6322_v16 = vsel %vm6315_vm10, %v6308_v19, %v6195_v25  ;;  %6005 = vrot.lane.b32.xlu0 %v5783_v2, %s12991_s28  ;;  %v5785_v25 = vld [vmem:[#allocation3 + $0x6b] sm:$0xf] }
 0x677   : > { %4518 = vrot.lane.b32.xlu1 %v3325_v54, %s12991_s28  ;;  %8594 = vmatmul.mubr.msk.f32.gmra.mxu0 %vm6338_vm8, %v6322_v16  ;;  %v6566_v16 = vld [vmem:[%s12921_s10 + $0x8] sm:$0xff] }
 0x678   : > { %8596 = vmatprep.mubr.msk.f32.mxu0 %vm8897_vm3, %v12987_v52  ;;  %v5909_v5 = vpop.permute.xlu0 %5908  ;;  %8615 = vmatpush3.msra.mxu0 %v6566_v16 }
 0x679   : > { %v6052_v4 = vpop.permute.xlu1 %6051  ;;  %v6242_v31 = vsel %vm2182_vm5, %v6229_v29, %v5909_v5  ;;  %v5825_v5 = vld [vmem:[#allocation3 + $0x6e] sm:$0xff]  ;;  %8616 = vmatprep.subr.mxu0 %v12987_v52 }
 0x67a   : > { %4066 = vrot.lane.b32.xlu0 %v3241_v21, %s12989_s26  ;;  %v6281_v43 = vsel %vm6273_vm15, %v6267_v32, %v6052_v4  ;;  %v6509_v4 = vmul.f32 %v12387_v11, %v12427_v1  ;;  %v5800_v1 = vld [vmem:[#allocation3 + $0x74] sm:$0xf] }
 0x67b   : > { %6200 = vrot.lane.b32.xlu1 %v5823_v49, %s13028_s1  ;;  %v6565_v49 = vld [vmem:[%s12921_s10] sm:$0xff] }
 0x67c   : > { %v5950_v50 = vpop.permute.xlu0 %5949  ;;  %8617 = vmatpush3.msra.mxu0 %v6565_v49  ;;  %v6522_v44 = vadd.f32 %v12394_v22, %v6509_v4 }
 0x67d   : > { %v6093_v30 = vpop.permute.xlu1 %6092  ;;  %v6255_v7 = vsel %vm2266_vm7, %v6242_v31, %v5950_v50  ;;  %8621 = vmatprep.subr.mxu0 %v12987_v52 }
 0x67e   : > { %6057 = vrot.lane.b32.xlu0 %v5796_v58, %s8903_s22  ;;  %v6295_v47 = vsel %vm6287_vm12, %v6281_v43, %v6093_v30  ;;  %v3326_v58 = vld [vmem:[#allocation2 + $0x166] sm:$0xf]  ;;  %vm6528_vm13 = vcmp.gt.f32.partialorder %v6522_v44, 0.0 }
 0x67f   : > { %5862 = vrot.lane.b32.xlu1 %v5756_v62, %s12988_s27  ;;  %v5798_v62 = vld [vmem:[#allocation3 + $0x6c] sm:$0xf] }
 0x680   : > { %v6002_v10 = vpop.permute.xlu0 %6001 }
 0x681   : > { %v6145_v33 = vpop.permute.xlu1 %6144  ;;  %v6268_v15 = vsel %vm2350_vm9, %v6255_v7, %v6002_v10  ;;  %v5813_v10 = vld [vmem:[#allocation3 + $0x75] sm:$0xf] }
 0x682   : > { %5914 = vrot.lane.b32.xlu0 %v5769_v38, %s12992_s25  ;;  %v6309_v14 = vsel %vm6301_vm11, %v6295_v47, %v6145_v33  ;;  %v6534_v47 = vmul.f32 0.01, %v6522_v44  ;;  %v3071_v7 = vld [vmem:[#allocation2 + $0x128] sm:$0xff] }
 0x683   : > { %4192 = vrot.lane.b32.xlu1 %v3244_v24, %s12993_s0 }
 0x684   : > { %v6054_v63 = vpop.permute.xlu0 %6053 }
 0x685   : > { %v6197_v26 = vpop.permute.xlu1 %6196  ;;  %v6282_v41 = vsel %vm6273_vm15, %v6268_v15, %v6054_v63 }
 0x686   : > { %v6323_v35 = vsel %vm6315_vm10, %v6309_v14, %v6197_v26  ;;  %4356 = vrot.lane.b32.xlu0 %v3285_v36, %s12990_s21  ;;  %v6540_v36 = vsel %vm6528_vm13, %v6522_v44, %v6534_v47  ;;  %vm13038_vm13 = vcmask 228352   ;;  %s8907_s21 = smov [#allocation6]  }
 0x687   : > { %6098 = vrot.lane.b32.xlu1 %v5797_v42, %s8904_s24  ;;  %8597 = vmatmul.mubr.msk.f32.gmra.mxu0 %vm6338_vm8, %v6323_v35 }
 0x688   : > { %8599 = vmatprep.mubr.msk.f32.mxu0 %vm8897_vm3, %v12987_v52  ;;  %v6147_v18 = vpop.permute.xlu0 %6146 }
 0x689   : > { %v6095_v9 = vpop.permute.xlu1 %6094 }
 0x68a   : > { %v6296_v17 = vsel %vm6287_vm12, %v6282_v41, %v6095_v9  ;;  %6150 = vrot.lane.b32.xlu0 %v5811_v34, %s13025_s2 }
 0x68b   : > { %5955 = vrot.lane.b32.xlu1 %v5771_v40, %s12993_s0  ;;  %v6310_v59 = vsel %vm6301_vm11, %v6296_v17, %v6147_v18  ;;  %v6547_v18 = vrot.slane %v6540_v36, 4 }
 0x68c   : > { %v3441_v46 = vpop.permute.xlu0 %3440 }
 0x68d   : > { %v6199_v39 = vpop.permute.xlu1 %6198  ;;  %v4599_v54 = vsel %vm13029_vm2, %v3070_v48, %v3441_v46 }
 0x68e   : > { %v6324_v61 = vsel %vm6315_vm10, %v6310_v59, %v6199_v39  ;;  %6007 = vrot.lane.b32.xlu0 %v5784_v6, %s12991_s28 }
 0x68f   : > { %4520 = vrot.lane.b32.xlu1 %v3326_v58, %s12991_s28  ;;  %8600 = vmatmul.mubr.msk.f32.gmra.mxu0 %vm6338_vm8, %v6324_v61 }
 0x690   : > { %8602 = vmatprep.mubr.msk.f32.mxu0 %vm8897_vm3, %v12987_v52  ;;  %v3731_v38 = vpop.permute.xlu0 %3730 }
 0x691   : > { %v3605_v51 = vpop.permute.xlu1 %3604 }
 0x692   : > { %5864 = vrot.lane.b32.xlu0 %v5757_v53, %s12988_s27  ;;  %v4640_v2 = vsel %vm512_vm1, %v4599_v54, %v3605_v51 }
 0x693   : > { %6202 = vrot.lane.b32.xlu1 %v5824_v56, %s13028_s1  ;;  %v4681_v21 = vsel %vm13030_vm0, %v4640_v2, %v3731_v38  ;;  %vm13034_vm0 = vcmask 31744  }
 0x694   : > { %v12489_v13 = vpop.permute.xlu0 %3442 }
 0x695   : > { %v3895_v60 = vpop.permute.xlu1 %3894  ;;  %v4600_v40 = vsel %vm13034_vm0, %v3071_v7, %v12489_v13 }
 0x696   : > { %5916 = vrot.lane.b32.xlu0 %v5770_v23, %s12992_s25  ;;  %v4722_v50 = vsel %vm2182_vm5, %v4681_v21, %v3895_v60 }
 0x697   : > { %6059 = vrot.lane.b32.xlu1 %v5797_v42, %s8903_s22 }
 0x698   : > { %v3607_v28 = vpop.permute.xlu0 %3606 }
 0x699   : > { %v4059_v57 = vpop.permute.xlu1 %4058  ;;  %v4641_v9 = vsel %vm512_vm1, %v4600_v40, %v3607_v28 }
 0x69a   : > { %5957 = vrot.lane.b32.xlu0 %v5772_v8, %s12993_s0  ;;  %v4763_v27 = vsel %vm13031_vm4, %v4722_v50, %v4059_v57  ;;  %vm13035_vm4 = vcmask 97280   ;;  %v3072_v8 = vld [vmem:[#allocation2 + $0x130] sm:$0xff]  ;;  %s458_s0 = sand.u32 1, %s8883_s30  }
 0x69b   : > { %6100 = vrot.lane.b32.xlu1 %v5799_v20, %s8904_s24  ;;  %s7888_s15 = scalar_lea.sflag [#allocation7], %s458_s0 }
 0x69c   : > { %v3733_v55 = vpop.permute.xlu0 %3732 }
 0x69d   : > { %v4185_v19 = vpop.permute.xlu1 %4184  ;;  %v4682_v17 = vsel %vm13035_vm4, %v4641_v9, %v3733_v55 }
 0x69e   : > { %6009 = vrot.lane.b32.xlu0 %v5785_v25, %s12991_s28  ;;  %v4804_v3 = vsel %vm2266_vm7, %v4763_v27, %v4185_v19 }
 0x69f   : > { %6152 = vrot.lane.b32.xlu1 %v5812_v45, %s13025_s2 }
 0x6a0   : > { %v3897_v30 = vpop.permute.xlu0 %3896 }
 0x6a1   : > { %v4349_v12 = vpop.permute.xlu1 %4348  ;;  %v4723_v46 = vsel %vm2182_vm5, %v4682_v17, %v3897_v30  ;;  %v3073_v30 = vld [vmem:[#allocation2 + $0x138] sm:$0xff] }
 0x6a2   : > { %6061 = vrot.lane.b32.xlu0 %v5798_v62, %s8903_s22  ;;  %v4845_v24 = vsel %vm13032_vm6, %v4804_v3, %v4349_v12  ;;  %vm13036_vm6 = vcmask 1043456  }
 0x6a3   : > { %6204 = vrot.lane.b32.xlu1 %v5825_v5, %s13028_s1 }
 0x6a4   : > { %v3445_v32 = vpop.permute.xlu0 %3444 }
 0x6a5   : > { %v4513_v37 = vpop.permute.xlu1 %4512  ;;  %v4601_v48 = vsel %vm13034_vm0, %v3072_v8, %v3445_v32 }
 0x6a6   : > { %v4886_v33 = vsel %vm2350_vm9, %v4845_v24, %v4513_v37  ;;  %v6458_v43 = vpop.f32.mrf.mxu0  ;;  %6154 = vrot.lane.b32.xlu0 %v5813_v10, %s13025_s2  ;;  %s459_s2 = scalar_lea.vmem [#allocation6], %s458_s0 }
 0x6a7   : > { %6102 = vrot.lane.b32.xlu1 %v5800_v1, %s8904_s24  ;;  %8543 = vmatmul.mubr.msk.f32.gmra.mxu1 %vm13033_vm14, %v4886_v33  ;;  %v6510_v42 = vmul.f32 %v12387_v11, %v6458_v43  ;;  %vm13037_vm14 = vcmask 162816   ;;  %s8109_s24 = sshll.u32 %s9004_s17, 4  ;;  %s7900_s19 = sshll.u32 %s459_s2, 4  ;;  %s7901_s19 = int_to_ptr.vmem [resolvable:$true] %s7900_s19 }
 0x6a8   : > { %8545 = vmatprep.mubr.msk.f32.mxu1 %vm8897_vm3, %v12987_v52  ;;  %v3609_v14 = vpop.permute.xlu0 %3608  ;;  %v8586_v63 = vpop.f32.mrf.mxu0  ;;  %s8831_s3 = scalar_lea.vmem %s7901_s19, 16  ;;  %s8835_s17 = sshll.u32 %s8907_s21, 4  ;;  %s8836_s17 = int_to_ptr.vmem [resolvable:$false] %s8835_s17 }
 0x6a9   : > { %v4061_v29 = vpop.permute.xlu1 %4060  ;;  %v6523_v26 = vadd.f32 %v12394_v22, %v6510_v42  ;;  %v4642_v45 = vsel %vm512_vm1, %v4601_v48, %v3609_v14  ;;  %p8832_p11 = scmp.ne.s32.totalorder %s7901_s19, %s8831_s3  ;;  %s8837_s27 = scalar_lea.vmem %s8836_s17, 32 }
 0x6aa   : > { %v4764_v6 = vsel %vm13037_vm14, %v4723_v46, %v4061_v29  ;;  %p8838_p0 = scmp.lt.s32.totalorder %s7901_s19, %s8836_s17  ;;  %p8839_p1 = scmp.lt.s32.totalorder %s8837_s27, %s8831_s3 }
 0x6ab   : > { %6206 = vrot.lane.b32.xlu1 %v5826_v0, %s13028_s1  ;;  %vm6529_vm2 = vcmp.gt.f32.partialorder %v6523_v26, 0.0  ;;  %v6535_v31 = vmul.f32 0.01, %v6523_v26  ;;  %s12876_s1 = scalar_lea.hbm %s12925_s14, %s8109_s24  ;;  %p8833_p12 = pnand %p8832_p11, %p9021_p5 }
 0x6ac   : > { %v3735_v15 = vpop.permute.xlu0 %3734  ;;  %p8840_p2 = por %p8839_p1, %p8838_p0 }
 0x6ad   : > { %v4187_v35 = vpop.permute.xlu1 %4186  ;;  %v6541_v41 = vsel %vm6529_vm2, %v6523_v26, %v6535_v31  ;;  %vm13039_vm2 = vcmask 293888   ;;  %v4683_v19 = vsel %vm13035_vm4, %v4642_v45, %v3735_v15  ;;  %v5741_v26 = vld [vmem:[#allocation3 + $0x48] sm:$0xff]  ;;  %p8834_p13 = pneg %p8833_p12 }
 0x6ae   : > { %v6548_v34 = vrot.slane %v6541_v41, 4  ;;  %v4805_v61 = vsel %vm2266_vm7, %v4764_v6, %v4187_v35 }
 0x6af   : > { %p8841_p3 = pnand %p8840_p2, %p8834_p13 }
 0x6b0   : > { %v6549_v59 = vsel %vm13036_vm6, %v6547_v18, %v6548_v34  ;;  %v3899_v39 = vpop.permute.xlu0 %3898  ;;  %vm13040_vm6 = vmmov %vm13037_vm14  ;;  %v3074_v18 = vld [vmem:[#allocation2 + $0x140] sm:$0xf] }
 0x6b1   : > { %v4351_v58 = vpop.permute.xlu1 %4350  ;;  %6558 = vst.msk [vmem:[#allocation5 + $0x8] sm:$0xff] %vm2182_vm5, %v6549_v59  ;;  %v4724_v25 = vsel %vm2182_vm5, %v4683_v19, %v3899_v39  ;;  %vm13041_vm14 = vmmov %vm13038_vm13  ;;  %v5742_v19 = vld [vmem:[#allocation3 + $0x50] sm:$0xff] }
 0x6b2   : > { %v4846_v56 = vsel %vm13038_vm13, %v4805_v61, %v4351_v58  ;;  %vm13042_vm13 = vmmov %vm13039_vm2 }
 0x6b4   : > { %v3447_v53 = vpop.permute.xlu0 %3446 }
 0x6b5   : > { %v4515_v38 = vpop.permute.xlu1 %4514 }
 0x6b6   : > { %v4887_v51 = vsel %vm2350_vm9, %v4846_v56, %v4515_v38 }
 0x6b7   : > { %8546 = vmatmul.mubr.msk.f32.gmra.mxu1 %vm13039_vm2, %v4887_v51  ;;  %vm13043_vm2 = vmmov %vm13034_vm0 }
 0x6b8   : > { %8548 = vmatprep.mubr.msk.f32.mxu1 %vm8897_vm3, %v12987_v52  ;;  %v5859_v13 = vpop.permute.xlu0 %5858  ;;  %v4602_v3 = vsel %vm13043_vm2, %v3073_v30, %v3447_v53  ;;  %vm13044_vm0 = vmmov %vm13035_vm4 }
 0x6b9   : > { %v4063_v60 = vpop.permute.xlu1 %4062  ;;  %vm13045_vm4 = vmmov %vm13040_vm6  ;;  %v6230_v31 = vsel %vm512_vm1, %v5741_v26, %v5859_v13  ;;  %v8077_v26 = vld [vmem:[%s12921_s10 + $0x58] sm:$0xff] }
 0x6ba   : > { %v4765_v2 = vsel %vm13040_vm6, %v4724_v25, %v4063_v60  ;;  %vm13046_vm6 = vmmov %vm13041_vm14 }
 0x6bc   : > { %v4189_v20 = vpop.permute.xlu0 %4188 }
 0x6bd   : > { %v3611_v23 = vpop.permute.xlu1 %3610  ;;  %v4806_v16 = vsel %vm2266_vm7, %v4765_v2, %v4189_v20 }
 0x6be   : > { %v4643_v24 = vsel %vm512_vm1, %v4602_v3, %v3611_v23 }
 0x6c0   : > { %v3737_v28 = vpop.permute.xlu0 %3736 }
 0x6c1   : > { %v5911_v57 = vpop.permute.xlu1 %5910  ;;  %v4684_v33 = vsel %vm13044_vm0, %v4643_v24, %v3737_v28 }
 0x6c2   : > { %v6243_v7 = vsel %vm2182_vm5, %v6230_v31, %v5911_v57 }
 0x6c4   : > { %v5952_v55 = vpop.permute.xlu0 %5951 }
 0x6c5   : > { %v4353_v54 = vpop.permute.xlu1 %4352  ;;  %v6256_v15 = vsel %vm2266_vm7, %v6243_v7, %v5952_v55 }
 0x6c6   : > { %v4847_v5 = vsel %vm13041_vm14, %v4806_v16, %v4353_v54  ;;  %vm13047_vm14 = vmmov %vm13042_vm13 }
 0x6c8   : > { %v4517_v4 = vpop.permute.xlu0 %4516 }
 0x6c9   : > { %v3901_v49 = vpop.permute.xlu1 %3900  ;;  %v4888_v21 = vsel %vm2350_vm9, %v4847_v5, %v4517_v4 }
 0x6ca   : > { %8549 = vmatmul.mubr.msk.f32.gmra.mxu1 %vm13042_vm13, %v4888_v21  ;;  %v4725_v43 = vsel %vm2182_vm5, %v4684_v33, %v3901_v49  ;;  %vm13048_vm13 = vmmov %vm13043_vm2 }
 0x6cb   : > { %8551 = vmatprep.mubr.msk.f32.mxu1 %vm8897_vm3, %v12987_v52  ;;  %vm13049_vm2 = vmmov %vm13044_vm0 }
 0x6cc   : > { %v3449_v62 = vpop.permute.xlu0 %3448  ;;  %vm13050_vm0 = vmmov %vm13045_vm4 }
 0x6cd   : > { %v6004_v12 = vpop.permute.xlu1 %6003  ;;  %v4603_v46 = vsel %vm13048_vm13, %v3074_v18, %v3449_v62 }
 0x6ce   : > { %v6269_v41 = vsel %vm2350_vm9, %v6256_v15, %v6004_v12 }
 0x6d0   : > { %v5861_v27 = vpop.permute.xlu0 %5860 }
 0x6d1   : > { %v4065_v50 = vpop.permute.xlu1 %4064  ;;  %v6231_v25 = vsel %vm512_vm1, %v5742_v19, %v5861_v27 }
 0x6d2   : > { %v4766_v47 = vsel %vm13045_vm4, %v4725_v43, %v4065_v50  ;;  %vm13051_vm4 = vmmov %vm13046_vm6 }
 0x6d4   : > { %v3613_v44 = vpop.permute.xlu0 %3612 }
 0x6d5   : > { %v6056_v1 = vpop.permute.xlu1 %6055  ;;  %v4644_v38 = vsel %vm512_vm1, %v4603_v46, %v3613_v44 }
 0x6d6   : > { %v6283_v17 = vsel %vm6273_vm15, %v6269_v41, %v6056_v1  ;;  %v12593_v1 = vld [vmem:[#allocation5] ss:$2 sm:$0xff]  ;;  %v5743_v41 = vld [vmem:[#allocation3 + $0x58] sm:$0xff] }
 0x6d7   : > { %v6798_v33 = vrot.slane %v12593_v1, 3  ;;  %v6952_v15 = vrot.slane %v12593_v1, 5 }
 0x6d8   : > { %v5913_v10 = vpop.permute.xlu0 %5912 }
 0x6d9   : > { %v4191_v37 = vpop.permute.xlu1 %4190  ;;  %v6244_v49 = vsel %vm2182_vm5, %v6231_v25, %v5913_v10 }
 0x6da   : > { %v4807_v14 = vsel %vm2266_vm7, %v4766_v47, %v4191_v37 }
 0x6dc   : > { %v3739_v0 = vpop.permute.xlu0 %3738 }
 0x6dd   : > { %v6097_v32 = vpop.permute.xlu1 %6096  ;;  %v4685_v13 = vsel %vm13049_vm2, %v4644_v38, %v3739_v0 }
 0x6de   : > { %v6297_v58 = vsel %vm6287_vm12, %v6283_v17, %v6097_v32  ;;  %v8074_v32 = vld [vmem:[%s12921_s10 + $0x48] sm:$0xff]  ;;  %v8079_v17 = vld [vmem:[%s12921_s10 + $0x60] sm:$0xff] }
 0x6e0   : > { %v5954_v29 = vpop.permute.xlu0 %5953 }
 0x6e1   : > { %v4355_v42 = vpop.permute.xlu1 %4354  ;;  %v6257_v4 = vsel %vm2266_vm7, %v6244_v49, %v5954_v29  ;;  %v5744_v29 = vld [vmem:[#allocation3 + $0x60] sm:$0xf] }
 0x6e2   : > { %v4848_v35 = vsel %vm13046_vm6, %v4807_v14, %v4355_v42  ;;  %vm13052_vm6 = vmmov %vm13047_vm14  ;;  %v8073_v42 = vld [vmem:[%s12921_s10 + $0x40] sm:$0xff] }
 0x6e4   : > { %v3903_v36 = vpop.permute.xlu0 %3902 }
 0x6e5   : > { %v6149_v63 = vpop.permute.xlu1 %6148  ;;  %v4726_v20 = vsel %vm2182_vm5, %v4685_v13, %v3903_v36 }
 0x6e6   : > { %v6311_v59 = vsel %vm6301_vm11, %v6297_v58, %v6149_v63  ;;  %v6875_v63 = vrot.slane %v12593_v1, 4 }
 0x6e8   : > { %v6006_v34 = vpop.permute.xlu0 %6005 }
 0x6e9   : > { %v4519_v40 = vpop.permute.xlu1 %4518  ;;  %v6270_v62 = vsel %vm2350_vm9, %v6257_v4, %v6006_v34  ;;  %v8064_v4 = vld [vmem:[%s12921_s10 + $0x10] sm:$0xff] }
 0x6ea   : > { %v4889_v9 = vsel %vm2350_vm9, %v4848_v35, %v4519_v40  ;;  %v8076_v35 = vld [vmem:[%s12921_s10 + $0x50] sm:$0xff]  ;;  %v8080_v40 = vld [vmem:[%s12921_s10 + $0x68] sm:$0xff] }
 0x6eb   : > { %8552 = vmatmul.mubr.msk.f32.gmra.mxu1 %vm13047_vm14, %v4889_v9 }
 0x6ec   : > { %8554 = vmatprep.mubr.msk.f32.mxu1 %vm8897_vm3, %v12987_v52  ;;  %v4067_v61 = vpop.permute.xlu0 %4066 }
 0x6ed   : > { %v6201_v39 = vpop.permute.xlu1 %6200  ;;  %v4767_v28 = vsel %vm13050_vm0, %v4726_v20, %v4067_v61  ;;  %v8083_v61 = vld [vmem:[%s12921_s10 + $0x78] sm:$0xff] }
 0x6ee   : > { %v6325_v6 = vsel %vm6315_vm10, %v6311_v59, %v6201_v39  ;;  %v6463_v56 = vpop.f32.mrf.mxu0 }
 0x6ef   : > { %8603 = vmatmul.mubr.msk.f32.gmra.mxu0 %vm6338_vm8, %v6325_v6  ;;  %v7029_v6 = vrot.slane %v12593_v1, 6 }
 0x6f0   : > { %8605 = vmatprep.mubr.msk.f32.mxu0 %vm8897_vm3, %v12987_v52  ;;  %v8589_v53 = vpop.f32.mrf.mxu0  ;;  %v6058_v60 = vpop.permute.xlu0 %6057 }
 0x6f1   : > { %v12575_v51 = vpop.permute.xlu1 %5862  ;;  %v6284_v27 = vsel %vm6273_vm15, %v6270_v62, %v6058_v60  ;;  %v8082_v53 = vld [vmem:[%s12921_s10 + $0x70] sm:$0xff]  ;;  %v8067_v62 = vld [vmem:[%s12921_s10 + $0x20] sm:$0xff] }
 0x6f2   : > { %v6232_v34 = vsel %vm512_vm1, %v5743_v41, %v12575_v51  ;;  %v8106_v41 = vld [vmem:[%s12921_s10 + $0xf0] sm:$0xff] }
 0x6f4   : > { %v12579_v57 = vpop.permute.xlu0 %5914 }
 0x6f5   : > { %v4193_v23 = vpop.permute.xlu1 %4192  ;;  %v6245_v58 = vsel %vm2182_vm5, %v6232_v34, %v12579_v57  ;;  %v7106_v57 = vrot.slane %v12593_v1, 7 }
 0x6f6   : > { %v4808_v45 = vsel %vm2266_vm7, %v4767_v28, %v4193_v23 }
 0x6f8   : > { %v4357_v48 = vpop.permute.xlu0 %4356 }
 0x6f9   : > { %v6099_v8 = vpop.permute.xlu1 %6098  ;;  %v4849_v2 = vsel %vm13051_vm4, %v4808_v45, %v4357_v48  ;;  %v8086_v48 = vld [vmem:[%s12921_s10 + $0x88] sm:$0xff] }
 0x6fa   : > { %v6298_v44 = vsel %vm6287_vm12, %v6284_v27, %v6099_v8 }
 0x6fc   : > { %v6151_v55 = vpop.permute.xlu0 %6150 }
 0x6fd   : > { %v12583_v54 = vpop.permute.xlu1 %5955  ;;  %v6312_v37 = vsel %vm6301_vm11, %v6298_v44, %v6151_v55 }
 0x6fe   : > { %v6467_v16 = vpop.f32.mrf.mxu0  ;;  %v6258_v46 = vsel %vm2266_vm7, %v6245_v58, %v12583_v54  ;;  %v8085_v54 = vld [vmem:[%s12921_s10 + $0x80] sm:$0xff] }
 0x6ff   : > { %v6511_v5 = vmul.f32 %v12387_v11, %v6467_v16 }
 0x700   : > { %v8592_v12 = vpop.f32.mrf.mxu0  ;;  %v6008_v3 = vpop.permute.xlu0 %6007 }
 0x701   : > { %v4521_v21 = vpop.permute.xlu1 %4520  ;;  %v6524_v50 = vadd.f32 %v12394_v22, %v6511_v5  ;;  %v6271_v56 = vsel %vm2350_vm9, %v6258_v46, %v6008_v3  ;;  %v8065_v5 = vld [vmem:[%s12921_s10 + $0x18] sm:$0xff]  ;;  %v8068_v12 = vld [vmem:[%s12921_s10 + $0x28] sm:$0xff]  ;;  %v8100_v3 = vld [vmem:[%s12921_s10 + $0xd0] sm:$0xff] }
 0x702   : > { %v4890_v30 = vsel %vm2350_vm9, %v4849_v2, %v4521_v21  ;;  %v6644_v21 = vrot.slane %v12593_v1, 1  ;;  %v8095_v46 = vld [vmem:[%s12921_s10 + $0xb8] sm:$0xff] }
 0x703   : > { %8555 = vmatmul.mubr.msk.f32.gmra.mxu1 %vm13052_vm6, %v4890_v30  ;;  %vm6530_vm14 = vcmp.gt.f32.partialorder %v6524_v50, 0.0  ;;  %v6536_v24 = vmul.f32 0.01, %v6524_v50  ;;  %v8101_v30 = vld [vmem:[%s12921_s10 + $0xd8] sm:$0xff] }
 0x704   : > { %8639 = vmatprep.mubr.msk.f32.mxu1 %vm8897_vm3, %v12987_v52  ;;  %v5865_v47 = vpop.permute.xlu0 %5864 }
 0x705   : > { %v6203_v10 = vpop.permute.xlu1 %6202  ;;  %v6542_v43 = vsel %vm6530_vm14, %v6524_v50, %v6536_v24  ;;  %v6233_v31 = vsel %vm512_vm1, %v5744_v29, %v5865_v47  ;;  %v6721_v50 = vrot.slane %v12593_v1, 2 }
 0x706   : > { %v6326_v0 = vsel %vm6315_vm10, %v6312_v37, %v6203_v10  ;;  %6559 = vst.msk [vmem:[#allocation5 + $0x10] sm:$0xff] %vm2182_vm5, %v6542_v43 }
 0x707   : > { %8606 = vmatmul.mubr.msk.f32.gmra.mxu0 %vm6338_vm8, %v6326_v0  ;;  %8640 = vmatmul.mubr.msk.f32.vlgmr.msra.gmra.mxu1 %vm2182_vm5, %v6798_v33 }
 0x708   : > { %8643 = vmatpush3.msra.mxu1 %v8074_v32  ;;  %8646 = vmatprep.mubr.msk.f32.mxu1 %vm8897_vm3, %v12987_v52  ;;  %v5917_v36 = vpop.permute.xlu0 %5916 }
 0x709   : > { %v6060_v14 = vpop.permute.xlu1 %6059  ;;  %8644 = vmatprep.subr.mxu1 %v12987_v52  ;;  %8608 = vmatprep.mubr.msk.f32.mxu0 %vm8897_vm3, %v12987_v52  ;;  %v6246_v18 = vsel %vm2182_vm5, %v6233_v31, %v5917_v36  ;;  %v8089_v31 = vld [vmem:[%s12921_s10 + $0x98] sm:$0xff] }
 0x70a   : > { %8645 = vmatpush3.msra.mxu1 %v8073_v42  ;;  %v6285_v51 = vsel %vm6273_vm15, %v6271_v56, %v6060_v14 }
 0x70b   : > { %8647 = vmatmul.mubr.msk.f32.vlgmr.msra.gmra.mxu1 %vm2182_vm5, %v6875_v63  ;;  %8649 = vmatprep.subr.mxu1 %v12987_v52 }
 0x70c   : > { %8650 = vmatpush3.msra.mxu1 %v8077_v26  ;;  %8653 = vmatprep.mubr.msk.f32.mxu1 %vm8897_vm3, %v12987_v52  ;;  %v5958_v9 = vpop.permute.xlu0 %5957 }
 0x70d   : > { %v6101_v7 = vpop.permute.xlu1 %6100  ;;  %8651 = vmatprep.subr.mxu1 %v12987_v52  ;;  %v6259_v59 = vsel %vm2266_vm7, %v6246_v18, %v5958_v9  ;;  %v8091_v18 = vld [vmem:[%s12921_s10 + $0xa0] sm:$0xff] }
 0x70e   : > { %8652 = vmatpush3.msra.mxu1 %v8076_v35  ;;  %v6299_v60 = vsel %vm6287_vm12, %v6285_v51, %v6101_v7  ;;  %v8107_v7 = vld [vmem:[%s12921_s10 + $0xf8] sm:$0xff]  ;;  %v8103_v51 = vld [vmem:[%s12921_s10 + $0xe0] sm:$0xff] }
 0x70f   : > { %8654 = vmatmul.mubr.msk.f32.vlgmr.msra.gmra.mxu1 %vm2182_vm5, %v6952_v15  ;;  %8656 = vmatprep.subr.mxu1 %v12987_v52 }
 0x710   : > { %8657 = vmatpush3.msra.mxu1 %v8080_v40  ;;  %8660 = vmatprep.mubr.msk.f32.mxu1 %vm8897_vm3, %v12987_v52  ;;  %v6010_v38 = vpop.permute.xlu0 %6009  ;;  %v8092_v40 = vld [vmem:[%s12921_s10 + $0xa8] sm:$0xff] }
 0x711   : > { %v6153_v39 = vpop.permute.xlu1 %6152  ;;  %8658 = vmatprep.subr.mxu1 %v12987_v52  ;;  %v6272_v13 = vsel %vm2350_vm9, %v6259_v59, %v6010_v38  ;;  %v8094_v59 = vld [vmem:[%s12921_s10 + $0xb0] sm:$0xff]  ;;  %v8104_v38 = vld [vmem:[%s12921_s10 + $0xe8] sm:$0xff] }
 0x712   : > { %8659 = vmatpush3.msra.mxu1 %v8079_v17  ;;  %v6313_v23 = vsel %vm6301_vm11, %v6299_v60, %v6153_v39  ;;  %v7814_v60 = vld [vmem:[%s12923_s12 + $0x78] sm:$0xff] }
 0x713   : > { %8661 = vmatmul.mubr.msk.f32.vlgmr.msra.gmra.mxu1 %vm2182_vm5, %v7029_v6  ;;  %8663 = vmatprep.subr.mxu1 %v12987_v52  ;;  %v8098_v6 = vld [vmem:[%s12921_s10 + $0xc8] sm:$0xff] }
 0x714   : > { %8664 = vmatpush3.msra.mxu1 %v8083_v61  ;;  %8667 = vmatprep.mubr.msk.f32.mxu1 %vm8897_vm3, %v12987_v52  ;;  %v6062_v8 = vpop.permute.xlu0 %6061  ;;  %v8097_v61 = vld [vmem:[%s12921_s10 + $0xc0] sm:$0xff] }
 0x715   : > { %v6205_v20 = vpop.permute.xlu1 %6204  ;;  %8665 = vmatprep.subr.mxu1 %v12987_v52  ;;  %v6286_v45 = vsel %vm6273_vm15, %v6272_v13, %v6062_v8  ;;  %v7812_v8 = vld [vmem:[%s12923_s12 + $0x68] sm:$0xff] }
 0x716   : > { %v6327_v28 = vsel %vm6315_vm10, %v6313_v23, %v6205_v20  ;;  %8666 = vmatpush3.msra.mxu1 %v8082_v53  ;;  %v7813_v23 = vld [vmem:[%s12923_s12 + $0x70] sm:$0xff] }
 0x717   : > { %8609 = vmatmul.mubr.msk.f32.gmra.mxu0 %vm6338_vm8, %v6327_v28  ;;  %8668 = vmatmul.mubr.msk.f32.vlgmr.msra.gmra.mxu1 %vm2182_vm5, %v7106_v57 }
 0x718   : > { %8611 = vmatprep.mubr.msk.f32.mxu0 %vm8897_vm3, %v12987_v52  ;;  %8670 = vmatprep.subr.mxu1 %v12987_v52  ;;  %v6155_v25 = vpop.permute.xlu0 %6154 }
 0x719   : > { %v6103_v19 = vpop.permute.xlu1 %6102  ;;  %8671 = vmatpush3.msra.mxu1 %v8086_v48  ;;  %8674 = vmatprep.mubr.msk.f32.mxu1 %vm8897_vm3, %v12987_v52  ;;  %v7811_v48 = vld [vmem:[%s12923_s12 + $0x60] sm:$0xff] }
 0x71a   : > { %v6300_v55 = vsel %vm6287_vm12, %v6286_v45, %v6103_v19  ;;  %8672 = vmatprep.subr.mxu1 %v12987_v52  ;;  %v7810_v45 = vld [vmem:[%s12923_s12 + $0x58] sm:$0xff] }
 0x71b   : > { %v6314_v2 = vsel %vm6301_vm11, %v6300_v55, %v6155_v25  ;;  %8673 = vmatpush3.msra.mxu1 %v8085_v54  ;;  %v7809_v54 = vld [vmem:[%s12923_s12 + $0x50] sm:$0xff]  ;;  %v7808_v55 = vld [vmem:[%s12923_s12 + $0x48] sm:$0xff] }
 0x71c   : > { %8677 = vmatprep.subr.mxu1 %v12987_v52 }
 0x71d   : > { %v6207_v16 = vpop.permute.xlu1 %6206 }
 0x71e   : > { %v6328_v49 = vsel %vm6315_vm10, %v6314_v2, %v6207_v16  ;;  %v7807_v2 = vld [vmem:[%s12923_s12 + $0x40] sm:$0xff] }
 0x71f   : > { %8612 = vmatmul.mubr.msk.f32.gmra.mxu0 %vm6338_vm8, %v6328_v49  ;;  %vm13053_vm8 = vcmask 1043456   ;;  %v7806_v49 = vld [vmem:[%s12923_s12 + $0x38] sm:$0xff] }
 0x720   : > { %8618 = vmatprep.mubr.msk.f32.mxu0 %vm8897_vm3, %v12987_v52 }
 0x723   : > { %8619 = vmatmul.mubr.msk.f32.vlgmr.msra.gmra.mxu0 %vm2182_vm5, %v12593_v1 }
 0x724   : > { %8622 = vmatpush3.msra.mxu0 %v8065_v5  ;;  %8625 = vmatprep.mubr.msk.f32.mxu0 %vm8897_vm3, %v12987_v52 }
 0x725   : > { %8623 = vmatprep.subr.mxu0 %v12987_v52 }
 0x726   : > { %8624 = vmatpush3.msra.mxu0 %v8064_v4  ;;  %v7805_v4 = vld [vmem:[%s12923_s12 + $0x30] sm:$0xff] }
 0x727   : > { %8626 = vmatmul.mubr.msk.f32.vlgmr.msra.gmra.mxu0 %vm2182_vm5, %v6644_v21  ;;  %8628 = vmatprep.subr.mxu0 %v12987_v52  ;;  %v7804_v21 = vld [vmem:[%s12923_s12 + $0x28] sm:$0xff] }
 0x728   : > { %8629 = vmatpush3.msra.mxu0 %v8068_v12  ;;  %8632 = vmatprep.mubr.msk.f32.mxu0 %vm8897_vm3, %v12987_v52  ;;  %v7803_v12 = vld [vmem:[%s12923_s12 + $0x20] sm:$0xff] }
 0x729   : > { %8630 = vmatprep.subr.mxu0 %v12987_v52 }
 0x72a   : > { %8631 = vmatpush3.msra.mxu0 %v8067_v62  ;;  %v7802_v62 = vld [vmem:[%s12923_s12 + $0x18] sm:$0xff] }
 0x72b   : > { %8633 = vmatmul.mubr.msk.f32.vlgmr.msra.gmra.mxu0 %vm2182_vm5, %v6721_v50  ;;  %8705 = vmatprep.subr.mxu0 %v12987_v52  ;;  %v7801_v50 = vld [vmem:[%s12923_s12 + $0x10] sm:$0xff] }
 0x72c   : > { %8706 = vmatpush3.msra.mxu0 %v8101_v30  ;;  %8709 = vmatprep.mubr.msk.f32.mxu0 %vm8897_vm3, %v12987_v52  ;;  %v7800_v30 = vld [vmem:[%s12923_s12 + $0x8] sm:$0xff] }
 0x72d   : > { %8707 = vmatprep.subr.mxu0 %v12987_v52 }
 0x72e   : > { %8708 = vmatpush3.msra.mxu0 %v8100_v3  ;;  %v7799_v3 = vld [vmem:[%s12923_s12] sm:$0xff] }
 0x72f   : > { %8719 = vmatprep.subr.mxu0 %v12987_v52 }
 0x737   : > { %v6472_v1 = vpop.f32.mrf.mxu0 }
 0x739   : > { %v8595_v27 = vpop.f32.mrf.mxu0 }
 0x747   : > { %v6476_v44 = vpop.f32.mrf.mxu0 }
 0x748   : > { %v6512_v24 = vmul.f32 %v12387_v11, %v6476_v44 }
 0x749   : > { %v8598_v37 = vpop.f32.mrf.mxu0 }
 0x74a   : > { %v6525_v10 = vadd.f32 %v12394_v22, %v6512_v24 }
 0x74c   : > { %v6537_v32 = vmul.f32 0.01, %v6525_v10  ;;  %vm6531_vm1 = vcmp.gt.f32.partialorder %v6525_v10, 0.0 }
 0x74e   : > { %v6543_v42 = vsel %vm6531_vm1, %v6525_v10, %v6537_v32 }
 0x74f   : > { %v6481_v33 = vpop.f32.mrf.mxu0  ;;  %v6553_v63 = vrot.slane %v6543_v42, 4 }
 0x750   : > { %v6513_v43 = vmul.f32 %v12387_v11, %v6481_v33  ;;  %v8088_v11 = vld [vmem:[%s12921_s10 + $0x90] sm:$0xff] }
 0x751   : > { %v8601_v0 = vpop.f32.mrf.mxu0 }
 0x752   : > { %v6526_v47 = vadd.f32 %v12394_v22, %v6513_v43 }
 0x754   : > { %vm6532_vm7 = vcmp.gt.f32.partialorder %v6526_v47, 0.0  ;;  %v6538_v29 = vmul.f32 0.01, %v6526_v47 }
 0x756   : > { %v6544_v14 = vsel %vm6532_vm7, %v6526_v47, %v6538_v29 }
 0x757   : > { %v6554_v26 = vrot.slane %v6544_v14, 4 }
 0x759   : > { %v6555_v36 = vsel %vm13053_vm8, %v6553_v63, %v6554_v26 }
 0x75a   : > { %6560 = vst.msk [vmem:[#allocation5 + $0x18] sm:$0xff] %vm2182_vm5, %v6555_v36 }
 0x761   : > { %v6563_v35 = vld [vmem:[#allocation5 + $0x10] ss:$2 sm:$0xff] }
 0x762   : > { %8675 = vmatmul.mubr.msk.f32.vlgmr.msra.gmra.mxu1 %vm2182_vm5, %v6563_v35  ;;  %v7568_v22 = vrot.slane %v6563_v35, 5  ;;  %v7260_v15 = vrot.slane %v6563_v35, 1  ;;  %v7722_v34 = vrot.slane %v6563_v35, 7  ;;  %v7337_v58 = vrot.slane %v6563_v35, 2 }
 0x763   : > { %8678 = vmatpush3.msra.mxu1 %v8089_v31  ;;  %8681 = vmatprep.mubr.msk.f32.mxu1 %vm8897_vm3, %v12987_v52  ;;  %v7414_v39 = vrot.slane %v6563_v35, 3  ;;  %v7491_v56 = vrot.slane %v6563_v35, 4  ;;  %v7645_v53 = vrot.slane %v6563_v35, 6  ;;  %v6564_v35 = vld [vmem:[%s12922_s11] sm:$0x1] }
 0x764   : > { %8679 = vmatprep.subr.mxu1 %v12987_v52  ;;  %8710 = vmatmul.mubr.msk.f32.vlgmr.msra.gmra.mxu0 %vm2182_vm5, %v7568_v22 }
 0x765   : > { %8680 = vmatpush3.msra.mxu1 %v8088_v11  ;;  %8720 = vmatpush3.msra.mxu0 %v8107_v7 }
 0x766   : > { %8684 = vmatprep.subr.mxu1 %v12987_v52  ;;  %8682 = vmatmul.mubr.msk.f32.vlgmr.msra.gmra.mxu1 %vm2182_vm5, %v7260_v15 }
 0x767   : > { %8685 = vmatpush3.msra.mxu1 %v8092_v40  ;;  %8721 = vmatprep.subr.mxu0 %v12987_v52  ;;  %v5268_v9 = vpop.f32.mrf.mxu1 }
 0x768   : > { %8686 = vmatprep.subr.mxu1 %v12987_v52  ;;  %8722 = vmatpush3.msra.mxu0 %v8106_v41 }
 0x769   : > { %8723 = vmatprep.mubr.msk.f32.mxu0 %vm8897_vm3, %v12987_v52  ;;  %8687 = vmatpush3.msra.mxu1 %v8091_v18  ;;  %v8544_v17 = vpop.f32.mrf.mxu1 }
 0x76a   : > { %8724 = vmatmul.mubr.msk.f32.vlgmr.msra.gmra.mxu0 %vm2182_vm5, %v7722_v34  ;;  %8688 = vmatprep.mubr.msk.f32.mxu1 %vm8897_vm3, %v12987_v52 }
 0x76b   : > { %8691 = vmatprep.subr.mxu1 %v12987_v52  ;;  %8689 = vmatmul.mubr.msk.f32.vlgmr.msra.gmra.mxu1 %vm2182_vm5, %v7337_v58 }
 0x76c   : > { %8692 = vmatpush3.msra.mxu1 %v8095_v46  ;;  %8695 = vmatprep.mubr.msk.f32.mxu1 %vm8897_vm3, %v12987_v52 }
 0x76d   : > { %8693 = vmatprep.subr.mxu1 %v12987_v52 }
 0x76e   : > { %8694 = vmatpush3.msra.mxu1 %v8094_v59 }
 0x76f   : > { %8698 = vmatprep.subr.mxu1 %v12987_v52  ;;  %8696 = vmatmul.mubr.msk.f32.vlgmr.msra.gmra.mxu1 %vm2182_vm5, %v7414_v39 }
 0x770   : > { %8699 = vmatpush3.msra.mxu1 %v8098_v6  ;;  %8702 = vmatprep.mubr.msk.f32.mxu1 %vm8897_vm3, %v12987_v52 }
 0x771   : > { %8700 = vmatprep.subr.mxu1 %v12987_v52 }
 0x772   : > { %8701 = vmatpush3.msra.mxu1 %v8097_v61 }
 0x773   : > { %8712 = vmatprep.subr.mxu1 %v12987_v52  ;;  %8703 = vmatmul.mubr.msk.f32.vlgmr.msra.gmra.mxu1 %vm2182_vm5, %v7491_v56 }
 0x774   : > { %8713 = vmatpush3.msra.mxu1 %v8104_v38  ;;  %8716 = vmatprep.mubr.msk.f32.mxu1 %vm8897_vm3, %v12987_v52 }
 0x775   : > { %8714 = vmatprep.subr.mxu1 %v12987_v52 }
 0x776   : > { %8715 = vmatpush3.msra.mxu1 %v8103_v51 }
 0x777   : > { %8717 = vmatmul.mubr.msk.f32.vlgmr.msra.gmra.mxu1 %vm2182_vm5, %v7645_v53  ;;  %v5272_v13 = vpop.f32.mrf.mxu1  ;;  %8726 = vmatprep.subr.mxu1 %v12987_v52 }
 0x778   : > { %8727 = vmatpush3.msra.mxu1 %v7814_v60  ;;  %8758 = vmatprep.mubr.msk.f32.mxu1 %vm8897_vm3, %v12987_v52 }
 0x779   : > { %v8547_v20 = vpop.f32.mrf.mxu1  ;;  %8728 = vmatprep.subr.mxu1 %v12987_v52 }
 0x77a   : > { %8729 = vmatpush3.msra.mxu1 %v7813_v23 }
 0x77b   : > { %8730 = vmatprep.subr.mxu1 %v12987_v52 }
 0x77c   : > { %8731 = vmatpush3.msra.mxu1 %v7812_v8 }
 0x77d   : > { %8732 = vmatprep.subr.mxu1 %v12987_v52 }
 0x77e   : > { %8733 = vmatpush3.msra.mxu1 %v7811_v48 }
 0x77f   : > { %8734 = vmatprep.subr.mxu1 %v12987_v52 }
 0x780   : > { %8735 = vmatpush3.msra.mxu1 %v7810_v45 }
 0x781   : > { %8736 = vmatprep.subr.mxu1 %v12987_v52 }
 0x782   : > { %8737 = vmatpush3.msra.mxu1 %v7809_v54 }
 0x783   : > { %8738 = vmatprep.subr.mxu1 %v12987_v52 }
 0x784   : > { %8739 = vmatpush3.msra.mxu1 %v7808_v55 }
 0x785   : > { %8740 = vmatprep.subr.mxu1 %v12987_v52 }
 0x786   : > { %8741 = vmatpush3.msra.mxu1 %v7807_v2 }
 0x787   : > { %8742 = vmatprep.subr.mxu1 %v12987_v52 }
 0x788   : > { %8743 = vmatpush3.msra.mxu1 %v7806_v49 }
 0x789   : > { %8744 = vmatprep.subr.mxu1 %v12987_v52 }
 0x78a   : > { %v5276_v57 = vpop.f32.mrf.mxu1  ;;  %8745 = vmatpush3.msra.mxu1 %v7805_v4 }
 0x78b   : > { %8746 = vmatprep.subr.mxu1 %v12987_v52 }
 0x78c   : > { %v8550_v28 = vpop.f32.mrf.mxu1  ;;  %8747 = vmatpush3.msra.mxu1 %v7804_v21 }
 0x78d   : > { %8748 = vmatprep.subr.mxu1 %v12987_v52 }
 0x78e   : > { %8749 = vmatpush3.msra.mxu1 %v7803_v12  ;;  %v7815_v12 = vld [vmem:[%s12924_s13] sm:$0x1] }
 0x78f   : > { %8750 = vmatprep.subr.mxu1 %v12987_v52 }
 0x790   : > { %8751 = vmatpush3.msra.mxu1 %v7802_v62 }
 0x791   : > { %8752 = vmatprep.subr.mxu1 %v12987_v52 }
 0x792   : > { %8753 = vmatpush3.msra.mxu1 %v7801_v50 }
 0x793   : > { %8754 = vmatprep.subr.mxu1 %v12987_v52 }
 0x794   : > { %8755 = vmatpush3.msra.mxu1 %v7800_v30 }
 0x795   : > { %8756 = vmatprep.subr.mxu1 %v12987_v52 }
 0x796   : > { %8757 = vmatpush3.msra.mxu1 %v7799_v3 }
 0x7ab   : > { %v5280_v19 = vpop.f32.mrf.mxu1 }
 0x7ad   : > { %v8553_v25 = vpop.f32.mrf.mxu1 }
 0x7af   : > { %v6486_v16 = vpop.f32.mrf.mxu0 }
 0x7b1   : > { %v8604_v5 = vpop.f32.mrf.mxu0 }
 0x7c3   : > { %v5284_v1 = vpop.f32.mrf.mxu1 }
 0x7c5   : > { %v8556_v27 = vpop.f32.mrf.mxu1 }
 0x7c7   : > { %v6490_v44 = vpop.f32.mrf.mxu0  ;;  %v6867_v24 = vpop.f32.mrf.mxu1 }
 0x7c9   : > { %v8607_v37 = vpop.f32.mrf.mxu0  ;;  %v8641_v10 = vpop.f32.mrf.mxu1 }
 0x7cb   : > { %v6944_v33 = vpop.f32.mrf.mxu1 }
 0x7cd   : > { %v8648_v32 = vpop.f32.mrf.mxu1 }
 0x7cf   : > { %v7021_v43 = vpop.f32.mrf.mxu1 }
 0x7d1   : > { %v8655_v0 = vpop.f32.mrf.mxu1 }
 0x7d3   : > { %v7098_v47 = vpop.f32.mrf.mxu1 }
 0x7d5   : > { %v8662_v42 = vpop.f32.mrf.mxu1 }
 0x7d7   : > { %v6494_v29 = vpop.f32.mrf.mxu0  ;;  %v7175_v14 = vpop.f32.mrf.mxu1 }
 0x7d9   : > { %v8610_v63 = vpop.f32.mrf.mxu0  ;;  %v8669_v26 = vpop.f32.mrf.mxu1 }
 0x7df   : > { %v6498_v36 = vpop.f32.mrf.mxu0 }
 0x7e1   : > { %v8613_v31 = vpop.f32.mrf.mxu0 }
 0x7e3   : > { %v6636_v52 = vpop.f32.mrf.mxu0 }
 0x7e4   : > { %v6640_v7 = vadd.f32 %v6636_v52, %v6564_v35 }
 0x7e5   : > { %v8620_v11 = vpop.f32.mrf.mxu0 }
 0x7e7   : > { %v6713_v22 = vpop.f32.mrf.mxu0 }
 0x7e8   : > { %v6717_v40 = vadd.f32 %v6713_v22, %v6640_v7 }
 0x7e9   : > { %v8627_v15 = vpop.f32.mrf.mxu0 }
 0x7eb   : > { %v6790_v41 = vpop.f32.mrf.mxu0 }
 0x7ec   : > { %v6794_v18 = vadd.f32 %v6790_v41, %v6717_v40 }
 0x7ed   : > { %v8634_v9 = vpop.f32.mrf.mxu0 }
 0x7ee   : > { %v6871_v34 = vadd.f32 %v6867_v24, %v6794_v18 }
 0x7f0   : > { %v6948_v17 = vadd.f32 %v6944_v33, %v6871_v34 }
 0x7f2   : > { %v7025_v58 = vadd.f32 %v7021_v43, %v6948_v17 }
 0x7f4   : > { %v7102_v46 = vadd.f32 %v7098_v47, %v7025_v58 }
 0x7f6   : > { %v7179_v59 = vadd.f32 %v7175_v14, %v7102_v46 }
 0x822   : > { %v7252_v39 = vpop.f32.mrf.mxu1 }
 0x823   : > { %v7256_v13 = vadd.f32 %v7252_v39, %v7179_v59 }
 0x824   : > { %v8676_v6 = vpop.f32.mrf.mxu1  ;;  %v7637_v61 = vpop.f32.mrf.mxu0 }
 0x826   : > { %v7329_v56 = vpop.f32.mrf.mxu1  ;;  %v8711_v38 = vpop.f32.mrf.mxu0 }
 0x827   : > { %v7333_v57 = vadd.f32 %v7329_v56, %v7256_v13 }
 0x828   : > { %v8683_v51 = vpop.f32.mrf.mxu1 }
 0x82a   : > { %v7791_v53 = vpop.f32.mrf.mxu0 }
 0x82b   : > { %v7406_v60 = vpop.f32.mrf.mxu1 }
 0x82c   : > { %v8725_v23 = vpop.f32.mrf.mxu0  ;;  %v7410_v8 = vadd.f32 %v7406_v60, %v7333_v57 }
 0x82d   : > { %v8690_v20 = vpop.f32.mrf.mxu1 }
 0x82f   : > { %v7483_v28 = vpop.f32.mrf.mxu1 }
 0x830   : > { %v7487_v45 = vadd.f32 %v7483_v28, %v7410_v8 }
 0x831   : > { %v8697_v48 = vpop.f32.mrf.mxu1 }
 0x833   : > { %v7560_v54 = vpop.f32.mrf.mxu1 }
 0x834   : > { %v7564_v19 = vadd.f32 %v7560_v54, %v7487_v45 }
 0x835   : > { %v8704_v55 = vpop.f32.mrf.mxu1 }
 0x836   : > { %v7641_v25 = vadd.f32 %v7637_v61, %v7564_v19 }
 0x837   : > { %v7714_v2 = vpop.f32.mrf.mxu1 }
 0x838   : > { %v7718_v16 = vadd.f32 %v7714_v2, %v7641_v25 }
 0x839   : > { %v8718_v49 = vpop.f32.mrf.mxu1 }
 0x83a   : > { %v7795_v5 = vadd.f32 %v7791_v53, %v7718_v16 }
 0x83c   : > { %v7797_v4 = vmul.f32 0.01, %v7795_v5  ;;  %vm7796_vm3 = vcmp.gt.f32.partialorder %v7795_v5, 0.0 }
 0x83e   : > { %v7798_v21 = vsel %vm7796_vm3, %v7795_v5, %v7797_v4 }
 0x83f   : > { %8759 = vmatmul.mubr.f32.vlgmr.msra.gmra.mxu1 %v7798_v21 }
 0x8ff   : > { %v7882_v62 = vpop.f32.mrf.mxu1 }
 0x900   : > { %v7883_v50 = vadd.f32 %v7882_v62, %v7815_v12 }
 0x901   : > { %v8760_v30 = vpop.f32.mrf.mxu1 }
 0x902   : > { %7886 = vst [vmem:[%s459_s2] sm:$0x1] %v7883_v50 }
 0x903   : > { %8844 = shalt.err (!%p8841_p3)
}
 0x904   : > { %s8845_s25 = scalar_lea.hbm %s12876_s1, 16  ;;  %s8849_s28 = scalar_lea.hbm %s12925_s14, 32 }
 0x905   : > { %p8846_p4 = scmp.ne.s32.totalorder %s12876_s1, %s8845_s25  ;;  %p8850_p9 = scmp.lt.s32.totalorder %s12876_s1, %s12925_s14 }
 0x906   : > { %p8851_p10 = scmp.lt.s32.totalorder %s8849_s28, %s8845_s25 }
 0x907   : > { %p8847_p7 = pnand %p8846_p4, %p9021_p5 }
 0x908   : > { %p8852_p11 = por %p8851_p10, %p8850_p9 }
 0x909   : > { %p8848_p8 = pneg %p8847_p7 }
 0x90b   : > { %p8853_p12 = pnand %p8852_p11, %p8848_p8 }
 0x90d   : > { %8856 = shalt.err (!%p8853_p12)
}
 0x90e   : > { %8762 = dma.vmem_to_hbm [thread:$0]  (%p9021_p5), %s7901_s19, 16, %s12876_s1, %s7888_s15  }
 0x90f PF: > { %p8768_p13 = scmp.ge.s32.totalorder %s8891_s16, 2  ;;  %s7912_s18 = sand.u32 1, %s8879_s29  }
 0x910   : > { %s7913_s20 = scalar_lea.sflag [#allocation7], %s7912_s18 }
 0x911   : > { %p8765_p0 = pnand %p8768_p13, %p9025_p6 }
 0x913   : > { %p8766_p1 = pneg %p8765_p0 }
 0x915   : > { %8874 = dma.done.wait (%p8766_p1), %s7913_s20, 16  }
 0x916   : > { %8876 = vsyncadd (%p8766_p1), %s7913_s20, 4294967280  ;;  %s13055_s16 = sld [smem:[#allocation10_spill]]  ;;  %s13058_s29 = smov %s8883_s30 }
 0x917   : > { %s13056_s3 = sld [smem:[#allocation9_spill]] }
 0x918   : > { %s13057_s15 = sld [smem:[#allocation11_spill]] }
 0x91c   : > { %p24_p2 = scmp.ge.s32.totalorder %s13055_s16, 4  }
 0x91d   : > { %s13059_s30 = smov %s13056_s3 }
 0x91e   :  { %26 = sbr.rel (!%p24_p2) target bundleno = 8 (0x8), region = 134 }
 0x923   :  { %7917 = vsyncpa [#allocation7], 1 }
 0x924   :  { %7919 = vsyncpa [#allocation7 + $0x1], 1 }

</bundles_post_ra>
